<compile_context>
chip_gen: v6e
topology: v6e:2x2x1
jax: 0.10.0
libtpu: 0.0.40
codegen_flags: <defaults>
</compile_context>

<pallas_src>
import functools

import jax
import jax.numpy as jnp
import numpy as np
from jax.experimental import pallas as pl
from jax.experimental.pallas import tpu as pltpu


def _w2v_loss_kernel(n_pos, n_vocab, table_ref, table_t_ref, inp_ref, ctx_ref,
                     out_ref):
    # table_ref:   [VP, E]  zero-padded embedding table (VMEM-resident)
    # table_t_ref: [E, VP]  its transpose (VMEM-resident)
    # inp_ref:     [1, TB]  center-word ids, batch on lanes
    # ctx_ref:     [C, TB]  pos (first n_pos rows) + neg context ids
    # out_ref:     [1, TB]  per-batch-element loss (lane-dense)
    table = table_ref[...]                                   # [VP, E] f32
    table_t = table_t_ref[...]                               # [E, VP] f32
    inp_ids = inp_ref[...]                                    # [1, TB] int32
    ctx_ids = ctx_ref[...]                                    # [C, TB] int32

    vp = table.shape[0]
    tb = inp_ids.shape[1]
    c = ctx_ids.shape[0]

    # ---- In-kernel gather of center embeddings: one-hot matmul on the MXU ----
    iota_v = jax.lax.broadcasted_iota(jnp.int32, (vp, tb), 0)
    onehot = jnp.where(iota_v == inp_ids, 1.0, 0.0)           # [VP, TB] f32
    inp_emb = jnp.dot(table_t, onehot,
                      preferred_element_type=jnp.float32)     # [E, TB]
    s_inp = jax.nn.sigmoid(inp_emb)                           # [E, TB]

    # ---- scores[v, b] = <table[v, :], sigmoid(center_emb[:, b])> ----
    scores = jnp.dot(table, s_inp,
                     preferred_element_type=jnp.float32)      # [VP, TB]

    # ---- dots[c, b] = scores[ctx_ids[c, b], b]: one-hot select-sum over V ----
    # Static unroll over the (small) real vocab; padded table rows never match.
    dots = jnp.zeros((c, tb), jnp.float32)
    for v in range(n_vocab):
        dots = dots + jnp.where(ctx_ids == v, scores[v:v + 1, :], 0.0)

    # Sign flip for negatives (dot(neg_emb, -inp) == -dot(neg_emb, inp)),
    # then clamp, logsigmoid, reduce over contexts — all on dense [C, TB] vregs.
    row = jax.lax.broadcasted_iota(jnp.int32, (c, tb), 0)
    dots = jnp.where(row < n_pos, dots, -dots)
    dots = jnp.clip(dots, -10.0, 10.0)
    # logsigmoid(x) = -log(1 + exp(-x)); x clamped to [-10, 10] so exp is safe.
    logsig = -jnp.log1p(jnp.exp(-dots))                       # [C, TB]
    out_ref[...] = -jnp.sum(logsig, axis=0, keepdims=True)    # [1, TB]


def word2vec_neg_sampling_loss(embed_table, input_labels, pos_labels, neg_labels,
                               *, tb=512):
    """Forward pass of EmbeddingModel. Returns loss of shape [batch].

    tb: batch rows (lanes) per grid step; multiple of 128.  Per-step VMEM is
        ~2 * (C + 1) * tb * 4 B of labels plus the (tiny) table, so tb=512 is
        comfortable on every generation (incl. v7x's 64 MiB VMEM).
    """
    V, E = embed_table.shape
    B = int(input_labels.shape[0])
    P = int(pos_labels.shape[1])
    N = int(neg_labels.shape[1])
    C = P + N

    b_pad = ((B + tb - 1) // tb) * tb
    num_blocks = b_pad // tb
    pad = b_pad - B

    # Pad vocab rows to a sublane multiple; padded rows are all-zero and are
    # never selected by any label.
    VP = ((V + 7) // 8) * 8
    table = jnp.pad(embed_table.astype(jnp.float32), ((0, VP - V), (0, 0)))  # [VP, E]
    table_t = table.T                                                        # [E, VP] (tiny)

    # Only labels cross HBM per batch row — no [B, C, E] gather, no big transposes.
    inp_ids = jnp.pad(input_labels.astype(jnp.int32)[None, :],
                      ((0, 0), (0, pad)))                                    # [1, b_pad]
    ctx_ids = jnp.concatenate([pos_labels, neg_labels], axis=1).astype(jnp.int32)
    ctx_ids = jnp.pad(ctx_ids.T, ((0, 0), (0, pad)))                         # [C, b_pad]

    kernel = functools.partial(_w2v_loss_kernel, P, V)

    out = pl.pallas_call(
        kernel,
        out_shape=jax.ShapeDtypeStruct((1, b_pad), jnp.float32),
        grid_spec=pltpu.PrefetchScalarGridSpec(
            num_scalar_prefetch=0,
            grid=(num_blocks,),
            in_specs=[
                pl.BlockSpec((VP, E), lambda b: (0, 0)),   # table (constant block)
                pl.BlockSpec((E, VP), lambda b: (0, 0)),   # table.T (constant block)
                pl.BlockSpec((1, tb), lambda b: (0, b)),   # center ids
                pl.BlockSpec((C, tb), lambda b: (0, b)),   # context ids
            ],
            out_specs=pl.BlockSpec((1, tb), lambda b: (0, b)),
        ),
        compiler_params=pltpu.CompilerParams(
            dimension_semantics=("parallel",),             # shards batch blocks on v7x
            vmem_limit_bytes=32 * 1024 * 1024,
        ),
    )(table, table_t, inp_ids, ctx_ids)

    return out[0, :B]                                      # [B]


def _reference(embed_table, input_labels, pos_labels, neg_labels):
    """Plain-JAX reference matching the PyTorch forward exactly."""
    inp = jax.nn.sigmoid(embed_table[input_labels])                  # [B, E]
    pos = embed_table[pos_labels]                                    # [B, P, E]
    neg = embed_table[neg_labels]                                    # [B, N, E]
    pos_dot = jnp.clip(jnp.einsum("bpe,be->bp", pos, inp), -10.0, 10.0)
    neg_dot = jnp.clip(jnp.einsum("bne,be->bn", neg, -inp), -10.0, 10.0)
    log_pos = jax.nn.log_sigmoid(pos_dot).sum(1)
    log_neg = jax.nn.log_sigmoid(neg_dot).sum(1)
    return -(log_pos + log_neg)


if __name__ == "__main__":
    vocab_size = 50
    embed_size = 32
    batch = 2
    window = 3          # pos = window * 2 = 6
    K = 5               # neg = window * 2 * K = 30
    P = window * 2
    N = window * 2 * K

    key = jax.random.PRNGKey(0)
    k_tab, k_in, k_pos, k_neg = jax.random.split(key, 4)

    # nn.Embedding default init: N(0, 1)
    embed_table = jax.random.normal(k_tab, (vocab_size, embed_size), dtype=jnp.float32)
    input_labels = jax.random.randint(k_in, (batch,), 0, vocab_size, dtype=jnp.int32)
    pos_labels = jax.random.randint(k_pos, (batch, P), 0, vocab_size, dtype=jnp.int32)
    neg_labels = jax.random.randint(k_neg, (batch, N), 0, vocab_size, dtype=jnp.int32)

    loss = word2vec_neg_sampling_loss(embed_table, input_labels, pos_labels, neg_labels)
    loss = jax.block_until_ready(loss)

    ref = _reference(embed_table, input_labels, pos_labels, neg_labels)
    assert loss.shape == (batch,)
    # Tolerance covers the MXU's default f32-matmul precision on the one-hot
    # gather / score matmuls (still catches layout/sign/index bugs, which are O(1)).
    np.testing.assert_allclose(np.asarray(loss), np.asarray(ref), rtol=2e-2, atol=2e-2)

    print("KERNEL_OK")
</pallas_src>

<mosaic_0001>
module attributes {stable_mosaic.version = 11 : i64} {
  func.func @_w2v_loss_kernel(%arg0: i32, %arg1: memref<56x32xf32, #tpu.memory_space<vmem>>, %arg2: memref<32x56xf32, #tpu.memory_space<vmem>>, %arg3: memref<1x512xi32, #tpu.memory_space<vmem>>, %arg4: memref<36x512xi32, #tpu.memory_space<vmem>>, %arg5: memref<1x512xf32, #tpu.memory_space<vmem>>) attributes {dimension_semantics = [#tpu.dimension_semantics<parallel>], iteration_bounds = array<i64: 1>, scalar_prefetch = 0 : i64, scratch_operands = 0 : i64, tpu.core_type = #tpu.core_type<tc>, window_params = [{pipeline_mode = #tpu.pipeline_mode<synchronous>, transform_indices = @transform_0, window_bounds = array<i64: 56, 32>}, {pipeline_mode = #tpu.pipeline_mode<synchronous>, transform_indices = @transform_1, window_bounds = array<i64: 32, 56>}, {transform_indices = @transform_2, window_bounds = array<i64: 1, 512>}, {transform_indices = @transform_3, window_bounds = array<i64: 36, 512>}, {transform_indices = @transform_4, window_bounds = array<i64: 1, 512>}]} {
    %c0 = arith.constant 0 : index
    %c0_0 = arith.constant 0 : index
    %0 = vector.load %arg1[%c0, %c0_0] : memref<56x32xf32, #tpu.memory_space<vmem>>, vector<56x32xf32>
    %c0_1 = arith.constant 0 : index
    %c0_2 = arith.constant 0 : index
    %1 = vector.load %arg2[%c0_1, %c0_2] : memref<32x56xf32, #tpu.memory_space<vmem>>, vector<32x56xf32>
    %c0_3 = arith.constant 0 : index
    %c0_4 = arith.constant 0 : index
    %2 = vector.load %arg3[%c0_3, %c0_4] : memref<1x512xi32, #tpu.memory_space<vmem>>, vector<1x512xi32>
    %c0_5 = arith.constant 0 : index
    %c0_6 = arith.constant 0 : index
    %3 = vector.load %arg4[%c0_5, %c0_6] : memref<36x512xi32, #tpu.memory_space<vmem>>, vector<36x512xi32>
    %4 = tpu.iota {dimensions = array<i32: 0>} : vector<56x512xi32>
    %5 = vector.broadcast %2 : vector<1x512xi32> to vector<56x512xi32>
    %6 = arith.cmpi eq, %4, %5 : vector<56x512xi32>
    %cst = arith.constant 1.000000e+00 : f32
    %cst_7 = arith.constant 0.000000e+00 : f32
    %7 = vector.broadcast %cst : f32 to vector<56x512xf32>
    %8 = vector.broadcast %cst_7 : f32 to vector<56x512xf32>
    %9 = arith.select %6, %7, %8 : vector<56x512xi1>, vector<56x512xf32>
    %cst_8 = arith.constant dense<0.000000e+00> : vector<32x512xf32>
    %10 = tpu.matmul %1, %9, %cst_8 {dimension_numbers = #tpu.dot_dimension_numbers<[1], [0], [0], [1], [0, 0, 1, 1], [], []>} : vector<32x56xf32>, vector<56x512xf32>, vector<32x512xf32> -> vector<32x512xf32>
    %11 = arith.negf %10 : vector<32x512xf32>
    %12 = math.exp %11 : vector<32x512xf32>
    %cst_9 = arith.constant 1.000000e+00 : f32
    %13 = vector.broadcast %cst_9 : f32 to vector<32x512xf32>
    %14 = arith.addf %13, %12 : vector<32x512xf32>
    %15 = arith.divf %13, %14 : vector<32x512xf32>
    %cst_10 = arith.constant dense<0.000000e+00> : vector<56x512xf32>
    %16 = tpu.matmul %0, %15, %cst_10 {dimension_numbers = #tpu.dot_dimension_numbers<[1], [0], [0], [1], [0, 0, 1, 1], [], []>} : vector<56x32xf32>, vector<32x512xf32>, vector<56x512xf32> -> vector<56x512xf32>
    %cst_11 = arith.constant 0.000000e+00 : f32
    %17 = vector.broadcast %cst_11 : f32 to vector<36x512xf32>
    %c0_i32 = arith.constant 0 : i32
    %18 = vector.broadcast %c0_i32 : i32 to vector<36x512xi32>
    %19 = arith.cmpi eq, %3, %18 : vector<36x512xi32>
    %20 = vector.extract_strided_slice %16 {offsets = [0, 0], sizes = [1, 512], strides = [1, 1]} : vector<56x512xf32> to vector<1x512xf32>
    %cst_12 = arith.constant 0.000000e+00 : f32
    %21 = vector.shape_cast %20 : vector<1x512xf32> to vector<1x512xf32>
    %22 = vector.broadcast %21 : vector<1x512xf32> to vector<36x512xf32>
    %23 = vector.broadcast %cst_12 : f32 to vector<36x512xf32>
    %24 = arith.select %19, %22, %23 : vector<36x512xi1>, vector<36x512xf32>
    %25 = arith.addf %17, %24 : vector<36x512xf32>
    %c1_i32 = arith.constant 1 : i32
    %26 = vector.broadcast %c1_i32 : i32 to vector<36x512xi32>
    %27 = arith.cmpi eq, %3, %26 : vector<36x512xi32>
    %28 = vector.extract_strided_slice %16 {offsets = [1, 0], sizes = [1, 512], strides = [1, 1]} : vector<56x512xf32> to vector<1x512xf32>
    %cst_13 = arith.constant 0.000000e+00 : f32
    %29 = vector.shape_cast %28 : vector<1x512xf32> to vector<1x512xf32>
    %30 = vector.broadcast %29 : vector<1x512xf32> to vector<36x512xf32>
    %31 = vector.broadcast %cst_13 : f32 to vector<36x512xf32>
    %32 = arith.select %27, %30, %31 : vector<36x512xi1>, vector<36x512xf32>
    %33 = arith.addf %25, %32 : vector<36x512xf32>
    %c2_i32 = arith.constant 2 : i32
    %34 = vector.broadcast %c2_i32 : i32 to vector<36x512xi32>
    %35 = arith.cmpi eq, %3, %34 : vector<36x512xi32>
    %36 = vector.extract_strided_slice %16 {offsets = [2, 0], sizes = [1, 512], strides = [1, 1]} : vector<56x512xf32> to vector<1x512xf32>
    %cst_14 = arith.constant 0.000000e+00 : f32
    %37 = vector.shape_cast %36 : vector<1x512xf32> to vector<1x512xf32>
    %38 = vector.broadcast %37 : vector<1x512xf32> to vector<36x512xf32>
    %39 = vector.broadcast %cst_14 : f32 to vector<36x512xf32>
    %40 = arith.select %35, %38, %39 : vector<36x512xi1>, vector<36x512xf32>
    %41 = arith.addf %33, %40 : vector<36x512xf32>
    %c3_i32 = arith.constant 3 : i32
    %42 = vector.broadcast %c3_i32 : i32 to vector<36x512xi32>
    %43 = arith.cmpi eq, %3, %42 : vector<36x512xi32>
    %44 = vector.extract_strided_slice %16 {offsets = [3, 0], sizes = [1, 512], strides = [1, 1]} : vector<56x512xf32> to vector<1x512xf32>
    %cst_15 = arith.constant 0.000000e+00 : f32
    %45 = vector.shape_cast %44 : vector<1x512xf32> to vector<1x512xf32>
    %46 = vector.broadcast %45 : vector<1x512xf32> to vector<36x512xf32>
    %47 = vector.broadcast %cst_15 : f32 to vector<36x512xf32>
    %48 = arith.select %43, %46, %47 : vector<36x512xi1>, vector<36x512xf32>
    %49 = arith.addf %41, %48 : vector<36x512xf32>
    %c4_i32 = arith.constant 4 : i32
    %50 = vector.broadcast %c4_i32 : i32 to vector<36x512xi32>
    %51 = arith.cmpi eq, %3, %50 : vector<36x512xi32>
    %52 = vector.extract_strided_slice %16 {offsets = [4, 0], sizes = [1, 512], strides = [1, 1]} : vector<56x512xf32> to vector<1x512xf32>
    %cst_16 = arith.constant 0.000000e+00 : f32
    %53 = vector.shape_cast %52 : vector<1x512xf32> to vector<1x512xf32>
    %54 = vector.broadcast %53 : vector<1x512xf32> to vector<36x512xf32>
    %55 = vector.broadcast %cst_16 : f32 to vector<36x512xf32>
    %56 = arith.select %51, %54, %55 : vector<36x512xi1>, vector<36x512xf32>
    %57 = arith.addf %49, %56 : vector<36x512xf32>
    %c5_i32 = arith.constant 5 : i32
    %58 = vector.broadcast %c5_i32 : i32 to vector<36x512xi32>
    %59 = arith.cmpi eq, %3, %58 : vector<36x512xi32>
    %60 = vector.extract_strided_slice %16 {offsets = [5, 0], sizes = [1, 512], strides = [1, 1]} : vector<56x512xf32> to vector<1x512xf32>
    %cst_17 = arith.constant 0.000000e+00 : f32
    %61 = vector.shape_cast %60 : vector<1x512xf32> to vector<1x512xf32>
    %62 = vector.broadcast %61 : vector<1x512xf32> to vector<36x512xf32>
    %63 = vector.broadcast %cst_17 : f32 to vector<36x512xf32>
    %64 = arith.select %59, %62, %63 : vector<36x512xi1>, vector<36x512xf32>
    %65 = arith.addf %57, %64 : vector<36x512xf32>
    %c6_i32 = arith.constant 6 : i32
    %66 = vector.broadcast %c6_i32 : i32 to vector<36x512xi32>
    %67 = arith.cmpi eq, %3, %66 : vector<36x512xi32>
    %68 = vector.extract_strided_slice %16 {offsets = [6, 0], sizes = [1, 512], strides = [1, 1]} : vector<56x512xf32> to vector<1x512xf32>
    %cst_18 = arith.constant 0.000000e+00 : f32
    %69 = vector.shape_cast %68 : vector<1x512xf32> to vector<1x512xf32>
    %70 = vector.broadcast %69 : vector<1x512xf32> to vector<36x512xf32>
    %71 = vector.broadcast %cst_18 : f32 to vector<36x512xf32>
    %72 = arith.select %67, %70, %71 : vector<36x512xi1>, vector<36x512xf32>
    %73 = arith.addf %65, %72 : vector<36x512xf32>
    %c7_i32 = arith.constant 7 : i32
    %74 = vector.broadcast %c7_i32 : i32 to vector<36x512xi32>
    %75 = arith.cmpi eq, %3, %74 : vector<36x512xi32>
    %76 = vector.extract_strided_slice %16 {offsets = [7, 0], sizes = [1, 512], strides = [1, 1]} : vector<56x512xf32> to vector<1x512xf32>
    %cst_19 = arith.constant 0.000000e+00 : f32
    %77 = vector.shape_cast %76 : vector<1x512xf32> to vector<1x512xf32>
    %78 = vector.broadcast %77 : vector<1x512xf32> to vector<36x512xf32>
    %79 = vector.broadcast %cst_19 : f32 to vector<36x512xf32>
    %80 = arith.select %75, %78, %79 : vector<36x512xi1>, vector<36x512xf32>
    %81 = arith.addf %73, %80 : vector<36x512xf32>
    %c8_i32 = arith.constant 8 : i32
    %82 = vector.broadcast %c8_i32 : i32 to vector<36x512xi32>
    %83 = arith.cmpi eq, %3, %82 : vector<36x512xi32>
    %84 = vector.extract_strided_slice %16 {offsets = [8, 0], sizes = [1, 512], strides = [1, 1]} : vector<56x512xf32> to vector<1x512xf32>
    %cst_20 = arith.constant 0.000000e+00 : f32
    %85 = vector.shape_cast %84 : vector<1x512xf32> to vector<1x512xf32>
    %86 = vector.broadcast %85 : vector<1x512xf32> to vector<36x512xf32>
    %87 = vector.broadcast %cst_20 : f32 to vector<36x512xf32>
    %88 = arith.select %83, %86, %87 : vector<36x512xi1>, vector<36x512xf32>
    %89 = arith.addf %81, %88 : vector<36x512xf32>
    %c9_i32 = arith.constant 9 : i32
    %90 = vector.broadcast %c9_i32 : i32 to vector<36x512xi32>
    %91 = arith.cmpi eq, %3, %90 : vector<36x512xi32>
    %92 = vector.extract_strided_slice %16 {offsets = [9, 0], sizes = [1, 512], strides = [1, 1]} : vector<56x512xf32> to vector<1x512xf32>
    %cst_21 = arith.constant 0.000000e+00 : f32
    %93 = vector.shape_cast %92 : vector<1x512xf32> to vector<1x512xf32>
    %94 = vector.broadcast %93 : vector<1x512xf32> to vector<36x512xf32>
    %95 = vector.broadcast %cst_21 : f32 to vector<36x512xf32>
    %96 = arith.select %91, %94, %95 : vector<36x512xi1>, vector<36x512xf32>
    %97 = arith.addf %89, %96 : vector<36x512xf32>
    %c10_i32 = arith.constant 10 : i32
    %98 = vector.broadcast %c10_i32 : i32 to vector<36x512xi32>
    %99 = arith.cmpi eq, %3, %98 : vector<36x512xi32>
    %100 = vector.extract_strided_slice %16 {offsets = [10, 0], sizes = [1, 512], strides = [1, 1]} : vector<56x512xf32> to vector<1x512xf32>
    %cst_22 = arith.constant 0.000000e+00 : f32
    %101 = vector.shape_cast %100 : vector<1x512xf32> to vector<1x512xf32>
    %102 = vector.broadcast %101 : vector<1x512xf32> to vector<36x512xf32>
    %103 = vector.broadcast %cst_22 : f32 to vector<36x512xf32>
    %104 = arith.select %99, %102, %103 : vector<36x512xi1>, vector<36x512xf32>
    %105 = arith.addf %97, %104 : vector<36x512xf32>
    %c11_i32 = arith.constant 11 : i32
    %106 = vector.broadcast %c11_i32 : i32 to vector<36x512xi32>
    %107 = arith.cmpi eq, %3, %106 : vector<36x512xi32>
    %108 = vector.extract_strided_slice %16 {offsets = [11, 0], sizes = [1, 512], strides = [1, 1]} : vector<56x512xf32> to vector<1x512xf32>
    %cst_23 = arith.constant 0.000000e+00 : f32
    %109 = vector.shape_cast %108 : vector<1x512xf32> to vector<1x512xf32>
    %110 = vector.broadcast %109 : vector<1x512xf32> to vector<36x512xf32>
    %111 = vector.broadcast %cst_23 : f32 to vector<36x512xf32>
    %112 = arith.select %107, %110, %111 : vector<36x512xi1>, vector<36x512xf32>
    %113 = arith.addf %105, %112 : vector<36x512xf32>
    %c12_i32 = arith.constant 12 : i32
    %114 = vector.broadcast %c12_i32 : i32 to vector<36x512xi32>
    %115 = arith.cmpi eq, %3, %114 : vector<36x512xi32>
    %116 = vector.extract_strided_slice %16 {offsets = [12, 0], sizes = [1, 512], strides = [1, 1]} : vector<56x512xf32> to vector<1x512xf32>
    %cst_24 = arith.constant 0.000000e+00 : f32
    %117 = vector.shape_cast %116 : vector<1x512xf32> to vector<1x512xf32>
    %118 = vector.broadcast %117 : vector<1x512xf32> to vector<36x512xf32>
    %119 = vector.broadcast %cst_24 : f32 to vector<36x512xf32>
    %120 = arith.select %115, %118, %119 : vector<36x512xi1>, vector<36x512xf32>
    %121 = arith.addf %113, %120 : vector<36x512xf32>
    %c13_i32 = arith.constant 13 : i32
    %122 = vector.broadcast %c13_i32 : i32 to vector<36x512xi32>
    %123 = arith.cmpi eq, %3, %122 : vector<36x512xi32>
    %124 = vector.extract_strided_slice %16 {offsets = [13, 0], sizes = [1, 512], strides = [1, 1]} : vector<56x512xf32> to vector<1x512xf32>
    %cst_25 = arith.constant 0.000000e+00 : f32
    %125 = vector.shape_cast %124 : vector<1x512xf32> to vector<1x512xf32>
    %126 = vector.broadcast %125 : vector<1x512xf32> to vector<36x512xf32>
    %127 = vector.broadcast %cst_25 : f32 to vector<36x512xf32>
    %128 = arith.select %123, %126, %127 : vector<36x512xi1>, vector<36x512xf32>
    %129 = arith.addf %121, %128 : vector<36x512xf32>
    %c14_i32 = arith.constant 14 : i32
    %130 = vector.broadcast %c14_i32 : i32 to vector<36x512xi32>
    %131 = arith.cmpi eq, %3, %130 : vector<36x512xi32>
    %132 = vector.extract_strided_slice %16 {offsets = [14, 0], sizes = [1, 512], strides = [1, 1]} : vector<56x512xf32> to vector<1x512xf32>
    %cst_26 = arith.constant 0.000000e+00 : f32
    %133 = vector.shape_cast %132 : vector<1x512xf32> to vector<1x512xf32>
    %134 = vector.broadcast %133 : vector<1x512xf32> to vector<36x512xf32>
    %135 = vector.broadcast %cst_26 : f32 to vector<36x512xf32>
    %136 = arith.select %131, %134, %135 : vector<36x512xi1>, vector<36x512xf32>
    %137 = arith.addf %129, %136 : vector<36x512xf32>
    %c15_i32 = arith.constant 15 : i32
    %138 = vector.broadcast %c15_i32 : i32 to vector<36x512xi32>
    %139 = arith.cmpi eq, %3, %138 : vector<36x512xi32>
    %140 = vector.extract_strided_slice %16 {offsets = [15, 0], sizes = [1, 512], strides = [1, 1]} : vector<56x512xf32> to vector<1x512xf32>
    %cst_27 = arith.constant 0.000000e+00 : f32
    %141 = vector.shape_cast %140 : vector<1x512xf32> to vector<1x512xf32>
    %142 = vector.broadcast %141 : vector<1x512xf32> to vector<36x512xf32>
    %143 = vector.broadcast %cst_27 : f32 to vector<36x512xf32>
    %144 = arith.select %139, %142, %143 : vector<36x512xi1>, vector<36x512xf32>
    %145 = arith.addf %137, %144 : vector<36x512xf32>
    %c16_i32 = arith.constant 16 : i32
    %146 = vector.broadcast %c16_i32 : i32 to vector<36x512xi32>
    %147 = arith.cmpi eq, %3, %146 : vector<36x512xi32>
    %148 = vector.extract_strided_slice %16 {offsets = [16, 0], sizes = [1, 512], strides = [1, 1]} : vector<56x512xf32> to vector<1x512xf32>
    %cst_28 = arith.constant 0.000000e+00 : f32
    %149 = vector.shape_cast %148 : vector<1x512xf32> to vector<1x512xf32>
    %150 = vector.broadcast %149 : vector<1x512xf32> to vector<36x512xf32>
    %151 = vector.broadcast %cst_28 : f32 to vector<36x512xf32>
    %152 = arith.select %147, %150, %151 : vector<36x512xi1>, vector<36x512xf32>
    %153 = arith.addf %145, %152 : vector<36x512xf32>
    %c17_i32 = arith.constant 17 : i32
    %154 = vector.broadcast %c17_i32 : i32 to vector<36x512xi32>
    %155 = arith.cmpi eq, %3, %154 : vector<36x512xi32>
    %156 = vector.extract_strided_slice %16 {offsets = [17, 0], sizes = [1, 512], strides = [1, 1]} : vector<56x512xf32> to vector<1x512xf32>
    %cst_29 = arith.constant 0.000000e+00 : f32
    %157 = vector.shape_cast %156 : vector<1x512xf32> to vector<1x512xf32>
    %158 = vector.broadcast %157 : vector<1x512xf32> to vector<36x512xf32>
    %159 = vector.broadcast %cst_29 : f32 to vector<36x512xf32>
    %160 = arith.select %155, %158, %159 : vector<36x512xi1>, vector<36x512xf32>
    %161 = arith.addf %153, %160 : vector<36x512xf32>
    %c18_i32 = arith.constant 18 : i32
    %162 = vector.broadcast %c18_i32 : i32 to vector<36x512xi32>
    %163 = arith.cmpi eq, %3, %162 : vector<36x512xi32>
    %164 = vector.extract_strided_slice %16 {offsets = [18, 0], sizes = [1, 512], strides = [1, 1]} : vector<56x512xf32> to vector<1x512xf32>
    %cst_30 = arith.constant 0.000000e+00 : f32
    %165 = vector.shape_cast %164 : vector<1x512xf32> to vector<1x512xf32>
    %166 = vector.broadcast %165 : vector<1x512xf32> to vector<36x512xf32>
    %167 = vector.broadcast %cst_30 : f32 to vector<36x512xf32>
    %168 = arith.select %163, %166, %167 : vector<36x512xi1>, vector<36x512xf32>
    %169 = arith.addf %161, %168 : vector<36x512xf32>
    %c19_i32 = arith.constant 19 : i32
    %170 = vector.broadcast %c19_i32 : i32 to vector<36x512xi32>
    %171 = arith.cmpi eq, %3, %170 : vector<36x512xi32>
    %172 = vector.extract_strided_slice %16 {offsets = [19, 0], sizes = [1, 512], strides = [1, 1]} : vector<56x512xf32> to vector<1x512xf32>
    %cst_31 = arith.constant 0.000000e+00 : f32
    %173 = vector.shape_cast %172 : vector<1x512xf32> to vector<1x512xf32>
    %174 = vector.broadcast %173 : vector<1x512xf32> to vector<36x512xf32>
    %175 = vector.broadcast %cst_31 : f32 to vector<36x512xf32>
    %176 = arith.select %171, %174, %175 : vector<36x512xi1>, vector<36x512xf32>
    %177 = arith.addf %169, %176 : vector<36x512xf32>
    %c20_i32 = arith.constant 20 : i32
    %178 = vector.broadcast %c20_i32 : i32 to vector<36x512xi32>
    %179 = arith.cmpi eq, %3, %178 : vector<36x512xi32>
    %180 = vector.extract_strided_slice %16 {offsets = [20, 0], sizes = [1, 512], strides = [1, 1]} : vector<56x512xf32> to vector<1x512xf32>
    %cst_32 = arith.constant 0.000000e+00 : f32
    %181 = vector.shape_cast %180 : vector<1x512xf32> to vector<1x512xf32>
    %182 = vector.broadcast %181 : vector<1x512xf32> to vector<36x512xf32>
    %183 = vector.broadcast %cst_32 : f32 to vector<36x512xf32>
    %184 = arith.select %179, %182, %183 : vector<36x512xi1>, vector<36x512xf32>
    %185 = arith.addf %177, %184 : vector<36x512xf32>
    %c21_i32 = arith.constant 21 : i32
    %186 = vector.broadcast %c21_i32 : i32 to vector<36x512xi32>
    %187 = arith.cmpi eq, %3, %186 : vector<36x512xi32>
    %188 = vector.extract_strided_slice %16 {offsets = [21, 0], sizes = [1, 512], strides = [1, 1]} : vector<56x512xf32> to vector<1x512xf32>
    %cst_33 = arith.constant 0.000000e+00 : f32
    %189 = vector.shape_cast %188 : vector<1x512xf32> to vector<1x512xf32>
    %190 = vector.broadcast %189 : vector<1x512xf32> to vector<36x512xf32>
    %191 = vector.broadcast %cst_33 : f32 to vector<36x512xf32>
    %192 = arith.select %187, %190, %191 : vector<36x512xi1>, vector<36x512xf32>
    %193 = arith.addf %185, %192 : vector<36x512xf32>
    %c22_i32 = arith.constant 22 : i32
    %194 = vector.broadcast %c22_i32 : i32 to vector<36x512xi32>
    %195 = arith.cmpi eq, %3, %194 : vector<36x512xi32>
    %196 = vector.extract_strided_slice %16 {offsets = [22, 0], sizes = [1, 512], strides = [1, 1]} : vector<56x512xf32> to vector<1x512xf32>
    %cst_34 = arith.constant 0.000000e+00 : f32
    %197 = vector.shape_cast %196 : vector<1x512xf32> to vector<1x512xf32>
    %198 = vector.broadcast %197 : vector<1x512xf32> to vector<36x512xf32>
    %199 = vector.broadcast %cst_34 : f32 to vector<36x512xf32>
    %200 = arith.select %195, %198, %199 : vector<36x512xi1>, vector<36x512xf32>
    %201 = arith.addf %193, %200 : vector<36x512xf32>
    %c23_i32 = arith.constant 23 : i32
    %202 = vector.broadcast %c23_i32 : i32 to vector<36x512xi32>
    %203 = arith.cmpi eq, %3, %202 : vector<36x512xi32>
    %204 = vector.extract_strided_slice %16 {offsets = [23, 0], sizes = [1, 512], strides = [1, 1]} : vector<56x512xf32> to vector<1x512xf32>
    %cst_35 = arith.constant 0.000000e+00 : f32
    %205 = vector.shape_cast %204 : vector<1x512xf32> to vector<1x512xf32>
    %206 = vector.broadcast %205 : vector<1x512xf32> to vector<36x512xf32>
    %207 = vector.broadcast %cst_35 : f32 to vector<36x512xf32>
    %208 = arith.select %203, %206, %207 : vector<36x512xi1>, vector<36x512xf32>
    %209 = arith.addf %201, %208 : vector<36x512xf32>
    %c24_i32 = arith.constant 24 : i32
    %210 = vector.broadcast %c24_i32 : i32 to vector<36x512xi32>
    %211 = arith.cmpi eq, %3, %210 : vector<36x512xi32>
    %212 = vector.extract_strided_slice %16 {offsets = [24, 0], sizes = [1, 512], strides = [1, 1]} : vector<56x512xf32> to vector<1x512xf32>
    %cst_36 = arith.constant 0.000000e+00 : f32
    %213 = vector.shape_cast %212 : vector<1x512xf32> to vector<1x512xf32>
    %214 = vector.broadcast %213 : vector<1x512xf32> to vector<36x512xf32>
    %215 = vector.broadcast %cst_36 : f32 to vector<36x512xf32>
    %216 = arith.select %211, %214, %215 : vector<36x512xi1>, vector<36x512xf32>
    %217 = arith.addf %209, %216 : vector<36x512xf32>
    %c25_i32 = arith.constant 25 : i32
    %218 = vector.broadcast %c25_i32 : i32 to vector<36x512xi32>
    %219 = arith.cmpi eq, %3, %218 : vector<36x512xi32>
    %220 = vector.extract_strided_slice %16 {offsets = [25, 0], sizes = [1, 512], strides = [1, 1]} : vector<56x512xf32> to vector<1x512xf32>
    %cst_37 = arith.constant 0.000000e+00 : f32
    %221 = vector.shape_cast %220 : vector<1x512xf32> to vector<1x512xf32>
    %222 = vector.broadcast %221 : vector<1x512xf32> to vector<36x512xf32>
    %223 = vector.broadcast %cst_37 : f32 to vector<36x512xf32>
    %224 = arith.select %219, %222, %223 : vector<36x512xi1>, vector<36x512xf32>
    %225 = arith.addf %217, %224 : vector<36x512xf32>
    %c26_i32 = arith.constant 26 : i32
    %226 = vector.broadcast %c26_i32 : i32 to vector<36x512xi32>
    %227 = arith.cmpi eq, %3, %226 : vector<36x512xi32>
    %228 = vector.extract_strided_slice %16 {offsets = [26, 0], sizes = [1, 512], strides = [1, 1]} : vector<56x512xf32> to vector<1x512xf32>
    %cst_38 = arith.constant 0.000000e+00 : f32
    %229 = vector.shape_cast %228 : vector<1x512xf32> to vector<1x512xf32>
    %230 = vector.broadcast %229 : vector<1x512xf32> to vector<36x512xf32>
    %231 = vector.broadcast %cst_38 : f32 to vector<36x512xf32>
    %232 = arith.select %227, %230, %231 : vector<36x512xi1>, vector<36x512xf32>
    %233 = arith.addf %225, %232 : vector<36x512xf32>
    %c27_i32 = arith.constant 27 : i32
    %234 = vector.broadcast %c27_i32 : i32 to vector<36x512xi32>
    %235 = arith.cmpi eq, %3, %234 : vector<36x512xi32>
    %236 = vector.extract_strided_slice %16 {offsets = [27, 0], sizes = [1, 512], strides = [1, 1]} : vector<56x512xf32> to vector<1x512xf32>
    %cst_39 = arith.constant 0.000000e+00 : f32
    %237 = vector.shape_cast %236 : vector<1x512xf32> to vector<1x512xf32>
    %238 = vector.broadcast %237 : vector<1x512xf32> to vector<36x512xf32>
    %239 = vector.broadcast %cst_39 : f32 to vector<36x512xf32>
    %240 = arith.select %235, %238, %239 : vector<36x512xi1>, vector<36x512xf32>
    %241 = arith.addf %233, %240 : vector<36x512xf32>
    %c28_i32 = arith.constant 28 : i32
    %242 = vector.broadcast %c28_i32 : i32 to vector<36x512xi32>
    %243 = arith.cmpi eq, %3, %242 : vector<36x512xi32>
    %244 = vector.extract_strided_slice %16 {offsets = [28, 0], sizes = [1, 512], strides = [1, 1]} : vector<56x512xf32> to vector<1x512xf32>
    %cst_40 = arith.constant 0.000000e+00 : f32
    %245 = vector.shape_cast %244 : vector<1x512xf32> to vector<1x512xf32>
    %246 = vector.broadcast %245 : vector<1x512xf32> to vector<36x512xf32>
    %247 = vector.broadcast %cst_40 : f32 to vector<36x512xf32>
    %248 = arith.select %243, %246, %247 : vector<36x512xi1>, vector<36x512xf32>
    %249 = arith.addf %241, %248 : vector<36x512xf32>
    %c29_i32 = arith.constant 29 : i32
    %250 = vector.broadcast %c29_i32 : i32 to vector<36x512xi32>
    %251 = arith.cmpi eq, %3, %250 : vector<36x512xi32>
    %252 = vector.extract_strided_slice %16 {offsets = [29, 0], sizes = [1, 512], strides = [1, 1]} : vector<56x512xf32> to vector<1x512xf32>
    %cst_41 = arith.constant 0.000000e+00 : f32
    %253 = vector.shape_cast %252 : vector<1x512xf32> to vector<1x512xf32>
    %254 = vector.broadcast %253 : vector<1x512xf32> to vector<36x512xf32>
    %255 = vector.broadcast %cst_41 : f32 to vector<36x512xf32>
    %256 = arith.select %251, %254, %255 : vector<36x512xi1>, vector<36x512xf32>
    %257 = arith.addf %249, %256 : vector<36x512xf32>
    %c30_i32 = arith.constant 30 : i32
    %258 = vector.broadcast %c30_i32 : i32 to vector<36x512xi32>
    %259 = arith.cmpi eq, %3, %258 : vector<36x512xi32>
    %260 = vector.extract_strided_slice %16 {offsets = [30, 0], sizes = [1, 512], strides = [1, 1]} : vector<56x512xf32> to vector<1x512xf32>
    %cst_42 = arith.constant 0.000000e+00 : f32
    %261 = vector.shape_cast %260 : vector<1x512xf32> to vector<1x512xf32>
    %262 = vector.broadcast %261 : vector<1x512xf32> to vector<36x512xf32>
    %263 = vector.broadcast %cst_42 : f32 to vector<36x512xf32>
    %264 = arith.select %259, %262, %263 : vector<36x512xi1>, vector<36x512xf32>
    %265 = arith.addf %257, %264 : vector<36x512xf32>
    %c31_i32 = arith.constant 31 : i32
    %266 = vector.broadcast %c31_i32 : i32 to vector<36x512xi32>
    %267 = arith.cmpi eq, %3, %266 : vector<36x512xi32>
    %268 = vector.extract_strided_slice %16 {offsets = [31, 0], sizes = [1, 512], strides = [1, 1]} : vector<56x512xf32> to vector<1x512xf32>
    %cst_43 = arith.constant 0.000000e+00 : f32
    %269 = vector.shape_cast %268 : vector<1x512xf32> to vector<1x512xf32>
    %270 = vector.broadcast %269 : vector<1x512xf32> to vector<36x512xf32>
    %271 = vector.broadcast %cst_43 : f32 to vector<36x512xf32>
    %272 = arith.select %267, %270, %271 : vector<36x512xi1>, vector<36x512xf32>
    %273 = arith.addf %265, %272 : vector<36x512xf32>
    %c32_i32 = arith.constant 32 : i32
    %274 = vector.broadcast %c32_i32 : i32 to vector<36x512xi32>
    %275 = arith.cmpi eq, %3, %274 : vector<36x512xi32>
    %276 = vector.extract_strided_slice %16 {offsets = [32, 0], sizes = [1, 512], strides = [1, 1]} : vector<56x512xf32> to vector<1x512xf32>
    %cst_44 = arith.constant 0.000000e+00 : f32
    %277 = vector.shape_cast %276 : vector<1x512xf32> to vector<1x512xf32>
    %278 = vector.broadcast %277 : vector<1x512xf32> to vector<36x512xf32>
    %279 = vector.broadcast %cst_44 : f32 to vector<36x512xf32>
    %280 = arith.select %275, %278, %279 : vector<36x512xi1>, vector<36x512xf32>
    %281 = arith.addf %273, %280 : vector<36x512xf32>
    %c33_i32 = arith.constant 33 : i32
    %282 = vector.broadcast %c33_i32 : i32 to vector<36x512xi32>
    %283 = arith.cmpi eq, %3, %282 : vector<36x512xi32>
    %284 = vector.extract_strided_slice %16 {offsets = [33, 0], sizes = [1, 512], strides = [1, 1]} : vector<56x512xf32> to vector<1x512xf32>
    %cst_45 = arith.constant 0.000000e+00 : f32
    %285 = vector.shape_cast %284 : vector<1x512xf32> to vector<1x512xf32>
    %286 = vector.broadcast %285 : vector<1x512xf32> to vector<36x512xf32>
    %287 = vector.broadcast %cst_45 : f32 to vector<36x512xf32>
    %288 = arith.select %283, %286, %287 : vector<36x512xi1>, vector<36x512xf32>
    %289 = arith.addf %281, %288 : vector<36x512xf32>
    %c34_i32 = arith.constant 34 : i32
    %290 = vector.broadcast %c34_i32 : i32 to vector<36x512xi32>
    %291 = arith.cmpi eq, %3, %290 : vector<36x512xi32>
    %292 = vector.extract_strided_slice %16 {offsets = [34, 0], sizes = [1, 512], strides = [1, 1]} : vector<56x512xf32> to vector<1x512xf32>
    %cst_46 = arith.constant 0.000000e+00 : f32
    %293 = vector.shape_cast %292 : vector<1x512xf32> to vector<1x512xf32>
    %294 = vector.broadcast %293 : vector<1x512xf32> to vector<36x512xf32>
    %295 = vector.broadcast %cst_46 : f32 to vector<36x512xf32>
    %296 = arith.select %291, %294, %295 : vector<36x512xi1>, vector<36x512xf32>
    %297 = arith.addf %289, %296 : vector<36x512xf32>
    %c35_i32 = arith.constant 35 : i32
    %298 = vector.broadcast %c35_i32 : i32 to vector<36x512xi32>
    %299 = arith.cmpi eq, %3, %298 : vector<36x512xi32>
    %300 = vector.extract_strided_slice %16 {offsets = [35, 0], sizes = [1, 512], strides = [1, 1]} : vector<56x512xf32> to vector<1x512xf32>
    %cst_47 = arith.constant 0.000000e+00 : f32
    %301 = vector.shape_cast %300 : vector<1x512xf32> to vector<1x512xf32>
    %302 = vector.broadcast %301 : vector<1x512xf32> to vector<36x512xf32>
    %303 = vector.broadcast %cst_47 : f32 to vector<36x512xf32>
    %304 = arith.select %299, %302, %303 : vector<36x512xi1>, vector<36x512xf32>
    %305 = arith.addf %297, %304 : vector<36x512xf32>
    %c36_i32 = arith.constant 36 : i32
    %306 = vector.broadcast %c36_i32 : i32 to vector<36x512xi32>
    %307 = arith.cmpi eq, %3, %306 : vector<36x512xi32>
    %308 = vector.extract_strided_slice %16 {offsets = [36, 0], sizes = [1, 512], strides = [1, 1]} : vector<56x512xf32> to vector<1x512xf32>
    %cst_48 = arith.constant 0.000000e+00 : f32
    %309 = vector.shape_cast %308 : vector<1x512xf32> to vector<1x512xf32>
    %310 = vector.broadcast %309 : vector<1x512xf32> to vector<36x512xf32>
    %311 = vector.broadcast %cst_48 : f32 to vector<36x512xf32>
    %312 = arith.select %307, %310, %311 : vector<36x512xi1>, vector<36x512xf32>
    %313 = arith.addf %305, %312 : vector<36x512xf32>
    %c37_i32 = arith.constant 37 : i32
    %314 = vector.broadcast %c37_i32 : i32 to vector<36x512xi32>
    %315 = arith.cmpi eq, %3, %314 : vector<36x512xi32>
    %316 = vector.extract_strided_slice %16 {offsets = [37, 0], sizes = [1, 512], strides = [1, 1]} : vector<56x512xf32> to vector<1x512xf32>
    %cst_49 = arith.constant 0.000000e+00 : f32
    %317 = vector.shape_cast %316 : vector<1x512xf32> to vector<1x512xf32>
    %318 = vector.broadcast %317 : vector<1x512xf32> to vector<36x512xf32>
    %319 = vector.broadcast %cst_49 : f32 to vector<36x512xf32>
    %320 = arith.select %315, %318, %319 : vector<36x512xi1>, vector<36x512xf32>
    %321 = arith.addf %313, %320 : vector<36x512xf32>
    %c38_i32 = arith.constant 38 : i32
    %322 = vector.broadcast %c38_i32 : i32 to vector<36x512xi32>
    %323 = arith.cmpi eq, %3, %322 : vector<36x512xi32>
    %324 = vector.extract_strided_slice %16 {offsets = [38, 0], sizes = [1, 512], strides = [1, 1]} : vector<56x512xf32> to vector<1x512xf32>
    %cst_50 = arith.constant 0.000000e+00 : f32
    %325 = vector.shape_cast %324 : vector<1x512xf32> to vector<1x512xf32>
    %326 = vector.broadcast %325 : vector<1x512xf32> to vector<36x512xf32>
    %327 = vector.broadcast %cst_50 : f32 to vector<36x512xf32>
    %328 = arith.select %323, %326, %327 : vector<36x512xi1>, vector<36x512xf32>
    %329 = arith.addf %321, %328 : vector<36x512xf32>
    %c39_i32 = arith.constant 39 : i32
    %330 = vector.broadcast %c39_i32 : i32 to vector<36x512xi32>
    %331 = arith.cmpi eq, %3, %330 : vector<36x512xi32>
    %332 = vector.extract_strided_slice %16 {offsets = [39, 0], sizes = [1, 512], strides = [1, 1]} : vector<56x512xf32> to vector<1x512xf32>
    %cst_51 = arith.constant 0.000000e+00 : f32
    %333 = vector.shape_cast %332 : vector<1x512xf32> to vector<1x512xf32>
    %334 = vector.broadcast %333 : vector<1x512xf32> to vector<36x512xf32>
    %335 = vector.broadcast %cst_51 : f32 to vector<36x512xf32>
    %336 = arith.select %331, %334, %335 : vector<36x512xi1>, vector<36x512xf32>
    %337 = arith.addf %329, %336 : vector<36x512xf32>
    %c40_i32 = arith.constant 40 : i32
    %338 = vector.broadcast %c40_i32 : i32 to vector<36x512xi32>
    %339 = arith.cmpi eq, %3, %338 : vector<36x512xi32>
    %340 = vector.extract_strided_slice %16 {offsets = [40, 0], sizes = [1, 512], strides = [1, 1]} : vector<56x512xf32> to vector<1x512xf32>
    %cst_52 = arith.constant 0.000000e+00 : f32
    %341 = vector.shape_cast %340 : vector<1x512xf32> to vector<1x512xf32>
    %342 = vector.broadcast %341 : vector<1x512xf32> to vector<36x512xf32>
    %343 = vector.broadcast %cst_52 : f32 to vector<36x512xf32>
    %344 = arith.select %339, %342, %343 : vector<36x512xi1>, vector<36x512xf32>
    %345 = arith.addf %337, %344 : vector<36x512xf32>
    %c41_i32 = arith.constant 41 : i32
    %346 = vector.broadcast %c41_i32 : i32 to vector<36x512xi32>
    %347 = arith.cmpi eq, %3, %346 : vector<36x512xi32>
    %348 = vector.extract_strided_slice %16 {offsets = [41, 0], sizes = [1, 512], strides = [1, 1]} : vector<56x512xf32> to vector<1x512xf32>
    %cst_53 = arith.constant 0.000000e+00 : f32
    %349 = vector.shape_cast %348 : vector<1x512xf32> to vector<1x512xf32>
    %350 = vector.broadcast %349 : vector<1x512xf32> to vector<36x512xf32>
    %351 = vector.broadcast %cst_53 : f32 to vector<36x512xf32>
    %352 = arith.select %347, %350, %351 : vector<36x512xi1>, vector<36x512xf32>
    %353 = arith.addf %345, %352 : vector<36x512xf32>
    %c42_i32 = arith.constant 42 : i32
    %354 = vector.broadcast %c42_i32 : i32 to vector<36x512xi32>
    %355 = arith.cmpi eq, %3, %354 : vector<36x512xi32>
    %356 = vector.extract_strided_slice %16 {offsets = [42, 0], sizes = [1, 512], strides = [1, 1]} : vector<56x512xf32> to vector<1x512xf32>
    %cst_54 = arith.constant 0.000000e+00 : f32
    %357 = vector.shape_cast %356 : vector<1x512xf32> to vector<1x512xf32>
    %358 = vector.broadcast %357 : vector<1x512xf32> to vector<36x512xf32>
    %359 = vector.broadcast %cst_54 : f32 to vector<36x512xf32>
    %360 = arith.select %355, %358, %359 : vector<36x512xi1>, vector<36x512xf32>
    %361 = arith.addf %353, %360 : vector<36x512xf32>
    %c43_i32 = arith.constant 43 : i32
    %362 = vector.broadcast %c43_i32 : i32 to vector<36x512xi32>
    %363 = arith.cmpi eq, %3, %362 : vector<36x512xi32>
    %364 = vector.extract_strided_slice %16 {offsets = [43, 0], sizes = [1, 512], strides = [1, 1]} : vector<56x512xf32> to vector<1x512xf32>
    %cst_55 = arith.constant 0.000000e+00 : f32
    %365 = vector.shape_cast %364 : vector<1x512xf32> to vector<1x512xf32>
    %366 = vector.broadcast %365 : vector<1x512xf32> to vector<36x512xf32>
    %367 = vector.broadcast %cst_55 : f32 to vector<36x512xf32>
    %368 = arith.select %363, %366, %367 : vector<36x512xi1>, vector<36x512xf32>
    %369 = arith.addf %361, %368 : vector<36x512xf32>
    %c44_i32 = arith.constant 44 : i32
    %370 = vector.broadcast %c44_i32 : i32 to vector<36x512xi32>
    %371 = arith.cmpi eq, %3, %370 : vector<36x512xi32>
    %372 = vector.extract_strided_slice %16 {offsets = [44, 0], sizes = [1, 512], strides = [1, 1]} : vector<56x512xf32> to vector<1x512xf32>
    %cst_56 = arith.constant 0.000000e+00 : f32
    %373 = vector.shape_cast %372 : vector<1x512xf32> to vector<1x512xf32>
    %374 = vector.broadcast %373 : vector<1x512xf32> to vector<36x512xf32>
    %375 = vector.broadcast %cst_56 : f32 to vector<36x512xf32>
    %376 = arith.select %371, %374, %375 : vector<36x512xi1>, vector<36x512xf32>
    %377 = arith.addf %369, %376 : vector<36x512xf32>
    %c45_i32 = arith.constant 45 : i32
    %378 = vector.broadcast %c45_i32 : i32 to vector<36x512xi32>
    %379 = arith.cmpi eq, %3, %378 : vector<36x512xi32>
    %380 = vector.extract_strided_slice %16 {offsets = [45, 0], sizes = [1, 512], strides = [1, 1]} : vector<56x512xf32> to vector<1x512xf32>
    %cst_57 = arith.constant 0.000000e+00 : f32
    %381 = vector.shape_cast %380 : vector<1x512xf32> to vector<1x512xf32>
    %382 = vector.broadcast %381 : vector<1x512xf32> to vector<36x512xf32>
    %383 = vector.broadcast %cst_57 : f32 to vector<36x512xf32>
    %384 = arith.select %379, %382, %383 : vector<36x512xi1>, vector<36x512xf32>
    %385 = arith.addf %377, %384 : vector<36x512xf32>
    %c46_i32 = arith.constant 46 : i32
    %386 = vector.broadcast %c46_i32 : i32 to vector<36x512xi32>
    %387 = arith.cmpi eq, %3, %386 : vector<36x512xi32>
    %388 = vector.extract_strided_slice %16 {offsets = [46, 0], sizes = [1, 512], strides = [1, 1]} : vector<56x512xf32> to vector<1x512xf32>
    %cst_58 = arith.constant 0.000000e+00 : f32
    %389 = vector.shape_cast %388 : vector<1x512xf32> to vector<1x512xf32>
    %390 = vector.broadcast %389 : vector<1x512xf32> to vector<36x512xf32>
    %391 = vector.broadcast %cst_58 : f32 to vector<36x512xf32>
    %392 = arith.select %387, %390, %391 : vector<36x512xi1>, vector<36x512xf32>
    %393 = arith.addf %385, %392 : vector<36x512xf32>
    %c47_i32 = arith.constant 47 : i32
    %394 = vector.broadcast %c47_i32 : i32 to vector<36x512xi32>
    %395 = arith.cmpi eq, %3, %394 : vector<36x512xi32>
    %396 = vector.extract_strided_slice %16 {offsets = [47, 0], sizes = [1, 512], strides = [1, 1]} : vector<56x512xf32> to vector<1x512xf32>
    %cst_59 = arith.constant 0.000000e+00 : f32
    %397 = vector.shape_cast %396 : vector<1x512xf32> to vector<1x512xf32>
    %398 = vector.broadcast %397 : vector<1x512xf32> to vector<36x512xf32>
    %399 = vector.broadcast %cst_59 : f32 to vector<36x512xf32>
    %400 = arith.select %395, %398, %399 : vector<36x512xi1>, vector<36x512xf32>
    %401 = arith.addf %393, %400 : vector<36x512xf32>
    %c48_i32 = arith.constant 48 : i32
    %402 = vector.broadcast %c48_i32 : i32 to vector<36x512xi32>
    %403 = arith.cmpi eq, %3, %402 : vector<36x512xi32>
    %404 = vector.extract_strided_slice %16 {offsets = [48, 0], sizes = [1, 512], strides = [1, 1]} : vector<56x512xf32> to vector<1x512xf32>
    %cst_60 = arith.constant 0.000000e+00 : f32
    %405 = vector.shape_cast %404 : vector<1x512xf32> to vector<1x512xf32>
    %406 = vector.broadcast %405 : vector<1x512xf32> to vector<36x512xf32>
    %407 = vector.broadcast %cst_60 : f32 to vector<36x512xf32>
    %408 = arith.select %403, %406, %407 : vector<36x512xi1>, vector<36x512xf32>
    %409 = arith.addf %401, %408 : vector<36x512xf32>
    %c49_i32 = arith.constant 49 : i32
    %410 = vector.broadcast %c49_i32 : i32 to vector<36x512xi32>
    %411 = arith.cmpi eq, %3, %410 : vector<36x512xi32>
    %412 = vector.extract_strided_slice %16 {offsets = [49, 0], sizes = [1, 512], strides = [1, 1]} : vector<56x512xf32> to vector<1x512xf32>
    %cst_61 = arith.constant 0.000000e+00 : f32
    %413 = vector.shape_cast %412 : vector<1x512xf32> to vector<1x512xf32>
    %414 = vector.broadcast %413 : vector<1x512xf32> to vector<36x512xf32>
    %415 = vector.broadcast %cst_61 : f32 to vector<36x512xf32>
    %416 = arith.select %411, %414, %415 : vector<36x512xi1>, vector<36x512xf32>
    %417 = arith.addf %409, %416 : vector<36x512xf32>
    %418 = tpu.iota {dimensions = array<i32: 0>} : vector<36x512xi32>
    %c6_i32_62 = arith.constant 6 : i32
    %419 = vector.broadcast %c6_i32_62 : i32 to vector<36x512xi32>
    %420 = arith.cmpi slt, %418, %419 : vector<36x512xi32>
    %cst_63 = arith.constant 0.000000e+00 : f32
    %421 = vector.broadcast %cst_63 : f32 to vector<36x512xf32>
    %422 = arith.subf %421, %417 : vector<36x512xf32>
    %423 = arith.select %420, %417, %422 : vector<36x512xi1>, vector<36x512xf32>
    %cst_64 = arith.constant -1.000000e+01 : f32
    %cst_65 = arith.constant 1.000000e+01 : f32
    %424 = vector.broadcast %cst_64 : f32 to vector<36x512xf32>
    %425 = arith.maximumf %424, %423 : vector<36x512xf32>
    %426 = vector.broadcast %cst_65 : f32 to vector<36x512xf32>
    %427 = arith.minimumf %426, %425 : vector<36x512xf32>
    %cst_66 = arith.constant 0.000000e+00 : f32
    %428 = vector.broadcast %cst_66 : f32 to vector<36x512xf32>
    %429 = arith.subf %428, %427 : vector<36x512xf32>
    %430 = math.exp %429 : vector<36x512xf32>
    %431 = math.log1p %430 : vector<36x512xf32>
    %cst_67 = arith.constant 0.000000e+00 : f32
    %432 = vector.broadcast %cst_67 : f32 to vector<36x512xf32>
    %433 = arith.subf %432, %431 : vector<36x512xf32>
    %cst_68 = arith.constant dense<0.000000e+00> : vector<512xf32>
    %434 = vector.multi_reduction <add>, %433, %cst_68 [0] : vector<36x512xf32> to vector<512xf32>
    %435 = vector.shape_cast %434 : vector<512xf32> to vector<1x512xf32>
    %cst_69 = arith.constant 0.000000e+00 : f32
    %436 = vector.broadcast %cst_69 : f32 to vector<1x512xf32>
    %437 = arith.subf %436, %435 : vector<1x512xf32>
    %c0_70 = arith.constant 0 : index
    %c0_71 = arith.constant 0 : index
    %438 = vector.load %arg5[%c0_70, %c0_71] : memref<1x512xf32, #tpu.memory_space<vmem>>, vector<1x512xf32>
    tpu.vector_store %arg5[%c0_70, %c0_71], %437 {strides = array<i32>} : memref<1x512xf32, #tpu.memory_space<vmem>>, vector<1x512xf32>,
    return
  }
  func.func @transform_0(%arg0: i32) -> (i32, i32) {
    %c0_i32 = arith.constant 0 : i32
    %c0_i32_0 = arith.constant 0 : i32
    %c0_i32_1 = arith.constant 0 : i32
    return %c0_i32, %c0_i32_0 : i32, i32
  }
  func.func @transform_1(%arg0: i32) -> (i32, i32) {
    %c0_i32 = arith.constant 0 : i32
    %c0_i32_0 = arith.constant 0 : i32
    %c0_i32_1 = arith.constant 0 : i32
    return %c0_i32, %c0_i32_0 : i32, i32
  }
  func.func @transform_2(%arg0: i32) -> (i32, i32) {
    %c0_i32 = arith.constant 0 : i32
    %c0_i32_0 = arith.constant 0 : i32
    return %c0_i32, %arg0 : i32, i32
  }
  func.func @transform_3(%arg0: i32) -> (i32, i32) {
    %c0_i32 = arith.constant 0 : i32
    %c0_i32_0 = arith.constant 0 : i32
    return %c0_i32, %arg0 : i32, i32
  }
  func.func @transform_4(%arg0: i32) -> (i32, i32) {
    %c0_i32 = arith.constant 0 : i32
    %c0_i32_0 = arith.constant 0 : i32
    return %c0_i32, %arg0 : i32, i32
  }
}

</mosaic_0001>

<bundles_post_ra>
// kernel: tpu_custom_call.1
= control target key start
LH: loop header
LB: loop body
LE: loop exit
PB: predicated region body
PF: predicated region fallthrough
CT: control target
= control target key end

     0   :  { %9 = vsyncpa [#allocation3], 0  ;;  %s9656_s0 = inlined_call_operand.vmem [shape: f32[56,32], index: 0, kind: input, shape index: {}]   ;;  %s9657_s1 = inlined_call_operand.vmem [shape: f32[32,56], index: 1, kind: input, shape index: {}]   ;;  %s9658_s2 = inlined_call_operand.vmem [shape: s32[1,512], index: 2, kind: input, shape index: {}]   ;;  %s9659_s3 = inlined_call_operand.hbm [shape: s32[36,512], index: 3, kind: input, shape index: {}]   ;;  %s9660_s4 = inlined_call_operand.hbm [shape: f32[1,512], index: 4, kind: output, shape index: {}]  }
   0x1   :  { %10 = vsyncpa [#allocation4], 0  ;;  %s5291_s15 = smov [#allocation2]  }
   0x2   :  { %s22_s16 = sshll.u32 %s5291_s15, 4  ;;  %s23_s16 = int_to_ptr.vmem [resolvable:$true] %s22_s16 }
   0x3   :  { %s5255_s17 = scalar_lea.vmem %s23_s16, 2560  ;;  %p5260_p1 = scmp.lt.s32.totalorder %s23_s16, %s23_s16 }
   0x4   :  { %p5256_p0 = scmp.ne.s32.totalorder %s23_s16, %s5255_s17  ;;  %p5261_p2 = scmp.lt.s32.totalorder %s5255_s17, %s5255_s17 }
   0x6   :  { %p5262_p3 = por %p5261_p2, %p5260_p1 }
   0x8   :  { %p5263_p4 = pnand %p5262_p3, %p5256_p0 }
   0xa   :  { %5266 = shalt.err (!%p5263_p4)
}
   0xb   :  { %s5292_s18 = smov 512   ;;  %s5293_s19 = smov 32  }
   0xc   :  { %28 = dma.hbm_to_vmem [thread:$0]  %s9659_s3, 2560, %s23_s16, [#allocation3], %s5292_s18, %s5292_s18, %s5293_s19  }
   0xd   :  { %5287 = dma.done.wait [#allocation3], 2560  }
   0xe   :  { %5288 = vsyncadd [#allocation3], 4294964736  ;;  %v9661_v0 = vlaneseq  ;;  %v5294_v1 = vmov 0.0   ;;  %v43_v8 = vld [vmem:[%s9658_s2] sm:$0xf]  ;;  %v5295_v16 = vmov 1.0  }
   0xf   :  { %221 = vmatprep.mubr.f32.mxu0 %v5294_v1  ;;  %310 = vmatprep.mubr.f32.mxu1 %v5294_v1  ;;  %v39_v19 = vld [vmem:[%s9657_s1] sm:$0xff]  ;;  %v40_v20 = vld [vmem:[%s9657_s1 + $0x8] sm:$0xff]  ;;  %v41_v21 = vld [vmem:[%s9657_s1 + $0x10] sm:$0xff] }
  0x10   :  { %v5329_v2 = vshrl.u32 %v9661_v0, 7  ;;  %v42_v22 = vld [vmem:[%s9657_s1 + $0x18] sm:$0xff] }
  0x12   :  { %9671 = vst [vmem:[#allocation8_spill] sm:$0xff] %v5329_v2  ;;  %v5332_v3 = vsub.s32 1, %v5329_v2  ;;  %v5335_v4 = vsub.s32 3, %v5329_v2  ;;  %v5338_v5 = vsub.s32 0, %v5329_v2  ;;  %v5341_v6 = vsub.s32 2, %v5329_v2 }
  0x13   :  { %v71_v7 = vadd.s32 48, %v5329_v2  ;;  %v70_v9 = vadd.s32 40, %v5329_v2  ;;  %v69_v10 = vadd.s32 32, %v5329_v2  ;;  %v68_v15 = vadd.s32 24, %v5329_v2 }
  0x14   :  { %v5350_v11 = vrot.slane %v43_v8, %v5332_v3  ;;  %v5353_v12 = vrot.slane %v43_v8, %v5335_v4  ;;  %v5356_v13 = vrot.slane %v43_v8, %v5338_v5  ;;  %v5359_v14 = vrot.slane %v43_v8, %v5341_v6 }
  0x15   :  { %v67_v17 = vadd.s32 16, %v5329_v2  ;;  %v66_v18 = vadd.s32 8, %v5329_v2 }
  0x16   :  { %vm113_vm0 = vcmp.eq.s32.totalorder %v71_v7, %v5350_v11  ;;  %vm115_vm1 = vcmp.eq.s32.totalorder %v71_v7, %v5353_v12  ;;  %vm112_vm2 = vcmp.eq.s32.totalorder %v71_v7, %v5356_v13  ;;  %vm114_vm3 = vcmp.eq.s32.totalorder %v71_v7, %v5359_v14 }
  0x17   :  { %4910 = vmatprep.subr.msk.mxu0 %vm113_vm0, %v5295_v16  ;;  %4928 = vmatprep.subr.msk.mxu1 %vm115_vm1, %v5295_v16  ;;  %vm109_vm4 = vcmp.eq.s32.totalorder %v70_v9, %v5350_v11  ;;  %vm111_vm5 = vcmp.eq.s32.totalorder %v70_v9, %v5353_v12  ;;  %vm108_vm6 = vcmp.eq.s32.totalorder %v70_v9, %v5356_v13 }
  0x18   :  { %4911 = vmatpush1.msk.msra.mxu0 %vm112_vm2, %v5295_v16  ;;  %4929 = vmatpush1.msk.msra.mxu1 %vm114_vm3, %v5295_v16  ;;  %vm110_vm7 = vcmp.eq.s32.totalorder %v70_v9, %v5359_v14  ;;  %vm105_vm8 = vcmp.eq.s32.totalorder %v69_v10, %v5350_v11  ;;  %vm107_vm9 = vcmp.eq.s32.totalorder %v69_v10, %v5353_v12 }
  0x19   :  { %4912 = vmatprep.subr.msk.mxu0 %vm109_vm4, %v5295_v16  ;;  %4930 = vmatprep.subr.msk.mxu1 %vm111_vm5, %v5295_v16  ;;  %vm104_vm10 = vcmp.eq.s32.totalorder %v69_v10, %v5356_v13  ;;  %vm106_vm11 = vcmp.eq.s32.totalorder %v69_v10, %v5359_v14  ;;  %vm101_vm12 = vcmp.eq.s32.totalorder %v68_v15, %v5350_v11 }
  0x1a   :  { %4913 = vmatpush1.msk.msra.mxu0 %vm108_vm6, %v5295_v16  ;;  %4931 = vmatpush1.msk.msra.mxu1 %vm110_vm7, %v5295_v16  ;;  %vm103_vm13 = vcmp.eq.s32.totalorder %v68_v15, %v5353_v12  ;;  %vm100_vm14 = vcmp.eq.s32.totalorder %v68_v15, %v5356_v13  ;;  %vm102_vm15 = vcmp.eq.s32.totalorder %v68_v15, %v5359_v14 }
  0x1b   :  { %4914 = vmatprep.subr.msk.mxu0 %vm105_vm8, %v5295_v16  ;;  %4932 = vmatprep.subr.msk.mxu1 %vm107_vm9, %v5295_v16  ;;  %vm97_vm0 = vcmp.eq.s32.totalorder %v67_v17, %v5350_v11  ;;  %vm99_vm1 = vcmp.eq.s32.totalorder %v67_v17, %v5353_v12  ;;  %vm96_vm2 = vcmp.eq.s32.totalorder %v67_v17, %v5356_v13 }
  0x1c   :  { %4915 = vmatpush1.msk.msra.mxu0 %vm104_vm10, %v5295_v16  ;;  %4933 = vmatpush1.msk.msra.mxu1 %vm106_vm11, %v5295_v16  ;;  %vm98_vm3 = vcmp.eq.s32.totalorder %v67_v17, %v5359_v14  ;;  %vm93_vm4 = vcmp.eq.s32.totalorder %v66_v18, %v5350_v11  ;;  %vm95_vm5 = vcmp.eq.s32.totalorder %v66_v18, %v5353_v12 }
  0x1d   :  { %4916 = vmatprep.subr.msk.mxu0 %vm101_vm12, %v5295_v16  ;;  %4934 = vmatprep.subr.msk.mxu1 %vm103_vm13, %v5295_v16  ;;  %vm92_vm6 = vcmp.eq.s32.totalorder %v66_v18, %v5356_v13  ;;  %vm94_vm7 = vcmp.eq.s32.totalorder %v66_v18, %v5359_v14  ;;  %vm89_vm8 = vcmp.eq.s32.totalorder %v5329_v2, %v5350_v11  ;;  %vm144_vm12 = vcmask 457728  }
  0x1e   :  { %4917 = vmatpush1.msk.msra.mxu0 %vm100_vm14, %v5295_v16  ;;  %4935 = vmatpush1.msk.msra.mxu1 %vm102_vm15, %v5295_v16  ;;  %vm91_vm9 = vcmp.eq.s32.totalorder %v5329_v2, %v5353_v12  ;;  %vm88_vm10 = vcmp.eq.s32.totalorder %v5329_v2, %v5356_v13  ;;  %vm90_vm11 = vcmp.eq.s32.totalorder %v5329_v2, %v5359_v14  ;;  %vm431_vm13 = vcmask 261120  }
  0x1f   :  { %4918 = vmatprep.subr.msk.mxu0 %vm97_vm0, %v5295_v16  ;;  %4936 = vmatprep.subr.msk.mxu1 %vm99_vm1, %v5295_v16 }
  0x20   :  { %4919 = vmatpush1.msk.msra.mxu0 %vm96_vm2, %v5295_v16  ;;  %4937 = vmatpush1.msk.msra.mxu1 %vm98_vm3, %v5295_v16 }
  0x21   :  { %4920 = vmatprep.subr.msk.mxu0 %vm93_vm4, %v5295_v16  ;;  %4938 = vmatprep.subr.msk.mxu1 %vm95_vm5, %v5295_v16 }
  0x22   :  { %4921 = vmatpush1.msk.msra.mxu0 %vm92_vm6, %v5295_v16  ;;  %4939 = vmatpush1.msk.msra.mxu1 %vm94_vm7, %v5295_v16 }
  0x23   :  { %4922 = vmatprep.subr.msk.mxu0 %vm89_vm8, %v5295_v16  ;;  %4940 = vmatprep.subr.msk.mxu1 %vm91_vm9, %v5295_v16 }
  0x24   :  { %4923 = vmatpush1.msk.msra.mxu0 %vm88_vm10, %v5295_v16  ;;  %4941 = vmatpush1.msk.msra.mxu1 %vm90_vm11, %v5295_v16 }
  0x25   :  { %4924 = vmatmul.mubr.msk.f32.vlgmr.msra.gmra.mxu0 %vm144_vm12, %v39_v19  ;;  %4942 = vmatmul.mubr.msk.f32.vlgmr.msra.gmra.mxu1 %vm144_vm12, %v39_v19 }
  0x26   :  { %227 = vmatprep.mubr.f32.mxu0 %v5294_v1  ;;  %316 = vmatprep.mubr.f32.mxu1 %v5294_v1 }
  0x29   :  { %4925 = vmatmul.mubr.msk.f32.gmra.mxu0 %vm144_vm12, %v40_v20  ;;  %4943 = vmatmul.mubr.msk.f32.gmra.mxu1 %vm144_vm12, %v40_v20 }
  0x2a   :  { %233 = vmatprep.mubr.f32.mxu0 %v5294_v1  ;;  %322 = vmatprep.mubr.f32.mxu1 %v5294_v1 }
  0x2d   :  { %4926 = vmatmul.mubr.msk.f32.gmra.mxu0 %vm144_vm12, %v41_v21  ;;  %4944 = vmatmul.mubr.msk.f32.gmra.mxu1 %vm144_vm12, %v41_v21 }
  0x2e   :  { %239 = vmatprep.mubr.f32.mxu0 %v5294_v1  ;;  %328 = vmatprep.mubr.f32.mxu1 %v5294_v1 }
  0x31   :  { %4927 = vmatmul.mubr.msk.f32.gmra.mxu0 %vm144_vm12, %v42_v22  ;;  %4945 = vmatmul.mubr.msk.f32.gmra.mxu1 %vm144_vm12, %v42_v22 }
  0x32   :  { %517 = vmatprep.mubr.f32.mxu0 %v5294_v1  ;;  %624 = vmatprep.mubr.f32.mxu1 %v5294_v1 }
  0xe5   :  { %v223_v23 = vpop.f32.mrf.mxu0  ;;  %v312_v24 = vpop.f32.mrf.mxu1 }
  0xe6   :  { %v4946_v25 = vmul.f32 -1.442695, %v223_v23  ;;  %v4948_v54 = vmul.f32 -1.442695, %v312_v24 }
  0xe7   :  { %v225_v26 = vpop.f32.mrf.mxu0  ;;  %v314_v27 = vpop.f32.mrf.mxu1 }
  0xe8   :  { %v4947_v28 = vmul.f32 -1.442695, %v225_v26  ;;  %5003 = vpow2.f32 %v4946_v25  ;;  %v4949_v53 = vmul.f32 -1.442695, %v314_v27 }
  0xe9   :  { %v229_v29 = vpop.f32.mrf.mxu0  ;;  %v318_v30 = vpop.f32.mrf.mxu1 }
  0xea   :  { %v4950_v31 = vmul.f32 -1.442695, %v229_v29  ;;  %5005 = vpow2.f32 %v4947_v28  ;;  %v4952_v50 = vmul.f32 -1.442695, %v318_v30 }
  0xeb   :  { %v231_v32 = vpop.f32.mrf.mxu0  ;;  %v320_v33 = vpop.f32.mrf.mxu1 }
  0xec   :  { %v4951_v34 = vmul.f32 -1.442695, %v231_v32  ;;  %v4953_v35 = vmul.f32 -1.442695, %v320_v33  ;;  %5007 = vpow2.f32 %v4950_v31 }
  0xed   :  { %v235_v36 = vpop.f32.mrf.mxu0  ;;  %v324_v37 = vpop.f32.mrf.mxu1 }
  0xee   :  { %5009 = vpow2.f32 %v4951_v34  ;;  %v4954_v38 = vmul.f32 -1.442695, %v235_v36  ;;  %v4956_v39 = vmul.f32 -1.442695, %v324_v37 }
  0xef   :  { %5011 = vpow2.f32 %v4953_v35  ;;  %v237_v40 = vpop.f32.mrf.mxu0  ;;  %v326_v41 = vpop.f32.mrf.mxu1 }
  0xf0   :  { %5013 = vpow2.f32 %v4954_v38  ;;  %v4955_v42 = vmul.f32 -1.442695, %v237_v40  ;;  %v4957_v43 = vmul.f32 -1.442695, %v326_v41 }
  0xf1   :  { %5015 = vpow2.f32 %v4956_v39  ;;  %v241_v44 = vpop.f32.mrf.mxu0  ;;  %v330_v45 = vpop.f32.mrf.mxu1 }
  0xf2   :  { %5017 = vpow2.f32 %v4955_v42  ;;  %v4958_v46 = vmul.f32 -1.442695, %v241_v44  ;;  %v4960_v47 = vmul.f32 -1.442695, %v330_v45  ;;  %v32_v44 = vld [vmem:[%s9656_s0] sm:$0xff] }
  0xf3   :  { %5019 = vpow2.f32 %v4957_v43  ;;  %v243_v48 = vpop.f32.mrf.mxu0  ;;  %v332_v49 = vpop.f32.mrf.mxu1 }
  0xf4   :  { %5021 = vpow2.f32 %v4958_v46  ;;  %v4959_v51 = vmul.f32 -1.442695, %v243_v48  ;;  %v4961_v52 = vmul.f32 -1.442695, %v332_v49  ;;  %v34_v48 = vld [vmem:[%s9656_s0 + $0x10] sm:$0xff]  ;;  %v35_v49 = vld [vmem:[%s9656_s0 + $0x18] sm:$0xff] }
  0xf5   :  { %5023 = vpow2.f32 %v4960_v47  ;;  %v5004_v55 = vpop.eup %5003  ;;  %v33_v47 = vld [vmem:[%s9656_s0 + $0x8] sm:$0xff] }
  0xf6   :  { %5025 = vpow2.f32 %v4959_v51  ;;  %v383_v59 = vadd.f32 1.0, %v5004_v55  ;;  %v37_v51 = vld [vmem:[%s9656_s0 + $0x28] sm:$0xff]  ;;  %v5475_v55 = vld [vmem:[#allocation2 + $0x40] sm:$0xff] }
  0xf7   :  { %5027 = vpow2.f32 %v4961_v52  ;;  %v5006_v56 = vpop.eup %5005  ;;  %v38_v52 = vld [vmem:[%s9656_s0 + $0x30] sm:$0xff]  ;;  %vm675_vm0 = vcmp.eq.s32.totalorder %v5475_v55, 0  ;;  %vm751_vm5 = vcmp.eq.s32.totalorder %v5475_v55, 1  ;;  %vm827_vm10 = vcmp.eq.s32.totalorder %v5475_v55, 2 }
  0xf8   :  { %5029 = vpow2.f32 %v4952_v50  ;;  %v384_v61 = vadd.f32 1.0, %v5006_v56  ;;  %v36_v50 = vld [vmem:[%s9656_s0 + $0x20] sm:$0xff]  ;;  %vm903_vm8 = vcmp.eq.s32.totalorder %v5475_v55, 3  ;;  %s5297_s0 = smov [#allocation5]  }
  0xf9   :  { %5031 = vpow2.f32 %v4949_v53  ;;  %v5008_v57 = vpop.eup %5007  ;;  %v5471_v53 = vld [vmem:[#allocation2] sm:$0xff]  ;;  %s4901_s17 = sshll.u32 %s5297_s0, 4  ;;  %s4902_s17 = int_to_ptr.vmem [resolvable:$true] %s4901_s17 }
  0xfa   :  { %5033 = vpow2.f32 %v4948_v54  ;;  %v387_v63 = vadd.f32 1.0, %v5008_v57  ;;  %v5473_v54 = vld [vmem:[#allocation2 + $0x20] sm:$0xff]  ;;  %vm667_vm14 = vcmp.eq.s32.totalorder %v5471_v53, 0  ;;  %vm743_vm3 = vcmp.eq.s32.totalorder %v5471_v53, 1  ;;  %s5267_s18 = scalar_lea.vmem %s4902_s17, 64  ;;  %p5272_p6 = scmp.lt.s32.totalorder %s4902_s17, %s4902_s17 }
  0xfb   :  { %v5010_v58 = vpop.eup %5009  ;;  %5035 = vrcp.f32 %v383_v59  ;;  %v5477_v56 = vld [vmem:[#allocation2 + $0x60] sm:$0xff]  ;;  %vm671_vm15 = vcmp.eq.s32.totalorder %v5473_v54, 0  ;;  %vm747_vm4 = vcmp.eq.s32.totalorder %v5473_v54, 1  ;;  %vm823_vm9 = vcmp.eq.s32.totalorder %v5473_v54, 2  ;;  %p5268_p5 = scmp.ne.s32.totalorder %s4902_s17, %s5267_s18  ;;  %p5273_p7 = scmp.lt.s32.totalorder %s5267_s18, %s5267_s18 }
  0xfc   :  { %v5012_v60 = vpop.eup %5011  ;;  %v388_v8 = vadd.f32 1.0, %v5010_v58  ;;  %5037 = vrcp.f32 %v384_v61  ;;  %v5479_v57 = vld [vmem:[#allocation2 + $0x80] sm:$0xf]  ;;  %vm679_vm1 = vcmp.eq.s32.totalorder %v5477_v56, 0  ;;  %vm755_vm6 = vcmp.eq.s32.totalorder %v5477_v56, 1 }
  0xfd   :  { %v5014_v62 = vpop.eup %5013  ;;  %5039 = vrcp.f32 %v387_v63  ;;  %v390_v26 = vadd.f32 1.0, %v5012_v60  ;;  %vm683_vm2 = vcmp.eq.s32.totalorder %v5479_v57, 0  ;;  %vm831_vm11 = vcmp.eq.s32.totalorder %v5477_v56, 2  ;;  %p5274_p8 = por %p5273_p7, %p5272_p6 }
  0xfe   :  { %v5016_v7 = vpop.eup %5015  ;;  %v391_v10 = vadd.f32 1.0, %v5014_v62  ;;  %5041 = vrcp.f32 %v388_v8  ;;  %vm835_vm12 = vcmp.eq.s32.totalorder %v5479_v57, 2  ;;  %vm899_vm7 = vcmp.eq.s32.totalorder %v5473_v54, 3 }
  0xff   :  { %v5018_v9 = vpop.eup %5017  ;;  %v393_v24 = vadd.f32 1.0, %v5016_v7  ;;  %p5275_p9 = pnand %p5274_p8, %p5268_p5 }
 0x100   :  { %v5020_v11 = vpop.eup %5019  ;;  %v392_v12 = vadd.f32 1.0, %v5018_v9  ;;  %5043 = vrcp.f32 %v391_v10 }
 0x101   :  { %v5022_v13 = vpop.eup %5021  ;;  %v394_v21 = vadd.f32 1.0, %v5020_v11 }
 0x102   :  { %v5024_v14 = vpop.eup %5023  ;;  %v395_v15 = vadd.f32 1.0, %v5022_v13  ;;  %5045 = vrcp.f32 %v392_v12 }
 0x103   :  { %v5026_v16 = vpop.eup %5025  ;;  %v397_v18 = vadd.f32 1.0, %v5024_v14  ;;  %v5530_v14 = vsub.s32 4, %v5329_v2 }
 0x104   :  { %v5028_v17 = vpop.eup %5027  ;;  %v396_v19 = vadd.f32 1.0, %v5026_v16  ;;  %5047 = vrcp.f32 %v395_v15 }
 0x105   :  { %v5030_v20 = vpop.eup %5029  ;;  %v398_v22 = vadd.f32 1.0, %v5028_v17 }
 0x106   :  { %v5032_v23 = vpop.eup %5031  ;;  %5049 = vrcp.f32 %v396_v19  ;;  %v389_v27 = vadd.f32 1.0, %v5030_v20 }
 0x107   :  { %v5034_v25 = vpop.eup %5033  ;;  %5051 = vrcp.f32 %v398_v22  ;;  %v386_v28 = vadd.f32 1.0, %v5032_v23 }
 0x108   :  { %5053 = vrcp.f32 %v397_v18  ;;  %v385_v29 = vadd.f32 1.0, %v5034_v25  ;;  %v5036_v30 = vpop.eup %5035  ;;  %v5533_v18 = vsub.s32 5, %v5329_v2 }
 0x109   :  { %5055 = vrcp.f32 %v394_v21  ;;  %v5038_v31 = vpop.eup %5037 }
 0x10a   :  { %5057 = vrcp.f32 %v393_v24  ;;  %v5040_v32 = vpop.eup %5039 }
 0x10b   :  { %5059 = vrcp.f32 %v390_v26  ;;  %v5042_v33 = vpop.eup %5041  ;;  %v5550_v26 = vld [vmem:[#allocation2 + $0x10] sm:$0xff] }
 0x10c   :  { %5061 = vrcp.f32 %v389_v27  ;;  %v5552_v27 = vld [vmem:[#allocation2 + $0x30] sm:$0xff] }
 0x10d   :  { %5063 = vrcp.f32 %v386_v28  ;;  %v5044_v34 = vpop.eup %5043 }
 0x10e   :  { %5065 = vrcp.f32 %v385_v29 }
 0x10f   :  { %v5046_v35 = vpop.eup %5045 }
 0x111   :  { %v5048_v36 = vpop.eup %5047 }
 0x113   :  { %v5050_v37 = vpop.eup %5049 }
 0x114   :  { %v5052_v38 = vpop.eup %5051  ;;  %477 = vmatprep.subr.mxu0 %v5050_v37  ;;  %v5568_v37 = vld [vmem:[#allocation2 + $0x90] sm:$0xf] }
 0x115   :  { %v5054_v39 = vpop.eup %5053  ;;  %584 = vmatprep.subr.mxu1 %v5052_v38  ;;  %478 = vmatpush1.msra.mxu0 %v5048_v36  ;;  %v5566_v36 = vsub.s32 6, %v5329_v2  ;;  %9674 = vst [vmem:[#allocation9_spill] sm:$0xff] %v5568_v37 }
 0x116   :  { %v5056_v40 = vpop.eup %5055  ;;  %585 = vmatpush1.msra.mxu1 %v5054_v39  ;;  %479 = vmatprep.subr.mxu0 %v5046_v35  ;;  %v5573_v39 = vsub.s32 7, %v5329_v2 }
 0x117   :  { %v5058_v41 = vpop.eup %5057  ;;  %586 = vmatprep.subr.mxu1 %v5056_v40  ;;  %480 = vmatpush1.msra.mxu0 %v5044_v34 }
 0x118   :  { %v5060_v42 = vpop.eup %5059  ;;  %587 = vmatpush1.msra.mxu1 %v5058_v41  ;;  %481 = vmatprep.subr.mxu0 %v5042_v33  ;;  %v5562_v33 = vld [vmem:[#allocation2 + $0x70] sm:$0xff]  ;;  %9675 = vst [vmem:[#allocation10_spill] sm:$0xff] %v5573_v39 }
 0x119   :  { %v5062_v43 = vpop.eup %5061  ;;  %588 = vmatprep.subr.mxu1 %v5060_v42  ;;  %482 = vmatpush1.msra.mxu0 %v5040_v32  ;;  %v5560_v32 = vld [vmem:[#allocation2 + $0x50] sm:$0xff] }
 0x11a   :  { %v5064_v45 = vpop.eup %5063  ;;  %589 = vmatpush1.msra.mxu1 %v5062_v43  ;;  %483 = vmatprep.subr.mxu0 %v5038_v31 }
 0x11b   :  { %v5066_v46 = vpop.eup %5065  ;;  %590 = vmatprep.subr.mxu1 %v5064_v45  ;;  %484 = vmatpush1.msra.mxu0 %v5036_v30 }
 0x11c   :  { %591 = vmatpush1.msra.mxu1 %v5066_v46  ;;  %4962 = vmatmul.mubr.msk.f32.vlgmr.msra.gmra.mxu0 %vm431_vm13, %v32_v44 }
 0x11d   :  { %4969 = vmatmul.mubr.msk.f32.vlgmr.msra.gmra.mxu1 %vm431_vm13, %v32_v44  ;;  %523 = vmatprep.mubr.f32.mxu0 %v5294_v1 }
 0x11e   :  { %630 = vmatprep.mubr.f32.mxu1 %v5294_v1 }
 0x120   :  { %4963 = vmatmul.mubr.msk.f32.gmra.mxu0 %vm431_vm13, %v33_v47 }
 0x121   :  { %4970 = vmatmul.mubr.msk.f32.gmra.mxu1 %vm431_vm13, %v33_v47  ;;  %529 = vmatprep.mubr.f32.mxu0 %v5294_v1 }
 0x122   :  { %636 = vmatprep.mubr.f32.mxu1 %v5294_v1 }
 0x124   :  { %4964 = vmatmul.mubr.msk.f32.gmra.mxu0 %vm431_vm13, %v34_v48 }
 0x125   :  { %4971 = vmatmul.mubr.msk.f32.gmra.mxu1 %vm431_vm13, %v34_v48  ;;  %535 = vmatprep.mubr.f32.mxu0 %v5294_v1 }
 0x126   :  { %642 = vmatprep.mubr.f32.mxu1 %v5294_v1 }
 0x128   :  { %4965 = vmatmul.mubr.msk.f32.gmra.mxu0 %vm431_vm13, %v35_v49 }
 0x129   :  { %4972 = vmatmul.mubr.msk.f32.gmra.mxu1 %vm431_vm13, %v35_v49  ;;  %541 = vmatprep.mubr.f32.mxu0 %v5294_v1 }
 0x12a   :  { %648 = vmatprep.mubr.f32.mxu1 %v5294_v1 }
 0x12c   :  { %4966 = vmatmul.mubr.msk.f32.gmra.mxu0 %vm431_vm13, %v36_v50 }
 0x12d   :  { %4973 = vmatmul.mubr.msk.f32.gmra.mxu1 %vm431_vm13, %v36_v50  ;;  %547 = vmatprep.mubr.f32.mxu0 %v5294_v1 }
 0x12e   :  { %654 = vmatprep.mubr.f32.mxu1 %v5294_v1 }
 0x130   :  { %4967 = vmatmul.mubr.msk.f32.gmra.mxu0 %vm431_vm13, %v37_v51 }
 0x131   :  { %4974 = vmatmul.mubr.msk.f32.gmra.mxu1 %vm431_vm13, %v37_v51  ;;  %553 = vmatprep.mubr.f32.mxu0 %v5294_v1 }
 0x132   :  { %660 = vmatprep.mubr.f32.mxu1 %v5294_v1 }
 0x134   :  { %4968 = vmatmul.mubr.msk.f32.gmra.mxu0 %vm431_vm13, %v38_v52 }
 0x135   :  { %4975 = vmatmul.mubr.msk.f32.gmra.mxu1 %vm431_vm13, %v38_v52  ;;  %vm895_vm13 = vcmp.eq.s32.totalorder %v5471_v53, 3 }
 0x1dc   :  { %v5481_v58 = vpop.f32.mrf.mxu0 }
 0x1dd   :  { %v690_v1 = vrot.slane %v5481_v58, %v5338_v5  ;;  %v766_v59 = vrot.slane %v5481_v58, %v5332_v3  ;;  %v842_v13 = vrot.slane %v5481_v58, %v5341_v6  ;;  %v918_v21 = vrot.slane %v5481_v58, %v5335_v4  ;;  %v5599_v51 = vpop.f32.mrf.mxu1 }
 0x1de   :  { %v994_v38 = vrot.slane %v5481_v58, %v5530_v14  ;;  %v1070_v50 = vrot.slane %v5481_v58, %v5533_v18 }
 0x1df   :  { %v703_v60 = vsel %vm667_vm14, %v690_v1, 0.0  ;;  %v707_v61 = vsel %vm671_vm15, %v690_v1, 0.0  ;;  %v711_v62 = vsel %vm675_vm0, %v690_v1, 0.0  ;;  %v779_v63 = vsel %vm743_vm3, %v766_v59, 0.0 }
 0x1e0   :  { %v783_v7 = vsel %vm747_vm4, %v766_v59, 0.0  ;;  %v787_v8 = vsel %vm751_vm5, %v766_v59, 0.0  ;;  %v715_v9 = vsel %vm679_vm1, %v690_v1, 0.0  ;;  %v719_v10 = vsel %vm683_vm2, %v690_v1, 0.0 }
 0x1e1   :  { %v791_v11 = vsel %vm755_vm6, %v766_v59, 0.0  ;;  %vm9672_vm14 = vcmp.eq.s32.totalorder %v5479_v57, 1  ;;  %vm907_vm15 = vcmp.eq.s32.totalorder %v5477_v56, 3  ;;  %vm911_vm0 = vcmp.eq.s32.totalorder %v5479_v57, 3 }
 0x1e2   :  { %v795_v12 = vsel %vm9672_vm14, %v766_v59, 0.0  ;;  %v799_v15 = vadd.f32 %v779_v63, %v703_v60  ;;  %v803_v16 = vadd.f32 %v783_v7, %v707_v61  ;;  %v807_v17 = vadd.f32 %v787_v8, %v711_v62 }
 0x1e3   :  { %v811_v19 = vadd.f32 %v791_v11, %v715_v9  ;;  %v815_v20 = vadd.f32 %v795_v12, %v719_v10  ;;  %vm971_vm1 = vcmp.eq.s32.totalorder %v5471_v53, 4  ;;  %vm975_vm2 = vcmp.eq.s32.totalorder %v5473_v54, 4 }
 0x1e4   :  { %vm979_vm3 = vcmp.eq.s32.totalorder %v5475_v55, 4  ;;  %vm983_vm4 = vcmp.eq.s32.totalorder %v5477_v56, 4  ;;  %vm987_vm5 = vcmp.eq.s32.totalorder %v5479_v57, 4  ;;  %vm9673_vm6 = vcmp.eq.s32.totalorder %v5471_v53, 2 }
 0x1e5   :  { %v855_v22 = vsel %vm9673_vm6, %v842_v13, 0.0  ;;  %v859_v23 = vsel %vm823_vm9, %v842_v13, 0.0  ;;  %v863_v24 = vsel %vm827_vm10, %v842_v13, 0.0  ;;  %v867_v25 = vsel %vm831_vm11, %v842_v13, 0.0 }
 0x1e6   :  { %v871_v28 = vsel %vm835_vm12, %v842_v13, 0.0  ;;  %v875_v29 = vadd.f32 %v855_v22, %v799_v15  ;;  %v879_v30 = vadd.f32 %v859_v23, %v803_v16  ;;  %v883_v31 = vadd.f32 %v863_v24, %v807_v17 }
 0x1e7   :  { %vm1047_vm14 = vcmp.eq.s32.totalorder %v5471_v53, 5  ;;  %vm1051_vm9 = vcmp.eq.s32.totalorder %v5473_v54, 5  ;;  %v887_v34 = vadd.f32 %v867_v25, %v811_v19  ;;  %v891_v35 = vadd.f32 %v871_v28, %v815_v20 }
 0x1e8   :  { %vm669_vm12 = vcmp.eq.s32.totalorder %v5550_v26, 0  ;;  %v931_v40 = vsel %vm895_vm13, %v918_v21, 0.0  ;;  %v935_v41 = vsel %vm899_vm7, %v918_v21, 0.0  ;;  %v939_v42 = vsel %vm903_vm8, %v918_v21, 0.0 }
 0x1e9   :  { %v943_v43 = vsel %vm907_vm15, %v918_v21, 0.0  ;;  %v947_v44 = vsel %vm911_vm0, %v918_v21, 0.0  ;;  %v951_v45 = vadd.f32 %v931_v40, %v875_v29  ;;  %v955_v46 = vadd.f32 %v935_v41, %v879_v30 }
 0x1ea   :  { %v959_v47 = vadd.f32 %v939_v42, %v883_v31  ;;  %v963_v48 = vadd.f32 %v943_v43, %v887_v34  ;;  %v967_v49 = vadd.f32 %v947_v44, %v891_v35  ;;  %vm1131_vm15 = vcmp.eq.s32.totalorder %v5475_v55, 6 }
 0x1eb   :  { %vm745_vm11 = vcmp.eq.s32.totalorder %v5550_v26, 1  ;;  %vm749_vm6 = vcmp.eq.s32.totalorder %v5552_v27, 1  ;;  %vm1135_vm0 = vcmp.eq.s32.totalorder %v5477_v56, 6  ;;  %vm753_vm13 = vcmp.eq.s32.totalorder %v5560_v32, 1 }
 0x1ec   :  { %vm757_vm7 = vcmp.eq.s32.totalorder %v5562_v33, 1  ;;  %vm761_vm8 = vcmp.eq.s32.totalorder %v5568_v37, 1  ;;  %v1007_v52 = vsel %vm971_vm1, %v994_v38, 0.0  ;;  %v1011_v1 = vsel %vm975_vm2, %v994_v38, 0.0 }
 0x1ed   :  { %v1015_v59 = vsel %vm979_vm3, %v994_v38, 0.0  ;;  %v1019_v60 = vsel %vm983_vm4, %v994_v38, 0.0  ;;  %v1023_v61 = vsel %vm987_vm5, %v994_v38, 0.0  ;;  %v1027_v62 = vadd.f32 %v1007_v52, %v951_v45 }
 0x1ee   :  { %v1031_v63 = vadd.f32 %v1011_v1, %v955_v46  ;;  %v1035_v7 = vadd.f32 %v1015_v59, %v959_v47  ;;  %v1039_v8 = vadd.f32 %v1019_v60, %v963_v48  ;;  %v1043_v9 = vadd.f32 %v1023_v61, %v967_v49 }
 0x1ef   :  { %v698_v10 = vrot.slane %v5599_v51, %v5338_v5  ;;  %v1146_v11 = vrot.slane %v5481_v58, %v5566_v36  ;;  %v5623_v12 = vrot.slane %v5481_v58, %v5573_v39  ;;  %v774_v13 = vrot.slane %v5599_v51, %v5332_v3 }
 0x1f0   :  { %v1083_v15 = vsel %vm1047_vm14, %v1070_v50, 0.0  ;;  %v1087_v16 = vsel %vm1051_vm9, %v1070_v50, 0.0  ;;  %vm9676_vm3 = vcmp.eq.s32.totalorder %v5475_v55, 5  ;;  %vm9677_vm2 = vcmp.eq.s32.totalorder %v5477_v56, 5 }
 0x1f1   :  { %v1091_v17 = vsel %vm9676_vm3, %v1070_v50, 0.0  ;;  %v1095_v58 = vsel %vm9677_vm2, %v1070_v50, 0.0  ;;  %vm1199_vm1 = vcmp.eq.s32.totalorder %v5471_v53, 7  ;;  %vm9678_vm10 = vcmp.eq.s32.totalorder %v5479_v57, 5 }
 0x1f2   :  { %v1099_v19 = vsel %vm9678_vm10, %v1070_v50, 0.0  ;;  %v1103_v20 = vadd.f32 %v1083_v15, %v1027_v62  ;;  %v1107_v21 = vadd.f32 %v1087_v16, %v1031_v63  ;;  %v1111_v22 = vadd.f32 %v1091_v17, %v1035_v7  ;;  %v5686_v7 = vld [vmem:[#allocation2 + $0x8] sm:$0xff] }
 0x1f3   :  { %vm1215_vm4 = vcmp.eq.s32.totalorder %v5479_v57, 7  ;;  %v1115_v23 = vadd.f32 %v1095_v58, %v1039_v8  ;;  %v1119_v24 = vadd.f32 %v1099_v19, %v1043_v9  ;;  %v705_v25 = vsel %vm669_vm12, %v698_v10, 0.0  ;;  %v5698_v15 = vld [vmem:[#allocation2 + $0x48] sm:$0xff] }
 0x1f4   :  { %vm9679_vm2 = vcmp.eq.s32.totalorder %v5552_v27, 0  ;;  %vm897_vm10 = vcmp.eq.s32.totalorder %v5550_v26, 3  ;;  %vm905_vm5 = vcmp.eq.s32.totalorder %v5560_v32, 3  ;;  %vm9680_vm14 = vcmp.eq.s32.totalorder %v5560_v32, 0  ;;  %v5700_v16 = vld [vmem:[#allocation2 + $0x68] sm:$0xff] }
 0x1f5   :  { %v709_v28 = vsel %vm9679_vm2, %v698_v10, 0.0  ;;  %v713_v29 = vsel %vm9680_vm14, %v698_v10, 0.0  ;;  %vm9681_vm9 = vcmp.eq.s32.totalorder %v5562_v33, 0  ;;  %v781_v31 = vsel %vm745_vm11, %v774_v13, 0.0 }
 0x1f6   :  { %v717_v30 = vsel %vm9681_vm9, %v698_v10, 0.0  ;;  %v785_v34 = vsel %vm749_vm6, %v774_v13, 0.0  ;;  %vm909_vm12 = vcmp.eq.s32.totalorder %v5562_v33, 3  ;;  %vm913_vm2 = vcmp.eq.s32.totalorder %v5568_v37, 3 }
 0x1f7   :  { %vm9682_vm3 = vcmp.eq.s32.totalorder %v5568_v37, 0  ;;  %v789_v38 = vsel %vm753_vm13, %v774_v13, 0.0  ;;  %v793_v40 = vsel %vm757_vm7, %v774_v13, 0.0  ;;  %v797_v41 = vsel %vm761_vm8, %v774_v13, 0.0  ;;  %v5696_v13 = vld [vmem:[#allocation2 + $0x28] sm:$0xff] }
 0x1f8   :  { %v721_v35 = vsel %vm9682_vm3, %v698_v10, 0.0  ;;  %vm9683_vm11 = vcmp.eq.s32.totalorder %v5471_v53, 6  ;;  %vm9684_vm6 = vcmp.eq.s32.totalorder %v5473_v54, 6  ;;  %v1167_v44 = vsel %vm1131_vm15, %v1146_v11, 0.0 }
 0x1f9   :  { %v1159_v42 = vsel %vm9683_vm11, %v1146_v11, 0.0  ;;  %v1163_v43 = vsel %vm9684_vm6, %v1146_v11, 0.0  ;;  %v850_v45 = vrot.slane %v5599_v51, %v5341_v6  ;;  %v1171_v46 = vsel %vm1135_vm0, %v1146_v11, 0.0 }
 0x1fa   :  { %vm9685_vm13 = vcmp.eq.s32.totalorder %v5479_v57, 6  ;;  %v801_v48 = vadd.f32 %v781_v31, %v705_v25  ;;  %v805_v49 = vadd.f32 %v785_v34, %v709_v28  ;;  %vm973_vm7 = vcmp.eq.s32.totalorder %v5550_v26, 4  ;;  %v5726_v31 = vld [vmem:[#allocation2 + $0x88] sm:$0xf] }
 0x1fb   :  { %v1175_v47 = vsel %vm9685_vm13, %v1146_v11, 0.0  ;;  %vm977_vm8 = vcmp.eq.s32.totalorder %v5552_v27, 4  ;;  %vm981_vm14 = vcmp.eq.s32.totalorder %v5560_v32, 4  ;;  %v1179_v50 = vadd.f32 %v1159_v42, %v1103_v20 }
 0x1fc   :  { %v809_v52 = vadd.f32 %v789_v38, %v713_v29  ;;  %v813_v1 = vadd.f32 %v793_v40, %v717_v30  ;;  %v817_v59 = vadd.f32 %v797_v41, %v721_v35  ;;  %vm985_vm15 = vcmp.eq.s32.totalorder %v5562_v33, 4 }
 0x1fd   :  { %v1183_v60 = vadd.f32 %v1163_v43, %v1107_v21  ;;  %v1187_v61 = vadd.f32 %v1167_v44, %v1111_v22  ;;  %v1191_v62 = vadd.f32 %v1171_v46, %v1115_v23  ;;  %v1195_v63 = vadd.f32 %v1175_v47, %v1119_v24 }
 0x1fe   :  { %vm9686_vm0 = vcmp.eq.s32.totalorder %v5550_v26, 2  ;;  %vm9687_vm3 = vcmp.eq.s32.totalorder %v5552_v27, 2  ;;  %vm9688_vm11 = vcmp.eq.s32.totalorder %v5560_v32, 2  ;;  %v926_v11 = vrot.slane %v5599_v51, %v5335_v4 }
 0x1ff   :  { %v857_v8 = vsel %vm9686_vm0, %v850_v45, 0.0  ;;  %v861_v9 = vsel %vm9687_vm3, %v850_v45, 0.0  ;;  %v865_v10 = vsel %vm9688_vm11, %v850_v45, 0.0  ;;  %vm9689_vm6 = vcmp.eq.s32.totalorder %v5562_v33, 2 }
 0x200   :  { %v869_v17 = vsel %vm9689_vm6, %v850_v45, 0.0  ;;  %vm9690_vm13 = vcmp.eq.s32.totalorder %v5568_v37, 2  ;;  %v877_v19 = vadd.f32 %v857_v8, %v801_v48  ;;  %v881_v20 = vadd.f32 %v861_v9, %v805_v49 }
 0x201   :  { %v873_v58 = vsel %vm9690_vm13, %v850_v45, 0.0  ;;  %vm1049_vm0 = vcmp.eq.s32.totalorder %v5550_v26, 5  ;;  %v1235_v21 = vsel %vm1199_vm1, %v5623_v12, 0.0  ;;  %v885_v22 = vadd.f32 %v865_v10, %v809_v52 }
 0x202   :  { %v889_v23 = vadd.f32 %v869_v17, %v813_v1  ;;  %v893_v24 = vadd.f32 %v873_v58, %v817_v59  ;;  %vm9691_vm13 = vcmp.eq.s32.totalorder %v5473_v54, 7  ;;  %vm9692_vm3 = vcmp.eq.s32.totalorder %v5475_v55, 7 }
 0x203   :  { %v1239_v25 = vsel %vm9691_vm13, %v5623_v12, 0.0  ;;  %v1243_v28 = vsel %vm9692_vm3, %v5623_v12, 0.0  ;;  %vm9693_vm11 = vcmp.eq.s32.totalorder %v5477_v56, 7  ;;  %v1251_v30 = vsel %vm1215_vm4, %v5623_v12, 0.0 }
 0x204   :  { %v1247_v29 = vsel %vm9693_vm11, %v5623_v12, 0.0  ;;  %vm668_vm1 = vcmp.eq.s32.totalorder %v5686_v7, 0  ;;  %vm672_vm9 = vcmp.eq.s32.totalorder %v5696_v13, 0  ;;  %v933_v34 = vsel %vm897_vm10, %v926_v11, 0.0 }
 0x205   :  { %vm9694_vm3 = vcmp.eq.s32.totalorder %v5552_v27, 3  ;;  %v941_v38 = vsel %vm905_vm5, %v926_v11, 0.0  ;;  %v1002_v12 = vrot.slane %v5599_v51, %v5530_v14  ;;  %vm744_vm4 = vcmp.eq.s32.totalorder %v5686_v7, 1 }
 0x206   :  { %v937_v35 = vsel %vm9694_vm3, %v926_v11, 0.0  ;;  %vm748_vm11 = vcmp.eq.s32.totalorder %v5696_v13, 1  ;;  %vm752_vm13 = vcmp.eq.s32.totalorder %v5698_v15, 1  ;;  %v945_v40 = vsel %vm909_vm12, %v926_v11, 0.0 }
 0x207   :  { %v949_v41 = vsel %vm913_vm2, %v926_v11, 0.0  ;;  %v953_v42 = vadd.f32 %v933_v34, %v877_v19  ;;  %v957_v43 = vadd.f32 %v937_v35, %v881_v20  ;;  %vm1125_vm5 = vcmp.eq.s32.totalorder %v5550_v26, 6 }
 0x208   :  { %v5749_v44 = vadd.f32 %v1235_v21, %v1179_v50  ;;  %v961_v45 = vadd.f32 %v941_v38, %v885_v22  ;;  %v965_v46 = vadd.f32 %v945_v40, %v889_v23  ;;  %v969_v47 = vadd.f32 %v949_v41, %v893_v24  ;;  %v5763_v50 = vpop.f32.mrf.mxu0 }
 0x209   :  { %vm1129_vm10 = vcmp.eq.s32.totalorder %v5552_v27, 6  ;;  %vm1133_vm3 = vcmp.eq.s32.totalorder %v5560_v32, 6  ;;  %v5755_v48 = vadd.f32 %v1239_v25, %v1183_v60  ;;  %v5757_v49 = vadd.f32 %v1243_v28, %v1187_v61 }
 0x20a   :  { %v5759_v52 = vadd.f32 %v1247_v29, %v1191_v62  ;;  %v5761_v1 = vadd.f32 %v1251_v30, %v1195_v63  ;;  %v1009_v59 = vsel %vm973_vm7, %v1002_v12, 0.0  ;;  %v1013_v8 = vsel %vm977_vm8, %v1002_v12, 0.0 }
 0x20b   :  { %v1017_v9 = vsel %vm981_vm14, %v1002_v12, 0.0  ;;  %v1078_v60 = vrot.slane %v5599_v51, %v5533_v18  ;;  %vm1137_vm2 = vcmp.eq.s32.totalorder %v5562_v33, 6  ;;  %v1021_v61 = vsel %vm985_vm15, %v1002_v12, 0.0 }
 0x20c   :  { %vm9695_vm6 = vcmp.eq.s32.totalorder %v5568_v37, 4  ;;  %v1029_v63 = vadd.f32 %v1009_v59, %v953_v42  ;;  %v1033_v10 = vadd.f32 %v1013_v8, %v957_v43  ;;  %v1037_v11 = vadd.f32 %v1017_v9, %v961_v45 }
 0x20d   :  { %v1025_v62 = vsel %vm9695_vm6, %v1002_v12, 0.0  ;;  %v1041_v17 = vadd.f32 %v1021_v61, %v965_v46  ;;  %v694_v19 = vrot.slane %v5763_v50, %v5338_v5  ;;  %v1154_v20 = vrot.slane %v5599_v51, %v5566_v36 }
 0x20e   :  { %v1045_v58 = vadd.f32 %v1025_v62, %v969_v47  ;;  %v5789_v21 = vrot.slane %v5599_v51, %v5573_v39  ;;  %v770_v22 = vrot.slane %v5763_v50, %v5332_v3  ;;  %v5795_v23 = vrot.slane %v5763_v50, %v5341_v6 }
 0x20f   :  { %v1085_v24 = vsel %vm1049_vm0, %v1078_v60, 0.0  ;;  %vm9696_vm15 = vcmp.eq.s32.totalorder %v5552_v27, 5  ;;  %vm9697_vm6 = vcmp.eq.s32.totalorder %v5560_v32, 5  ;;  %vm1201_vm12 = vcmp.eq.s32.totalorder %v5550_v26, 7 }
 0x210   :  { %v1089_v25 = vsel %vm9696_vm15, %v1078_v60, 0.0  ;;  %v1093_v28 = vsel %vm9697_vm6, %v1078_v60, 0.0  ;;  %v5809_v51 = vrot.slane %v5763_v50, %v5335_v4  ;;  %vm9698_vm0 = vcmp.eq.s32.totalorder %v5562_v33, 5 }
 0x211   :  { %v1097_v29 = vsel %vm9698_vm0, %v1078_v60, 0.0  ;;  %vm9699_vm15 = vcmp.eq.s32.totalorder %v5568_v37, 5  ;;  %v1105_v34 = vadd.f32 %v1085_v24, %v1029_v63  ;;  %v1109_v35 = vadd.f32 %v1089_v25, %v1033_v10 }
 0x212   :  { %v1101_v30 = vsel %vm9699_vm15, %v1078_v60, 0.0  ;;  %vm896_vm8 = vcmp.eq.s32.totalorder %v5686_v7, 3  ;;  %v704_v38 = vsel %vm668_vm1, %v694_v19, 0.0  ;;  %v708_v12 = vsel %vm672_vm9, %v694_v19, 0.0 }
 0x213   :  { %vm9700_vm7 = vcmp.eq.s32.totalorder %v5698_v15, 0  ;;  %vm9701_vm0 = vcmp.eq.s32.totalorder %v5700_v16, 0  ;;  %vm900_vm15 = vcmp.eq.s32.totalorder %v5696_v13, 3  ;;  %vm904_vm6 = vcmp.eq.s32.totalorder %v5698_v15, 3 }
 0x214   :  { %v712_v40 = vsel %vm9700_vm7, %v694_v19, 0.0  ;;  %v716_v41 = vsel %vm9701_vm0, %v694_v19, 0.0  ;;  %vm908_vm14 = vcmp.eq.s32.totalorder %v5700_v16, 3  ;;  %v780_v42 = vsel %vm744_vm4, %v770_v22, 0.0 }
 0x215   :  { %v784_v43 = vsel %vm748_vm11, %v770_v22, 0.0  ;;  %v788_v45 = vsel %vm752_vm13, %v770_v22, 0.0  ;;  %vm9702_vm9 = vcmp.eq.s32.totalorder %v5700_v16, 1  ;;  %v1113_v47 = vadd.f32 %v1093_v28, %v1037_v11 }
 0x216   :  { %v792_v46 = vsel %vm9702_vm9, %v770_v22, 0.0  ;;  %v1117_v59 = vadd.f32 %v1097_v29, %v1041_v17  ;;  %v1121_v8 = vadd.f32 %v1101_v30, %v1045_v58  ;;  %v1161_v9 = vsel %vm1125_vm5, %v1154_v20, 0.0 }
 0x217   :  { %vm912_vm1 = vcmp.eq.s32.totalorder %v5726_v31, 3  ;;  %v1165_v60 = vsel %vm1129_vm10, %v1154_v20, 0.0  ;;  %v1169_v61 = vsel %vm1133_vm3, %v1154_v20, 0.0  ;;  %vm9703_vm4 = vcmp.eq.s32.totalorder %v5726_v31, 0 }
 0x218   :  { %v720_v62 = vsel %vm9703_vm4, %v694_v19, 0.0  ;;  %vm9704_vm13 = vcmp.eq.s32.totalorder %v5726_v31, 1  ;;  %v800_v10 = vadd.f32 %v780_v42, %v704_v38  ;;  %v804_v11 = vadd.f32 %v784_v43, %v708_v12 }
 0x219   :  { %v796_v63 = vsel %vm9704_vm13, %v770_v22, 0.0  ;;  %v808_v17 = vadd.f32 %v788_v45, %v712_v40  ;;  %v812_v58 = vadd.f32 %v792_v46, %v716_v41  ;;  %vm972_vm11 = vcmp.eq.s32.totalorder %v5686_v7, 4  ;;  %v5872_v41 = vld [vmem:[#allocation2 + $0x38] sm:$0xff] }
 0x21a   :  { %vm976_vm5 = vcmp.eq.s32.totalorder %v5696_v13, 4  ;;  %vm980_vm7 = vcmp.eq.s32.totalorder %v5698_v15, 4  ;;  %vm984_vm10 = vcmp.eq.s32.totalorder %v5700_v16, 4  ;;  %v1173_v24 = vsel %vm1137_vm2, %v1154_v20, 0.0 }
 0x21b   :  { %vm9705_vm3 = vcmp.eq.s32.totalorder %v5568_v37, 6  ;;  %v1181_v25 = vadd.f32 %v1161_v9, %v1105_v34  ;;  %v1185_v22 = vadd.f32 %v1165_v60, %v1109_v35  ;;  %v1189_v28 = vadd.f32 %v1169_v61, %v1113_v47  ;;  %v5870_v35 = vld [vmem:[#allocation2 + $0x18] sm:$0xff] }
 0x21c   :  { %v1177_v19 = vsel %vm9705_vm3, %v1154_v20, 0.0  ;;  %v1193_v29 = vadd.f32 %v1173_v24, %v1117_v59  ;;  %v816_v38 = vadd.f32 %v796_v63, %v720_v62  ;;  %vm9706_vm9 = vcmp.eq.s32.totalorder %v5686_v7, 2  ;;  %v5878_v47 = vld [vmem:[#allocation2 + $0x58] sm:$0xff] }
 0x21d   :  { %v1197_v30 = vadd.f32 %v1177_v19, %v1121_v8  ;;  %v856_v12 = vsel %vm9706_vm9, %v5795_v23, 0.0  ;;  %vm9707_vm4 = vcmp.eq.s32.totalorder %v5696_v13, 2  ;;  %vm9708_vm2 = vcmp.eq.s32.totalorder %v5698_v15, 2  ;;  %v5880_v59 = vld [vmem:[#allocation2 + $0x78] sm:$0xff] }
 0x21e   :  { %v860_v40 = vsel %vm9707_vm4, %v5795_v23, 0.0  ;;  %v864_v20 = vsel %vm9708_vm2, %v5795_v23, 0.0  ;;  %vm9709_vm13 = vcmp.eq.s32.totalorder %v5700_v16, 2  ;;  %vm1048_vm3 = vcmp.eq.s32.totalorder %v5686_v7, 5  ;;  %v5894_v62 = vld [vmem:[#allocation2 + $0x98] sm:$0xf] }
 0x21f   :  { %v868_v34 = vsel %vm9709_vm13, %v5795_v23, 0.0  ;;  %v876_v42 = vadd.f32 %v856_v12, %v800_v10  ;;  %v880_v43 = vadd.f32 %v860_v40, %v804_v11  ;;  %v884_v45 = vadd.f32 %v864_v20, %v808_v17 }
 0x220   :  { %v888_v46 = vadd.f32 %v868_v34, %v812_v58  ;;  %v1237_v8 = vsel %vm1201_vm12, %v5789_v21, 0.0  ;;  %vm9710_vm13 = vcmp.eq.s32.totalorder %v5552_v27, 7  ;;  %vm9711_vm9 = vcmp.eq.s32.totalorder %v5560_v32, 7 }
 0x221   :  { %v1241_v9 = vsel %vm9710_vm13, %v5789_v21, 0.0  ;;  %v1245_v60 = vsel %vm9711_vm9, %v5789_v21, 0.0  ;;  %vm9712_vm2 = vcmp.eq.s32.totalorder %v5726_v31, 2  ;;  %vm9713_vm0 = vcmp.eq.s32.totalorder %v5562_v33, 7 }
 0x222   :  { %v872_v61 = vsel %vm9712_vm2, %v5795_v23, 0.0  ;;  %v1249_v63 = vsel %vm9713_vm0, %v5789_v21, 0.0  ;;  %vm9714_vm12 = vcmp.eq.s32.totalorder %v5568_v37, 7  ;;  %v932_v17 = vsel %vm896_vm8, %v5809_v51, 0.0 }
 0x223   :  { %v1253_v10 = vsel %vm9714_vm12, %v5789_v21, 0.0  ;;  %v892_v11 = vadd.f32 %v872_v61, %v816_v38  ;;  %vm670_vm9 = vcmp.eq.s32.totalorder %v5870_v35, 0  ;;  %vm674_vm13 = vcmp.eq.s32.totalorder %v5872_v41, 0 }
 0x224   :  { %vm746_vm2 = vcmp.eq.s32.totalorder %v5870_v35, 1  ;;  %v936_v23 = vsel %vm900_vm15, %v5809_v51, 0.0  ;;  %v940_v21 = vsel %vm904_vm6, %v5809_v51, 0.0  ;;  %v944_v58 = vsel %vm908_vm14, %v5809_v51, 0.0 }
 0x225   :  { %v998_v24 = vrot.slane %v5763_v50, %v5530_v14  ;;  %vm1124_vm8 = vcmp.eq.s32.totalorder %v5686_v7, 6  ;;  %vm678_vm0 = vcmp.eq.s32.totalorder %v5878_v47, 0  ;;  %v952_v19 = vadd.f32 %v932_v17, %v876_v42 }
 0x226   :  { %v956_v38 = vadd.f32 %v936_v23, %v880_v43  ;;  %v960_v12 = vadd.f32 %v940_v21, %v884_v45  ;;  %v964_v40 = vadd.f32 %v944_v58, %v888_v46  ;;  %vm686_vm6 = vcmp.eq.s32.totalorder %v5894_v62, 0 }
 0x227   :  { %v5927_v20 = vadd.f32 %v1237_v8, %v1181_v25  ;;  %v5929_v34 = vadd.f32 %v1241_v9, %v1185_v22  ;;  %v5931_v61 = vadd.f32 %v1245_v60, %v1189_v28  ;;  %v948_v42 = vsel %vm912_vm1, %v5809_v51, 0.0  ;;  %v5946_v22 = vpop.f32.mrf.mxu1 }
 0x228   :  { %vm1128_vm12 = vcmp.eq.s32.totalorder %v5696_v13, 6  ;;  %vm1132_vm15 = vcmp.eq.s32.totalorder %v5698_v15, 6  ;;  %v5938_v43 = vadd.f32 %v1249_v63, %v1193_v29  ;;  %v5940_v45 = vadd.f32 %v1253_v10, %v1197_v30 }
 0x229   :  { %9715 = vst [vmem:[#allocation11_spill] sm:$0xff] %v5927_v20  ;;  %9716 = vst [vmem:[#allocation12_spill] sm:$0xff] %v5929_v34  ;;  %v968_v46 = vadd.f32 %v948_v42, %v892_v11  ;;  %v1074_v25 = vrot.slane %v5763_v50, %v5533_v18  ;;  %v1008_v51 = vsel %vm972_vm11, %v998_v24, 0.0  ;;  %v1012_v28 = vsel %vm976_vm5, %v998_v24, 0.0 }
 0x22a   :  { %9717 = vst [vmem:[#allocation13_spill] sm:$0xff] %v5931_v61  ;;  %9718 = vst [vmem:[#allocation14_spill] sm:$0xff] %v5938_v43  ;;  %v1016_v29 = vsel %vm980_vm7, %v998_v24, 0.0  ;;  %v1020_v30 = vsel %vm984_vm10, %v998_v24, 0.0  ;;  %v1028_v8 = vadd.f32 %v1008_v51, %v952_v19  ;;  %v1032_v9 = vadd.f32 %v1012_v28, %v956_v38 }
 0x22b   :  { %9719 = vst [vmem:[#allocation15_spill] sm:$0xff] %v5940_v45  ;;  %v1036_v60 = vadd.f32 %v1016_v29, %v960_v12  ;;  %v1040_v63 = vadd.f32 %v1020_v30, %v964_v40  ;;  %vm9720_vm14 = vcmp.eq.s32.totalorder %v5726_v31, 4  ;;  %v1150_v11 = vrot.slane %v5763_v50, %v5566_v36 }
 0x22c   :  { %v1024_v10 = vsel %vm9720_vm14, %v998_v24, 0.0  ;;  %v702_v17 = vrot.slane %v5946_v22, %v5338_v5  ;;  %v778_v23 = vrot.slane %v5946_v22, %v5332_v3  ;;  %v1084_v58 = vsel %vm1048_vm3, %v1074_v25, 0.0 }
 0x22d   :  { %v1044_v21 = vadd.f32 %v1024_v10, %v968_v46  ;;  %v5972_v24 = vrot.slane %v5763_v50, %v5573_v39  ;;  %v854_v19 = vrot.slane %v5946_v22, %v5341_v6  ;;  %vm9721_vm14 = vcmp.eq.s32.totalorder %v5696_v13, 5 }
 0x22e   :  { %v1088_v38 = vsel %vm9721_vm14, %v1074_v25, 0.0  ;;  %vm9722_vm11 = vcmp.eq.s32.totalorder %v5698_v15, 5  ;;  %vm9723_vm3 = vcmp.eq.s32.totalorder %v5700_v16, 5  ;;  %vm9724_vm5 = vcmp.eq.s32.totalorder %v5726_v31, 5 }
 0x22f   :  { %v1092_v12 = vsel %vm9722_vm11, %v1074_v25, 0.0  ;;  %v1096_v40 = vsel %vm9723_vm3, %v1074_v25, 0.0  ;;  %v1100_v50 = vsel %vm9724_vm5, %v1074_v25, 0.0  ;;  %vm1204_vm4 = vcmp.eq.s32.totalorder %v5696_v13, 7 }
 0x230   :  { %vm1208_vm7 = vcmp.eq.s32.totalorder %v5698_v15, 7  ;;  %v1104_v42 = vadd.f32 %v1084_v58, %v1028_v8  ;;  %v1108_v46 = vadd.f32 %v1088_v38, %v1032_v9  ;;  %v1112_v51 = vadd.f32 %v1092_v12, %v1036_v60 }
 0x231   :  { %v1116_v28 = vadd.f32 %v1096_v40, %v1040_v63  ;;  %vm1212_vm10 = vcmp.eq.s32.totalorder %v5700_v16, 7  ;;  %vm898_vm14 = vcmp.eq.s32.totalorder %v5870_v35, 3  ;;  %vm902_vm11 = vcmp.eq.s32.totalorder %v5872_v41, 3 }
 0x232   :  { %v706_v29 = vsel %vm670_vm9, %v702_v17, 0.0  ;;  %v710_v25 = vsel %vm674_vm13, %v702_v17, 0.0  ;;  %v782_v30 = vsel %vm746_vm2, %v778_v23, 0.0  ;;  %vm9725_vm5 = vcmp.eq.s32.totalorder %v5872_v41, 1 }
 0x233   :  { %v786_v8 = vsel %vm9725_vm5, %v778_v23, 0.0  ;;  %vm906_vm3 = vcmp.eq.s32.totalorder %v5878_v47, 3  ;;  %v1120_v9 = vadd.f32 %v1100_v50, %v1044_v21  ;;  %v1160_v60 = vsel %vm1124_vm8, %v1150_v11, 0.0 }
 0x234   :  { %v714_v63 = vsel %vm678_vm0, %v702_v17, 0.0  ;;  %vm9726_vm9 = vcmp.eq.s32.totalorder %v5878_v47, 1  ;;  %vm910_vm13 = vcmp.eq.s32.totalorder %v5880_v59, 3  ;;  %vm914_vm1 = vcmp.eq.s32.totalorder %v5894_v62, 3 }
 0x235   :  { %v790_v10 = vsel %vm9726_vm9, %v778_v23, 0.0  ;;  %vm9727_vm2 = vcmp.eq.s32.totalorder %v5880_v59, 0  ;;  %v722_v38 = vsel %vm686_vm6, %v702_v17, 0.0  ;;  %vm9728_vm5 = vcmp.eq.s32.totalorder %v5880_v59, 1 }
 0x236   :  { %v718_v58 = vsel %vm9727_vm2, %v702_v17, 0.0  ;;  %v794_v21 = vsel %vm9728_vm5, %v778_v23, 0.0  ;;  %vm9729_vm8 = vcmp.eq.s32.totalorder %v5894_v62, 1  ;;  %v1164_v40 = vsel %vm1128_vm12, %v1150_v11, 0.0 }
 0x237   :  { %v798_v12 = vsel %vm9729_vm8, %v778_v23, 0.0  ;;  %v1168_v50 = vsel %vm1132_vm15, %v1150_v11, 0.0  ;;  %v802_v0 = vadd.f32 %v782_v30, %v706_v29  ;;  %v806_v2 = vadd.f32 %v786_v8, %v710_v25 }
 0x238   :  { %vm9730_vm6 = vcmp.eq.s32.totalorder %v5700_v16, 6  ;;  %vm9731_vm2 = vcmp.eq.s32.totalorder %v5726_v31, 6  ;;  %v1180_v43 = vadd.f32 %v1160_v60, %v1104_v42  ;;  %v810_v23 = vadd.f32 %v790_v10, %v714_v63 }
 0x239   :  { %v1172_v17 = vsel %vm9730_vm6, %v1150_v11, 0.0  ;;  %v1176_v45 = vsel %vm9731_vm2, %v1150_v11, 0.0  ;;  %v1184_v61 = vadd.f32 %v1164_v40, %v1108_v46  ;;  %v1188_v34 = vadd.f32 %v1168_v50, %v1112_v51 }
 0x23a   :  { %v814_v20 = vadd.f32 %v794_v21, %v718_v58  ;;  %v818_v37 = vadd.f32 %v798_v12, %v722_v38  ;;  %v1192_v29 = vadd.f32 %v1172_v17, %v1116_v28  ;;  %vm9732_vm8 = vcmp.eq.s32.totalorder %v5870_v35, 2 }
 0x23b   :  { %v858_v25 = vsel %vm9732_vm8, %v854_v19, 0.0  ;;  %vm9733_vm6 = vcmp.eq.s32.totalorder %v5872_v41, 2  ;;  %v930_v11 = vrot.slane %v5946_v22, %v5335_v4  ;;  %v1196_v42 = vadd.f32 %v1176_v45, %v1120_v9 }
 0x23c   :  { %v862_v30 = vsel %vm9733_vm6, %v854_v19, 0.0  ;;  %vm9734_vm2 = vcmp.eq.s32.totalorder %v5878_v47, 2  ;;  %v878_v51 = vadd.f32 %v858_v25, %v802_v0  ;;  %vm1054_vm15 = vcmp.eq.s32.totalorder %v5872_v41, 5 }
 0x23d   :  { %v866_v46 = vsel %vm9734_vm2, %v854_v19, 0.0  ;;  %v882_v8 = vadd.f32 %v862_v30, %v806_v2  ;;  %vm1058_vm5 = vcmp.eq.s32.totalorder %v5878_v47, 5  ;;  %vm1062_vm8 = vcmp.eq.s32.totalorder %v5880_v59, 5 }
 0x23e   :  { %vm9735_vm6 = vcmp.eq.s32.totalorder %v5686_v7, 7  ;;  %vm9736_vm9 = vcmp.eq.s32.totalorder %v5880_v59, 2  ;;  %vm9737_vm0 = vcmp.eq.s32.totalorder %v5894_v62, 2  ;;  %v886_v0 = vadd.f32 %v866_v46, %v810_v23 }
 0x23f   :  { %v1236_v28 = vsel %vm9735_vm6, %v5972_v24, 0.0  ;;  %v870_v45 = vsel %vm9736_vm9, %v854_v19, 0.0  ;;  %v874_v9 = vsel %vm9737_vm0, %v854_v19, 0.0  ;;  %vm1066_vm2 = vcmp.eq.s32.totalorder %v5894_v62, 5 }
 0x240   :  { %vm1275_vm12 = vcmp.eq.s32.totalorder %v5471_v53, 8  ;;  %v1240_v2 = vsel %vm1204_vm4, %v5972_v24, 0.0  ;;  %v1244_v7 = vsel %vm1208_vm7, %v5972_v24, 0.0  ;;  %v890_v60 = vadd.f32 %v870_v45, %v814_v20 }
 0x241   :  { %v894_v63 = vadd.f32 %v874_v9, %v818_v37  ;;  %vm1279_vm9 = vcmp.eq.s32.totalorder %v5473_v54, 8  ;;  %vm1283_vm6 = vcmp.eq.s32.totalorder %v5475_v55, 8  ;;  %vm1287_vm0 = vcmp.eq.s32.totalorder %v5477_v56, 8 }
 0x242   :  { %v1248_v19 = vsel %vm1212_vm10, %v5972_v24, 0.0  ;;  %v934_v13 = vsel %vm898_vm14, %v930_v11, 0.0  ;;  %v938_v10 = vsel %vm902_vm11, %v930_v11, 0.0  ;;  %v1006_v15 = vrot.slane %v5946_v22, %v5530_v14 }
 0x243   :  { %vm1126_vm4 = vcmp.eq.s32.totalorder %v5870_v35, 6  ;;  %vm9738_vm7 = vcmp.eq.s32.totalorder %v5726_v31, 7  ;;  %v942_v20 = vsel %vm906_vm3, %v930_v11, 0.0  ;;  %v954_v16 = vadd.f32 %v934_v13, %v878_v51 }
 0x244   :  { %v1252_v37 = vsel %vm9738_vm7, %v5972_v24, 0.0  ;;  %v958_v58 = vadd.f32 %v938_v10, %v882_v8  ;;  %vm1130_vm10 = vcmp.eq.s32.totalorder %v5872_v41, 6  ;;  %v6078_v38 = vadd.f32 %v1236_v28, %v1180_v43 }
 0x245   :  { %v946_v21 = vsel %vm910_vm13, %v930_v11, 0.0  ;;  %v950_v31 = vsel %vm914_vm1, %v930_v11, 0.0  ;;  %v962_v24 = vadd.f32 %v942_v20, %v886_v0  ;;  %v6085_v12 = vadd.f32 %v1240_v2, %v1184_v61  ;;  %v6098_v11 = vpop.f32.mrf.mxu0 }
 0x246   :  { %v6087_v40 = vadd.f32 %v1244_v7, %v1188_v34  ;;  %v966_v50 = vadd.f32 %v946_v21, %v890_v60  ;;  %v970_v17 = vadd.f32 %v950_v31, %v894_v63  ;;  %v6090_v23 = vadd.f32 %v1248_v19, %v1192_v29 }
 0x247   :  { %vm9739_vm11 = vcmp.eq.s32.totalorder %v5870_v35, 4  ;;  %vm9740_vm13 = vcmp.eq.s32.totalorder %v5872_v41, 4  ;;  %v1082_v30 = vrot.slane %v5946_v22, %v5533_v18  ;;  %vm9741_vm7 = vcmp.eq.s32.totalorder %v5878_v47, 4 }
 0x248   :  { %v1010_v43 = vsel %vm9739_vm11, %v1006_v15, 0.0  ;;  %v1014_v25 = vsel %vm9740_vm13, %v1006_v15, 0.0  ;;  %v1018_v34 = vsel %vm9741_vm7, %v1006_v15, 0.0  ;;  %v1298_v29 = vrot.slane %v6098_v11, %v5338_v5 }
 0x249   :  { %v1030_v61 = vadd.f32 %v1010_v43, %v954_v16  ;;  %v1034_v46 = vadd.f32 %v1014_v25, %v958_v58  ;;  %vm1355_vm11 = vcmp.eq.s32.totalorder %v5473_v54, 9  ;;  %v6108_v51 = vadd.f32 %v1252_v37, %v1196_v42 }
 0x24a   :  { %vm9742_vm14 = vcmp.eq.s32.totalorder %v5880_v59, 4  ;;  %vm9743_vm1 = vcmp.eq.s32.totalorder %v5894_v62, 4  ;;  %v1038_v45 = vadd.f32 %v1018_v34, %v962_v24  ;;  %v1158_v2 = vrot.slane %v5946_v22, %v5566_v36 }
 0x24b   :  { %v1022_v8 = vsel %vm9742_vm14, %v1006_v15, 0.0  ;;  %v1026_v28 = vsel %vm9743_vm1, %v1006_v15, 0.0  ;;  %vm1202_vm7 = vcmp.eq.s32.totalorder %v5870_v35, 7  ;;  %v6121_v42 = vrot.slane %v5946_v22, %v5573_v39 }
 0x24c   :  { %v1042_v9 = vadd.f32 %v1022_v8, %v966_v50  ;;  %v1046_v0 = vadd.f32 %v1026_v28, %v970_v17  ;;  %vm1367_vm14 = vcmp.eq.s32.totalorder %v5479_v57, 9  ;;  %vm9744_vm1 = vcmp.eq.s32.totalorder %v5870_v35, 5  ;;  %v6152_v17 = vld [vmem:[#allocation2 + $0x80] sm:$0xf] }
 0x24d   :  { %v1086_v7 = vsel %vm9744_vm1, %v1082_v30, 0.0  ;;  %v1090_v60 = vsel %vm1054_vm15, %v1082_v30, 0.0  ;;  %v1094_v63 = vsel %vm1058_vm5, %v1082_v30, 0.0  ;;  %v1098_v19 = vsel %vm1062_vm8, %v1082_v30, 0.0  ;;  %9745 = vst [vmem:[#allocation16_spill] sm:$0xff] %v6152_v17 }
 0x24e   :  { %vm1214_vm13 = vcmp.eq.s32.totalorder %v5880_v59, 7  ;;  %vm1427_vm3 = vcmp.eq.s32.totalorder %v5471_v53, 10  ;;  %v1102_v22 = vsel %vm1066_vm2, %v1082_v30, 0.0  ;;  %v1106_v13 = vadd.f32 %v1086_v7, %v1030_v61  ;;  %v6162_v61 = vld [vmem:[#allocation2] sm:$0xff] }
 0x24f   :  { %v1110_v10 = vadd.f32 %v1090_v60, %v1034_v46  ;;  %v1311_v15 = vsel %vm1275_vm12, %v1298_v29, 0.0  ;;  %vm1431_vm15 = vcmp.eq.s32.totalorder %v5473_v54, 10  ;;  %vm1435_vm1 = vcmp.eq.s32.totalorder %v5475_v55, 10 }
 0x250   :  { %vm1439_vm5 = vcmp.eq.s32.totalorder %v5477_v56, 10  ;;  %v1114_v37 = vadd.f32 %v1094_v63, %v1038_v45  ;;  %vm1218_vm8 = vcmp.eq.s32.totalorder %v5894_v62, 7  ;;  %v1315_v20 = vsel %vm1279_vm9, %v1298_v29, 0.0 }
 0x251   :  { %v1319_v16 = vsel %vm1283_vm6, %v1298_v29, 0.0  ;;  %v1323_v58 = vsel %vm1287_vm0, %v1298_v29, 0.0  ;;  %v1118_v21 = vadd.f32 %v1098_v19, %v1042_v9  ;;  %v1122_v31 = vadd.f32 %v1102_v22, %v1046_v0  ;;  %v6170_v9 = vld [vmem:[#allocation2 + $0x20] sm:$0xff] }
 0x252   :  { %v1162_v24 = vsel %vm1126_vm4, %v1158_v2, 0.0  ;;  %v1374_v50 = vrot.slane %v6098_v11, %v5332_v3  ;;  %vm1443_vm12 = vcmp.eq.s32.totalorder %v6152_v17, 10  ;;  %v1166_v43 = vsel %vm1130_vm10, %v1158_v2, 0.0 }
 0x253   :  { %vm9746_vm2 = vcmp.eq.s32.totalorder %v5878_v47, 6  ;;  %vm9747_vm9 = vcmp.eq.s32.totalorder %v5479_v57, 8  ;;  %v1331_v34 = vadd.f32 %v1311_v15, %v5749_v44  ;;  %vm9748_vm0 = vcmp.eq.s32.totalorder %v5880_v59, 6  ;;  %v6176_v44 = vld [vmem:[#allocation2 + $0x60] sm:$0xff]  ;;  %v9755_v59 = vld [vmem:[#allocation9_spill] sm:$0xff] }
 0x254   :  { %v1170_v25 = vsel %vm9746_vm2, %v1158_v2, 0.0  ;;  %v1327_v30 = vsel %vm9747_vm9, %v1298_v29, 0.0  ;;  %v1174_v46 = vsel %vm9748_vm0, %v1158_v2, 0.0  ;;  %v1335_v8 = vadd.f32 %v1315_v20, %v5755_v48  ;;  %v6173_v29 = vld [vmem:[#allocation2 + $0x40] sm:$0xff] }
 0x255   :  { %v1339_v28 = vadd.f32 %v1319_v16, %v5757_v49  ;;  %v1343_v45 = vadd.f32 %v1323_v58, %v5759_v52  ;;  %vm9749_vm9 = vcmp.eq.s32.totalorder %v5894_v62, 6  ;;  %v1182_v48 = vadd.f32 %v1162_v24, %v1106_v13 }
 0x256   :  { %v1178_v0 = vsel %vm9749_vm9, %v1158_v2, 0.0  ;;  %v1186_v7 = vadd.f32 %v1166_v43, %v1110_v10  ;;  %v1190_v49 = vadd.f32 %v1170_v25, %v1114_v37  ;;  %v1194_v60 = vadd.f32 %v1174_v46, %v1118_v21 }
 0x257   :  { %v1347_v52 = vadd.f32 %v1327_v30, %v5761_v1  ;;  %vm9750_vm0 = vcmp.eq.s32.totalorder %v5471_v53, 9  ;;  %v1450_v19 = vrot.slane %v6098_v11, %v5341_v6  ;;  %v1391_v22 = vsel %vm1355_vm11, %v1374_v50, 0.0 }
 0x258   :  { %v1387_v63 = vsel %vm9750_vm0, %v1374_v50, 0.0  ;;  %vm9751_vm2 = vcmp.eq.s32.totalorder %v5475_v55, 9  ;;  %vm9752_vm9 = vcmp.eq.s32.totalorder %v5477_v56, 9  ;;  %vm1579_vm4 = vcmp.eq.s32.totalorder %v6162_v61, 12 }
 0x259   :  { %v1395_v2 = vsel %vm9751_vm2, %v1374_v50, 0.0  ;;  %v1399_v13 = vsel %vm9752_vm9, %v1374_v50, 0.0  ;;  %v1407_v10 = vadd.f32 %v1387_v63, %v1331_v34  ;;  %vm1583_vm6 = vcmp.eq.s32.totalorder %v6170_v9, 12  ;;  %v6261_v63 = vld [vmem:[#allocation2 + $0x50] sm:$0xff] }
 0x25a   :  { %vm1587_vm0 = vcmp.eq.s32.totalorder %v6173_v29, 12  ;;  %v1198_v1 = vadd.f32 %v1178_v0, %v1122_v31  ;;  %v1411_v15 = vadd.f32 %v1391_v22, %v1335_v8  ;;  %v1415_v37 = vadd.f32 %v1395_v2, %v1339_v28  ;;  %v6249_v0 = vld [vmem:[#allocation2 + $0x10] sm:$0xff] }
 0x25b   :  { %v1419_v20 = vadd.f32 %v1399_v13, %v1343_v45  ;;  %vm1591_vm10 = vcmp.eq.s32.totalorder %v6176_v44, 12  ;;  %v1238_v16 = vsel %vm1202_vm7, %v6121_v42, 0.0  ;;  %vm9753_vm2 = vcmp.eq.s32.totalorder %v5872_v41, 7  ;;  %v6267_v22 = vld [vmem:[#allocation2 + $0x90] sm:$0xf] }
 0x25c   :  { %v1242_v58 = vsel %vm9753_vm2, %v6121_v42, 0.0  ;;  %vm9754_vm9 = vcmp.eq.s32.totalorder %v5878_v47, 7  ;;  %v1403_v31 = vsel %vm1367_vm14, %v1374_v50, 0.0  ;;  %v1250_v24 = vsel %vm1214_vm13, %v6121_v42, 0.0 }
 0x25d   :  { %v1246_v21 = vsel %vm9754_vm9, %v6121_v42, 0.0  ;;  %v1423_v43 = vadd.f32 %v1403_v31, %v1347_v52  ;;  %v1463_v35 = vsel %vm1427_vm3, %v1450_v19, 0.0  ;;  %v1526_v25 = vrot.slane %v6098_v11, %v5335_v4 }
 0x25e   :  { %vm1277_vm7 = vcmp.eq.s32.totalorder %v5550_v26, 8  ;;  %vm1281_vm2 = vcmp.eq.s32.totalorder %v5552_v27, 8  ;;  %vm1285_vm9 = vcmp.eq.s32.totalorder %v5560_v32, 8  ;;  %vm1289_vm11 = vcmp.eq.s32.totalorder %v5562_v33, 8  ;;  %v9763_v26 = vld [vmem:[#allocation12_spill] sm:$0xff]  ;;  %v9764_v32 = vld [vmem:[#allocation13_spill] sm:$0xff] }
 0x25f   :  { %v1467_v57 = vsel %vm1431_vm15, %v1450_v19, 0.0  ;;  %v1471_v41 = vsel %vm1435_vm1, %v1450_v19, 0.0  ;;  %v1475_v53 = vsel %vm1439_vm5, %v1450_v19, 0.0  ;;  %v1483_v47 = vadd.f32 %v1463_v35, %v1407_v10 }
 0x260   :  { %vm1655_vm3 = vcmp.eq.s32.totalorder %v6162_v61, 13  ;;  %vm1293_vm13 = vcmp.eq.s32.totalorder %v9755_v59, 8  ;;  %v1254_v50 = vsel %vm1218_vm8, %v6121_v42, 0.0  ;;  %v1487_v30 = vadd.f32 %v1467_v57, %v1411_v15 }
 0x261   :  { %v1491_v34 = vadd.f32 %v1471_v41, %v1415_v37  ;;  %v1495_v46 = vadd.f32 %v1475_v53, %v1419_v20  ;;  %v6231_v54 = vadd.f32 %v1238_v16, %v1182_v48  ;;  %v6233_v8 = vadd.f32 %v1242_v58, %v1186_v7  ;;  %v6252_v48 = vld [vmem:[#allocation2 + $0x30] sm:$0xff] }
 0x262   :  { %v6235_v55 = vadd.f32 %v1246_v21, %v1190_v49  ;;  %v1479_v56 = vsel %vm1443_vm12, %v1450_v19, 0.0  ;;  %v6243_v62 = vadd.f32 %v1250_v24, %v1194_v60  ;;  %vm9756_vm8 = vcmp.eq.s32.totalorder %v6162_v61, 11  ;;  %v6264_v19 = vld [vmem:[#allocation2 + $0x70] sm:$0xff] }
 0x263   :  { %v1499_v42 = vadd.f32 %v1479_v56, %v1423_v43  ;;  %v1539_v28 = vsel %vm9756_vm8, %v1526_v25, 0.0  ;;  %v1602_v45 = vrot.slane %v6098_v11, %v5530_v14  ;;  %vm9757_vm1 = vcmp.eq.s32.totalorder %v6170_v9, 11  ;;  %v6291_v43 = vpop.f32.mrf.mxu1 }
 0x264   :  { %v1543_v7 = vsel %vm9757_vm1, %v1526_v25, 0.0  ;;  %vm9758_vm5 = vcmp.eq.s32.totalorder %v6173_v29, 11  ;;  %vm9759_vm14 = vcmp.eq.s32.totalorder %v6176_v44, 11  ;;  %v1559_v52 = vadd.f32 %v1539_v28, %v1483_v47 }
 0x265   :  { %v1547_v49 = vsel %vm9758_vm5, %v1526_v25, 0.0  ;;  %v1551_v60 = vsel %vm9759_vm14, %v1526_v25, 0.0  ;;  %vm1361_vm8 = vcmp.eq.s32.totalorder %v6261_v63, 9  ;;  %vm1365_vm12 = vcmp.eq.s32.totalorder %v6264_v19, 9 }
 0x266   :  { %v6270_v2 = vadd.f32 %v1254_v50, %v1198_v1  ;;  %v1563_v13 = vadd.f32 %v1543_v7, %v1487_v30  ;;  %v1567_v10 = vadd.f32 %v1547_v49, %v1491_v34  ;;  %v1571_v15 = vadd.f32 %v1551_v60, %v1495_v46  ;;  %v9762_v7 = vld [vmem:[#allocation11_spill] sm:$0xff] }
 0x267   :  { %vm9760_vm14 = vcmp.eq.s32.totalorder %v6152_v17, 11  ;;  %v1678_v20 = vrot.slane %v6098_v11, %v5533_v18  ;;  %v6278_v16 = vrot.slane %v6098_v11, %v5566_v36  ;;  %v6282_v58 = vrot.slane %v6098_v11, %v5573_v39 }
 0x268   :  { %v1555_v37 = vsel %vm9760_vm14, %v1526_v25, 0.0  ;;  %v1615_v1 = vsel %vm1579_vm4, %v1602_v45, 0.0  ;;  %v1619_v31 = vsel %vm1583_vm6, %v1602_v45, 0.0  ;;  %v1623_v24 = vsel %vm1587_vm0, %v1602_v45, 0.0 }
 0x269   :  { %v1575_v21 = vadd.f32 %v1555_v37, %v1499_v42  ;;  %vm1731_vm1 = vcmp.eq.s32.totalorder %v6162_v61, 14  ;;  %v1627_v11 = vsel %vm1591_vm10, %v1602_v45, 0.0  ;;  %vm9761_vm15 = vcmp.eq.s32.totalorder %v6152_v17, 12 }
 0x26a   :  { %v1631_v35 = vsel %vm9761_vm15, %v1602_v45, 0.0  ;;  %v1635_v25 = vadd.f32 %v1615_v1, %v1559_v52  ;;  %v1306_v57 = vrot.slane %v6291_v43, %v5338_v5  ;;  %vm1437_vm6 = vcmp.eq.s32.totalorder %v6261_v63, 10  ;;  %v9765_v52 = vld [vmem:[#allocation14_spill] sm:$0xff] }
 0x26b   :  { %vm1441_vm4 = vcmp.eq.s32.totalorder %v6264_v19, 10  ;;  %vm1445_vm0 = vcmp.eq.s32.totalorder %v6267_v22, 10  ;;  %v1639_v41 = vadd.f32 %v1619_v31, %v1563_v13  ;;  %v1643_v53 = vadd.f32 %v1623_v24, %v1567_v10  ;;  %v9766_v13 = vld [vmem:[#allocation15_spill] sm:$0xff] }
 0x26c   :  { %v1647_v47 = vadd.f32 %v1627_v11, %v1571_v15  ;;  %v1382_v50 = vrot.slane %v6291_v43, %v5332_v3  ;;  %vm1735_vm10 = vcmp.eq.s32.totalorder %v6170_v9, 14  ;;  %vm1739_vm15 = vcmp.eq.s32.totalorder %v6173_v29, 14 }
 0x26d   :  { %v1313_v30 = vsel %vm1277_vm7, %v1306_v57, 0.0  ;;  %v1317_v34 = vsel %vm1281_vm2, %v1306_v57, 0.0  ;;  %v1321_v46 = vsel %vm1285_vm9, %v1306_v57, 0.0  ;;  %v1325_v56 = vsel %vm1289_vm11, %v1306_v57, 0.0 }
 0x26e   :  { %v1651_v42 = vadd.f32 %v1631_v35, %v1575_v21  ;;  %v1691_v28 = vsel %vm1655_vm3, %v1678_v20, 0.0  ;;  %v1329_v45 = vsel %vm1293_vm13, %v1306_v57, 0.0  ;;  %v1333_v49 = vadd.f32 %v1313_v30, %v9762_v7 }
 0x26f   :  { %v1337_v27 = vadd.f32 %v1317_v34, %v9763_v26  ;;  %v1341_v60 = vadd.f32 %v1321_v46, %v9764_v32  ;;  %v1345_v33 = vadd.f32 %v1325_v56, %v9765_v52  ;;  %v1349_v10 = vadd.f32 %v1329_v45, %v9766_v13 }
 0x270   :  { %vm1513_vm11 = vcmp.eq.s32.totalorder %v6261_v63, 11  ;;  %vm1521_vm9 = vcmp.eq.s32.totalorder %v6267_v22, 11  ;;  %vm9767_vm3 = vcmp.eq.s32.totalorder %v6170_v9, 13  ;;  %vm9768_vm13 = vcmp.eq.s32.totalorder %v6173_v29, 13 }
 0x271   :  { %v1695_v59 = vsel %vm9767_vm3, %v1678_v20, 0.0  ;;  %v1699_v15 = vsel %vm9768_vm13, %v1678_v20, 0.0  ;;  %vm9769_vm5 = vcmp.eq.s32.totalorder %v6176_v44, 13  ;;  %vm9770_vm7 = vcmp.eq.s32.totalorder %v6152_v17, 13 }
 0x272   :  { %v1703_v37 = vsel %vm9769_vm5, %v1678_v20, 0.0  ;;  %v1707_v21 = vsel %vm9770_vm7, %v1678_v20, 0.0  ;;  %v1711_v1 = vadd.f32 %v1691_v28, %v1635_v25  ;;  %vm9771_vm14 = vcmp.eq.s32.totalorder %v6249_v0, 9 }
 0x273   :  { %v1389_v31 = vsel %vm9771_vm14, %v1382_v50, 0.0  ;;  %vm9772_vm2 = vcmp.eq.s32.totalorder %v6252_v48, 9  ;;  %v1458_v11 = vrot.slane %v6291_v43, %v5341_v6  ;;  %vm1807_vm3 = vcmp.eq.s32.totalorder %v6162_v61, 15 }
 0x274   :  { %v1393_v24 = vsel %vm9772_vm2, %v1382_v50, 0.0  ;;  %v1397_v35 = vsel %vm1361_vm8, %v1382_v50, 0.0  ;;  %v1401_v57 = vsel %vm1365_vm12, %v1382_v50, 0.0  ;;  %vm9773_vm5 = vcmp.eq.s32.totalorder %v6267_v22, 9 }
 0x275   :  { %v1405_v20 = vsel %vm9773_vm5, %v1382_v50, 0.0  ;;  %v1409_v25 = vadd.f32 %v1389_v31, %v1333_v49  ;;  %vm1581_vm14 = vcmp.eq.s32.totalorder %v6249_v0, 12  ;;  %v1413_v30 = vadd.f32 %v1393_v24, %v1337_v27 }
 0x276   :  { %v1417_v34 = vadd.f32 %v1397_v35, %v1341_v60  ;;  %v1421_v46 = vadd.f32 %v1401_v57, %v1345_v33  ;;  %v1425_v56 = vadd.f32 %v1405_v20, %v1349_v10  ;;  %v1715_v28 = vadd.f32 %v1695_v59, %v1639_v41 }
 0x277   :  { %v1719_v45 = vadd.f32 %v1699_v15, %v1643_v53  ;;  %v1723_v7 = vadd.f32 %v1703_v37, %v1647_v47  ;;  %v1727_v26 = vadd.f32 %v1707_v21, %v1651_v42  ;;  %v1767_v50 = vsel %vm1731_vm1, %v6278_v16, 0.0 }
 0x278   :  { %vm1811_vm12 = vcmp.eq.s32.totalorder %v6170_v9, 15  ;;  %vm1815_vm5 = vcmp.eq.s32.totalorder %v6173_v29, 15  ;;  %vm1819_vm7 = vcmp.eq.s32.totalorder %v6176_v44, 15  ;;  %vm9774_vm13 = vcmp.eq.s32.totalorder %v6249_v0, 10 }
 0x279   :  { %v1465_v49 = vsel %vm9774_vm13, %v1458_v11, 0.0  ;;  %vm9775_vm8 = vcmp.eq.s32.totalorder %v6252_v48, 10  ;;  %v1534_v53 = vrot.slane %v6291_v43, %v5335_v4  ;;  %v1473_v47 = vsel %vm1437_vm6, %v1458_v11, 0.0 }
 0x27a   :  { %v1469_v41 = vsel %vm9775_vm8, %v1458_v11, 0.0  ;;  %v1477_v42 = vsel %vm1441_vm4, %v1458_v11, 0.0  ;;  %v1481_v27 = vsel %vm1445_vm0, %v1458_v11, 0.0  ;;  %v1485_v32 = vadd.f32 %v1465_v49, %v1409_v25 }
 0x27b   :  { %vm1657_vm1 = vcmp.eq.s32.totalorder %v6249_v0, 13  ;;  %vm1661_vm13 = vcmp.eq.s32.totalorder %v6252_v48, 13  ;;  %v1489_v60 = vadd.f32 %v1469_v41, %v1413_v30  ;;  %v1493_v52 = vadd.f32 %v1473_v47, %v1417_v34 }
 0x27c   :  { %v1497_v33 = vadd.f32 %v1477_v42, %v1421_v46  ;;  %v1501_v13 = vadd.f32 %v1481_v27, %v1425_v56  ;;  %vm1665_vm8 = vcmp.eq.s32.totalorder %v6261_v63, 13  ;;  %v1771_v10 = vsel %vm1735_vm10, %v6278_v16, 0.0 }
 0x27d   :  { %v1775_v59 = vsel %vm1739_vm15, %v6278_v16, 0.0  ;;  %vm9776_vm4 = vcmp.eq.s32.totalorder %v6176_v44, 14  ;;  %vm9777_vm0 = vcmp.eq.s32.totalorder %v6152_v17, 14  ;;  %v1787_v21 = vadd.f32 %v1767_v50, %v1711_v1 }
 0x27e   :  { %v1779_v15 = vsel %vm9776_vm4, %v6278_v16, 0.0  ;;  %v1783_v37 = vsel %vm9777_vm0, %v6278_v16, 0.0  ;;  %vm9778_vm2 = vcmp.eq.s32.totalorder %v6249_v0, 11  ;;  %vm9779_vm6 = vcmp.eq.s32.totalorder %v6252_v48, 11 }
 0x27f   :  { %v1541_v31 = vsel %vm9778_vm2, %v1534_v53, 0.0  ;;  %v1545_v24 = vsel %vm9779_vm6, %v1534_v53, 0.0  ;;  %v1610_v11 = vrot.slane %v6291_v43, %v5530_v14  ;;  %v1549_v35 = vsel %vm1513_vm11, %v1534_v53, 0.0 }
 0x280   :  { %vm9780_vm10 = vcmp.eq.s32.totalorder %v6264_v19, 11  ;;  %v1557_v20 = vsel %vm1521_vm9, %v1534_v53, 0.0  ;;  %v1561_v16 = vadd.f32 %v1541_v31, %v1485_v32  ;;  %vm1733_vm15 = vcmp.eq.s32.totalorder %v6249_v0, 14 }
 0x281   :  { %v1553_v57 = vsel %vm9780_vm10, %v1534_v53, 0.0  ;;  %vm1737_vm2 = vcmp.eq.s32.totalorder %v6252_v48, 14  ;;  %vm1741_vm4 = vcmp.eq.s32.totalorder %v6261_v63, 14  ;;  %v1565_v1 = vadd.f32 %v1545_v24, %v1489_v60 }
 0x282   :  { %v1569_v25 = vadd.f32 %v1549_v35, %v1493_v52  ;;  %v1573_v30 = vadd.f32 %v1553_v57, %v1497_v33  ;;  %v1577_v34 = vadd.f32 %v1557_v20, %v1501_v13  ;;  %v1791_v46 = vadd.f32 %v1771_v10, %v1715_v28  ;;  %v6429_v33 = vld [vmem:[#allocation2 + $0x8] sm:$0xff] }
 0x283   :  { %v1795_v56 = vadd.f32 %v1775_v59, %v1719_v45  ;;  %v1799_v50 = vadd.f32 %v1779_v15, %v1723_v7  ;;  %v1803_v49 = vadd.f32 %v1783_v37, %v1727_v26  ;;  %v1843_v41 = vsel %vm1807_vm3, %v6282_v58, 0.0  ;;  %v6432_v13 = vld [vmem:[#allocation2 + $0x28] sm:$0xff] }
 0x284   :  { %v1617_v53 = vsel %vm1581_vm14, %v1610_v11, 0.0  ;;  %vm9781_vm9 = vcmp.eq.s32.totalorder %v6252_v48, 12  ;;  %v1686_v42 = vrot.slane %v6291_v43, %v5533_v18  ;;  %vm1809_vm0 = vcmp.eq.s32.totalorder %v6249_v0, 15  ;;  %v6435_v10 = vld [vmem:[#allocation2 + $0x48] sm:$0xff] }
 0x285   :  { %v1621_v47 = vsel %vm9781_vm9, %v1610_v11, 0.0  ;;  %vm1813_vm10 = vcmp.eq.s32.totalorder %v6252_v48, 15  ;;  %vm9782_vm6 = vcmp.eq.s32.totalorder %v6261_v63, 12  ;;  %vm9783_vm3 = vcmp.eq.s32.totalorder %v6264_v19, 12  ;;  %v6438_v59 = vld [vmem:[#allocation2 + $0x68] sm:$0xff] }
 0x286   :  { %v1625_v28 = vsel %vm9782_vm6, %v1610_v11, 0.0  ;;  %v1629_v45 = vsel %vm9783_vm3, %v1610_v11, 0.0  ;;  %vm9784_vm14 = vcmp.eq.s32.totalorder %v6267_v22, 12  ;;  %v1637_v26 = vadd.f32 %v1617_v53, %v1561_v16 }
 0x287   :  { %v1633_v7 = vsel %vm9784_vm14, %v1610_v11, 0.0  ;;  %v1641_v27 = vadd.f32 %v1621_v47, %v1565_v1  ;;  %v1645_v32 = vadd.f32 %v1625_v28, %v1569_v25  ;;  %v1649_v60 = vadd.f32 %v1629_v45, %v1573_v30  ;;  %v6453_v11 = vld [vmem:[#allocation2 + $0x88] sm:$0xf]  ;;  %v6472_v47 = vpop.f32.mrf.mxu0 }
 0x288   :  { %v1653_v52 = vadd.f32 %v1633_v7, %v1577_v34  ;;  %vm1276_vm9 = vcmp.eq.s32.totalorder %v6429_v33, 8  ;;  %vm1280_vm11 = vcmp.eq.s32.totalorder %v6432_v13, 8  ;;  %vm1284_vm6 = vcmp.eq.s32.totalorder %v6435_v10, 8 }
 0x289   :  { %v1847_v15 = vsel %vm1811_vm12, %v6282_v58, 0.0  ;;  %v1851_v37 = vsel %vm1815_vm5, %v6282_v58, 0.0  ;;  %v1855_v31 = vsel %vm1819_vm7, %v6282_v58, 0.0  ;;  %vm9785_vm14 = vcmp.eq.s32.totalorder %v6152_v17, 15 }
 0x28a   :  { %v1859_v24 = vsel %vm9785_vm14, %v6282_v58, 0.0  ;;  %vm1292_vm3 = vcmp.eq.s32.totalorder %v6453_v11, 8  ;;  %v6456_v35 = vadd.f32 %v1843_v41, %v1787_v21  ;;  %v1693_v57 = vsel %vm1657_vm1, %v1686_v42, 0.0 }
 0x28b   :  { %v1697_v20 = vsel %vm1661_vm13, %v1686_v42, 0.0  ;;  %v1762_v16 = vrot.slane %v6291_v43, %v5566_v36  ;;  %vm1821_vm7 = vcmp.eq.s32.totalorder %v6264_v19, 15  ;;  %v1701_v58 = vsel %vm1665_vm8, %v1686_v42, 0.0 }
 0x28c   :  { %9786 = vst [vmem:[#allocation9_spill] sm:$0xff] %v6456_v35  ;;  %vm9787_vm12 = vcmp.eq.s32.totalorder %v6264_v19, 13  ;;  %vm9788_vm5 = vcmp.eq.s32.totalorder %v6267_v22, 13  ;;  %v1713_v25 = vadd.f32 %v1693_v57, %v1637_v26  ;;  %vm1825_vm1 = vcmp.eq.s32.totalorder %v6267_v22, 15 }
 0x28d   :  { %v1705_v1 = vsel %vm9787_vm12, %v1686_v42, 0.0  ;;  %v1709_v21 = vsel %vm9788_vm5, %v1686_v42, 0.0  ;;  %v1717_v30 = vadd.f32 %v1697_v20, %v1641_v27  ;;  %v1721_v34 = vadd.f32 %v1701_v58, %v1645_v32 }
 0x28e   :  { %v1725_v41 = vadd.f32 %v1705_v1, %v1649_v60  ;;  %v1729_v53 = vadd.f32 %v1709_v21, %v1653_v52  ;;  %v6474_v28 = vadd.f32 %v1847_v15, %v1791_v46  ;;  %v6476_v45 = vadd.f32 %v1851_v37, %v1795_v56 }
 0x28f   :  { %v6478_v7 = vadd.f32 %v1855_v31, %v1799_v50  ;;  %v1838_v35 = vrot.slane %v6291_v43, %v5573_v39  ;;  %v6482_v17 = vadd.f32 %v1859_v24, %v1803_v49  ;;  %v1769_v42 = vsel %vm1733_vm15, %v1762_v16, 0.0 }
 0x290   :  { %v1773_v26 = vsel %vm1737_vm2, %v1762_v16, 0.0  ;;  %v1777_v27 = vsel %vm1741_vm4, %v1762_v16, 0.0  ;;  %vm9789_vm13 = vcmp.eq.s32.totalorder %v6264_v19, 14  ;;  %vm9790_vm8 = vcmp.eq.s32.totalorder %v6267_v22, 14 }
 0x291   :  { %v1781_v46 = vsel %vm9789_vm13, %v1762_v16, 0.0  ;;  %v1785_v56 = vsel %vm9790_vm8, %v1762_v16, 0.0  ;;  %v1789_v50 = vadd.f32 %v1769_v42, %v1713_v25  ;;  %v1302_v43 = vrot.slane %v6472_v47, %v5338_v5 }
 0x292   :  { %v1793_v49 = vadd.f32 %v1773_v26, %v1717_v30  ;;  %v1797_v32 = vadd.f32 %v1777_v27, %v1721_v34  ;;  %v6496_v60 = vadd.f32 %v1781_v46, %v1725_v41  ;;  %v6498_v52 = vadd.f32 %v1785_v56, %v1729_v53 }
 0x293   :  { %v1845_v15 = vsel %vm1809_vm0, %v1838_v35, 0.0  ;;  %v1849_v37 = vsel %vm1813_vm10, %v1838_v35, 0.0  ;;  %vm9791_vm15 = vcmp.eq.s32.totalorder %v6261_v63, 15  ;;  %vm1352_vm2 = vcmp.eq.s32.totalorder %v6429_v33, 9 }
 0x294   :  { %v1853_v31 = vsel %vm9791_vm15, %v1838_v35, 0.0  ;;  %vm1356_vm4 = vcmp.eq.s32.totalorder %v6432_v13, 9  ;;  %vm1360_vm14 = vcmp.eq.s32.totalorder %v6435_v10, 9  ;;  %vm1364_vm12 = vcmp.eq.s32.totalorder %v6438_v59, 9 }
 0x295   :  { %v1378_v24 = vrot.slane %v6472_v47, %v5332_v3  ;;  %v1312_v0 = vsel %vm1276_vm9, %v1302_v43, 0.0  ;;  %v1316_v48 = vsel %vm1280_vm11, %v1302_v43, 0.0  ;;  %v1320_v63 = vsel %vm1284_vm6, %v1302_v43, 0.0 }
 0x296   :  { %vm9792_vm0 = vcmp.eq.s32.totalorder %v6438_v59, 8  ;;  %v1328_v20 = vsel %vm1292_vm3, %v1302_v43, 0.0  ;;  %v1332_v16 = vadd.f32 %v1312_v0, %v6078_v38  ;;  %v1336_v58 = vadd.f32 %v1316_v48, %v6085_v12 }
 0x297   :  { %v1324_v57 = vsel %vm9792_vm0, %v1302_v43, 0.0  ;;  %v1340_v1 = vadd.f32 %v1320_v63, %v6087_v40  ;;  %v6527_v21 = vsel %vm1821_vm7, %v1838_v35, 0.0  ;;  %v1348_v30 = vadd.f32 %v1328_v20, %v6108_v51 }
 0x298   :  { %v1344_v25 = vadd.f32 %v1324_v57, %v6090_v23  ;;  %vm1368_vm11 = vcmp.eq.s32.totalorder %v6453_v11, 9  ;;  %v6534_v34 = vsel %vm1825_vm1, %v1838_v35, 0.0  ;;  %v6536_v41 = vadd.f32 %v1845_v15, %v1789_v50 }
 0x299   :  { %v1388_v38 = vsel %vm1352_vm2, %v1378_v24, 0.0  ;;  %vm1428_vm10 = vcmp.eq.s32.totalorder %v6429_v33, 10  ;;  %v1392_v12 = vsel %vm1356_vm4, %v1378_v24, 0.0  ;;  %v1396_v40 = vsel %vm1360_vm14, %v1378_v24, 0.0 }
 0x29a   :  { %v1400_v23 = vsel %vm1364_vm12, %v1378_v24, 0.0  ;;  %v1454_v51 = vrot.slane %v6472_v47, %v5341_v6  ;;  %v1404_v19 = vsel %vm1368_vm11, %v1378_v24, 0.0  ;;  %v1408_v22 = vadd.f32 %v1388_v38, %v1332_v16 }
 0x29b   :  { %v1412_v35 = vadd.f32 %v1392_v12, %v1336_v58  ;;  %v1416_v53 = vadd.f32 %v1396_v40, %v1340_v1  ;;  %v1420_v42 = vadd.f32 %v1400_v23, %v1344_v25  ;;  %v1424_v26 = vadd.f32 %v1404_v19, %v1348_v30 }
 0x29c   :  { %vm1432_vm9 = vcmp.eq.s32.totalorder %v6432_v13, 10  ;;  %vm1436_vm6 = vcmp.eq.s32.totalorder %v6435_v10, 10  ;;  %vm1440_vm3 = vcmp.eq.s32.totalorder %v6438_v59, 10  ;;  %vm1444_vm7 = vcmp.eq.s32.totalorder %v6453_v11, 10 }
 0x29d   :  { %vm1504_vm5 = vcmp.eq.s32.totalorder %v6429_v33, 11  ;;  %vm1508_vm1 = vcmp.eq.s32.totalorder %v6432_v13, 11  ;;  %v1464_v27 = vsel %vm1428_vm10, %v1454_v51, 0.0  ;;  %vm1512_vm13 = vcmp.eq.s32.totalorder %v6435_v10, 11 }
 0x29e   :  { %vm1516_vm8 = vcmp.eq.s32.totalorder %v6438_v59, 11  ;;  %v1530_v46 = vrot.slane %v6472_v47, %v5335_v4  ;;  %v1468_v56 = vsel %vm1432_vm9, %v1454_v51, 0.0  ;;  %v1472_v50 = vsel %vm1436_vm6, %v1454_v51, 0.0 }
 0x29f   :  { %v1484_v43 = vadd.f32 %v1464_v27, %v1408_v22  ;;  %vm1520_vm15 = vcmp.eq.s32.totalorder %v6453_v11, 11  ;;  %v1476_v15 = vsel %vm1440_vm3, %v1454_v51, 0.0  ;;  %v1480_v24 = vsel %vm1444_vm7, %v1454_v51, 0.0 }
 0x2a0   :  { %v1488_v0 = vadd.f32 %v1468_v56, %v1412_v35  ;;  %v1492_v48 = vadd.f32 %v1472_v50, %v1416_v53  ;;  %v6562_v63 = vadd.f32 %v1849_v37, %v1793_v49  ;;  %v6564_v57 = vadd.f32 %v1853_v31, %v1797_v32 }
 0x2a1   :  { %v1496_v20 = vadd.f32 %v1476_v15, %v1420_v42  ;;  %v1500_v16 = vadd.f32 %v1480_v24, %v1424_v26  ;;  %v1540_v58 = vsel %vm1504_vm5, %v1530_v46, 0.0  ;;  %v1544_v1 = vsel %vm1508_vm1, %v1530_v46, 0.0 }
 0x2a2   :  { %v1548_v25 = vsel %vm1512_vm13, %v1530_v46, 0.0  ;;  %vm1580_vm2 = vcmp.eq.s32.totalorder %v6429_v33, 12  ;;  %v1552_v30 = vsel %vm1516_vm8, %v1530_v46, 0.0  ;;  %v1556_v49 = vsel %vm1520_vm15, %v1530_v46, 0.0 }
 0x2a3   :  { %v1560_v37 = vadd.f32 %v1540_v58, %v1484_v43  ;;  %v1606_v32 = vrot.slane %v6472_v47, %v5530_v14  ;;  %v1564_v31 = vadd.f32 %v1544_v1, %v1488_v0  ;;  %v1568_v38 = vadd.f32 %v1548_v25, %v1492_v48  ;;  %v6610_v58 = vpop.f32.mrf.mxu1 }
 0x2a4   :  { %vm1584_vm4 = vcmp.eq.s32.totalorder %v6432_v13, 12  ;;  %vm1588_vm14 = vcmp.eq.s32.totalorder %v6435_v10, 12  ;;  %v1572_v12 = vadd.f32 %v1552_v30, %v1496_v20  ;;  %v1576_v40 = vadd.f32 %v1556_v49, %v1500_v16  ;;  %v6622_v49 = vld [vmem:[#allocation2 + $0x18] sm:$0xff] }
 0x2a5   :  { %vm1592_vm12 = vcmp.eq.s32.totalorder %v6438_v59, 12  ;;  %vm1596_vm0 = vcmp.eq.s32.totalorder %v6453_v11, 12  ;;  %vm1656_vm11 = vcmp.eq.s32.totalorder %v6429_v33, 13  ;;  %vm1660_vm10 = vcmp.eq.s32.totalorder %v6432_v13, 13 }
 0x2a6   :  { %vm1664_vm9 = vcmp.eq.s32.totalorder %v6435_v10, 13  ;;  %v1682_v23 = vrot.slane %v6472_v47, %v5533_v18  ;;  %v1616_v51 = vsel %vm1580_vm2, %v1606_v32, 0.0  ;;  %v1620_v19 = vsel %vm1584_vm4, %v1606_v32, 0.0 }
 0x2a7   :  { %v1624_v22 = vsel %vm1588_vm14, %v1606_v32, 0.0  ;;  %vm1668_vm6 = vcmp.eq.s32.totalorder %v6438_v59, 13  ;;  %v1628_v35 = vsel %vm1592_vm12, %v1606_v32, 0.0  ;;  %v1636_v53 = vadd.f32 %v1616_v51, %v1560_v37 }
 0x2a8   :  { %v1640_v42 = vadd.f32 %v1620_v19, %v1564_v31  ;;  %v1644_v26 = vadd.f32 %v1624_v22, %v1568_v38  ;;  %v6591_v27 = vadd.f32 %v6527_v21, %v6496_v60  ;;  %v1632_v46 = vsel %vm1596_vm0, %v1606_v32, 0.0  ;;  %v6633_v19 = vld [vmem:[#allocation2 + $0x38] sm:$0xff] }
 0x2a9   :  { %v1648_v56 = vadd.f32 %v1628_v35, %v1572_v12  ;;  %vm1672_vm3 = vcmp.eq.s32.totalorder %v6453_v11, 13  ;;  %v6596_v50 = vadd.f32 %v6534_v34, %v6498_v52  ;;  %v1652_v43 = vadd.f32 %v1632_v46, %v1576_v40  ;;  %v6639_v22 = vld [vmem:[#allocation2 + $0x78] sm:$0xff] }
 0x2aa   :  { %v1692_v15 = vsel %vm1656_vm11, %v1682_v23, 0.0  ;;  %vm1732_vm7 = vcmp.eq.s32.totalorder %v6429_v33, 14  ;;  %v1696_v24 = vsel %vm1660_vm10, %v1682_v23, 0.0  ;;  %v1700_v60 = vsel %vm1664_vm9, %v1682_v23, 0.0  ;;  %v6642_v35 = vld [vmem:[#allocation2 + $0x98] sm:$0xf] }
 0x2ab   :  { %v1704_v21 = vsel %vm1668_vm6, %v1682_v23, 0.0  ;;  %v1758_v0 = vrot.slane %v6472_v47, %v5566_v36  ;;  %v1708_v48 = vsel %vm1672_vm3, %v1682_v23, 0.0  ;;  %v1712_v20 = vadd.f32 %v1692_v15, %v1636_v53 }
 0x2ac   :  { %v1716_v52 = vadd.f32 %v1696_v24, %v1640_v42  ;;  %v1720_v34 = vadd.f32 %v1700_v60, %v1644_v26  ;;  %v1724_v16 = vadd.f32 %v1704_v21, %v1648_v56  ;;  %vm1736_vm5 = vcmp.eq.s32.totalorder %v6432_v13, 14 }
 0x2ad   :  { %vm1740_vm1 = vcmp.eq.s32.totalorder %v6435_v10, 14  ;;  %vm1744_vm13 = vcmp.eq.s32.totalorder %v6438_v59, 14  ;;  %v1728_v1 = vadd.f32 %v1708_v48, %v1652_v43  ;;  %vm1748_vm8 = vcmp.eq.s32.totalorder %v6453_v11, 14 }
 0x2ae   :  { %vm1808_vm15 = vcmp.eq.s32.totalorder %v6429_v33, 15  ;;  %vm1812_vm2 = vcmp.eq.s32.totalorder %v6432_v13, 15  ;;  %v1768_v25 = vsel %vm1732_vm7, %v1758_v0, 0.0  ;;  %vm1816_vm4 = vcmp.eq.s32.totalorder %v6435_v10, 15 }
 0x2af   :  { %v6620_v30 = vrot.slane %v6472_v47, %v5573_v39  ;;  %vm1278_vm14 = vcmp.eq.s32.totalorder %v6622_v49, 8  ;;  %v1772_v37 = vsel %vm1736_vm5, %v1758_v0, 0.0  ;;  %v1776_v32 = vsel %vm1740_vm1, %v1758_v0, 0.0  ;;  %v6636_v47 = vld [vmem:[#allocation2 + $0x58] sm:$0xff] }
 0x2b0   :  { %v1780_v31 = vsel %vm1744_vm13, %v1758_v0, 0.0  ;;  %v1310_v38 = vrot.slane %v6610_v58, %v5338_v5  ;;  %v1784_v12 = vsel %vm1748_vm8, %v1758_v0, 0.0  ;;  %v6627_v40 = vadd.f32 %v1768_v25, %v1712_v20 }
 0x2b1   :  { %v6629_v23 = vadd.f32 %v1772_v37, %v1716_v52  ;;  %v6631_v51 = vadd.f32 %v1776_v32, %v1720_v34  ;;  %vm1282_vm12 = vcmp.eq.s32.totalorder %v6633_v19, 8  ;;  %vm1286_vm0 = vcmp.eq.s32.totalorder %v6636_v47, 8 }
 0x2b2   :  { %vm1290_vm11 = vcmp.eq.s32.totalorder %v6639_v22, 8  ;;  %vm1294_vm10 = vcmp.eq.s32.totalorder %v6642_v35, 8  ;;  %v6645_v53 = vadd.f32 %v1780_v31, %v1724_v16  ;;  %vm1354_vm9 = vcmp.eq.s32.totalorder %v6622_v49, 9 }
 0x2b3   :  { %vm1358_vm6 = vcmp.eq.s32.totalorder %v6633_v19, 9  ;;  %vm1362_vm3 = vcmp.eq.s32.totalorder %v6636_v47, 9  ;;  %v1314_v42 = vsel %vm1278_vm14, %v1310_v38, 0.0  ;;  %vm1366_vm7 = vcmp.eq.s32.totalorder %v6639_v22, 9 }
 0x2b4   :  { %vm1370_vm5 = vcmp.eq.s32.totalorder %v6642_v35, 9  ;;  %v1386_v26 = vrot.slane %v6610_v58, %v5332_v3  ;;  %vm1820_vm1 = vcmp.eq.s32.totalorder %v6438_v59, 15  ;;  %vm1824_vm13 = vcmp.eq.s32.totalorder %v6453_v11, 15 }
 0x2b5   :  { %v1318_v46 = vsel %vm1282_vm12, %v1310_v38, 0.0  ;;  %v1322_v56 = vsel %vm1286_vm0, %v1310_v38, 0.0  ;;  %v1326_v43 = vsel %vm1290_vm11, %v1310_v38, 0.0  ;;  %v1330_v15 = vsel %vm1294_vm10, %v1310_v38, 0.0 }
 0x2b6   :  { %v1334_v24 = vadd.f32 %v1314_v42, %v6231_v54  ;;  %v1338_v60 = vadd.f32 %v1318_v46, %v6233_v8  ;;  %v1342_v21 = vadd.f32 %v1322_v56, %v6235_v55  ;;  %v1346_v0 = vadd.f32 %v1326_v43, %v6243_v62 }
 0x2b7   :  { %v6666_v48 = vadd.f32 %v1784_v12, %v1728_v1  ;;  %v1844_v20 = vsel %vm1808_vm15, %v6620_v30, 0.0  ;;  %v6674_v52 = vsel %vm1812_vm2, %v6620_v30, 0.0  ;;  %v1350_v34 = vadd.f32 %v1330_v15, %v6270_v2 }
 0x2b8   :  { %v6680_v54 = vsel %vm1816_vm4, %v6620_v30, 0.0  ;;  %v1390_v8 = vsel %vm1354_vm9, %v1386_v26, 0.0  ;;  %v1394_v55 = vsel %vm1358_vm6, %v1386_v26, 0.0  ;;  %vm1430_vm8 = vcmp.eq.s32.totalorder %v6622_v49, 10 }
 0x2b9   :  { %v1398_v62 = vsel %vm1362_vm3, %v1386_v26, 0.0  ;;  %v1402_v33 = vsel %vm1366_vm7, %v1386_v26, 0.0  ;;  %v1406_v2 = vsel %vm1370_vm5, %v1386_v26, 0.0  ;;  %v1462_v13 = vrot.slane %v6610_v58, %v5341_v6 }
 0x2ba   :  { %v1410_v10 = vadd.f32 %v1390_v8, %v1334_v24  ;;  %v1414_v16 = vadd.f32 %v1394_v55, %v1338_v60  ;;  %v1418_v1 = vadd.f32 %v1398_v62, %v1342_v21  ;;  %v1422_v25 = vadd.f32 %v1402_v33, %v1346_v0 }
 0x2bb   :  { %v1426_v37 = vadd.f32 %v1406_v2, %v1350_v34  ;;  %vm1434_vm15 = vcmp.eq.s32.totalorder %v6633_v19, 10  ;;  %vm1438_vm2 = vcmp.eq.s32.totalorder %v6636_v47, 10  ;;  %vm1442_vm4 = vcmp.eq.s32.totalorder %v6639_v22, 10 }
 0x2bc   :  { %vm1446_vm14 = vcmp.eq.s32.totalorder %v6642_v35, 10  ;;  %vm1506_vm12 = vcmp.eq.s32.totalorder %v6622_v49, 11  ;;  %vm1510_vm0 = vcmp.eq.s32.totalorder %v6633_v19, 11  ;;  %vm1514_vm11 = vcmp.eq.s32.totalorder %v6636_v47, 11 }
 0x2bd   :  { %v1466_v32 = vsel %vm1430_vm8, %v1462_v13, 0.0  ;;  %vm1518_vm10 = vcmp.eq.s32.totalorder %v6639_v22, 11  ;;  %vm1522_vm9 = vcmp.eq.s32.totalorder %v6642_v35, 11  ;;  %v1538_v31 = vrot.slane %v6610_v58, %v5335_v4 }
 0x2be   :  { %v1470_v38 = vsel %vm1434_vm15, %v1462_v13, 0.0  ;;  %v1474_v12 = vsel %vm1438_vm2, %v1462_v13, 0.0  ;;  %v1478_v42 = vsel %vm1442_vm4, %v1462_v13, 0.0  ;;  %v1486_v26 = vadd.f32 %v1466_v32, %v1410_v10 }
 0x2bf   :  { %v1482_v46 = vsel %vm1446_vm14, %v1462_v13, 0.0  ;;  %v1490_v56 = vadd.f32 %v1470_v38, %v1414_v16  ;;  %v1494_v43 = vadd.f32 %v1474_v12, %v1418_v1  ;;  %v1498_v15 = vadd.f32 %v1478_v42, %v1422_v25 }
 0x2c0   :  { %v1856_v24 = vsel %vm1820_vm1, %v6620_v30, 0.0  ;;  %v1860_v60 = vsel %vm1824_vm13, %v6620_v30, 0.0  ;;  %v6715_v21 = vadd.f32 %v1844_v20, %v6627_v40  ;;  %v1502_v0 = vadd.f32 %v1482_v46, %v1426_v37 }
 0x2c1   :  { %v1542_v34 = vsel %vm1506_vm12, %v1538_v31, 0.0  ;;  %v1546_v8 = vsel %vm1510_vm0, %v1538_v31, 0.0  ;;  %v1550_v55 = vsel %vm1514_vm11, %v1538_v31, 0.0  ;;  %vm1582_vm6 = vcmp.eq.s32.totalorder %v6622_v49, 12 }
 0x2c2   :  { %v1554_v59 = vsel %vm1518_vm10, %v1538_v31, 0.0  ;;  %v1558_v11 = vsel %vm1522_vm9, %v1538_v31, 0.0  ;;  %v1562_v30 = vadd.f32 %v1542_v34, %v1486_v26  ;;  %v1614_v40 = vrot.slane %v6610_v58, %v5530_v14 }
 0x2c3   :  { %v1566_v20 = vadd.f32 %v1546_v8, %v1490_v56  ;;  %v1570_v62 = vadd.f32 %v1550_v55, %v1494_v43  ;;  %v1574_v33 = vadd.f32 %v1554_v59, %v1498_v15  ;;  %vm1586_vm3 = vcmp.eq.s32.totalorder %v6633_v19, 12  ;;  %v6774_v8 = vpop.f32.mrf.mxu0 }
 0x2c4   :  { %v1578_v2 = vadd.f32 %v1558_v11, %v1502_v0  ;;  %vm1590_vm7 = vcmp.eq.s32.totalorder %v6636_v47, 12  ;;  %vm1594_vm5 = vcmp.eq.s32.totalorder %v6639_v22, 12  ;;  %vm1598_vm1 = vcmp.eq.s32.totalorder %v6642_v35, 12 }
 0x2c5   :  { %vm1658_vm13 = vcmp.eq.s32.totalorder %v6622_v49, 13  ;;  %vm1662_vm8 = vcmp.eq.s32.totalorder %v6633_v19, 13  ;;  %vm1666_vm15 = vcmp.eq.s32.totalorder %v6636_v47, 13  ;;  %vm1670_vm2 = vcmp.eq.s32.totalorder %v6639_v22, 13 }
 0x2c6   :  { %v1618_v13 = vsel %vm1582_vm6, %v1614_v40, 0.0  ;;  %v1622_v10 = vsel %vm1586_vm3, %v1614_v40, 0.0  ;;  %vm1674_vm4 = vcmp.eq.s32.totalorder %v6642_v35, 13  ;;  %v1690_v16 = vrot.slane %v6610_v58, %v5533_v18 }
 0x2c7   :  { %v1626_v1 = vsel %vm1590_vm7, %v1614_v40, 0.0  ;;  %v1630_v25 = vsel %vm1594_vm5, %v1614_v40, 0.0  ;;  %v1634_v37 = vsel %vm1598_vm1, %v1614_v40, 0.0  ;;  %v1638_v32 = vadd.f32 %v1618_v13, %v1562_v30 }
 0x2c8   :  { %v1642_v31 = vadd.f32 %v1622_v10, %v1566_v20  ;;  %v1646_v38 = vadd.f32 %v1626_v1, %v1570_v62  ;;  %v1650_v12 = vadd.f32 %v1630_v25, %v1574_v33  ;;  %v1654_v42 = vadd.f32 %v1634_v37, %v1578_v2  ;;  %v9793_v2 = vld [vmem:[#allocation16_spill] sm:$0xff] }
 0x2c9   :  { %v6745_v26 = vadd.f32 %v6674_v52, %v6629_v23  ;;  %v6749_v46 = vadd.f32 %v6680_v54, %v6631_v51  ;;  %v6752_v56 = vadd.f32 %v1856_v24, %v6645_v53  ;;  %v6755_v43 = vadd.f32 %v1860_v60, %v6666_v48 }
 0x2ca   :  { %v1694_v15 = vsel %vm1658_vm13, %v1690_v16, 0.0  ;;  %v1698_v0 = vsel %vm1662_vm8, %v1690_v16, 0.0  ;;  %v1702_v23 = vsel %vm1666_vm15, %v1690_v16, 0.0  ;;  %vm1734_vm14 = vcmp.eq.s32.totalorder %v6622_v49, 14 }
 0x2cb   :  { %v1706_v51 = vsel %vm1670_vm2, %v1690_v16, 0.0  ;;  %v1710_v53 = vsel %vm1674_vm4, %v1690_v16, 0.0  ;;  %v1714_v52 = vadd.f32 %v1694_v15, %v1638_v32  ;;  %v1766_v48 = vrot.slane %v6610_v58, %v5566_v36 }
 0x2cc   :  { %v1718_v54 = vadd.f32 %v1698_v0, %v1642_v31  ;;  %v1722_v24 = vadd.f32 %v1702_v23, %v1646_v38  ;;  %v1726_v60 = vadd.f32 %v1706_v51, %v1650_v12  ;;  %v1730_v34 = vadd.f32 %v1710_v53, %v1654_v42  ;;  %v9794_v12 = vld [vmem:[#allocation9_spill] sm:$0xff]  ;;  %v6817_v53 = vld [vmem:[#allocation2 + $0x80] sm:$0xf] }
 0x2cd   :  { %vm1738_vm12 = vcmp.eq.s32.totalorder %v6633_v19, 14  ;;  %vm1742_vm0 = vcmp.eq.s32.totalorder %v6636_v47, 14  ;;  %vm1746_vm11 = vcmp.eq.s32.totalorder %v6639_v22, 14  ;;  %vm1750_vm10 = vcmp.eq.s32.totalorder %v6642_v35, 14 }
 0x2ce   :  { %vm1810_vm9 = vcmp.eq.s32.totalorder %v6622_v49, 15  ;;  %vm1814_vm6 = vcmp.eq.s32.totalorder %v6633_v19, 15  ;;  %vm1818_vm3 = vcmp.eq.s32.totalorder %v6636_v47, 15  ;;  %v1906_v55 = vrot.slane %v6774_v8, %v5338_v5  ;;  %v6831_v49 = vld [vmem:[#allocation2] sm:$0xff] }
 0x2cf   :  { %v1770_v59 = vsel %vm1734_vm14, %v1766_v48, 0.0  ;;  %v6785_v11 = vrot.slane %v6610_v58, %v5573_v39  ;;  %vm1883_vm7 = vcmp.eq.s32.totalorder %v6162_v61, 16  ;;  %vm1887_vm5 = vcmp.eq.s32.totalorder %v6170_v9, 16 }
 0x2d0   :  { %v1774_v30 = vsel %vm1738_vm12, %v1766_v48, 0.0  ;;  %v1778_v40 = vsel %vm1742_vm0, %v1766_v48, 0.0  ;;  %vm1891_vm1 = vcmp.eq.s32.totalorder %v6173_v29, 16  ;;  %vm1895_vm13 = vcmp.eq.s32.totalorder %v6176_v44, 16 }
 0x2d1   :  { %v1782_v20 = vsel %vm1746_vm11, %v1766_v48, 0.0  ;;  %v1786_v62 = vsel %vm1750_vm10, %v1766_v48, 0.0  ;;  %v6791_v33 = vadd.f32 %v1770_v59, %v1714_v52  ;;  %vm1899_vm8 = vcmp.eq.s32.totalorder %v9793_v2, 16 }
 0x2d2   :  { %v6794_v13 = vadd.f32 %v1774_v30, %v1718_v54  ;;  %v6796_v58 = vadd.f32 %v1778_v40, %v1722_v24  ;;  %v1919_v10 = vsel %vm1883_vm7, %v1906_v55, 0.0  ;;  %v1923_v16 = vsel %vm1887_vm5, %v1906_v55, 0.0 }
 0x2d3   :  { %v6798_v1 = vadd.f32 %v1782_v20, %v1726_v60  ;;  %v6800_v25 = vadd.f32 %v1786_v62, %v1730_v34  ;;  %v1927_v37 = vsel %vm1891_vm1, %v1906_v55, 0.0  ;;  %v1931_v32 = vsel %vm1895_vm13, %v1906_v55, 0.0  ;;  %v6840_v34 = vld [vmem:[#allocation2 + $0x20] sm:$0xff] }
 0x2d4   :  { %vm1822_vm15 = vcmp.eq.s32.totalorder %v6639_v22, 15  ;;  %vm1826_vm2 = vcmp.eq.s32.totalorder %v6642_v35, 15  ;;  %v1935_v31 = vsel %vm1899_vm8, %v1906_v55, 0.0  ;;  %vm1959_vm4 = vcmp.eq.s32.totalorder %v6162_v61, 17  ;;  %v6843_v55 = vld [vmem:[#allocation2 + $0x40] sm:$0xff] }
 0x2d5   :  { %vm1963_vm14 = vcmp.eq.s32.totalorder %v6170_v9, 17  ;;  %v1982_v38 = vrot.slane %v6774_v8, %v5332_v3  ;;  %v1939_v42 = vadd.f32 %v1919_v10, %v9794_v12  ;;  %v1943_v15 = vadd.f32 %v1923_v16, %v6474_v28  ;;  %v6846_v9 = vld [vmem:[#allocation2 + $0x60] sm:$0xff] }
 0x2d6   :  { %vm1967_vm12 = vcmp.eq.s32.totalorder %v6173_v29, 17  ;;  %vm1971_vm0 = vcmp.eq.s32.totalorder %v6176_v44, 17  ;;  %v1846_v0 = vsel %vm1810_vm9, %v6785_v11, 0.0  ;;  %v1947_v23 = vadd.f32 %v1927_v37, %v6476_v45 }
 0x2d7   :  { %v1951_v51 = vadd.f32 %v1931_v32, %v6478_v7  ;;  %vm1975_vm11 = vcmp.eq.s32.totalorder %v6817_v53, 17  ;;  %v6823_v28 = vsel %vm1814_vm6, %v6785_v11, 0.0  ;;  %v6828_v29 = vsel %vm1818_vm3, %v6785_v11, 0.0 }
 0x2d8   :  { %v1955_v44 = vadd.f32 %v1935_v31, %v6482_v17  ;;  %vm2035_vm10 = vcmp.eq.s32.totalorder %v6831_v49, 18  ;;  %v1995_v45 = vsel %vm1959_vm4, %v1982_v38, 0.0  ;;  %v1999_v7 = vsel %vm1963_vm14, %v1982_v38, 0.0 }
 0x2d9   :  { %v2003_v19 = vsel %vm1967_vm12, %v1982_v38, 0.0  ;;  %v2007_v52 = vsel %vm1971_vm0, %v1982_v38, 0.0  ;;  %v2011_v48 = vsel %vm1975_vm11, %v1982_v38, 0.0  ;;  %v2015_v54 = vadd.f32 %v1995_v45, %v1939_v42 }
 0x2da   :  { %v2019_v24 = vadd.f32 %v1999_v7, %v1943_v15  ;;  %v2058_v47 = vrot.slane %v6774_v8, %v5341_v6  ;;  %v2023_v60 = vadd.f32 %v2003_v19, %v1947_v23  ;;  %v2027_v17 = vadd.f32 %v2007_v52, %v1951_v51 }
 0x2db   :  { %vm2039_vm9 = vcmp.eq.s32.totalorder %v6840_v34, 18  ;;  %vm2043_vm6 = vcmp.eq.s32.totalorder %v6843_v55, 18  ;;  %v2031_v61 = vadd.f32 %v2011_v48, %v1955_v44  ;;  %vm2047_vm3 = vcmp.eq.s32.totalorder %v6846_v9, 18 }
 0x2dc   :  { %vm2051_vm7 = vcmp.eq.s32.totalorder %v6817_v53, 18  ;;  %vm2111_vm5 = vcmp.eq.s32.totalorder %v6831_v49, 19  ;;  %vm2115_vm1 = vcmp.eq.s32.totalorder %v6840_v34, 19  ;;  %vm2119_vm13 = vcmp.eq.s32.totalorder %v6843_v55, 19 }
 0x2dd   :  { %vm2123_vm8 = vcmp.eq.s32.totalorder %v6846_v9, 19  ;;  %v2134_v59 = vrot.slane %v6774_v8, %v5335_v4  ;;  %v2071_v30 = vsel %vm2035_vm10, %v2058_v47, 0.0  ;;  %v2075_v40 = vsel %vm2039_vm9, %v2058_v47, 0.0 }
 0x2de   :  { %v2079_v20 = vsel %vm2043_vm6, %v2058_v47, 0.0  ;;  %vm2127_vm4 = vcmp.eq.s32.totalorder %v6817_v53, 19  ;;  %v2083_v62 = vsel %vm2047_vm3, %v2058_v47, 0.0  ;;  %v2091_v2 = vadd.f32 %v2071_v30, %v2015_v54 }
 0x2df   :  { %v2095_v10 = vadd.f32 %v2075_v40, %v2019_v24  ;;  %v2099_v16 = vadd.f32 %v2079_v20, %v2023_v60  ;;  %v1858_v37 = vsel %vm1822_vm15, %v6785_v11, 0.0  ;;  %v1862_v32 = vsel %vm1826_vm2, %v6785_v11, 0.0 }
 0x2e0   :  { %v2087_v31 = vsel %vm2051_vm7, %v2058_v47, 0.0  ;;  %v2103_v38 = vadd.f32 %v2083_v62, %v2027_v17  ;;  %v6868_v12 = vadd.f32 %v1846_v0, %v6791_v33  ;;  %v2147_v15 = vsel %vm2111_vm5, %v2134_v59, 0.0 }
 0x2e1   :  { %v2107_v42 = vadd.f32 %v2087_v31, %v2031_v61  ;;  %vm2187_vm14 = vcmp.eq.s32.totalorder %v6831_v49, 20  ;;  %v2151_v22 = vsel %vm2115_vm1, %v2134_v59, 0.0  ;;  %v2155_v35 = vsel %vm2119_vm13, %v2134_v59, 0.0 }
 0x2e2   :  { %v2159_v11 = vsel %vm2123_vm8, %v2134_v59, 0.0  ;;  %v2163_v23 = vsel %vm2127_vm4, %v2134_v59, 0.0  ;;  %v2167_v33 = vadd.f32 %v2147_v15, %v2091_v2  ;;  %v2171_v0 = vadd.f32 %v2151_v22, %v2095_v10  ;;  %v6936_v15 = vld [vmem:[#allocation2 + $0x10] sm:$0xff] }
 0x2e3   :  { %v2175_v51 = vadd.f32 %v2155_v35, %v2099_v16  ;;  %v2210_v44 = vrot.slane %v6774_v8, %v5530_v14  ;;  %v2179_v45 = vadd.f32 %v2159_v11, %v2103_v38  ;;  %vm2191_vm15 = vcmp.eq.s32.totalorder %v6840_v34, 20  ;;  %v6929_v38 = vpop.f32.mrf.mxu1  ;;  %v6943_v11 = vld [vmem:[#allocation2 + $0x30] sm:$0xff] }
 0x2e4   :  { %vm2195_vm2 = vcmp.eq.s32.totalorder %v6843_v55, 20  ;;  %vm2199_vm12 = vcmp.eq.s32.totalorder %v6846_v9, 20  ;;  %v2183_v7 = vadd.f32 %v2163_v23, %v2107_v42  ;;  %vm2203_vm0 = vcmp.eq.s32.totalorder %v6817_v53, 20  ;;  %v6946_v23 = vld [vmem:[#allocation2 + $0x50] sm:$0xff] }
 0x2e5   :  { %vm2263_vm11 = vcmp.eq.s32.totalorder %v6831_v49, 21  ;;  %vm2267_vm10 = vcmp.eq.s32.totalorder %v6840_v34, 21  ;;  %vm2271_vm9 = vcmp.eq.s32.totalorder %v6843_v55, 21  ;;  %vm2275_vm6 = vcmp.eq.s32.totalorder %v6846_v9, 21 }
 0x2e6   :  { %vm2279_vm3 = vcmp.eq.s32.totalorder %v6817_v53, 21  ;;  %v2286_v19 = vrot.slane %v6774_v8, %v5533_v18  ;;  %v2223_v52 = vsel %vm2187_vm14, %v2210_v44, 0.0  ;;  %v2227_v48 = vsel %vm2191_vm15, %v2210_v44, 0.0 }
 0x2e7   :  { %v2231_v54 = vsel %vm2195_vm2, %v2210_v44, 0.0  ;;  %v2235_v24 = vsel %vm2199_vm12, %v2210_v44, 0.0  ;;  %v2239_v47 = vsel %vm2203_vm0, %v2210_v44, 0.0  ;;  %v2243_v60 = vadd.f32 %v2223_v52, %v2167_v33  ;;  %v6958_v44 = vld [vmem:[#allocation2 + $0x90] sm:$0xf] }
 0x2e8   :  { %v2247_v17 = vadd.f32 %v2227_v48, %v2171_v0  ;;  %v2251_v61 = vadd.f32 %v2231_v54, %v2175_v51  ;;  %v6898_v59 = vadd.f32 %v6823_v28, %v6794_v13  ;;  %v6902_v30 = vadd.f32 %v6828_v29, %v6796_v58 }
 0x2e9   :  { %v2255_v40 = vadd.f32 %v2235_v24, %v2179_v45  ;;  %v2259_v20 = vadd.f32 %v2239_v47, %v2183_v7  ;;  %v6905_v62 = vadd.f32 %v1858_v37, %v6798_v1  ;;  %v6908_v2 = vadd.f32 %v1862_v32, %v6800_v25 }
 0x2ea   :  { %v2299_v10 = vsel %vm2263_vm11, %v2286_v19, 0.0  ;;  %vm2339_vm7 = vcmp.eq.s32.totalorder %v6831_v49, 22  ;;  %v2303_v13 = vsel %vm2267_vm10, %v2286_v19, 0.0  ;;  %v2307_v58 = vsel %vm2271_vm9, %v2286_v19, 0.0 }
 0x2eb   :  { %v2311_v28 = vsel %vm2275_vm6, %v2286_v19, 0.0  ;;  %v2315_v1 = vsel %vm2279_vm3, %v2286_v19, 0.0  ;;  %v2319_v29 = vadd.f32 %v2299_v10, %v2243_v60  ;;  %v2323_v25 = vadd.f32 %v2303_v13, %v2247_v17 }
 0x2ec   :  { %v2327_v16 = vadd.f32 %v2307_v58, %v2251_v61  ;;  %v2362_v37 = vrot.slane %v6774_v8, %v5566_v36  ;;  %v2331_v32 = vadd.f32 %v2311_v28, %v2255_v40  ;;  %v2335_v31 = vadd.f32 %v2315_v1, %v2259_v20 }
 0x2ed   :  { %vm2343_vm5 = vcmp.eq.s32.totalorder %v6840_v34, 22  ;;  %vm2347_vm1 = vcmp.eq.s32.totalorder %v6843_v55, 22  ;;  %vm2351_vm13 = vcmp.eq.s32.totalorder %v6846_v9, 22  ;;  %vm2355_vm8 = vcmp.eq.s32.totalorder %v6817_v53, 22 }
 0x2ee   :  { %vm2415_vm4 = vcmp.eq.s32.totalorder %v6831_v49, 23  ;;  %vm2419_vm14 = vcmp.eq.s32.totalorder %v6840_v34, 23  ;;  %vm2423_vm15 = vcmp.eq.s32.totalorder %v6843_v55, 23  ;;  %v6934_v42 = vrot.slane %v6774_v8, %v5573_v39  ;;  %v6949_v8 = vld [vmem:[#allocation2 + $0x70] sm:$0xff] }
 0x2ef   :  { %vm1885_vm2 = vcmp.eq.s32.totalorder %v6936_v15, 16  ;;  %v1914_v22 = vrot.slane %v6929_v38, %v5338_v5  ;;  %v2375_v35 = vsel %vm2339_vm7, %v2362_v37, 0.0  ;;  %vm1889_vm12 = vcmp.eq.s32.totalorder %v6943_v11, 16 }
 0x2f0   :  { %vm1893_vm0 = vcmp.eq.s32.totalorder %v6946_v23, 16  ;;  %vm1897_vm11 = vcmp.eq.s32.totalorder %v6949_v8, 16  ;;  %v2379_v33 = vsel %vm2343_vm5, %v2362_v37, 0.0  ;;  %v2383_v0 = vsel %vm2347_vm1, %v2362_v37, 0.0 }
 0x2f1   :  { %v2387_v51 = vsel %vm2351_vm13, %v2362_v37, 0.0  ;;  %vm1901_vm10 = vcmp.eq.s32.totalorder %v6958_v44, 16  ;;  %v2391_v45 = vsel %vm2355_vm8, %v2362_v37, 0.0  ;;  %v2395_v7 = vadd.f32 %v2375_v35, %v2319_v29 }
 0x2f2   :  { %v6963_v19 = vadd.f32 %v2379_v33, %v2323_v25  ;;  %v6965_v52 = vadd.f32 %v2383_v0, %v2327_v16  ;;  %v1921_v48 = vsel %vm1885_vm2, %v1914_v22, 0.0  ;;  %v1925_v54 = vsel %vm1889_vm12, %v1914_v22, 0.0 }
 0x2f3   :  { %v1929_v24 = vsel %vm1893_vm0, %v1914_v22, 0.0  ;;  %v1933_v47 = vsel %vm1897_vm11, %v1914_v22, 0.0  ;;  %v6969_v60 = vadd.f32 %v2387_v51, %v2331_v32  ;;  %v1937_v17 = vsel %vm1901_vm10, %v1914_v22, 0.0 }
 0x2f4   :  { %vm1961_vm9 = vcmp.eq.s32.totalorder %v6936_v15, 17  ;;  %v1990_v61 = vrot.slane %v6929_v38, %v5332_v3  ;;  %vm2427_vm6 = vcmp.eq.s32.totalorder %v6846_v9, 23  ;;  %vm2431_vm3 = vcmp.eq.s32.totalorder %v6817_v53, 23 }
 0x2f5   :  { %vm1965_vm7 = vcmp.eq.s32.totalorder %v6943_v11, 17  ;;  %vm1969_vm5 = vcmp.eq.s32.totalorder %v6946_v23, 17  ;;  %vm1973_vm1 = vcmp.eq.s32.totalorder %v6949_v8, 17  ;;  %vm1977_vm13 = vcmp.eq.s32.totalorder %v6958_v44, 17 }
 0x2f6   :  { %v1941_v40 = vadd.f32 %v1921_v48, %v6536_v41  ;;  %v1945_v20 = vadd.f32 %v1925_v54, %v6562_v63  ;;  %v1949_v10 = vadd.f32 %v1929_v24, %v6564_v57  ;;  %v1953_v13 = vadd.f32 %v1933_v47, %v6591_v27 }
 0x2f7   :  { %v6984_v58 = vadd.f32 %v2391_v45, %v2335_v31  ;;  %v2451_v28 = vsel %vm2415_vm4, %v6934_v42, 0.0  ;;  %v6992_v1 = vsel %vm2419_vm14, %v6934_v42, 0.0  ;;  %v1957_v29 = vadd.f32 %v1937_v17, %v6596_v50 }
 0x2f8   :  { %v6998_v41 = vsel %vm2423_vm15, %v6934_v42, 0.0  ;;  %v1997_v63 = vsel %vm1961_vm9, %v1990_v61, 0.0  ;;  %v2001_v57 = vsel %vm1965_vm7, %v1990_v61, 0.0  ;;  %vm2037_vm8 = vcmp.eq.s32.totalorder %v6936_v15, 18 }
 0x2f9   :  { %v2005_v27 = vsel %vm1969_vm5, %v1990_v61, 0.0  ;;  %v2009_v25 = vsel %vm1973_vm1, %v1990_v61, 0.0  ;;  %v2013_v16 = vsel %vm1977_vm13, %v1990_v61, 0.0  ;;  %v2066_v37 = vrot.slane %v6929_v38, %v5341_v6 }
 0x2fa   :  { %v2017_v32 = vadd.f32 %v1997_v63, %v1941_v40  ;;  %v2021_v31 = vadd.f32 %v2001_v57, %v1945_v20  ;;  %v2025_v50 = vadd.f32 %v2005_v27, %v1949_v10  ;;  %v2029_v22 = vadd.f32 %v2009_v25, %v1953_v13 }
 0x2fb   :  { %v2033_v35 = vadd.f32 %v2013_v16, %v1957_v29  ;;  %vm2041_vm4 = vcmp.eq.s32.totalorder %v6943_v11, 18  ;;  %vm2045_vm14 = vcmp.eq.s32.totalorder %v6946_v23, 18  ;;  %vm2049_vm15 = vcmp.eq.s32.totalorder %v6949_v8, 18 }
 0x2fc   :  { %vm2053_vm2 = vcmp.eq.s32.totalorder %v6958_v44, 18  ;;  %vm2113_vm12 = vcmp.eq.s32.totalorder %v6936_v15, 19  ;;  %vm2117_vm0 = vcmp.eq.s32.totalorder %v6943_v11, 19  ;;  %vm2121_vm11 = vcmp.eq.s32.totalorder %v6946_v23, 19 }
 0x2fd   :  { %v2073_v33 = vsel %vm2037_vm8, %v2066_v37, 0.0  ;;  %vm2125_vm10 = vcmp.eq.s32.totalorder %v6949_v8, 19  ;;  %vm2129_vm9 = vcmp.eq.s32.totalorder %v6958_v44, 19  ;;  %v2142_v0 = vrot.slane %v6929_v38, %v5335_v4 }
 0x2fe   :  { %v2077_v51 = vsel %vm2041_vm4, %v2066_v37, 0.0  ;;  %v2081_v45 = vsel %vm2045_vm14, %v2066_v37, 0.0  ;;  %v2085_v48 = vsel %vm2049_vm15, %v2066_v37, 0.0  ;;  %v2093_v54 = vadd.f32 %v2073_v33, %v2017_v32 }
 0x2ff   :  { %v2089_v24 = vsel %vm2053_vm2, %v2066_v37, 0.0  ;;  %v2097_v47 = vadd.f32 %v2077_v51, %v2021_v31  ;;  %v2101_v17 = vadd.f32 %v2081_v45, %v2025_v50  ;;  %v2105_v61 = vadd.f32 %v2085_v48, %v2029_v22 }
 0x300   :  { %v2463_v40 = vsel %vm2427_vm6, %v6934_v42, 0.0  ;;  %v2467_v20 = vsel %vm2431_vm3, %v6934_v42, 0.0  ;;  %v7024_v10 = vadd.f32 %v2451_v28, %v2395_v7  ;;  %v2109_v13 = vadd.f32 %v2089_v24, %v2033_v35 }
 0x301   :  { %v2149_v29 = vsel %vm2113_vm12, %v2142_v0, 0.0  ;;  %v2153_v63 = vsel %vm2117_vm0, %v2142_v0, 0.0  ;;  %v2157_v57 = vsel %vm2121_vm11, %v2142_v0, 0.0  ;;  %vm2189_vm7 = vcmp.eq.s32.totalorder %v6936_v15, 20 }
 0x302   :  { %v2161_v27 = vsel %vm2125_vm10, %v2142_v0, 0.0  ;;  %v2165_v42 = vsel %vm2129_vm9, %v2142_v0, 0.0  ;;  %v2169_v7 = vadd.f32 %v2149_v29, %v2093_v54  ;;  %v2218_v28 = vrot.slane %v6929_v38, %v5530_v14 }
 0x303   :  { %v2173_v25 = vadd.f32 %v2153_v63, %v2097_v47  ;;  %v2177_v16 = vadd.f32 %v2157_v57, %v2101_v17  ;;  %v2181_v37 = vadd.f32 %v2161_v27, %v2105_v61  ;;  %vm2193_vm6 = vcmp.eq.s32.totalorder %v6943_v11, 20 }
 0x304   :  { %v2185_v32 = vadd.f32 %v2165_v42, %v2109_v13  ;;  %vm2197_vm3 = vcmp.eq.s32.totalorder %v6946_v23, 20  ;;  %vm2201_vm5 = vcmp.eq.s32.totalorder %v6949_v8, 20  ;;  %vm2205_vm1 = vcmp.eq.s32.totalorder %v6958_v44, 20  ;;  %v7088_v42 = vpop.f32.mrf.mxu0 }
 0x305   :  { %vm2265_vm13 = vcmp.eq.s32.totalorder %v6936_v15, 21  ;;  %vm2269_vm8 = vcmp.eq.s32.totalorder %v6943_v11, 21  ;;  %vm2273_vm4 = vcmp.eq.s32.totalorder %v6946_v23, 21  ;;  %vm2277_vm14 = vcmp.eq.s32.totalorder %v6949_v8, 21 }
 0x306   :  { %v2225_v31 = vsel %vm2189_vm7, %v2218_v28, 0.0  ;;  %v2229_v50 = vsel %vm2193_vm6, %v2218_v28, 0.0  ;;  %vm2281_vm15 = vcmp.eq.s32.totalorder %v6958_v44, 21  ;;  %v2294_v22 = vrot.slane %v6929_v38, %v5533_v18 }
 0x307   :  { %v2233_v35 = vsel %vm2197_vm3, %v2218_v28, 0.0  ;;  %v2237_v33 = vsel %vm2201_vm5, %v2218_v28, 0.0  ;;  %v2241_v0 = vsel %vm2205_vm1, %v2218_v28, 0.0  ;;  %v2245_v51 = vadd.f32 %v2225_v31, %v2169_v7  ;;  %v7094_v28 = vld [vmem:[#allocation2 + $0x8] sm:$0xff] }
 0x308   :  { %v2249_v45 = vadd.f32 %v2229_v50, %v2173_v25  ;;  %v2253_v48 = vadd.f32 %v2233_v35, %v2177_v16  ;;  %v2257_v54 = vadd.f32 %v2237_v33, %v2181_v37  ;;  %v2261_v24 = vadd.f32 %v2241_v0, %v2185_v32 }
 0x309   :  { %v7054_v47 = vadd.f32 %v6992_v1, %v6963_v19  ;;  %v7058_v17 = vadd.f32 %v6998_v41, %v6965_v52  ;;  %v7061_v61 = vadd.f32 %v2463_v40, %v6969_v60  ;;  %v7064_v13 = vadd.f32 %v2467_v20, %v6984_v58 }
 0x30a   :  { %v2301_v29 = vsel %vm2265_vm13, %v2294_v22, 0.0  ;;  %v2305_v63 = vsel %vm2269_vm8, %v2294_v22, 0.0  ;;  %v2309_v19 = vsel %vm2273_vm4, %v2294_v22, 0.0  ;;  %vm2341_vm2 = vcmp.eq.s32.totalorder %v6936_v15, 22 }
 0x30b   :  { %v2313_v52 = vsel %vm2277_vm14, %v2294_v22, 0.0  ;;  %v2317_v60 = vsel %vm2281_vm15, %v2294_v22, 0.0  ;;  %v2321_v1 = vadd.f32 %v2301_v29, %v2245_v51  ;;  %v2370_v58 = vrot.slane %v6929_v38, %v5566_v36  ;;  %v7111_v51 = vld [vmem:[#allocation2 + $0x28] sm:$0xff] }
 0x30c   :  { %v2325_v41 = vadd.f32 %v2305_v63, %v2249_v45  ;;  %v2329_v40 = vadd.f32 %v2309_v19, %v2253_v48  ;;  %v2333_v20 = vadd.f32 %v2313_v52, %v2257_v54  ;;  %v2337_v57 = vadd.f32 %v2317_v60, %v2261_v24  ;;  %v7122_v24 = vld [vmem:[#allocation2 + $0x48] sm:$0xff] }
 0x30d   :  { %vm2345_vm12 = vcmp.eq.s32.totalorder %v6943_v11, 22  ;;  %vm2349_vm0 = vcmp.eq.s32.totalorder %v6946_v23, 22  ;;  %vm2353_vm11 = vcmp.eq.s32.totalorder %v6949_v8, 22  ;;  %vm2357_vm10 = vcmp.eq.s32.totalorder %v6958_v44, 22  ;;  %v7128_v29 = vld [vmem:[#allocation2 + $0x88] sm:$0xf] }
 0x30e   :  { %vm2417_vm9 = vcmp.eq.s32.totalorder %v6936_v15, 23  ;;  %vm2421_vm7 = vcmp.eq.s32.totalorder %v6943_v11, 23  ;;  %vm2425_vm6 = vcmp.eq.s32.totalorder %v6946_v23, 23  ;;  %v2446_v27 = vrot.slane %v6929_v38, %v5573_v39  ;;  %v7125_v15 = vld [vmem:[#allocation2 + $0x68] sm:$0xff] }
 0x30f   :  { %v2377_v7 = vsel %vm2341_vm2, %v2370_v58, 0.0  ;;  %vm2429_vm3 = vcmp.eq.s32.totalorder %v6949_v8, 23  ;;  %vm2433_vm5 = vcmp.eq.s32.totalorder %v6958_v44, 23  ;;  %vm1884_vm1 = vcmp.eq.s32.totalorder %v7094_v28, 16 }
 0x310   :  { %v2381_v25 = vsel %vm2345_vm12, %v2370_v58, 0.0  ;;  %v2385_v16 = vsel %vm2349_vm0, %v2370_v58, 0.0  ;;  %v2389_v37 = vsel %vm2353_vm11, %v2370_v58, 0.0  ;;  %v2393_v32 = vsel %vm2357_vm10, %v2370_v58, 0.0 }
 0x311   :  { %v7097_v31 = vadd.f32 %v2377_v7, %v2321_v1  ;;  %v7099_v38 = vadd.f32 %v2381_v25, %v2325_v41  ;;  %v7101_v50 = vadd.f32 %v2385_v16, %v2329_v40  ;;  %v1910_v22 = vrot.slane %v7088_v42, %v5338_v5 }
 0x312   :  { %v7105_v35 = vadd.f32 %v2389_v37, %v2333_v20  ;;  %v7107_v33 = vadd.f32 %v2393_v32, %v2337_v57  ;;  %v2453_v0 = vsel %vm2417_vm9, %v2446_v27, 0.0  ;;  %vm1888_vm13 = vcmp.eq.s32.totalorder %v7111_v51, 16 }
 0x313   :  { %v2457_v45 = vsel %vm2421_vm7, %v2446_v27, 0.0  ;;  %v2461_v48 = vsel %vm2425_vm6, %v2446_v27, 0.0  ;;  %v7120_v54 = vsel %vm2429_vm3, %v2446_v27, 0.0  ;;  %vm1892_vm8 = vcmp.eq.s32.totalorder %v7122_v24, 16 }
 0x314   :  { %vm1896_vm4 = vcmp.eq.s32.totalorder %v7125_v15, 16  ;;  %vm1900_vm14 = vcmp.eq.s32.totalorder %v7128_v29, 16  ;;  %vm1960_vm15 = vcmp.eq.s32.totalorder %v7094_v28, 17  ;;  %vm1964_vm2 = vcmp.eq.s32.totalorder %v7111_v51, 17 }
 0x315   :  { %v1920_v11 = vsel %vm1884_vm1, %v1910_v22, 0.0  ;;  %v1924_v23 = vsel %vm1888_vm13, %v1910_v22, 0.0  ;;  %vm1968_vm12 = vcmp.eq.s32.totalorder %v7122_v24, 17  ;;  %v1986_v8 = vrot.slane %v7088_v42, %v5332_v3 }
 0x316   :  { %v1928_v63 = vsel %vm1892_vm8, %v1910_v22, 0.0  ;;  %v1940_v19 = vadd.f32 %v1920_v11, %v6715_v21  ;;  %v1944_v52 = vadd.f32 %v1924_v23, %v6745_v26  ;;  %vm1972_vm0 = vcmp.eq.s32.totalorder %v7125_v15, 17 }
 0x317   :  { %v1932_v60 = vsel %vm1896_vm4, %v1910_v22, 0.0  ;;  %v1936_v1 = vsel %vm1900_vm14, %v1910_v22, 0.0  ;;  %v1948_v58 = vadd.f32 %v1928_v63, %v6749_v46  ;;  %vm1976_vm11 = vcmp.eq.s32.totalorder %v7128_v29, 17 }
 0x318   :  { %v7145_v41 = vsel %vm2433_vm5, %v2446_v27, 0.0  ;;  %v1952_v40 = vadd.f32 %v1932_v60, %v6752_v56  ;;  %v1956_v20 = vadd.f32 %v1936_v1, %v6755_v43  ;;  %vm2036_vm10 = vcmp.eq.s32.totalorder %v7094_v28, 18 }
 0x319   :  { %v1996_v21 = vsel %vm1960_vm15, %v1986_v8, 0.0  ;;  %v2000_v26 = vsel %vm1964_vm2, %v1986_v8, 0.0  ;;  %v2004_v46 = vsel %vm1968_vm12, %v1986_v8, 0.0  ;;  %v2008_v57 = vsel %vm1972_vm0, %v1986_v8, 0.0 }
 0x31a   :  { %v2012_v7 = vsel %vm1976_vm11, %v1986_v8, 0.0  ;;  %v2016_v44 = vadd.f32 %v1996_v21, %v1940_v19  ;;  %v2020_v27 = vadd.f32 %v2000_v26, %v1944_v52  ;;  %v2062_v56 = vrot.slane %v7088_v42, %v5341_v6 }
 0x31b   :  { %v2024_v25 = vadd.f32 %v2004_v46, %v1948_v58  ;;  %vm2040_vm9 = vcmp.eq.s32.totalorder %v7111_v51, 18  ;;  %vm2044_vm7 = vcmp.eq.s32.totalorder %v7122_v24, 18  ;;  %vm2048_vm6 = vcmp.eq.s32.totalorder %v7125_v15, 18 }
 0x31c   :  { %v2028_v43 = vadd.f32 %v2008_v57, %v1952_v40  ;;  %v2032_v16 = vadd.f32 %v2012_v7, %v1956_v20  ;;  %vm2052_vm3 = vcmp.eq.s32.totalorder %v7128_v29, 18  ;;  %vm2112_vm5 = vcmp.eq.s32.totalorder %v7094_v28, 19 }
 0x31d   :  { %vm2116_vm1 = vcmp.eq.s32.totalorder %v7111_v51, 19  ;;  %vm2120_vm13 = vcmp.eq.s32.totalorder %v7122_v24, 19  ;;  %vm2124_vm8 = vcmp.eq.s32.totalorder %v7125_v15, 19  ;;  %v2138_v37 = vrot.slane %v7088_v42, %v5335_v4 }
 0x31e   :  { %v2072_v32 = vsel %vm2036_vm10, %v2062_v56, 0.0  ;;  %v2076_v22 = vsel %vm2040_vm9, %v2062_v56, 0.0  ;;  %v2080_v11 = vsel %vm2044_vm7, %v2062_v56, 0.0  ;;  %v2084_v23 = vsel %vm2048_vm6, %v2062_v56, 0.0 }
 0x31f   :  { %v2088_v8 = vsel %vm2052_vm3, %v2062_v56, 0.0  ;;  %v2092_v63 = vadd.f32 %v2072_v32, %v2016_v44  ;;  %v2096_v19 = vadd.f32 %v2076_v22, %v2020_v27  ;;  %v2100_v52 = vadd.f32 %v2080_v11, %v2024_v25 }
 0x320   :  { %v7171_v60 = vadd.f32 %v2453_v0, %v7097_v31  ;;  %v2104_v1 = vadd.f32 %v2084_v23, %v2028_v43  ;;  %v2108_v58 = vadd.f32 %v2088_v8, %v2032_v16  ;;  %vm2128_vm4 = vcmp.eq.s32.totalorder %v7128_v29, 19 }
 0x321   :  { %v7175_v40 = vadd.f32 %v2457_v45, %v7099_v38  ;;  %v7178_v20 = vadd.f32 %v2461_v48, %v7101_v50  ;;  %v2148_v21 = vsel %vm2112_vm5, %v2138_v37, 0.0  ;;  %vm2188_vm14 = vcmp.eq.s32.totalorder %v7094_v28, 20 }
 0x322   :  { %v2152_v26 = vsel %vm2116_vm1, %v2138_v37, 0.0  ;;  %v2156_v31 = vsel %vm2120_vm13, %v2138_v37, 0.0  ;;  %v2160_v0 = vsel %vm2124_vm8, %v2138_v37, 0.0  ;;  %v2214_v38 = vrot.slane %v7088_v42, %v5530_v14 }
 0x323   :  { %v2164_v45 = vsel %vm2128_vm4, %v2138_v37, 0.0  ;;  %v2168_v50 = vadd.f32 %v2148_v21, %v2092_v63  ;;  %v2172_v48 = vadd.f32 %v2152_v26, %v2096_v19  ;;  %v2176_v46 = vadd.f32 %v2156_v31, %v2100_v52 }
 0x324   :  { %v2180_v57 = vadd.f32 %v2160_v0, %v2104_v1  ;;  %v2184_v7 = vadd.f32 %v2164_v45, %v2108_v58  ;;  %vm2192_vm15 = vcmp.eq.s32.totalorder %v7111_v51, 20  ;;  %vm2196_vm2 = vcmp.eq.s32.totalorder %v7122_v24, 20  ;;  %v7227_v0 = vpop.f32.mrf.mxu1 }
 0x325   :  { %vm2200_vm12 = vcmp.eq.s32.totalorder %v7125_v15, 20  ;;  %vm2204_vm0 = vcmp.eq.s32.totalorder %v7128_v29, 20  ;;  %vm2264_vm11 = vcmp.eq.s32.totalorder %v7094_v28, 21  ;;  %vm2268_vm10 = vcmp.eq.s32.totalorder %v7111_v51, 21 }
 0x326   :  { %v2224_v44 = vsel %vm2188_vm14, %v2214_v38, 0.0  ;;  %vm2272_vm9 = vcmp.eq.s32.totalorder %v7122_v24, 21  ;;  %vm2276_vm7 = vcmp.eq.s32.totalorder %v7125_v15, 21  ;;  %v2290_v27 = vrot.slane %v7088_v42, %v5533_v18 }
 0x327   :  { %v2228_v56 = vsel %vm2192_vm15, %v2214_v38, 0.0  ;;  %v2232_v25 = vsel %vm2196_vm2, %v2214_v38, 0.0  ;;  %v2244_v43 = vadd.f32 %v2224_v44, %v2168_v50  ;;  %vm2280_vm6 = vcmp.eq.s32.totalorder %v7128_v29, 21 }
 0x328   :  { %v2236_v16 = vsel %vm2200_vm12, %v2214_v38, 0.0  ;;  %v2240_v37 = vsel %vm2204_vm0, %v2214_v38, 0.0  ;;  %v2248_v32 = vadd.f32 %v2228_v56, %v2172_v48  ;;  %v2252_v22 = vadd.f32 %v2232_v25, %v2176_v46  ;;  %v7238_v46 = vld [vmem:[#allocation2 + $0x18] sm:$0xff] }
 0x329   :  { %v7206_v11 = vadd.f32 %v7120_v54, %v7105_v35  ;;  %v7210_v23 = vadd.f32 %v7145_v41, %v7107_v33  ;;  %v2256_v8 = vadd.f32 %v2236_v16, %v2180_v57  ;;  %v2260_v63 = vadd.f32 %v2240_v37, %v2184_v7 }
 0x32a   :  { %v2300_v19 = vsel %vm2264_vm11, %v2290_v27, 0.0  ;;  %v2304_v52 = vsel %vm2268_vm10, %v2290_v27, 0.0  ;;  %v2308_v1 = vsel %vm2272_vm9, %v2290_v27, 0.0  ;;  %vm2340_vm3 = vcmp.eq.s32.totalorder %v7094_v28, 22 }
 0x32b   :  { %v2312_v35 = vsel %vm2276_vm7, %v2290_v27, 0.0  ;;  %v2316_v54 = vsel %vm2280_vm6, %v2290_v27, 0.0  ;;  %v2320_v58 = vadd.f32 %v2300_v19, %v2244_v43  ;;  %v2366_v33 = vrot.slane %v7088_v42, %v5566_v36  ;;  %v7251_v43 = vld [vmem:[#allocation2 + $0x38] sm:$0xff] }
 0x32c   :  { %v2324_v41 = vadd.f32 %v2304_v52, %v2248_v32  ;;  %v2328_v21 = vadd.f32 %v2308_v1, %v2252_v22  ;;  %vm2344_vm5 = vcmp.eq.s32.totalorder %v7111_v51, 22  ;;  %vm2348_vm1 = vcmp.eq.s32.totalorder %v7122_v24, 22  ;;  %v7259_v32 = vld [vmem:[#allocation2 + $0x58] sm:$0xff] }
 0x32d   :  { %v2332_v26 = vadd.f32 %v2312_v35, %v2256_v8  ;;  %v2336_v31 = vadd.f32 %v2316_v54, %v2260_v63  ;;  %vm2352_vm13 = vcmp.eq.s32.totalorder %v7125_v15, 22  ;;  %vm2356_vm8 = vcmp.eq.s32.totalorder %v7128_v29, 22  ;;  %v7262_v22 = vld [vmem:[#allocation2 + $0x78] sm:$0xff] }
 0x32e   :  { %vm2416_vm4 = vcmp.eq.s32.totalorder %v7094_v28, 23  ;;  %vm2420_vm14 = vcmp.eq.s32.totalorder %v7111_v51, 23  ;;  %vm2424_vm15 = vcmp.eq.s32.totalorder %v7122_v24, 23  ;;  %v7234_v38 = vrot.slane %v7088_v42, %v5573_v39  ;;  %v7265_v8 = vld [vmem:[#allocation2 + $0x98] sm:$0xf] }
 0x32f   :  { %v2376_v45 = vsel %vm2340_vm3, %v2366_v33, 0.0  ;;  %v2380_v50 = vsel %vm2344_vm5, %v2366_v33, 0.0  ;;  %v2384_v48 = vsel %vm2348_vm1, %v2366_v33, 0.0  ;;  %vm1886_vm2 = vcmp.eq.s32.totalorder %v7238_v46, 16 }
 0x330   :  { %v2388_v57 = vsel %vm2352_vm13, %v2366_v33, 0.0  ;;  %v2392_v7 = vsel %vm2356_vm8, %v2366_v33, 0.0  ;;  %v7241_v44 = vadd.f32 %v2376_v45, %v2320_v58  ;;  %v1918_v27 = vrot.slane %v7227_v0, %v5338_v5 }
 0x331   :  { %v7245_v56 = vadd.f32 %v2380_v50, %v2324_v41  ;;  %v7247_v42 = vadd.f32 %v2384_v48, %v2328_v21  ;;  %v7249_v25 = vadd.f32 %v2388_v57, %v2332_v26  ;;  %vm1890_vm12 = vcmp.eq.s32.totalorder %v7251_v43, 16 }
 0x332   :  { %v7254_v16 = vadd.f32 %v2392_v7, %v2336_v31  ;;  %v2452_v37 = vsel %vm2416_vm4, %v7234_v38, 0.0  ;;  %vm1894_vm0 = vcmp.eq.s32.totalorder %v7259_v32, 16  ;;  %vm1898_vm11 = vcmp.eq.s32.totalorder %v7262_v22, 16 }
 0x333   :  { %vm1902_vm10 = vcmp.eq.s32.totalorder %v7265_v8, 16  ;;  %vm1962_vm9 = vcmp.eq.s32.totalorder %v7238_v46, 17  ;;  %vm1966_vm7 = vcmp.eq.s32.totalorder %v7251_v43, 17  ;;  %vm1970_vm6 = vcmp.eq.s32.totalorder %v7259_v32, 17 }
 0x334   :  { %vm2428_vm3 = vcmp.eq.s32.totalorder %v7125_v15, 23  ;;  %vm2432_vm5 = vcmp.eq.s32.totalorder %v7128_v29, 23  ;;  %v1922_v28 = vsel %vm1886_vm2, %v1918_v27, 0.0  ;;  %v1926_v63 = vsel %vm1890_vm12, %v1918_v27, 0.0 }
 0x335   :  { %vm1974_vm1 = vcmp.eq.s32.totalorder %v7262_v22, 17  ;;  %v1994_v19 = vrot.slane %v7227_v0, %v5332_v3  ;;  %v1930_v52 = vsel %vm1894_vm0, %v1918_v27, 0.0  ;;  %v1934_v1 = vsel %vm1898_vm11, %v1918_v27, 0.0 }
 0x336   :  { %v1942_v35 = vadd.f32 %v1922_v28, %v6868_v12  ;;  %v1946_v54 = vadd.f32 %v1926_v63, %v6898_v59  ;;  %v1938_v58 = vsel %vm1902_vm10, %v1918_v27, 0.0  ;;  %v1950_v33 = vadd.f32 %v1930_v52, %v6902_v30 }
 0x337   :  { %v1954_v41 = vadd.f32 %v1934_v1, %v6905_v62  ;;  %vm1978_vm13 = vcmp.eq.s32.totalorder %v7265_v8, 17  ;;  %v7286_v21 = vsel %vm2420_vm14, %v7234_v38, 0.0  ;;  %v7291_v26 = vsel %vm2424_vm15, %v7234_v38, 0.0 }
 0x338   :  { %v1958_v12 = vadd.f32 %v1938_v58, %v6908_v2  ;;  %vm2038_vm8 = vcmp.eq.s32.totalorder %v7238_v46, 18  ;;  %v1998_v59 = vsel %vm1962_vm9, %v1994_v19, 0.0  ;;  %v2002_v30 = vsel %vm1966_vm7, %v1994_v19, 0.0 }
 0x339   :  { %v2006_v62 = vsel %vm1970_vm6, %v1994_v19, 0.0  ;;  %v2010_v51 = vsel %vm1974_vm1, %v1994_v19, 0.0  ;;  %v2014_v31 = vsel %vm1978_vm13, %v1994_v19, 0.0  ;;  %v2018_v24 = vadd.f32 %v1998_v59, %v1942_v35 }
 0x33a   :  { %v2022_v45 = vadd.f32 %v2002_v30, %v1946_v54  ;;  %v2070_v2 = vrot.slane %v7227_v0, %v5341_v6  ;;  %v2026_v50 = vadd.f32 %v2006_v62, %v1950_v33  ;;  %v2030_v48 = vadd.f32 %v2010_v51, %v1954_v41 }
 0x33b   :  { %vm2042_vm4 = vcmp.eq.s32.totalorder %v7251_v43, 18  ;;  %vm2046_vm14 = vcmp.eq.s32.totalorder %v7259_v32, 18  ;;  %v2034_v57 = vadd.f32 %v2014_v31, %v1958_v12  ;;  %vm2050_vm15 = vcmp.eq.s32.totalorder %v7262_v22, 18 }
 0x33c   :  { %vm2054_vm2 = vcmp.eq.s32.totalorder %v7265_v8, 18  ;;  %vm2114_vm12 = vcmp.eq.s32.totalorder %v7238_v46, 19  ;;  %vm2118_vm0 = vcmp.eq.s32.totalorder %v7251_v43, 19  ;;  %vm2122_vm11 = vcmp.eq.s32.totalorder %v7259_v32, 19 }
 0x33d   :  { %vm2126_vm10 = vcmp.eq.s32.totalorder %v7262_v22, 19  ;;  %v2146_v7 = vrot.slane %v7227_v0, %v5335_v4  ;;  %v2074_v27 = vsel %vm2038_vm8, %v2070_v2, 0.0  ;;  %v2078_v28 = vsel %vm2042_vm4, %v2070_v2, 0.0 }
 0x33e   :  { %v2082_v63 = vsel %vm2046_vm14, %v2070_v2, 0.0  ;;  %vm2130_vm9 = vcmp.eq.s32.totalorder %v7265_v8, 19  ;;  %v2086_v19 = vsel %vm2050_vm15, %v2070_v2, 0.0  ;;  %v2094_v52 = vadd.f32 %v2074_v27, %v2018_v24 }
 0x33f   :  { %v2098_v1 = vadd.f32 %v2078_v28, %v2022_v45  ;;  %v2102_v35 = vadd.f32 %v2082_v63, %v2026_v50  ;;  %v2464_v54 = vsel %vm2428_vm3, %v7234_v38, 0.0  ;;  %v2468_v58 = vsel %vm2432_vm5, %v7234_v38, 0.0 }
 0x340   :  { %v2090_v33 = vsel %vm2054_vm2, %v2070_v2, 0.0  ;;  %v2106_v41 = vadd.f32 %v2086_v19, %v2030_v48  ;;  %v7327_v12 = vadd.f32 %v2452_v37, %v7241_v44  ;;  %v2150_v30 = vsel %vm2114_vm12, %v2146_v7, 0.0 }
 0x341   :  { %v2110_v59 = vadd.f32 %v2090_v33, %v2034_v57  ;;  %vm2190_vm7 = vcmp.eq.s32.totalorder %v7238_v46, 20  ;;  %v2154_v15 = vsel %vm2118_vm0, %v2146_v7, 0.0  ;;  %v2158_v29 = vsel %vm2122_vm11, %v2146_v7, 0.0 }
 0x342   :  { %v2162_v38 = vsel %vm2126_vm10, %v2146_v7, 0.0  ;;  %v2166_v62 = vsel %vm2130_vm9, %v2146_v7, 0.0  ;;  %v2170_v44 = vadd.f32 %v2150_v30, %v2094_v52  ;;  %v2174_v37 = vadd.f32 %v2154_v15, %v2098_v1 }
 0x343   :  { %v2178_v51 = vadd.f32 %v2158_v29, %v2102_v35  ;;  %v2222_v31 = vrot.slane %v7227_v0, %v5530_v14  ;;  %v2182_v24 = vadd.f32 %v2162_v38, %v2106_v41  ;;  %vm2194_vm6 = vcmp.eq.s32.totalorder %v7251_v43, 20  ;;  %v7388_v38 = vpop.f32.mrf.mxu0 }
 0x344   :  { %vm2198_vm3 = vcmp.eq.s32.totalorder %v7259_v32, 20  ;;  %vm2202_vm5 = vcmp.eq.s32.totalorder %v7262_v22, 20  ;;  %v2186_v45 = vadd.f32 %v2166_v62, %v2110_v59  ;;  %vm2206_vm1 = vcmp.eq.s32.totalorder %v7265_v8, 20 }
 0x345   :  { %vm2266_vm13 = vcmp.eq.s32.totalorder %v7238_v46, 21  ;;  %vm2270_vm8 = vcmp.eq.s32.totalorder %v7251_v43, 21  ;;  %vm2274_vm4 = vcmp.eq.s32.totalorder %v7259_v32, 21  ;;  %vm2278_vm14 = vcmp.eq.s32.totalorder %v7262_v22, 21 }
 0x346   :  { %vm2282_vm15 = vcmp.eq.s32.totalorder %v7265_v8, 21  ;;  %v2298_v2 = vrot.slane %v7227_v0, %v5533_v18  ;;  %v2226_v50 = vsel %vm2190_vm7, %v2222_v31, 0.0  ;;  %v2230_v48 = vsel %vm2194_vm6, %v2222_v31, 0.0 }
 0x347   :  { %v2234_v57 = vsel %vm2198_vm3, %v2222_v31, 0.0  ;;  %v2238_v7 = vsel %vm2202_vm5, %v2222_v31, 0.0  ;;  %v2242_v27 = vsel %vm2206_vm1, %v2222_v31, 0.0  ;;  %v2246_v28 = vadd.f32 %v2226_v50, %v2170_v44 }
 0x348   :  { %v2250_v63 = vadd.f32 %v2230_v48, %v2174_v37  ;;  %v2254_v19 = vadd.f32 %v2234_v57, %v2178_v51  ;;  %v7357_v52 = vadd.f32 %v7286_v21, %v7245_v56  ;;  %v7361_v1 = vadd.f32 %v7291_v26, %v7247_v42 }
 0x349   :  { %v2258_v35 = vadd.f32 %v2238_v7, %v2182_v24  ;;  %v2262_v33 = vadd.f32 %v2242_v27, %v2186_v45  ;;  %v7364_v41 = vadd.f32 %v2464_v54, %v7249_v25  ;;  %v7367_v59 = vadd.f32 %v2468_v58, %v7254_v16 }
 0x34a   :  { %v2302_v30 = vsel %vm2266_vm13, %v2298_v2, 0.0  ;;  %vm2342_vm2 = vcmp.eq.s32.totalorder %v7238_v46, 22  ;;  %v2306_v56 = vsel %vm2270_vm8, %v2298_v2, 0.0  ;;  %v2310_v42 = vsel %vm2274_vm4, %v2298_v2, 0.0 }
 0x34b   :  { %v2314_v21 = vsel %vm2278_vm14, %v2298_v2, 0.0  ;;  %v2318_v25 = vsel %vm2282_vm15, %v2298_v2, 0.0  ;;  %v2322_v26 = vadd.f32 %v2302_v30, %v2246_v28  ;;  %v2326_v16 = vadd.f32 %v2306_v56, %v2250_v63 }
 0x34c   :  { %v2330_v54 = vadd.f32 %v2310_v42, %v2254_v19  ;;  %v2374_v58 = vrot.slane %v7227_v0, %v5566_v36  ;;  %v2334_v15 = vadd.f32 %v2314_v21, %v2258_v35  ;;  %v2338_v29 = vadd.f32 %v2318_v25, %v2262_v33 }
 0x34d   :  { %vm2346_vm12 = vcmp.eq.s32.totalorder %v7251_v43, 22  ;;  %vm2350_vm0 = vcmp.eq.s32.totalorder %v7259_v32, 22  ;;  %vm2354_vm11 = vcmp.eq.s32.totalorder %v7262_v22, 22  ;;  %vm2358_vm10 = vcmp.eq.s32.totalorder %v7265_v8, 22 }
 0x34e   :  { %vm2418_vm9 = vcmp.eq.s32.totalorder %v7238_v46, 23  ;;  %vm2422_vm7 = vcmp.eq.s32.totalorder %v7251_v43, 23  ;;  %vm2426_vm6 = vcmp.eq.s32.totalorder %v7259_v32, 23  ;;  %v7393_v62 = vrot.slane %v7227_v0, %v5573_v39 }
 0x34f   :  { %vm2491_vm3 = vcmp.eq.s32.totalorder %v6831_v49, 24  ;;  %v2514_v44 = vrot.slane %v7388_v38, %v5338_v5  ;;  %v2378_v37 = vsel %vm2342_vm2, %v2374_v58, 0.0  ;;  %vm2495_vm5 = vcmp.eq.s32.totalorder %v6840_v34, 24 }
 0x350   :  { %vm2499_vm1 = vcmp.eq.s32.totalorder %v6843_v55, 24  ;;  %vm2503_vm13 = vcmp.eq.s32.totalorder %v6846_v9, 24  ;;  %v2382_v51 = vsel %vm2346_vm12, %v2374_v58, 0.0  ;;  %v2386_v31 = vsel %vm2350_vm0, %v2374_v58, 0.0 }
 0x351   :  { %v2390_v24 = vsel %vm2354_vm11, %v2374_v58, 0.0  ;;  %vm2507_vm8 = vcmp.eq.s32.totalorder %v6817_v53, 24  ;;  %v2394_v0 = vsel %vm2358_vm10, %v2374_v58, 0.0  ;;  %v7406_v45 = vadd.f32 %v2378_v37, %v2322_v26 }
 0x352   :  { %v7408_v2 = vadd.f32 %v2382_v51, %v2326_v16  ;;  %v7410_v50 = vadd.f32 %v2386_v31, %v2330_v54  ;;  %v2527_v48 = vsel %vm2491_vm3, %v2514_v44, 0.0  ;;  %v2531_v57 = vsel %vm2495_vm5, %v2514_v44, 0.0 }
 0x353   :  { %v2535_v7 = vsel %vm2499_vm1, %v2514_v44, 0.0  ;;  %v2539_v27 = vsel %vm2503_vm13, %v2514_v44, 0.0  ;;  %v7412_v28 = vadd.f32 %v2390_v24, %v2334_v15  ;;  %v2543_v63 = vsel %vm2507_vm8, %v2514_v44, 0.0  ;;  %v7456_v15 = vld [vmem:[#allocation2 + $0x20] sm:$0xff] }
 0x354   :  { %vm2567_vm4 = vcmp.eq.s32.totalorder %v6831_v49, 25  ;;  %v2590_v19 = vrot.slane %v7388_v38, %v5332_v3  ;;  %vm2430_vm14 = vcmp.eq.s32.totalorder %v7262_v22, 23  ;;  %vm2434_vm15 = vcmp.eq.s32.totalorder %v7265_v8, 23 }
 0x355   :  { %vm2571_vm2 = vcmp.eq.s32.totalorder %v6840_v34, 25  ;;  %vm2575_vm12 = vcmp.eq.s32.totalorder %v6843_v55, 25  ;;  %vm2579_vm0 = vcmp.eq.s32.totalorder %v6846_v9, 25  ;;  %vm2583_vm11 = vcmp.eq.s32.totalorder %v6817_v53, 25  ;;  %v7459_v55 = vld [vmem:[#allocation2 + $0x40] sm:$0xff] }
 0x356   :  { %v2547_v35 = vadd.f32 %v2527_v48, %v7024_v10  ;;  %v2551_v33 = vadd.f32 %v2531_v57, %v7054_v47  ;;  %v2555_v30 = vadd.f32 %v2535_v7, %v7058_v17  ;;  %v2559_v56 = vadd.f32 %v2539_v27, %v7061_v61  ;;  %v7445_v61 = vld [vmem:[#allocation2] sm:$0xff] }
 0x357   :  { %v7427_v42 = vadd.f32 %v2394_v0, %v2338_v29  ;;  %v2454_v34 = vsel %vm2418_vm9, %v7393_v62, 0.0  ;;  %v7435_v21 = vsel %vm2422_vm7, %v7393_v62, 0.0  ;;  %v2563_v25 = vadd.f32 %v2543_v63, %v7064_v13  ;;  %v7462_v9 = vld [vmem:[#allocation2 + $0x60] sm:$0xff] }
 0x358   :  { %v7441_v10 = vsel %vm2426_vm6, %v7393_v62, 0.0  ;;  %v2603_v47 = vsel %vm2567_vm4, %v2590_v19, 0.0  ;;  %v2607_v17 = vsel %vm2571_vm2, %v2590_v19, 0.0  ;;  %vm2643_vm10 = vcmp.eq.s32.totalorder %v7445_v61, 26  ;;  %v7465_v53 = vld [vmem:[#allocation2 + $0x80] sm:$0xf] }
 0x359   :  { %v2611_v46 = vsel %vm2575_vm12, %v2590_v19, 0.0  ;;  %v2615_v43 = vsel %vm2579_vm0, %v2590_v19, 0.0  ;;  %v2619_v13 = vsel %vm2583_vm11, %v2590_v19, 0.0  ;;  %v2666_v32 = vrot.slane %v7388_v38, %v5341_v6 }
 0x35a   :  { %v2623_v26 = vadd.f32 %v2603_v47, %v2547_v35  ;;  %v2627_v49 = vadd.f32 %v2607_v17, %v2551_v33  ;;  %v2631_v16 = vadd.f32 %v2611_v46, %v2555_v30  ;;  %v2635_v54 = vadd.f32 %v2615_v43, %v2559_v56 }
 0x35b   :  { %v2639_v58 = vadd.f32 %v2619_v13, %v2563_v25  ;;  %vm2647_vm9 = vcmp.eq.s32.totalorder %v7456_v15, 26  ;;  %vm2651_vm7 = vcmp.eq.s32.totalorder %v7459_v55, 26  ;;  %vm2655_vm6 = vcmp.eq.s32.totalorder %v7462_v9, 26 }
 0x35c   :  { %vm2659_vm3 = vcmp.eq.s32.totalorder %v7465_v53, 26  ;;  %vm2719_vm5 = vcmp.eq.s32.totalorder %v7445_v61, 27  ;;  %vm2723_vm1 = vcmp.eq.s32.totalorder %v7456_v15, 27  ;;  %vm2727_vm13 = vcmp.eq.s32.totalorder %v7459_v55, 27 }
 0x35d   :  { %v2679_v29 = vsel %vm2643_vm10, %v2666_v32, 0.0  ;;  %vm2731_vm8 = vcmp.eq.s32.totalorder %v7462_v9, 27  ;;  %vm2735_vm4 = vcmp.eq.s32.totalorder %v7465_v53, 27  ;;  %v2742_v44 = vrot.slane %v7388_v38, %v5335_v4 }
 0x35e   :  { %v2683_v37 = vsel %vm2647_vm9, %v2666_v32, 0.0  ;;  %v2687_v51 = vsel %vm2651_vm7, %v2666_v32, 0.0  ;;  %v2691_v31 = vsel %vm2655_vm6, %v2666_v32, 0.0  ;;  %v2699_v24 = vadd.f32 %v2679_v29, %v2623_v26 }
 0x35f   :  { %v2695_v0 = vsel %vm2659_vm3, %v2666_v32, 0.0  ;;  %v2703_v48 = vadd.f32 %v2683_v37, %v2627_v49  ;;  %v2707_v57 = vadd.f32 %v2687_v51, %v2631_v16  ;;  %v2711_v7 = vadd.f32 %v2691_v31, %v2635_v54 }
 0x360   :  { %v2466_v27 = vsel %vm2430_vm14, %v7393_v62, 0.0  ;;  %v2470_v63 = vsel %vm2434_vm15, %v7393_v62, 0.0  ;;  %v7484_v19 = vadd.f32 %v2454_v34, %v7406_v45  ;;  %v2715_v35 = vadd.f32 %v2695_v0, %v2639_v58 }
 0x361   :  { %v2755_v33 = vsel %vm2719_vm5, %v2742_v44, 0.0  ;;  %v2759_v30 = vsel %vm2723_vm1, %v2742_v44, 0.0  ;;  %v2763_v56 = vsel %vm2727_vm13, %v2742_v44, 0.0  ;;  %vm2795_vm2 = vcmp.eq.s32.totalorder %v7445_v61, 28 }
 0x362   :  { %v2767_v22 = vsel %vm2731_vm8, %v2742_v44, 0.0  ;;  %v2771_v8 = vsel %vm2735_vm4, %v2742_v44, 0.0  ;;  %v2775_v62 = vadd.f32 %v2755_v33, %v2699_v24  ;;  %v2818_v45 = vrot.slane %v7388_v38, %v5530_v14 }
 0x363   :  { %v2779_v34 = vadd.f32 %v2759_v30, %v2703_v48  ;;  %v2783_v25 = vadd.f32 %v2763_v56, %v2707_v57  ;;  %v2787_v47 = vadd.f32 %v2767_v22, %v2711_v7  ;;  %vm2799_vm14 = vcmp.eq.s32.totalorder %v7456_v15, 28  ;;  %v7554_v30 = vld [vmem:[#allocation2 + $0x10] sm:$0xff] }
 0x364   :  { %v2791_v17 = vadd.f32 %v2771_v8, %v2715_v35  ;;  %vm2803_vm15 = vcmp.eq.s32.totalorder %v7459_v55, 28  ;;  %vm2807_vm12 = vcmp.eq.s32.totalorder %v7462_v9, 28  ;;  %vm2811_vm0 = vcmp.eq.s32.totalorder %v7465_v53, 28  ;;  %v7550_v35 = vpop.f32.mrf.mxu1  ;;  %v7557_v56 = vld [vmem:[#allocation2 + $0x30] sm:$0xff] }
 0x365   :  { %vm2871_vm11 = vcmp.eq.s32.totalorder %v7445_v61, 29  ;;  %vm2875_vm10 = vcmp.eq.s32.totalorder %v7456_v15, 29  ;;  %vm2879_vm9 = vcmp.eq.s32.totalorder %v7459_v55, 29  ;;  %vm2883_vm7 = vcmp.eq.s32.totalorder %v7462_v9, 29 }
 0x366   :  { %v2831_v46 = vsel %vm2795_vm2, %v2818_v45, 0.0  ;;  %v2835_v43 = vsel %vm2799_vm14, %v2818_v45, 0.0  ;;  %vm2887_vm6 = vcmp.eq.s32.totalorder %v7465_v53, 29  ;;  %v2894_v13 = vrot.slane %v7388_v38, %v5533_v18 }
 0x367   :  { %v2839_v32 = vsel %vm2803_vm15, %v2818_v45, 0.0  ;;  %v2843_v26 = vsel %vm2807_vm12, %v2818_v45, 0.0  ;;  %v2847_v49 = vsel %vm2811_vm0, %v2818_v45, 0.0  ;;  %v2851_v16 = vadd.f32 %v2831_v46, %v2775_v62  ;;  %v7565_v45 = vld [vmem:[#allocation2 + $0x70] sm:$0xff] }
 0x368   :  { %v2855_v54 = vadd.f32 %v2835_v43, %v2779_v34  ;;  %v2859_v58 = vadd.f32 %v2839_v32, %v2783_v25  ;;  %v2863_v29 = vadd.f32 %v2843_v26, %v2787_v47  ;;  %v2867_v44 = vadd.f32 %v2847_v49, %v2791_v17  ;;  %v7572_v17 = vld [vmem:[#allocation2 + $0x90] sm:$0xf] }
 0x369   :  { %v7514_v37 = vadd.f32 %v7435_v21, %v7408_v2  ;;  %v7518_v51 = vadd.f32 %v7441_v10, %v7410_v50  ;;  %v7521_v31 = vadd.f32 %v2466_v27, %v7412_v28  ;;  %v7524_v24 = vadd.f32 %v2470_v63, %v7427_v42 }
 0x36a   :  { %v2907_v0 = vsel %vm2871_vm11, %v2894_v13, 0.0  ;;  %v2911_v48 = vsel %vm2875_vm10, %v2894_v13, 0.0  ;;  %v2915_v2 = vsel %vm2879_vm9, %v2894_v13, 0.0  ;;  %vm2947_vm3 = vcmp.eq.s32.totalorder %v7445_v61, 30 }
 0x36b   :  { %v2919_v50 = vsel %vm2883_vm7, %v2894_v13, 0.0  ;;  %v2923_v28 = vsel %vm2887_vm6, %v2894_v13, 0.0  ;;  %v2927_v21 = vadd.f32 %v2907_v0, %v2851_v16  ;;  %v2970_v42 = vrot.slane %v7388_v38, %v5566_v36 }
 0x36c   :  { %v2931_v10 = vadd.f32 %v2911_v48, %v2855_v54  ;;  %v2935_v57 = vadd.f32 %v2915_v2, %v2859_v58  ;;  %v2939_v7 = vadd.f32 %v2919_v50, %v2863_v29  ;;  %v2943_v27 = vadd.f32 %v2923_v28, %v2867_v44 }
 0x36d   :  { %vm2951_vm5 = vcmp.eq.s32.totalorder %v7456_v15, 30  ;;  %vm2955_vm1 = vcmp.eq.s32.totalorder %v7459_v55, 30  ;;  %vm2959_vm13 = vcmp.eq.s32.totalorder %v7462_v9, 30  ;;  %vm2963_vm8 = vcmp.eq.s32.totalorder %v7465_v53, 30 }
 0x36e   :  { %vm3023_vm4 = vcmp.eq.s32.totalorder %v7445_v61, 31  ;;  %vm3027_vm2 = vcmp.eq.s32.totalorder %v7456_v15, 31  ;;  %vm3031_vm14 = vcmp.eq.s32.totalorder %v7459_v55, 31  ;;  %v7548_v63 = vrot.slane %v7388_v38, %v5573_v39  ;;  %v7562_v38 = vld [vmem:[#allocation2 + $0x50] sm:$0xff] }
 0x36f   :  { %v2983_v33 = vsel %vm2947_vm3, %v2970_v42, 0.0  ;;  %vm2493_vm15 = vcmp.eq.s32.totalorder %v7554_v30, 24  ;;  %vm2497_vm12 = vcmp.eq.s32.totalorder %v7557_v56, 24  ;;  %v2522_v22 = vrot.slane %v7550_v35, %v5338_v5 }
 0x370   :  { %v2987_v8 = vsel %vm2951_vm5, %v2970_v42, 0.0  ;;  %v2991_v62 = vsel %vm2955_vm1, %v2970_v42, 0.0  ;;  %vm2501_vm0 = vcmp.eq.s32.totalorder %v7562_v38, 24  ;;  %vm2505_vm11 = vcmp.eq.s32.totalorder %v7565_v45, 24 }
 0x371   :  { %v2995_v34 = vsel %vm2959_vm13, %v2970_v42, 0.0  ;;  %v2999_v25 = vsel %vm2963_vm8, %v2970_v42, 0.0  ;;  %v3003_v47 = vadd.f32 %v2983_v33, %v2927_v21  ;;  %vm2509_vm10 = vcmp.eq.s32.totalorder %v7572_v17, 24 }
 0x372   :  { %v7575_v46 = vadd.f32 %v2987_v8, %v2931_v10  ;;  %v7577_v43 = vadd.f32 %v2991_v62, %v2935_v57  ;;  %v2529_v13 = vsel %vm2493_vm15, %v2522_v22, 0.0  ;;  %v2533_v32 = vsel %vm2497_vm12, %v2522_v22, 0.0 }
 0x373   :  { %v7583_v26 = vadd.f32 %v2995_v34, %v2939_v7  ;;  %v7585_v49 = vadd.f32 %v2999_v25, %v2943_v27  ;;  %v2537_v16 = vsel %vm2501_vm0, %v2522_v22, 0.0  ;;  %v2541_v54 = vsel %vm2505_vm11, %v2522_v22, 0.0 }
 0x374   :  { %vm3035_vm9 = vcmp.eq.s32.totalorder %v7462_v9, 31  ;;  %vm3039_vm7 = vcmp.eq.s32.totalorder %v7465_v53, 31  ;;  %v2545_v58 = vsel %vm2509_vm10, %v2522_v22, 0.0  ;;  %vm2569_vm6 = vcmp.eq.s32.totalorder %v7554_v30, 25 }
 0x375   :  { %vm2573_vm3 = vcmp.eq.s32.totalorder %v7557_v56, 25  ;;  %v2598_v29 = vrot.slane %v7550_v35, %v5332_v3  ;;  %v2549_v44 = vadd.f32 %v2529_v13, %v7171_v60  ;;  %v2553_v0 = vadd.f32 %v2533_v32, %v7175_v40 }
 0x376   :  { %vm2577_vm5 = vcmp.eq.s32.totalorder %v7562_v38, 25  ;;  %vm2581_vm1 = vcmp.eq.s32.totalorder %v7565_v45, 25  ;;  %v3059_v48 = vsel %vm3023_vm4, %v7548_v63, 0.0  ;;  %v2557_v2 = vadd.f32 %v2537_v16, %v7178_v20 }
 0x377   :  { %v2561_v50 = vadd.f32 %v2541_v54, %v7206_v11  ;;  %vm2585_vm13 = vcmp.eq.s32.totalorder %v7572_v17, 25  ;;  %v7606_v60 = vsel %vm3027_vm2, %v7548_v63, 0.0  ;;  %v7611_v40 = vsel %vm3031_vm14, %v7548_v63, 0.0 }
 0x378   :  { %v2565_v28 = vadd.f32 %v2545_v58, %v7210_v23  ;;  %vm2645_vm8 = vcmp.eq.s32.totalorder %v7554_v30, 26  ;;  %v2605_v21 = vsel %vm2569_vm6, %v2598_v29, 0.0  ;;  %v2609_v20 = vsel %vm2573_vm3, %v2598_v29, 0.0 }
 0x379   :  { %v2613_v42 = vsel %vm2577_vm5, %v2598_v29, 0.0  ;;  %v2617_v11 = vsel %vm2581_vm1, %v2598_v29, 0.0  ;;  %v2621_v10 = vsel %vm2585_vm13, %v2598_v29, 0.0  ;;  %v2625_v57 = vadd.f32 %v2605_v21, %v2549_v44 }
 0x37a   :  { %v2629_v7 = vadd.f32 %v2609_v20, %v2553_v0  ;;  %v2674_v27 = vrot.slane %v7550_v35, %v5341_v6  ;;  %v2633_v33 = vadd.f32 %v2613_v42, %v2557_v2  ;;  %v2637_v22 = vadd.f32 %v2617_v11, %v2561_v50 }
 0x37b   :  { %vm2649_vm4 = vcmp.eq.s32.totalorder %v7557_v56, 26  ;;  %vm2653_vm2 = vcmp.eq.s32.totalorder %v7562_v38, 26  ;;  %v2641_v8 = vadd.f32 %v2621_v10, %v2565_v28  ;;  %vm2657_vm14 = vcmp.eq.s32.totalorder %v7565_v45, 26 }
 0x37c   :  { %vm2661_vm15 = vcmp.eq.s32.totalorder %v7572_v17, 26  ;;  %vm2721_vm12 = vcmp.eq.s32.totalorder %v7554_v30, 27  ;;  %vm2725_vm0 = vcmp.eq.s32.totalorder %v7557_v56, 27  ;;  %vm2729_vm11 = vcmp.eq.s32.totalorder %v7562_v38, 27 }
 0x37d   :  { %vm2733_vm10 = vcmp.eq.s32.totalorder %v7565_v45, 27  ;;  %v2750_v23 = vrot.slane %v7550_v35, %v5335_v4  ;;  %v2681_v62 = vsel %vm2645_vm8, %v2674_v27, 0.0  ;;  %v2685_v34 = vsel %vm2649_vm4, %v2674_v27, 0.0 }
 0x37e   :  { %v2689_v25 = vsel %vm2653_vm2, %v2674_v27, 0.0  ;;  %vm2737_vm6 = vcmp.eq.s32.totalorder %v7572_v17, 27  ;;  %v2693_v13 = vsel %vm2657_vm14, %v2674_v27, 0.0  ;;  %v2701_v32 = vadd.f32 %v2681_v62, %v2625_v57 }
 0x37f   :  { %v2705_v16 = vadd.f32 %v2685_v34, %v2629_v7  ;;  %v2709_v54 = vadd.f32 %v2689_v25, %v2633_v33  ;;  %v3071_v58 = vsel %vm3035_vm9, %v7548_v63, 0.0  ;;  %v3075_v29 = vsel %vm3039_vm7, %v7548_v63, 0.0 }
 0x380   :  { %v2697_v44 = vsel %vm2661_vm15, %v2674_v27, 0.0  ;;  %v2713_v0 = vadd.f32 %v2693_v13, %v2637_v22  ;;  %v7638_v2 = vadd.f32 %v3059_v48, %v3003_v47  ;;  %v2757_v28 = vsel %vm2721_vm12, %v2750_v23, 0.0 }
 0x381   :  { %v2717_v50 = vadd.f32 %v2697_v44, %v2641_v8  ;;  %vm2797_vm3 = vcmp.eq.s32.totalorder %v7554_v30, 28  ;;  %v2761_v21 = vsel %vm2725_vm0, %v2750_v23, 0.0  ;;  %v2765_v20 = vsel %vm2729_vm11, %v2750_v23, 0.0 }
 0x382   :  { %v2769_v63 = vsel %vm2733_vm10, %v2750_v23, 0.0  ;;  %v2773_v42 = vsel %vm2737_vm6, %v2750_v23, 0.0  ;;  %v2777_v47 = vadd.f32 %v2757_v28, %v2701_v32  ;;  %v2781_v48 = vadd.f32 %v2761_v21, %v2705_v16 }
 0x383   :  { %v2785_v11 = vadd.f32 %v2765_v20, %v2709_v54  ;;  %v2826_v10 = vrot.slane %v7550_v35, %v5530_v14  ;;  %v2789_v57 = vadd.f32 %v2769_v63, %v2713_v0  ;;  %vm2801_vm9 = vcmp.eq.s32.totalorder %v7557_v56, 28 }
 0x384   :  { %vm2805_vm7 = vcmp.eq.s32.totalorder %v7562_v38, 28  ;;  %vm2809_vm5 = vcmp.eq.s32.totalorder %v7565_v45, 28  ;;  %v2793_v7 = vadd.f32 %v2773_v42, %v2717_v50  ;;  %vm2813_vm1 = vcmp.eq.s32.totalorder %v7572_v17, 28  ;;  %v7704_v42 = vpop.f32.mrf.mxu0 }
 0x385   :  { %vm2873_vm13 = vcmp.eq.s32.totalorder %v7554_v30, 29  ;;  %vm2877_vm8 = vcmp.eq.s32.totalorder %v7557_v56, 29  ;;  %vm2881_vm4 = vcmp.eq.s32.totalorder %v7562_v38, 29  ;;  %vm2885_vm2 = vcmp.eq.s32.totalorder %v7565_v45, 29 }
 0x386   :  { %vm2889_vm14 = vcmp.eq.s32.totalorder %v7572_v17, 29  ;;  %v2902_v27 = vrot.slane %v7550_v35, %v5533_v18  ;;  %v2833_v33 = vsel %vm2797_vm3, %v2826_v10, 0.0  ;;  %v2837_v22 = vsel %vm2801_vm9, %v2826_v10, 0.0 }
 0x387   :  { %v2841_v8 = vsel %vm2805_vm7, %v2826_v10, 0.0  ;;  %v2845_v23 = vsel %vm2809_vm5, %v2826_v10, 0.0  ;;  %v2849_v62 = vsel %vm2813_vm1, %v2826_v10, 0.0  ;;  %v2853_v34 = vadd.f32 %v2833_v33, %v2777_v47  ;;  %v7708_v10 = vld [vmem:[#allocation2 + $0x8] sm:$0xff] }
 0x388   :  { %v2857_v25 = vadd.f32 %v2837_v22, %v2781_v48  ;;  %v2861_v13 = vadd.f32 %v2841_v8, %v2785_v11  ;;  %v7668_v32 = vadd.f32 %v7606_v60, %v7575_v46  ;;  %v7672_v16 = vadd.f32 %v7611_v40, %v7577_v43 }
 0x389   :  { %v2865_v54 = vadd.f32 %v2845_v23, %v2789_v57  ;;  %v2869_v44 = vadd.f32 %v2849_v62, %v2793_v7  ;;  %v7675_v0 = vadd.f32 %v3071_v58, %v7583_v26  ;;  %v7678_v50 = vadd.f32 %v3075_v29, %v7585_v49 }
 0x38a   :  { %v2909_v28 = vsel %vm2873_vm13, %v2902_v27, 0.0  ;;  %vm2949_vm15 = vcmp.eq.s32.totalorder %v7554_v30, 30  ;;  %v2913_v46 = vsel %vm2877_vm8, %v2902_v27, 0.0  ;;  %v2917_v43 = vsel %vm2881_vm4, %v2902_v27, 0.0 }
 0x38b   :  { %v2921_v60 = vsel %vm2885_vm2, %v2902_v27, 0.0  ;;  %v2925_v26 = vsel %vm2889_vm14, %v2902_v27, 0.0  ;;  %v2929_v40 = vadd.f32 %v2909_v28, %v2853_v34  ;;  %v2933_v49 = vadd.f32 %v2913_v46, %v2857_v25  ;;  %v7723_v34 = vld [vmem:[#allocation2 + $0x28] sm:$0xff] }
 0x38c   :  { %v2937_v58 = vadd.f32 %v2917_v43, %v2861_v13  ;;  %v2978_v29 = vrot.slane %v7550_v35, %v5566_v36  ;;  %v2941_v21 = vadd.f32 %v2921_v60, %v2865_v54  ;;  %v2945_v20 = vadd.f32 %v2925_v26, %v2869_v44  ;;  %v7726_v25 = vld [vmem:[#allocation2 + $0x48] sm:$0xff] }
 0x38d   :  { %vm2953_vm12 = vcmp.eq.s32.totalorder %v7557_v56, 30  ;;  %vm2957_vm0 = vcmp.eq.s32.totalorder %v7562_v38, 30  ;;  %vm2961_vm11 = vcmp.eq.s32.totalorder %v7565_v45, 30  ;;  %vm2965_vm10 = vcmp.eq.s32.totalorder %v7572_v17, 30  ;;  %v7729_v13 = vld [vmem:[#allocation2 + $0x68] sm:$0xff] }
 0x38e   :  { %vm3025_vm6 = vcmp.eq.s32.totalorder %v7554_v30, 31  ;;  %vm3029_vm3 = vcmp.eq.s32.totalorder %v7557_v56, 31  ;;  %vm3033_vm9 = vcmp.eq.s32.totalorder %v7562_v38, 31  ;;  %vm3037_vm7 = vcmp.eq.s32.totalorder %v7565_v45, 31  ;;  %v7736_v30 = vld [vmem:[#allocation2 + $0x88] sm:$0xf] }
 0x38f   :  { %vm3041_vm5 = vcmp.eq.s32.totalorder %v7572_v17, 31  ;;  %v3054_v63 = vrot.slane %v7550_v35, %v5573_v39  ;;  %v2985_v47 = vsel %vm2949_vm15, %v2978_v29, 0.0  ;;  %v2989_v48 = vsel %vm2953_vm12, %v2978_v29, 0.0 }
 0x390   :  { %v2993_v11 = vsel %vm2957_vm0, %v2978_v29, 0.0  ;;  %vm2492_vm1 = vcmp.eq.s32.totalorder %v7708_v10, 24  ;;  %v2997_v57 = vsel %vm2961_vm11, %v2978_v29, 0.0  ;;  %v3001_v7 = vsel %vm2965_vm10, %v2978_v29, 0.0 }
 0x391   :  { %v3005_v27 = vadd.f32 %v2985_v47, %v2929_v40  ;;  %v7711_v33 = vadd.f32 %v2989_v48, %v2933_v49  ;;  %v7713_v22 = vadd.f32 %v2993_v11, %v2937_v58  ;;  %v7715_v8 = vadd.f32 %v2997_v57, %v2941_v21 }
 0x392   :  { %v7717_v35 = vadd.f32 %v3001_v7, %v2945_v20  ;;  %v2518_v23 = vrot.slane %v7704_v42, %v5338_v5  ;;  %v3061_v62 = vsel %vm3025_vm6, %v3054_v63, 0.0  ;;  %vm2496_vm13 = vcmp.eq.s32.totalorder %v7723_v34, 24 }
 0x393   :  { %vm2500_vm8 = vcmp.eq.s32.totalorder %v7726_v25, 24  ;;  %vm2504_vm4 = vcmp.eq.s32.totalorder %v7729_v13, 24  ;;  %v3065_v54 = vsel %vm3029_vm3, %v3054_v63, 0.0  ;;  %v3069_v44 = vsel %vm3033_vm9, %v3054_v63, 0.0 }
 0x394   :  { %vm2508_vm2 = vcmp.eq.s32.totalorder %v7736_v30, 24  ;;  %vm2568_vm14 = vcmp.eq.s32.totalorder %v7708_v10, 25  ;;  %vm2572_vm15 = vcmp.eq.s32.totalorder %v7723_v34, 25  ;;  %vm2576_vm12 = vcmp.eq.s32.totalorder %v7726_v25, 25 }
 0x395   :  { %vm2580_vm0 = vcmp.eq.s32.totalorder %v7729_v13, 25  ;;  %v2594_v28 = vrot.slane %v7704_v42, %v5332_v3  ;;  %v2528_v56 = vsel %vm2492_vm1, %v2518_v23, 0.0  ;;  %v2532_v38 = vsel %vm2496_vm13, %v2518_v23, 0.0 }
 0x396   :  { %v2536_v46 = vsel %vm2500_vm8, %v2518_v23, 0.0  ;;  %v2540_v43 = vsel %vm2504_vm4, %v2518_v23, 0.0  ;;  %v2544_v60 = vsel %vm2508_vm2, %v2518_v23, 0.0  ;;  %v2548_v26 = vadd.f32 %v2528_v56, %v7327_v12 }
 0x397   :  { %v2552_v40 = vadd.f32 %v2532_v38, %v7357_v52  ;;  %v2556_v49 = vadd.f32 %v2536_v46, %v7361_v1  ;;  %v3073_v58 = vsel %vm3037_vm7, %v3054_v63, 0.0  ;;  %v2560_v29 = vadd.f32 %v2540_v43, %v7364_v41 }
 0x398   :  { %v2564_v21 = vadd.f32 %v2544_v60, %v7367_v59  ;;  %vm2584_vm11 = vcmp.eq.s32.totalorder %v7736_v30, 25  ;;  %v7757_v20 = vsel %vm3041_vm5, %v3054_v63, 0.0  ;;  %v7759_v47 = vadd.f32 %v3061_v62, %v3005_v27 }
 0x399   :  { %v2604_v12 = vsel %vm2568_vm14, %v2594_v28, 0.0  ;;  %vm2644_vm10 = vcmp.eq.s32.totalorder %v7708_v10, 26  ;;  %v2608_v52 = vsel %vm2572_vm15, %v2594_v28, 0.0  ;;  %v2612_v1 = vsel %vm2576_vm12, %v2594_v28, 0.0 }
 0x39a   :  { %v2616_v41 = vsel %vm2580_vm0, %v2594_v28, 0.0  ;;  %v2670_v59 = vrot.slane %v7704_v42, %v5341_v6  ;;  %v2620_v45 = vsel %vm2584_vm11, %v2594_v28, 0.0  ;;  %v2624_v17 = vadd.f32 %v2604_v12, %v2548_v26 }
 0x39b   :  { %v2628_v63 = vadd.f32 %v2608_v52, %v2552_v40  ;;  %v2632_v48 = vadd.f32 %v2612_v1, %v2556_v49  ;;  %v2636_v11 = vadd.f32 %v2616_v41, %v2560_v29  ;;  %v2640_v57 = vadd.f32 %v2620_v45, %v2564_v21 }
 0x39c   :  { %vm2648_vm6 = vcmp.eq.s32.totalorder %v7723_v34, 26  ;;  %vm2652_vm3 = vcmp.eq.s32.totalorder %v7726_v25, 26  ;;  %vm2656_vm9 = vcmp.eq.s32.totalorder %v7729_v13, 26  ;;  %vm2660_vm7 = vcmp.eq.s32.totalorder %v7736_v30, 26 }
 0x39d   :  { %vm2720_vm5 = vcmp.eq.s32.totalorder %v7708_v10, 27  ;;  %vm2724_vm1 = vcmp.eq.s32.totalorder %v7723_v34, 27  ;;  %v2680_v7 = vsel %vm2644_vm10, %v2670_v59, 0.0  ;;  %vm2728_vm13 = vcmp.eq.s32.totalorder %v7726_v25, 27 }
 0x39e   :  { %vm2732_vm8 = vcmp.eq.s32.totalorder %v7729_v13, 27  ;;  %v2746_v27 = vrot.slane %v7704_v42, %v5335_v4  ;;  %v2684_v23 = vsel %vm2648_vm6, %v2670_v59, 0.0  ;;  %v2688_v62 = vsel %vm2652_vm3, %v2670_v59, 0.0 }
 0x39f   :  { %v2700_v28 = vadd.f32 %v2680_v7, %v2624_v17  ;;  %vm2736_vm4 = vcmp.eq.s32.totalorder %v7736_v30, 27  ;;  %v2692_v56 = vsel %vm2656_vm9, %v2670_v59, 0.0  ;;  %v2696_v38 = vsel %vm2660_vm7, %v2670_v59, 0.0 }
 0x3a0   :  { %v2704_v46 = vadd.f32 %v2684_v23, %v2628_v63  ;;  %v2708_v43 = vadd.f32 %v2688_v62, %v2632_v48  ;;  %v7786_v60 = vadd.f32 %v3065_v54, %v7711_v33  ;;  %v7789_v26 = vadd.f32 %v3069_v44, %v7713_v22 }
 0x3a1   :  { %v2712_v40 = vadd.f32 %v2692_v56, %v2636_v11  ;;  %v2716_v49 = vadd.f32 %v2696_v38, %v2640_v57  ;;  %v2756_v29 = vsel %vm2720_vm5, %v2746_v27, 0.0  ;;  %v2760_v21 = vsel %vm2724_vm1, %v2746_v27, 0.0 }
 0x3a2   :  { %v2764_v12 = vsel %vm2728_vm13, %v2746_v27, 0.0  ;;  %vm2796_vm2 = vcmp.eq.s32.totalorder %v7708_v10, 28  ;;  %v2768_v33 = vsel %vm2732_vm8, %v2746_v27, 0.0  ;;  %v2772_v54 = vsel %vm2736_vm4, %v2746_v27, 0.0 }
 0x3a3   :  { %v2776_v52 = vadd.f32 %v2756_v29, %v2700_v28  ;;  %v2822_v22 = vrot.slane %v7704_v42, %v5530_v14  ;;  %v2780_v44 = vadd.f32 %v2760_v21, %v2704_v46  ;;  %v2784_v1 = vadd.f32 %v2764_v12, %v2708_v43 }
 0x3a4   :  { %vm2800_vm14 = vcmp.eq.s32.totalorder %v7723_v34, 28  ;;  %vm2804_vm15 = vcmp.eq.s32.totalorder %v7726_v25, 28  ;;  %v7805_v41 = vadd.f32 %v3073_v58, %v7715_v8  ;;  %v2788_v59 = vadd.f32 %v2768_v33, %v2712_v40  ;;  %v7835_v33 = vpop.f32.mrf.mxu1 }
 0x3a5   :  { %v2792_v45 = vadd.f32 %v2772_v54, %v2716_v49  ;;  %vm2808_vm12 = vcmp.eq.s32.totalorder %v7729_v13, 28  ;;  %vm2812_vm0 = vcmp.eq.s32.totalorder %v7736_v30, 28  ;;  %vm2872_vm11 = vcmp.eq.s32.totalorder %v7708_v10, 29 }
 0x3a6   :  { %vm2876_vm10 = vcmp.eq.s32.totalorder %v7723_v34, 29  ;;  %v2898_v17 = vrot.slane %v7704_v42, %v5533_v18  ;;  %v2832_v63 = vsel %vm2796_vm2, %v2822_v22, 0.0  ;;  %v2836_v48 = vsel %vm2800_vm14, %v2822_v22, 0.0 }
 0x3a7   :  { %v2840_v11 = vsel %vm2804_vm15, %v2822_v22, 0.0  ;;  %vm2880_vm6 = vcmp.eq.s32.totalorder %v7726_v25, 29  ;;  %v2852_v8 = vadd.f32 %v2832_v63, %v2776_v52  ;;  %v2856_v58 = vadd.f32 %v2836_v48, %v2780_v44 }
 0x3a8   :  { %v2860_v57 = vadd.f32 %v2840_v11, %v2784_v1  ;;  %vm2884_vm3 = vcmp.eq.s32.totalorder %v7729_v13, 29  ;;  %v7819_v7 = vadd.f32 %v7757_v20, %v7717_v35  ;;  %v2844_v27 = vsel %vm2808_vm12, %v2822_v22, 0.0 }
 0x3a9   :  { %v2848_v23 = vsel %vm2812_vm0, %v2822_v22, 0.0  ;;  %vm2888_vm9 = vcmp.eq.s32.totalorder %v7736_v30, 29  ;;  %v2864_v62 = vadd.f32 %v2844_v27, %v2788_v59  ;;  %v2908_v56 = vsel %vm2872_vm11, %v2898_v17, 0.0  ;;  %v7844_v22 = vld [vmem:[#allocation2 + $0x18] sm:$0xff] }
 0x3aa   :  { %v2868_v28 = vadd.f32 %v2848_v23, %v2792_v45  ;;  %vm2948_vm7 = vcmp.eq.s32.totalorder %v7708_v10, 30  ;;  %v2912_v38 = vsel %vm2876_vm10, %v2898_v17, 0.0  ;;  %v2916_v46 = vsel %vm2880_vm6, %v2898_v17, 0.0  ;;  %v7868_v23 = vld [vmem:[#allocation2 + $0x98] sm:$0xf] }
 0x3ab   :  { %v2920_v43 = vsel %vm2884_vm3, %v2898_v17, 0.0  ;;  %v2974_v35 = vrot.slane %v7704_v42, %v5566_v36  ;;  %v2924_v20 = vsel %vm2888_vm9, %v2898_v17, 0.0  ;;  %v2928_v40 = vadd.f32 %v2908_v56, %v2852_v8 }
 0x3ac   :  { %v2932_v49 = vadd.f32 %v2912_v38, %v2856_v58  ;;  %v2936_v29 = vadd.f32 %v2916_v46, %v2860_v57  ;;  %vm2952_vm5 = vcmp.eq.s32.totalorder %v7723_v34, 30  ;;  %vm2956_vm1 = vcmp.eq.s32.totalorder %v7726_v25, 30  ;;  %v7860_v58 = vld [vmem:[#allocation2 + $0x58] sm:$0xff] }
 0x3ad   :  { %vm2960_vm13 = vcmp.eq.s32.totalorder %v7729_v13, 30  ;;  %vm2964_vm8 = vcmp.eq.s32.totalorder %v7736_v30, 30  ;;  %v2940_v21 = vadd.f32 %v2920_v43, %v2864_v62  ;;  %v2944_v12 = vadd.f32 %v2924_v20, %v2868_v28  ;;  %v7863_v57 = vld [vmem:[#allocation2 + $0x78] sm:$0xff] }
 0x3ae   :  { %vm3024_vm4 = vcmp.eq.s32.totalorder %v7708_v10, 31  ;;  %vm3028_vm2 = vcmp.eq.s32.totalorder %v7723_v34, 31  ;;  %v2984_v54 = vsel %vm2948_vm7, %v2974_v35, 0.0  ;;  %vm3032_vm14 = vcmp.eq.s32.totalorder %v7726_v25, 31 }
 0x3af   :  { %v7842_v52 = vrot.slane %v7704_v42, %v5573_v39  ;;  %vm2494_vm15 = vcmp.eq.s32.totalorder %v7844_v22, 24  ;;  %v2988_v44 = vsel %vm2952_vm5, %v2974_v35, 0.0  ;;  %v2992_v1 = vsel %vm2956_vm1, %v2974_v35, 0.0  ;;  %v7857_v42 = vld [vmem:[#allocation2 + $0x38] sm:$0xff] }
 0x3b0   :  { %v2996_v59 = vsel %vm2960_vm13, %v2974_v35, 0.0  ;;  %v3000_v45 = vsel %vm2964_vm8, %v2974_v35, 0.0  ;;  %v7847_v17 = vadd.f32 %v2984_v54, %v2928_v40  ;;  %v7849_v63 = vadd.f32 %v2988_v44, %v2932_v49 }
 0x3b1   :  { %v7851_v48 = vadd.f32 %v2992_v1, %v2936_v29  ;;  %v2526_v11 = vrot.slane %v7835_v33, %v5338_v5  ;;  %v7855_v8 = vadd.f32 %v2996_v59, %v2940_v21  ;;  %vm2498_vm12 = vcmp.eq.s32.totalorder %v7857_v42, 24 }
 0x3b2   :  { %vm2502_vm0 = vcmp.eq.s32.totalorder %v7860_v58, 24  ;;  %vm2506_vm11 = vcmp.eq.s32.totalorder %v7863_v57, 24  ;;  %v7866_v27 = vadd.f32 %v3000_v45, %v2944_v12  ;;  %vm2510_vm10 = vcmp.eq.s32.totalorder %v7868_v23, 24 }
 0x3b3   :  { %vm2570_vm6 = vcmp.eq.s32.totalorder %v7844_v22, 25  ;;  %vm2574_vm3 = vcmp.eq.s32.totalorder %v7857_v42, 25  ;;  %vm2578_vm9 = vcmp.eq.s32.totalorder %v7860_v58, 25  ;;  %vm2582_vm7 = vcmp.eq.s32.totalorder %v7863_v57, 25 }
 0x3b4   :  { %vm2586_vm5 = vcmp.eq.s32.totalorder %v7868_v23, 25  ;;  %v2602_v62 = vrot.slane %v7835_v33, %v5332_v3  ;;  %vm3036_vm1 = vcmp.eq.s32.totalorder %v7729_v13, 31  ;;  %vm3040_vm13 = vcmp.eq.s32.totalorder %v7736_v30, 31 }
 0x3b5   :  { %v2530_v28 = vsel %vm2494_vm15, %v2526_v11, 0.0  ;;  %v2534_v56 = vsel %vm2498_vm12, %v2526_v11, 0.0  ;;  %v2538_v38 = vsel %vm2502_vm0, %v2526_v11, 0.0  ;;  %v2542_v46 = vsel %vm2506_vm11, %v2526_v11, 0.0 }
 0x3b6   :  { %v2550_v43 = vadd.f32 %v2530_v28, %v7484_v19  ;;  %v2554_v35 = vadd.f32 %v2534_v56, %v7514_v37  ;;  %v2558_v20 = vadd.f32 %v2538_v38, %v7518_v51  ;;  %v2562_v40 = vadd.f32 %v2542_v46, %v7521_v31 }
 0x3b7   :  { %v3060_v49 = vsel %vm3024_vm4, %v7842_v52, 0.0  ;;  %v3064_v29 = vsel %vm3028_vm2, %v7842_v52, 0.0  ;;  %v7899_v21 = vsel %vm3032_vm14, %v7842_v52, 0.0  ;;  %v2546_v19 = vsel %vm2510_vm10, %v2526_v11, 0.0 }
 0x3b8   :  { %v2566_v37 = vadd.f32 %v2546_v19, %v7524_v24  ;;  %v2606_v51 = vsel %vm2570_vm6, %v2602_v62, 0.0  ;;  %v2610_v31 = vsel %vm2574_vm3, %v2602_v62, 0.0  ;;  %vm2646_vm8 = vcmp.eq.s32.totalorder %v7844_v22, 26 }
 0x3b9   :  { %v2614_v10 = vsel %vm2578_vm9, %v2602_v62, 0.0  ;;  %v2618_v25 = vsel %vm2582_vm7, %v2602_v62, 0.0  ;;  %v2622_v12 = vsel %vm2586_vm5, %v2602_v62, 0.0  ;;  %v2678_v24 = vrot.slane %v7835_v33, %v5341_v6 }
 0x3ba   :  { %v2626_v54 = vadd.f32 %v2606_v51, %v2550_v43  ;;  %v2630_v44 = vadd.f32 %v2610_v31, %v2554_v35  ;;  %v2634_v1 = vadd.f32 %v2614_v10, %v2558_v20  ;;  %v2638_v59 = vadd.f32 %v2618_v25, %v2562_v40 }
 0x3bb   :  { %vm2650_vm4 = vcmp.eq.s32.totalorder %v7857_v42, 26  ;;  %vm2654_vm2 = vcmp.eq.s32.totalorder %v7860_v58, 26  ;;  %vm2658_vm14 = vcmp.eq.s32.totalorder %v7863_v57, 26  ;;  %vm2662_vm15 = vcmp.eq.s32.totalorder %v7868_v23, 26 }
 0x3bc   :  { %v2642_v45 = vadd.f32 %v2622_v12, %v2566_v37  ;;  %vm2722_vm12 = vcmp.eq.s32.totalorder %v7844_v22, 27  ;;  %vm2726_vm0 = vcmp.eq.s32.totalorder %v7857_v42, 27  ;;  %vm2730_vm11 = vcmp.eq.s32.totalorder %v7860_v58, 27 }
 0x3bd   :  { %v2682_v11 = vsel %vm2646_vm8, %v2678_v24, 0.0  ;;  %vm2734_vm10 = vcmp.eq.s32.totalorder %v7863_v57, 27  ;;  %vm2738_vm6 = vcmp.eq.s32.totalorder %v7868_v23, 27  ;;  %v2754_v62 = vrot.slane %v7835_v33, %v5335_v4 }
 0x3be   :  { %v2686_v28 = vsel %vm2650_vm4, %v2678_v24, 0.0  ;;  %v2690_v56 = vsel %vm2654_vm2, %v2678_v24, 0.0  ;;  %v2694_v38 = vsel %vm2658_vm14, %v2678_v24, 0.0  ;;  %v2698_v46 = vsel %vm2662_vm15, %v2678_v24, 0.0 }
 0x3bf   :  { %v2702_v43 = vadd.f32 %v2682_v11, %v2626_v54  ;;  %v2706_v35 = vadd.f32 %v2686_v28, %v2630_v44  ;;  %v2710_v20 = vadd.f32 %v2690_v56, %v2634_v1  ;;  %v2714_v40 = vadd.f32 %v2694_v38, %v2638_v59 }
 0x3c0   :  { %v3072_v19 = vsel %vm3036_vm1, %v7842_v52, 0.0  ;;  %v3076_v37 = vsel %vm3040_vm13, %v7842_v52, 0.0  ;;  %v7937_v51 = vadd.f32 %v3060_v49, %v7847_v17  ;;  %v2718_v31 = vadd.f32 %v2698_v46, %v2642_v45 }
 0x3c1   :  { %v7940_v10 = vadd.f32 %v3064_v29, %v7849_v63  ;;  %v2758_v25 = vsel %vm2722_vm12, %v2754_v62, 0.0  ;;  %v2762_v12 = vsel %vm2726_vm0, %v2754_v62, 0.0  ;;  %vm2798_vm3 = vcmp.eq.s32.totalorder %v7844_v22, 28 }
 0x3c2   :  { %v2766_v13 = vsel %vm2730_vm11, %v2754_v62, 0.0  ;;  %v2770_v30 = vsel %vm2734_vm10, %v2754_v62, 0.0  ;;  %v2774_v52 = vsel %vm2738_vm6, %v2754_v62, 0.0  ;;  %v2830_v17 = vrot.slane %v7835_v33, %v5530_v14 }
 0x3c3   :  { %v2778_v63 = vadd.f32 %v2758_v25, %v2702_v43  ;;  %v2782_v49 = vadd.f32 %v2762_v12, %v2706_v35  ;;  %v2786_v29 = vadd.f32 %v2766_v13, %v2710_v20  ;;  %v2790_v24 = vadd.f32 %v2770_v30, %v2714_v40 }
 0x3c4   :  { %v2794_v54 = vadd.f32 %v2774_v52, %v2718_v31  ;;  %vm2802_vm9 = vcmp.eq.s32.totalorder %v7857_v42, 28  ;;  %vm2806_vm7 = vcmp.eq.s32.totalorder %v7860_v58, 28  ;;  %vm2810_vm5 = vcmp.eq.s32.totalorder %v7863_v57, 28 }
 0x3c5   :  { %vm2814_vm1 = vcmp.eq.s32.totalorder %v7868_v23, 28  ;;  %vm2874_vm13 = vcmp.eq.s32.totalorder %v7844_v22, 29  ;;  %vm2878_vm8 = vcmp.eq.s32.totalorder %v7857_v42, 29  ;;  %vm2882_vm4 = vcmp.eq.s32.totalorder %v7860_v58, 29 }
 0x3c6   :  { %v2834_v44 = vsel %vm2798_vm3, %v2830_v17, 0.0  ;;  %vm2886_vm2 = vcmp.eq.s32.totalorder %v7863_v57, 29  ;;  %vm2890_vm14 = vcmp.eq.s32.totalorder %v7868_v23, 29  ;;  %v2906_v1 = vrot.slane %v7835_v33, %v5533_v18 }
 0x3c7   :  { %v2838_v59 = vsel %vm2802_vm9, %v2830_v17, 0.0  ;;  %v2842_v45 = vsel %vm2806_vm7, %v2830_v17, 0.0  ;;  %v2846_v11 = vsel %vm2810_vm5, %v2830_v17, 0.0  ;;  %v2854_v62 = vadd.f32 %v2834_v44, %v2778_v63 }
 0x3c8   :  { %v2850_v28 = vsel %vm2814_vm1, %v2830_v17, 0.0  ;;  %v2858_v56 = vadd.f32 %v2838_v59, %v2782_v49  ;;  %v2862_v38 = vadd.f32 %v2842_v45, %v2786_v29  ;;  %v2866_v46 = vadd.f32 %v2846_v11, %v2790_v24  ;;  %v8004_v49 = vpop.f32.mrf.mxu0 }
 0x3c9   :  { %v7970_v43 = vadd.f32 %v7899_v21, %v7851_v48  ;;  %v7973_v35 = vadd.f32 %v3072_v19, %v7855_v8  ;;  %v7976_v20 = vadd.f32 %v3076_v37, %v7866_v27  ;;  %v2870_v40 = vadd.f32 %v2850_v28, %v2794_v54 }
 0x3ca   :  { %v2910_v31 = vsel %vm2874_vm13, %v2906_v1, 0.0  ;;  %v2914_v25 = vsel %vm2878_vm8, %v2906_v1, 0.0  ;;  %v2918_v12 = vsel %vm2882_vm4, %v2906_v1, 0.0  ;;  %vm2950_vm15 = vcmp.eq.s32.totalorder %v7844_v22, 30 }
 0x3cb   :  { %v2922_v48 = vsel %vm2886_vm2, %v2906_v1, 0.0  ;;  %v2926_v8 = vsel %vm2890_vm14, %v2906_v1, 0.0  ;;  %v2930_v27 = vadd.f32 %v2910_v31, %v2854_v62  ;;  %v2982_v21 = vrot.slane %v7835_v33, %v5566_v36 }
 0x3cc   :  { %v2934_v19 = vadd.f32 %v2914_v25, %v2858_v56  ;;  %v2938_v37 = vadd.f32 %v2918_v12, %v2862_v38  ;;  %v2942_v13 = vadd.f32 %v2922_v48, %v2866_v46  ;;  %vm2954_vm12 = vcmp.eq.s32.totalorder %v7857_v42, 30 }
 0x3cd   :  { %v2946_v30 = vadd.f32 %v2926_v8, %v2870_v40  ;;  %vm2958_vm0 = vcmp.eq.s32.totalorder %v7860_v58, 30  ;;  %vm2962_vm11 = vcmp.eq.s32.totalorder %v7863_v57, 30  ;;  %vm2966_vm10 = vcmp.eq.s32.totalorder %v7868_v23, 30 }
 0x3ce   :  { %vm3026_vm6 = vcmp.eq.s32.totalorder %v7844_v22, 31  ;;  %vm3030_vm3 = vcmp.eq.s32.totalorder %v7857_v42, 31  ;;  %vm3034_vm9 = vcmp.eq.s32.totalorder %v7860_v58, 31  ;;  %v8000_v52 = vrot.slane %v7835_v33, %v5573_v39 }
 0x3cf   :  { %v2986_v17 = vsel %vm2950_vm15, %v2982_v21, 0.0  ;;  %v2990_v63 = vsel %vm2954_vm12, %v2982_v21, 0.0  ;;  %vm3099_vm7 = vcmp.eq.s32.totalorder %v7445_v61, 32  ;;  %vm3103_vm5 = vcmp.eq.s32.totalorder %v7456_v15, 32 }
 0x3d0   :  { %v2994_v29 = vsel %vm2958_vm0, %v2982_v21, 0.0  ;;  %vm3107_vm1 = vcmp.eq.s32.totalorder %v7459_v55, 32  ;;  %vm3111_vm13 = vcmp.eq.s32.totalorder %v7462_v9, 32  ;;  %v3122_v24 = vrot.slane %v8004_v49, %v5338_v5 }
 0x3d1   :  { %v2998_v33 = vsel %vm2962_vm11, %v2982_v21, 0.0  ;;  %v3002_v54 = vsel %vm2966_vm10, %v2982_v21, 0.0  ;;  %v8012_v44 = vadd.f32 %v2986_v17, %v2930_v27  ;;  %vm3115_vm8 = vcmp.eq.s32.totalorder %v7465_v53, 32  ;;  %v8059_v17 = vld [vmem:[#allocation2 + $0x20] sm:$0xff] }
 0x3d2   :  { %v8015_v1 = vadd.f32 %v2990_v63, %v2934_v19  ;;  %v8017_v59 = vadd.f32 %v2994_v29, %v2938_v37  ;;  %v3135_v45 = vsel %vm3099_vm7, %v3122_v24, 0.0  ;;  %v3139_v11 = vsel %vm3103_vm5, %v3122_v24, 0.0  ;;  %v8062_v63 = vld [vmem:[#allocation2 + $0x40] sm:$0xff] }
 0x3d3   :  { %v8019_v62 = vadd.f32 %v2998_v33, %v2942_v13  ;;  %v8021_v28 = vadd.f32 %v3002_v54, %v2946_v30  ;;  %v3143_v56 = vsel %vm3107_vm1, %v3122_v24, 0.0  ;;  %v3147_v38 = vsel %vm3111_vm13, %v3122_v24, 0.0  ;;  %v8068_v29 = vld [vmem:[#allocation2 + $0x80] sm:$0xf] }
 0x3d4   :  { %vm3038_vm4 = vcmp.eq.s32.totalorder %v7863_v57, 31  ;;  %vm3042_vm2 = vcmp.eq.s32.totalorder %v7868_v23, 31  ;;  %v3151_v46 = vsel %vm3115_vm8, %v3122_v24, 0.0  ;;  %vm3175_vm14 = vcmp.eq.s32.totalorder %v7445_v61, 33  ;;  %9795 = vst [vmem:[#allocation11_spill] sm:$0xff] %v8068_v29 }
 0x3d5   :  { %vm3179_vm15 = vcmp.eq.s32.totalorder %v7456_v15, 33  ;;  %v3198_v40 = vrot.slane %v8004_v49, %v5332_v3  ;;  %v3155_v31 = vadd.f32 %v3135_v45, %v7638_v2  ;;  %v3159_v25 = vadd.f32 %v3139_v11, %v7668_v32  ;;  %v8050_v32 = vld [vmem:[#allocation2] sm:$0xff] }
 0x3d6   :  { %vm3183_vm12 = vcmp.eq.s32.totalorder %v7459_v55, 33  ;;  %vm3187_vm0 = vcmp.eq.s32.totalorder %v7462_v9, 33  ;;  %v3062_v12 = vsel %vm3026_vm6, %v8000_v52, 0.0  ;;  %v3163_v48 = vadd.f32 %v3143_v56, %v7672_v16  ;;  %v8065_v15 = vld [vmem:[#allocation2 + $0x60] sm:$0xff] }
 0x3d7   :  { %v3167_v8 = vadd.f32 %v3147_v38, %v7675_v0  ;;  %vm3191_vm11 = vcmp.eq.s32.totalorder %v7465_v53, 33  ;;  %v8042_v2 = vsel %vm3030_vm3, %v8000_v52, 0.0  ;;  %v8047_v55 = vsel %vm3034_vm9, %v8000_v52, 0.0 }
 0x3d8   :  { %v3171_v9 = vadd.f32 %v3151_v46, %v7678_v50  ;;  %vm3251_vm10 = vcmp.eq.s32.totalorder %v8050_v32, 34  ;;  %v3211_v16 = vsel %vm3175_vm14, %v3198_v40, 0.0  ;;  %v3215_v53 = vsel %vm3179_vm15, %v3198_v40, 0.0 }
 0x3d9   :  { %v3219_v0 = vsel %vm3183_vm12, %v3198_v40, 0.0  ;;  %v3223_v27 = vsel %vm3187_vm0, %v3198_v40, 0.0  ;;  %v3227_v21 = vsel %vm3191_vm11, %v3198_v40, 0.0  ;;  %v3231_v19 = vadd.f32 %v3211_v16, %v3155_v31 }
 0x3da   :  { %v3235_v37 = vadd.f32 %v3215_v53, %v3159_v25  ;;  %v3274_v13 = vrot.slane %v8004_v49, %v5341_v6  ;;  %v3239_v30 = vadd.f32 %v3219_v0, %v3163_v48  ;;  %v3243_v50 = vadd.f32 %v3223_v27, %v3167_v8 }
 0x3db   :  { %vm3255_vm6 = vcmp.eq.s32.totalorder %v8059_v17, 34  ;;  %vm3259_vm3 = vcmp.eq.s32.totalorder %v8062_v63, 34  ;;  %v3247_v61 = vadd.f32 %v3227_v21, %v3171_v9  ;;  %vm3263_vm9 = vcmp.eq.s32.totalorder %v8065_v15, 34 }
 0x3dc   :  { %vm3267_vm7 = vcmp.eq.s32.totalorder %v8068_v29, 34  ;;  %vm3327_vm5 = vcmp.eq.s32.totalorder %v8050_v32, 35  ;;  %vm3331_vm1 = vcmp.eq.s32.totalorder %v8059_v17, 35  ;;  %vm3335_vm13 = vcmp.eq.s32.totalorder %v8062_v63, 35 }
 0x3dd   :  { %vm3339_vm8 = vcmp.eq.s32.totalorder %v8065_v15, 35  ;;  %v3350_v24 = vrot.slane %v8004_v49, %v5335_v4  ;;  %v3287_v33 = vsel %vm3251_vm10, %v3274_v13, 0.0  ;;  %v3291_v54 = vsel %vm3255_vm6, %v3274_v13, 0.0 }
 0x3de   :  { %v3295_v45 = vsel %vm3259_vm3, %v3274_v13, 0.0  ;;  %vm3343_vm14 = vcmp.eq.s32.totalorder %v8068_v29, 35  ;;  %v3299_v11 = vsel %vm3263_vm9, %v3274_v13, 0.0  ;;  %v3307_v56 = vadd.f32 %v3287_v33, %v3231_v19 }
 0x3df   :  { %v3311_v38 = vadd.f32 %v3291_v54, %v3235_v37  ;;  %v3315_v46 = vadd.f32 %v3295_v45, %v3239_v30  ;;  %v3074_v40 = vsel %vm3038_vm4, %v8000_v52, 0.0  ;;  %v3078_v31 = vsel %vm3042_vm2, %v8000_v52, 0.0 }
 0x3e0   :  { %v3303_v25 = vsel %vm3267_vm7, %v3274_v13, 0.0  ;;  %v3319_v48 = vadd.f32 %v3299_v11, %v3243_v50  ;;  %v8089_v8 = vadd.f32 %v3062_v12, %v8012_v44  ;;  %v3363_v16 = vsel %vm3327_vm5, %v3350_v24, 0.0 }
 0x3e1   :  { %v3323_v9 = vadd.f32 %v3303_v25, %v3247_v61  ;;  %vm3403_vm15 = vcmp.eq.s32.totalorder %v8050_v32, 36  ;;  %v3367_v53 = vsel %vm3331_vm1, %v3350_v24, 0.0  ;;  %v3371_v0 = vsel %vm3335_vm13, %v3350_v24, 0.0 }
 0x3e2   :  { %v3375_v52 = vsel %vm3339_vm8, %v3350_v24, 0.0  ;;  %v3379_v27 = vsel %vm3343_vm14, %v3350_v24, 0.0  ;;  %v3383_v44 = vadd.f32 %v3363_v16, %v3307_v56  ;;  %v3387_v12 = vadd.f32 %v3367_v53, %v3311_v38 }
 0x3e3   :  { %v3391_v21 = vadd.f32 %v3371_v0, %v3315_v46  ;;  %v3426_v19 = vrot.slane %v8004_v49, %v5530_v14  ;;  %v3395_v37 = vadd.f32 %v3375_v52, %v3319_v48  ;;  %vm3407_vm4 = vcmp.eq.s32.totalorder %v8059_v17, 36 }
 0x3e4   :  { %vm3411_vm2 = vcmp.eq.s32.totalorder %v8062_v63, 36  ;;  %vm3415_vm12 = vcmp.eq.s32.totalorder %v8065_v15, 36  ;;  %v3399_v13 = vadd.f32 %v3379_v27, %v3323_v9  ;;  %vm3419_vm0 = vcmp.eq.s32.totalorder %v8068_v29, 36 }
 0x3e5   :  { %vm3479_vm11 = vcmp.eq.s32.totalorder %v8050_v32, 37  ;;  %vm3483_vm10 = vcmp.eq.s32.totalorder %v8059_v17, 37  ;;  %vm3487_vm6 = vcmp.eq.s32.totalorder %v8062_v63, 37  ;;  %vm3491_vm3 = vcmp.eq.s32.totalorder %v8065_v15, 37 }
 0x3e6   :  { %vm3495_vm9 = vcmp.eq.s32.totalorder %v8068_v29, 37  ;;  %v3502_v30 = vrot.slane %v8004_v49, %v5533_v18  ;;  %v3439_v50 = vsel %vm3403_vm15, %v3426_v19, 0.0  ;;  %v3443_v61 = vsel %vm3407_vm4, %v3426_v19, 0.0 }
 0x3e7   :  { %v3447_v24 = vsel %vm3411_vm2, %v3426_v19, 0.0  ;;  %v3451_v33 = vsel %vm3415_vm12, %v3426_v19, 0.0  ;;  %v3455_v54 = vsel %vm3419_vm0, %v3426_v19, 0.0  ;;  %v3459_v45 = vadd.f32 %v3439_v50, %v3383_v44  ;;  %v8155_v44 = vpop.f32.mrf.mxu1  ;;  %v8159_v19 = vld [vmem:[#allocation2 + $0x10] sm:$0xff] }
 0x3e8   :  { %v3463_v11 = vadd.f32 %v3443_v61, %v3387_v12  ;;  %v3467_v56 = vadd.f32 %v3447_v24, %v3391_v21  ;;  %v8119_v38 = vadd.f32 %v8042_v2, %v8015_v1  ;;  %v8123_v46 = vadd.f32 %v8047_v55, %v8017_v59 }
 0x3e9   :  { %v3471_v25 = vadd.f32 %v3451_v33, %v3395_v37  ;;  %v3475_v48 = vadd.f32 %v3455_v54, %v3399_v13  ;;  %v8126_v9 = vadd.f32 %v3074_v40, %v8019_v62  ;;  %v8129_v16 = vadd.f32 %v3078_v31, %v8021_v28  ;;  %v8171_v33 = vld [vmem:[#allocation2 + $0x50] sm:$0xff] }
 0x3ea   :  { %v3515_v53 = vsel %vm3479_vm11, %v3502_v30, 0.0  ;;  %vm3555_vm7 = vcmp.eq.s32.totalorder %v8050_v32, 38  ;;  %v3519_v1 = vsel %vm3483_vm10, %v3502_v30, 0.0  ;;  %v3523_v59 = vsel %vm3487_vm6, %v3502_v30, 0.0  ;;  %v8174_v54 = vld [vmem:[#allocation2 + $0x70] sm:$0xff] }
 0x3eb   :  { %v3527_v2 = vsel %vm3491_vm3, %v3502_v30, 0.0  ;;  %v3531_v62 = vsel %vm3495_vm9, %v3502_v30, 0.0  ;;  %v3535_v55 = vadd.f32 %v3515_v53, %v3459_v45  ;;  %v3539_v28 = vadd.f32 %v3519_v1, %v3463_v11 }
 0x3ec   :  { %v3543_v40 = vadd.f32 %v3523_v59, %v3467_v56  ;;  %v3578_v31 = vrot.slane %v8004_v49, %v5566_v36  ;;  %v3547_v0 = vadd.f32 %v3527_v2, %v3471_v25  ;;  %v3551_v52 = vadd.f32 %v3531_v62, %v3475_v48  ;;  %v8183_v25 = vld [vmem:[#allocation2 + $0x90] sm:$0xf] }
 0x3ed   :  { %vm3559_vm5 = vcmp.eq.s32.totalorder %v8059_v17, 38  ;;  %vm3563_vm1 = vcmp.eq.s32.totalorder %v8062_v63, 38  ;;  %vm3567_vm13 = vcmp.eq.s32.totalorder %v8065_v15, 38  ;;  %vm3571_vm8 = vcmp.eq.s32.totalorder %v8068_v29, 38 }
 0x3ee   :  { %vm3631_vm14 = vcmp.eq.s32.totalorder %v8050_v32, 39  ;;  %vm3635_vm15 = vcmp.eq.s32.totalorder %v8059_v17, 39  ;;  %vm3639_vm4 = vcmp.eq.s32.totalorder %v8062_v63, 39  ;;  %vm3643_vm2 = vcmp.eq.s32.totalorder %v8065_v15, 39 }
 0x3ef   :  { %vm3647_vm12 = vcmp.eq.s32.totalorder %v8068_v29, 39  ;;  %v3654_v27 = vrot.slane %v8004_v49, %v5573_v39  ;;  %v3591_v12 = vsel %vm3555_vm7, %v3578_v31, 0.0  ;;  %v3595_v21 = vsel %vm3559_vm5, %v3578_v31, 0.0  ;;  %v8168_v49 = vld [vmem:[#allocation2 + $0x30] sm:$0xff] }
 0x3f0   :  { %vm3101_vm0 = vcmp.eq.s32.totalorder %v8159_v19, 32  ;;  %v3130_v37 = vrot.slane %v8155_v44, %v5338_v5  ;;  %v3599_v13 = vsel %vm3563_vm1, %v3578_v31, 0.0  ;;  %v3603_v30 = vsel %vm3567_vm13, %v3578_v31, 0.0 }
 0x3f1   :  { %v3607_v50 = vsel %vm3571_vm8, %v3578_v31, 0.0  ;;  %v8164_v61 = vadd.f32 %v3591_v12, %v3535_v55  ;;  %v8166_v24 = vadd.f32 %v3595_v21, %v3539_v28  ;;  %vm3105_vm11 = vcmp.eq.s32.totalorder %v8168_v49, 32 }
 0x3f2   :  { %vm3109_vm10 = vcmp.eq.s32.totalorder %v8171_v33, 32  ;;  %vm3113_vm6 = vcmp.eq.s32.totalorder %v8174_v54, 32  ;;  %v8177_v45 = vadd.f32 %v3599_v13, %v3543_v40  ;;  %v8179_v11 = vadd.f32 %v3603_v30, %v3547_v0 }
 0x3f3   :  { %v8181_v56 = vadd.f32 %v3607_v50, %v3551_v52  ;;  %vm3117_vm3 = vcmp.eq.s32.totalorder %v8183_v25, 32  ;;  %v8188_v48 = vsel %vm3631_vm14, %v3654_v27, 0.0  ;;  %v8192_v53 = vsel %vm3635_vm15, %v3654_v27, 0.0 }
 0x3f4   :  { %v8196_v1 = vsel %vm3639_vm4, %v3654_v27, 0.0  ;;  %v3137_v59 = vsel %vm3101_vm0, %v3130_v37, 0.0  ;;  %v8202_v2 = vsel %vm3643_vm2, %v3654_v27, 0.0  ;;  %v3141_v62 = vsel %vm3105_vm11, %v3130_v37, 0.0 }
 0x3f5   :  { %v3145_v55 = vsel %vm3109_vm10, %v3130_v37, 0.0  ;;  %v3149_v28 = vsel %vm3113_vm6, %v3130_v37, 0.0  ;;  %v8206_v40 = vsel %vm3647_vm12, %v3654_v27, 0.0  ;;  %v3153_v31 = vsel %vm3117_vm3, %v3130_v37, 0.0 }
 0x3f6   :  { %vm3177_vm9 = vcmp.eq.s32.totalorder %v8159_v19, 33  ;;  %v3206_v0 = vrot.slane %v8155_v44, %v5332_v3  ;;  %v3157_v52 = vadd.f32 %v3137_v59, %v7759_v47  ;;  %vm3181_vm7 = vcmp.eq.s32.totalorder %v8168_v49, 33 }
 0x3f7   :  { %vm3185_vm5 = vcmp.eq.s32.totalorder %v8171_v33, 33  ;;  %vm3189_vm1 = vcmp.eq.s32.totalorder %v8174_v54, 33  ;;  %v3161_v12 = vadd.f32 %v3141_v62, %v7786_v60  ;;  %v3165_v21 = vadd.f32 %v3145_v55, %v7789_v26 }
 0x3f8   :  { %v3169_v27 = vadd.f32 %v3149_v28, %v7805_v41  ;;  %vm3193_vm13 = vcmp.eq.s32.totalorder %v8183_v25, 33  ;;  %v3173_v37 = vadd.f32 %v3153_v31, %v7819_v7  ;;  %vm3253_vm8 = vcmp.eq.s32.totalorder %v8159_v19, 34 }
 0x3f9   :  { %vm3257_vm14 = vcmp.eq.s32.totalorder %v8168_v49, 34  ;;  %vm3261_vm15 = vcmp.eq.s32.totalorder %v8171_v33, 34  ;;  %v3213_v47 = vsel %vm3177_vm9, %v3206_v0, 0.0  ;;  %v3217_v13 = vsel %vm3181_vm7, %v3206_v0, 0.0 }
 0x3fa   :  { %vm3265_vm4 = vcmp.eq.s32.totalorder %v8174_v54, 34  ;;  %v3282_v60 = vrot.slane %v8155_v44, %v5341_v6  ;;  %v3221_v26 = vsel %vm3185_vm5, %v3206_v0, 0.0  ;;  %v3225_v30 = vsel %vm3189_vm1, %v3206_v0, 0.0 }
 0x3fb   :  { %v3229_v41 = vsel %vm3193_vm13, %v3206_v0, 0.0  ;;  %v3233_v50 = vadd.f32 %v3213_v47, %v3157_v52  ;;  %v3237_v59 = vadd.f32 %v3217_v13, %v3161_v12  ;;  %v3241_v62 = vadd.f32 %v3221_v26, %v3165_v21 }
 0x3fc   :  { %v3245_v7 = vadd.f32 %v3225_v30, %v3169_v27  ;;  %vm3269_vm2 = vcmp.eq.s32.totalorder %v8183_v25, 34  ;;  %v3249_v55 = vadd.f32 %v3229_v41, %v3173_v37  ;;  %vm3329_vm12 = vcmp.eq.s32.totalorder %v8159_v19, 35 }
 0x3fd   :  { %vm3333_vm0 = vcmp.eq.s32.totalorder %v8168_v49, 35  ;;  %vm3337_vm11 = vcmp.eq.s32.totalorder %v8171_v33, 35  ;;  %v3289_v28 = vsel %vm3253_vm8, %v3282_v60, 0.0  ;;  %v3293_v31 = vsel %vm3257_vm14, %v3282_v60, 0.0 }
 0x3fe   :  { %vm3341_vm10 = vcmp.eq.s32.totalorder %v8174_v54, 35  ;;  %v3358_v0 = vrot.slane %v8155_v44, %v5335_v4  ;;  %v3297_v52 = vsel %vm3261_vm15, %v3282_v60, 0.0  ;;  %v3301_v12 = vsel %vm3265_vm4, %v3282_v60, 0.0 }
 0x3ff   :  { %v3305_v21 = vsel %vm3269_vm2, %v3282_v60, 0.0  ;;  %v3309_v27 = vadd.f32 %v3289_v28, %v3233_v50  ;;  %v3313_v37 = vadd.f32 %v3293_v31, %v3237_v59  ;;  %v3317_v47 = vadd.f32 %v3297_v52, %v3241_v62 }
 0x400   :  { %v3321_v13 = vadd.f32 %v3301_v12, %v3245_v7  ;;  %vm3345_vm6 = vcmp.eq.s32.totalorder %v8183_v25, 35  ;;  %v3325_v26 = vadd.f32 %v3305_v21, %v3249_v55  ;;  %vm3405_vm3 = vcmp.eq.s32.totalorder %v8159_v19, 36 }
 0x401   :  { %vm3409_vm9 = vcmp.eq.s32.totalorder %v8168_v49, 36  ;;  %vm3413_vm7 = vcmp.eq.s32.totalorder %v8171_v33, 36  ;;  %v3365_v30 = vsel %vm3329_vm12, %v3358_v0, 0.0  ;;  %v3369_v41 = vsel %vm3333_vm0, %v3358_v0, 0.0 }
 0x402   :  { %vm3417_vm5 = vcmp.eq.s32.totalorder %v8174_v54, 36  ;;  %v3434_v60 = vrot.slane %v8155_v44, %v5530_v14  ;;  %v3373_v50 = vsel %vm3337_vm11, %v3358_v0, 0.0  ;;  %v3377_v59 = vsel %vm3341_vm10, %v3358_v0, 0.0 }
 0x403   :  { %v3381_v62 = vsel %vm3345_vm6, %v3358_v0, 0.0  ;;  %v3385_v7 = vadd.f32 %v3365_v30, %v3309_v27  ;;  %v3389_v55 = vadd.f32 %v3369_v41, %v3313_v37  ;;  %v3393_v28 = vadd.f32 %v3373_v50, %v3317_v47 }
 0x404   :  { %v3397_v31 = vadd.f32 %v3377_v59, %v3321_v13  ;;  %vm3421_vm1 = vcmp.eq.s32.totalorder %v8183_v25, 36  ;;  %v3401_v52 = vadd.f32 %v3381_v62, %v3325_v26  ;;  %vm3481_vm13 = vcmp.eq.s32.totalorder %v8159_v19, 37 }
 0x405   :  { %vm3485_vm8 = vcmp.eq.s32.totalorder %v8168_v49, 37  ;;  %vm3489_vm14 = vcmp.eq.s32.totalorder %v8171_v33, 37  ;;  %v3441_v12 = vsel %vm3405_vm3, %v3434_v60, 0.0  ;;  %v3445_v21 = vsel %vm3409_vm9, %v3434_v60, 0.0 }
 0x406   :  { %vm3493_vm15 = vcmp.eq.s32.totalorder %v8174_v54, 37  ;;  %v3510_v0 = vrot.slane %v8155_v44, %v5533_v18  ;;  %v3449_v27 = vsel %vm3413_vm7, %v3434_v60, 0.0  ;;  %v3453_v37 = vsel %vm3417_vm5, %v3434_v60, 0.0 }
 0x407   :  { %v3457_v47 = vsel %vm3421_vm1, %v3434_v60, 0.0  ;;  %v3461_v13 = vadd.f32 %v3441_v12, %v3385_v7  ;;  %v3465_v26 = vadd.f32 %v3445_v21, %v3389_v55  ;;  %v3469_v30 = vadd.f32 %v3449_v27, %v3393_v28 }
 0x408   :  { %v3473_v41 = vadd.f32 %v3453_v37, %v3397_v31  ;;  %vm3497_vm4 = vcmp.eq.s32.totalorder %v8183_v25, 37  ;;  %v3477_v50 = vadd.f32 %v3457_v47, %v3401_v52  ;;  %vm3557_vm2 = vcmp.eq.s32.totalorder %v8159_v19, 38 }
 0x409   :  { %vm3561_vm12 = vcmp.eq.s32.totalorder %v8168_v49, 38  ;;  %vm3565_vm0 = vcmp.eq.s32.totalorder %v8171_v33, 38  ;;  %v3517_v59 = vsel %vm3481_vm13, %v3510_v0, 0.0  ;;  %v3521_v62 = vsel %vm3485_vm8, %v3510_v0, 0.0 }
 0x40a   :  { %vm3569_vm11 = vcmp.eq.s32.totalorder %v8174_v54, 38  ;;  %v3586_v60 = vrot.slane %v8155_v44, %v5566_v36  ;;  %v3525_v7 = vsel %vm3489_vm14, %v3510_v0, 0.0  ;;  %v3529_v55 = vsel %vm3493_vm15, %v3510_v0, 0.0 }
 0x40b   :  { %v3533_v28 = vsel %vm3497_vm4, %v3510_v0, 0.0  ;;  %v3537_v31 = vadd.f32 %v3517_v59, %v3461_v13  ;;  %v3541_v52 = vadd.f32 %v3521_v62, %v3465_v26  ;;  %v3545_v12 = vadd.f32 %v3525_v7, %v3469_v30  ;;  %v8297_v13 = vpop.f32.mrf.mxu0 }
 0x40c   :  { %v3549_v21 = vadd.f32 %v3529_v55, %v3473_v41  ;;  %vm3573_vm10 = vcmp.eq.s32.totalorder %v8183_v25, 38  ;;  %v3553_v27 = vadd.f32 %v3533_v28, %v3477_v50  ;;  %vm3633_vm6 = vcmp.eq.s32.totalorder %v8159_v19, 39  ;;  %v8314_v55 = vld [vmem:[#allocation2 + $0x8] sm:$0xff] }
 0x40d   :  { %vm3637_vm3 = vcmp.eq.s32.totalorder %v8168_v49, 39  ;;  %vm3641_vm9 = vcmp.eq.s32.totalorder %v8171_v33, 39  ;;  %v3593_v37 = vsel %vm3557_vm2, %v3586_v60, 0.0  ;;  %v3597_v47 = vsel %vm3561_vm12, %v3586_v60, 0.0  ;;  %v8344_v49 = vld [vmem:[#allocation2 + $0x88] sm:$0xf] }
 0x40e   :  { %vm3645_vm7 = vcmp.eq.s32.totalorder %v8174_v54, 39  ;;  %v3662_v0 = vrot.slane %v8155_v44, %v5573_v39  ;;  %v3601_v26 = vsel %vm3565_vm0, %v3586_v60, 0.0  ;;  %v3605_v30 = vsel %vm3569_vm11, %v3586_v60, 0.0 }
 0x40f   :  { %v3609_v41 = vsel %vm3573_vm10, %v3586_v60, 0.0  ;;  %v8303_v50 = vadd.f32 %v3593_v37, %v3537_v31  ;;  %v8305_v59 = vadd.f32 %v3597_v47, %v3541_v52  ;;  %v8307_v62 = vadd.f32 %v3601_v26, %v3545_v12  ;;  %v8331_v52 = vld [vmem:[#allocation2 + $0x68] sm:$0xff] }
 0x410   :  { %v8309_v7 = vadd.f32 %v3605_v30, %v3549_v21  ;;  %vm3649_vm5 = vcmp.eq.s32.totalorder %v8183_v25, 39  ;;  %v8312_v44 = vadd.f32 %v3609_v41, %v3553_v27  ;;  %vm3100_vm1 = vcmp.eq.s32.totalorder %v8314_v55, 32  ;;  %v8328_v25 = vld [vmem:[#allocation2 + $0x48] sm:$0xff] }
 0x411   :  { %9796 = vst [vmem:[#allocation12_spill] sm:$0xff] %v8303_v50  ;;  %9797 = vst [vmem:[#allocation13_spill] sm:$0xff] %v8305_v59  ;;  %vm3104_vm13 = vcmp.eq.s32.totalorder %v7723_v34, 32  ;;  %v3126_v60 = vrot.slane %v8297_v13, %v5338_v5  ;;  %v8322_v28 = vsel %vm3633_vm6, %v3662_v0, 0.0  ;;  %v8326_v31 = vsel %vm3637_vm3, %v3662_v0, 0.0  ;;  %v8348_v27 = vld [vmem:[#allocation2 + $0x28] sm:$0xff] }
 0x412   :  { %9798 = vst [vmem:[#allocation14_spill] sm:$0xff] %v8307_v62  ;;  %9799 = vst [vmem:[#allocation15_spill] sm:$0xff] %v8309_v7  ;;  %vm3108_vm8 = vcmp.eq.s32.totalorder %v8328_v25, 32  ;;  %vm3112_vm14 = vcmp.eq.s32.totalorder %v8331_v52, 32  ;;  %v8336_v12 = vsel %vm3641_vm9, %v3662_v0, 0.0  ;;  %v8340_v19 = vsel %vm3645_vm7, %v3662_v0, 0.0 }
 0x413   :  { %9800 = vst [vmem:[#allocation16_spill] sm:$0xff] %v8312_v44  ;;  %9801 = vst [vmem:[#allocation9_spill] sm:$0xff] %v8322_v28  ;;  %v8342_v21 = vsel %vm3649_vm5, %v3662_v0, 0.0  ;;  %vm3116_vm15 = vcmp.eq.s32.totalorder %v8344_v49, 32  ;;  %vm3176_vm4 = vcmp.eq.s32.totalorder %v8314_v55, 33  ;;  %vm3180_vm2 = vcmp.eq.s32.totalorder %v8348_v27, 33 }
 0x414   :  { %9802 = vst [vmem:[#allocation17_spill] sm:$0xff] %v8326_v31  ;;  %9803 = vst [vmem:[#allocation18_spill] sm:$0xff] %v8336_v12  ;;  %vm3184_vm12 = vcmp.eq.s32.totalorder %v8328_v25, 33  ;;  %vm3188_vm0 = vcmp.eq.s32.totalorder %v8331_v52, 33  ;;  %v3136_v33 = vsel %vm3100_vm1, %v3126_v60, 0.0  ;;  %v3140_v54 = vsel %vm3104_vm13, %v3126_v60, 0.0 }
 0x415   :  { %9804 = vst [vmem:[#allocation19_spill] sm:$0xff] %v8340_v19  ;;  %9805 = vst [vmem:[#allocation20_spill] sm:$0xff] %v8342_v21  ;;  %vm3192_vm11 = vcmp.eq.s32.totalorder %v8344_v49, 33  ;;  %v3202_v37 = vrot.slane %v8297_v13, %v5332_v3  ;;  %v3144_v47 = vsel %vm3108_vm8, %v3126_v60, 0.0  ;;  %v3148_v0 = vsel %vm3112_vm14, %v3126_v60, 0.0 }
 0x416   :  { %v3152_v26 = vsel %vm3116_vm15, %v3126_v60, 0.0  ;;  %v3156_v30 = vadd.f32 %v3136_v33, %v7937_v51  ;;  %v3160_v41 = vadd.f32 %v3140_v54, %v7940_v10  ;;  %v3164_v21 = vadd.f32 %v3144_v47, %v7970_v43 }
 0x417   :  { %v3168_v34 = vadd.f32 %v3148_v0, %v7973_v35  ;;  %v3172_v44 = vadd.f32 %v3152_v26, %v7976_v20  ;;  %vm3252_vm10 = vcmp.eq.s32.totalorder %v8314_v55, 34  ;;  %vm3256_vm6 = vcmp.eq.s32.totalorder %v8348_v27, 34 }
 0x418   :  { %vm3260_vm3 = vcmp.eq.s32.totalorder %v8328_v25, 34  ;;  %vm3264_vm9 = vcmp.eq.s32.totalorder %v8331_v52, 34  ;;  %v3212_v60 = vsel %vm3176_vm4, %v3202_v37, 0.0  ;;  %v3216_v51 = vsel %vm3180_vm2, %v3202_v37, 0.0 }
 0x419   :  { %vm3268_vm7 = vcmp.eq.s32.totalorder %v8344_v49, 34  ;;  %v3278_v10 = vrot.slane %v8297_v13, %v5341_v6  ;;  %v3220_v43 = vsel %vm3184_vm12, %v3202_v37, 0.0  ;;  %v3224_v35 = vsel %vm3188_vm0, %v3202_v37, 0.0 }
 0x41a   :  { %v3228_v20 = vsel %vm3192_vm11, %v3202_v37, 0.0  ;;  %v3232_v33 = vadd.f32 %v3212_v60, %v3156_v30  ;;  %v3236_v54 = vadd.f32 %v3216_v51, %v3160_v41  ;;  %v3240_v47 = vadd.f32 %v3220_v43, %v3164_v21 }
 0x41b   :  { %v3244_v0 = vadd.f32 %v3224_v35, %v3168_v34  ;;  %v3248_v26 = vadd.f32 %v3228_v20, %v3172_v44  ;;  %vm3328_vm5 = vcmp.eq.s32.totalorder %v8314_v55, 35  ;;  %vm3332_vm1 = vcmp.eq.s32.totalorder %v8348_v27, 35 }
 0x41c   :  { %vm3336_vm13 = vcmp.eq.s32.totalorder %v8328_v25, 35  ;;  %vm3340_vm8 = vcmp.eq.s32.totalorder %v8331_v52, 35  ;;  %v3288_v19 = vsel %vm3252_vm10, %v3278_v10, 0.0  ;;  %v3292_v7 = vsel %vm3256_vm6, %v3278_v10, 0.0 }
 0x41d   :  { %vm3344_vm14 = vcmp.eq.s32.totalorder %v8344_v49, 35  ;;  %v3354_v21 = vrot.slane %v8297_v13, %v5335_v4  ;;  %v3296_v44 = vsel %vm3260_vm3, %v3278_v10, 0.0  ;;  %v3300_v37 = vsel %vm3264_vm9, %v3278_v10, 0.0 }
 0x41e   :  { %v3304_v30 = vsel %vm3268_vm7, %v3278_v10, 0.0  ;;  %v3308_v41 = vadd.f32 %v3288_v19, %v3232_v33  ;;  %v3312_v34 = vadd.f32 %v3292_v7, %v3236_v54  ;;  %v3316_v60 = vadd.f32 %v3296_v44, %v3240_v47 }
 0x41f   :  { %v3320_v51 = vadd.f32 %v3300_v37, %v3244_v0  ;;  %v3324_v43 = vadd.f32 %v3304_v30, %v3248_v26  ;;  %vm3404_vm15 = vcmp.eq.s32.totalorder %v8314_v55, 36  ;;  %vm3408_vm4 = vcmp.eq.s32.totalorder %v8348_v27, 36 }
 0x420   :  { %vm3412_vm2 = vcmp.eq.s32.totalorder %v8328_v25, 36  ;;  %vm3416_vm12 = vcmp.eq.s32.totalorder %v8331_v52, 36  ;;  %v3364_v35 = vsel %vm3328_vm5, %v3354_v21, 0.0  ;;  %v3368_v20 = vsel %vm3332_vm1, %v3354_v21, 0.0 }
 0x421   :  { %vm3420_vm0 = vcmp.eq.s32.totalorder %v8344_v49, 36  ;;  %v3430_v7 = vrot.slane %v8297_v13, %v5530_v14  ;;  %v3372_v19 = vsel %vm3336_vm13, %v3354_v21, 0.0  ;;  %v3376_v10 = vsel %vm3340_vm8, %v3354_v21, 0.0 }
 0x422   :  { %v3380_v33 = vsel %vm3344_vm14, %v3354_v21, 0.0  ;;  %v3384_v54 = vadd.f32 %v3364_v35, %v3308_v41  ;;  %v3388_v47 = vadd.f32 %v3368_v20, %v3312_v34  ;;  %v3392_v0 = vadd.f32 %v3372_v19, %v3316_v60 }
 0x423   :  { %v3396_v26 = vadd.f32 %v3376_v10, %v3320_v51  ;;  %v3400_v44 = vadd.f32 %v3380_v33, %v3324_v43  ;;  %vm3480_vm11 = vcmp.eq.s32.totalorder %v8314_v55, 37  ;;  %vm3484_vm10 = vcmp.eq.s32.totalorder %v8348_v27, 37 }
 0x424   :  { %vm3488_vm6 = vcmp.eq.s32.totalorder %v8328_v25, 37  ;;  %vm3492_vm3 = vcmp.eq.s32.totalorder %v8331_v52, 37  ;;  %v3440_v37 = vsel %vm3404_vm15, %v3430_v7, 0.0  ;;  %v3444_v30 = vsel %vm3408_vm4, %v3430_v7, 0.0 }
 0x425   :  { %vm3496_vm9 = vcmp.eq.s32.totalorder %v8344_v49, 37  ;;  %v3506_v21 = vrot.slane %v8297_v13, %v5533_v18  ;;  %v3448_v41 = vsel %vm3412_vm2, %v3430_v7, 0.0  ;;  %v3452_v34 = vsel %vm3416_vm12, %v3430_v7, 0.0 }
 0x426   :  { %v3456_v60 = vsel %vm3420_vm0, %v3430_v7, 0.0  ;;  %v3460_v51 = vadd.f32 %v3440_v37, %v3384_v54  ;;  %v3464_v43 = vadd.f32 %v3444_v30, %v3388_v47  ;;  %v3468_v35 = vadd.f32 %v3448_v41, %v3392_v0 }
 0x427   :  { %v3472_v20 = vadd.f32 %v3452_v34, %v3396_v26  ;;  %v3476_v19 = vadd.f32 %v3456_v60, %v3400_v44  ;;  %vm3556_vm7 = vcmp.eq.s32.totalorder %v8314_v55, 38  ;;  %vm3560_vm5 = vcmp.eq.s32.totalorder %v8348_v27, 38  ;;  %v8454_v44 = vpop.f32.mrf.mxu1 }
 0x428   :  { %vm3564_vm1 = vcmp.eq.s32.totalorder %v8328_v25, 38  ;;  %v3582_v10 = vrot.slane %v8297_v13, %v5566_v36  ;;  %v3516_v33 = vsel %vm3480_vm11, %v3506_v21, 0.0  ;;  %v3520_v7 = vsel %vm3484_vm10, %v3506_v21, 0.0 }
 0x429   :  { %vm3568_vm13 = vcmp.eq.s32.totalorder %v8331_v52, 38  ;;  %vm3572_vm8 = vcmp.eq.s32.totalorder %v8344_v49, 38  ;;  %v3524_v54 = vsel %vm3488_vm6, %v3506_v21, 0.0  ;;  %v3528_v47 = vsel %vm3492_vm3, %v3506_v21, 0.0 }
 0x42a   :  { %v3532_v0 = vsel %vm3496_vm9, %v3506_v21, 0.0  ;;  %v3536_v26 = vadd.f32 %v3516_v33, %v3460_v51  ;;  %v3540_v37 = vadd.f32 %v3520_v7, %v3464_v43  ;;  %v3544_v30 = vadd.f32 %v3524_v54, %v3468_v35  ;;  %v8479_v43 = vld [vmem:[#allocation2 + $0x18] sm:$0xff] }
 0x42b   :  { %v8456_v41 = vadd.f32 %v3528_v47, %v3472_v20  ;;  %v8458_v34 = vadd.f32 %v3532_v0, %v3476_v19  ;;  %v3592_v60 = vsel %vm3556_vm7, %v3582_v10, 0.0  ;;  %v3596_v12 = vsel %vm3560_vm5, %v3582_v10, 0.0 }
 0x42c   :  { %v3600_v62 = vsel %vm3564_vm1, %v3582_v10, 0.0  ;;  %v8466_v31 = vsel %vm3568_vm13, %v3582_v10, 0.0  ;;  %vm3102_vm14 = vcmp.eq.s32.totalorder %v7844_v22, 32  ;;  %vm3106_vm15 = vcmp.eq.s32.totalorder %v7857_v42, 32 }
 0x42d   :  { %vm3110_vm4 = vcmp.eq.s32.totalorder %v7860_v58, 32  ;;  %v3134_v21 = vrot.slane %v8454_v44, %v5338_v5  ;;  %v8475_v51 = vsel %vm3572_vm8, %v3582_v10, 0.0  ;;  %vm3114_vm2 = vcmp.eq.s32.totalorder %v7863_v57, 32 }
 0x42e   :  { %vm3118_vm12 = vcmp.eq.s32.totalorder %v7868_v23, 32  ;;  %vm3178_vm0 = vcmp.eq.s32.totalorder %v8479_v43, 33  ;;  %vm3182_vm11 = vcmp.eq.s32.totalorder %v7857_v42, 33  ;;  %vm3186_vm10 = vcmp.eq.s32.totalorder %v7860_v58, 33  ;;  %v8519_v42 = vld [vmem:[#allocation2 + $0x38] sm:$0xff] }
 0x42f   :  { %vm3190_vm6 = vcmp.eq.s32.totalorder %v7863_v57, 33  ;;  %v3210_v22 = vrot.slane %v8454_v44, %v5332_v3  ;;  %v3138_v35 = vsel %vm3102_vm14, %v3134_v21, 0.0  ;;  %v3142_v20 = vsel %vm3106_vm15, %v3134_v21, 0.0  ;;  %v8522_v58 = vld [vmem:[#allocation2 + $0x58] sm:$0xff] }
 0x430   :  { %v3146_v19 = vsel %vm3110_vm4, %v3134_v21, 0.0  ;;  %vm3194_vm3 = vcmp.eq.s32.totalorder %v7868_v23, 33  ;;  %vm3632_vm9 = vcmp.eq.s32.totalorder %v8314_v55, 39  ;;  %v3150_v10 = vsel %vm3114_vm2, %v3134_v21, 0.0  ;;  %v8525_v23 = vld [vmem:[#allocation2 + $0x78] sm:$0xff] }
 0x431   :  { %v3158_v33 = vadd.f32 %v3138_v35, %v8089_v8  ;;  %v3162_v7 = vadd.f32 %v3142_v20, %v8119_v38  ;;  %v3166_v54 = vadd.f32 %v3146_v19, %v8123_v46  ;;  %v8492_v47 = vadd.f32 %v3592_v60, %v3536_v26 }
 0x432   :  { %v8494_v0 = vadd.f32 %v3596_v12, %v3540_v37  ;;  %v3154_v59 = vsel %vm3118_vm12, %v3134_v21, 0.0  ;;  %v3170_v28 = vadd.f32 %v3150_v10, %v8126_v9  ;;  %v8499_v50 = vadd.f32 %v3600_v62, %v3544_v30  ;;  %v8528_v30 = vld [vmem:[#allocation2 + $0x98] sm:$0xf] }
 0x433   :  { %v8503_v29 = vrot.slane %v8297_v13, %v5573_v39  ;;  %v3174_v8 = vadd.f32 %v3154_v59, %v8129_v16  ;;  %v3214_v38 = vsel %vm3178_vm0, %v3210_v22, 0.0  ;;  %v3218_v46 = vsel %vm3182_vm11, %v3210_v22, 0.0 }
 0x434   :  { %v3222_v12 = vsel %vm3186_vm10, %v3210_v22, 0.0  ;;  %v3226_v9 = vsel %vm3190_vm6, %v3210_v22, 0.0  ;;  %v3230_v62 = vsel %vm3194_vm3, %v3210_v22, 0.0  ;;  %v3234_v26 = vadd.f32 %v3214_v38, %v3158_v33 }
 0x435   :  { %v3238_v13 = vadd.f32 %v3218_v46, %v3162_v7  ;;  %v3242_v37 = vadd.f32 %v3222_v12, %v3166_v54  ;;  %v3286_v16 = vrot.slane %v8454_v44, %v5341_v6  ;;  %v3246_v59 = vadd.f32 %v3226_v9, %v3170_v28 }
 0x436   :  { %vm3254_vm7 = vcmp.eq.s32.totalorder %v8479_v43, 34  ;;  %vm3258_vm5 = vcmp.eq.s32.totalorder %v8519_v42, 34  ;;  %vm3262_vm1 = vcmp.eq.s32.totalorder %v8522_v58, 34  ;;  %v3250_v57 = vadd.f32 %v3230_v62, %v3174_v8 }
 0x437   :  { %vm3266_vm13 = vcmp.eq.s32.totalorder %v8525_v23, 34  ;;  %vm3270_vm8 = vcmp.eq.s32.totalorder %v8528_v30, 34  ;;  %vm3330_vm14 = vcmp.eq.s32.totalorder %v8479_v43, 35  ;;  %vm3334_vm15 = vcmp.eq.s32.totalorder %v8519_v42, 35 }
 0x438   :  { %vm3338_vm4 = vcmp.eq.s32.totalorder %v8522_v58, 35  ;;  %vm3342_vm2 = vcmp.eq.s32.totalorder %v8525_v23, 35  ;;  %v3362_v28 = vrot.slane %v8454_v44, %v5335_v4  ;;  %vm3636_vm12 = vcmp.eq.s32.totalorder %v8348_v27, 39 }
 0x439   :  { %vm3640_vm0 = vcmp.eq.s32.totalorder %v8328_v25, 39  ;;  %vm3644_vm11 = vcmp.eq.s32.totalorder %v8331_v52, 39  ;;  %v3290_v60 = vsel %vm3254_vm7, %v3286_v16, 0.0  ;;  %v3294_v21 = vsel %vm3258_vm5, %v3286_v16, 0.0 }
 0x43a   :  { %v3298_v22 = vsel %vm3262_vm1, %v3286_v16, 0.0  ;;  %vm3346_vm10 = vcmp.eq.s32.totalorder %v8528_v30, 35  ;;  %vm3648_vm6 = vcmp.eq.s32.totalorder %v8344_v49, 39  ;;  %v3302_v35 = vsel %vm3266_vm13, %v3286_v16, 0.0 }
 0x43b   :  { %v3310_v20 = vadd.f32 %v3290_v60, %v3234_v26  ;;  %v3314_v19 = vadd.f32 %v3294_v21, %v3238_v13  ;;  %v3318_v10 = vadd.f32 %v3298_v22, %v3242_v37  ;;  %v8552_v33 = vadd.f32 %v8466_v31, %v8456_v41 }
 0x43c   :  { %v8556_v7 = vadd.f32 %v8475_v51, %v8458_v34  ;;  %v3306_v54 = vsel %vm3270_vm8, %v3286_v16, 0.0  ;;  %v3322_v8 = vadd.f32 %v3302_v35, %v3246_v59  ;;  %v8563_v38 = vsel %vm3632_vm9, %v8503_v29, 0.0 }
 0x43d   :  { %v3326_v46 = vadd.f32 %v3306_v54, %v3250_v57  ;;  %v3366_v12 = vsel %vm3330_vm14, %v3362_v28, 0.0  ;;  %v3370_v31 = vsel %vm3334_vm15, %v3362_v28, 0.0  ;;  %v3374_v41 = vsel %vm3338_vm4, %v3362_v28, 0.0 }
 0x43e   :  { %v3378_v34 = vsel %vm3342_vm2, %v3362_v28, 0.0  ;;  %v3382_v51 = vsel %vm3346_vm10, %v3362_v28, 0.0  ;;  %v3438_v55 = vrot.slane %v8454_v44, %v5530_v14  ;;  %v3386_v9 = vadd.f32 %v3366_v12, %v3310_v20 }
 0x43f   :  { %v3390_v62 = vadd.f32 %v3370_v31, %v3314_v19  ;;  %v3394_v26 = vadd.f32 %v3374_v41, %v3318_v10  ;;  %vm3406_vm3 = vcmp.eq.s32.totalorder %v8479_v43, 36  ;;  %v3398_v13 = vadd.f32 %v3378_v34, %v3322_v8 }
 0x440   :  { %vm3410_vm9 = vcmp.eq.s32.totalorder %v8519_v42, 36  ;;  %vm3414_vm7 = vcmp.eq.s32.totalorder %v8522_v58, 36  ;;  %vm3418_vm5 = vcmp.eq.s32.totalorder %v8525_v23, 36  ;;  %v3402_v37 = vadd.f32 %v3382_v51, %v3326_v46 }
 0x441   :  { %vm3422_vm1 = vcmp.eq.s32.totalorder %v8528_v30, 36  ;;  %vm3482_vm13 = vcmp.eq.s32.totalorder %v8479_v43, 37  ;;  %vm3486_vm8 = vcmp.eq.s32.totalorder %v8519_v42, 37  ;;  %v3442_v16 = vsel %vm3406_vm3, %v3438_v55, 0.0 }
 0x442   :  { %vm3490_vm14 = vcmp.eq.s32.totalorder %v8522_v58, 37  ;;  %vm3494_vm15 = vcmp.eq.s32.totalorder %v8525_v23, 37  ;;  %v3514_v59 = vrot.slane %v8454_v44, %v5533_v18  ;;  %v3446_v57 = vsel %vm3410_vm9, %v3438_v55, 0.0 }
 0x443   :  { %v3450_v28 = vsel %vm3414_vm7, %v3438_v55, 0.0  ;;  %v3454_v60 = vsel %vm3418_vm5, %v3438_v55, 0.0  ;;  %v3462_v21 = vadd.f32 %v3442_v16, %v3386_v9  ;;  %v3466_v22 = vadd.f32 %v3446_v57, %v3390_v62 }
 0x444   :  { %v3470_v35 = vadd.f32 %v3450_v28, %v3394_v26  ;;  %v3474_v20 = vadd.f32 %v3454_v60, %v3398_v13  ;;  %vm3498_vm4 = vcmp.eq.s32.totalorder %v8528_v30, 37  ;;  %v8592_v19 = vsel %vm3636_vm12, %v8503_v29, 0.0 }
 0x445   :  { %v8597_v10 = vsel %vm3640_vm0, %v8503_v29, 0.0  ;;  %v8602_v54 = vsel %vm3644_vm11, %v8503_v29, 0.0  ;;  %v3458_v8 = vsel %vm3422_vm1, %v3438_v55, 0.0  ;;  %v8609_v46 = vsel %vm3648_vm6, %v8503_v29, 0.0 }
 0x446   :  { %v3478_v27 = vadd.f32 %v3458_v8, %v3402_v37  ;;  %v3518_v12 = vsel %vm3482_vm13, %v3514_v59, 0.0  ;;  %v3522_v25 = vsel %vm3486_vm8, %v3514_v59, 0.0  ;;  %v3526_v52 = vsel %vm3490_vm14, %v3514_v59, 0.0 }
 0x447   :  { %v3530_v31 = vsel %vm3494_vm15, %v3514_v59, 0.0  ;;  %v3534_v41 = vsel %vm3498_vm4, %v3514_v59, 0.0  ;;  %v3538_v34 = vadd.f32 %v3518_v12, %v3462_v21  ;;  %v3542_v51 = vadd.f32 %v3522_v25, %v3466_v22 }
 0x448   :  { %v3546_v55 = vadd.f32 %v3526_v52, %v3470_v35  ;;  %v3550_v49 = vadd.f32 %v3530_v31, %v3474_v20  ;;  %v3590_v29 = vrot.slane %v8454_v44, %v5566_v36  ;;  %vm3558_vm2 = vcmp.eq.s32.totalorder %v8479_v43, 38  ;;  %v549_v35 = vpop.f32.mrf.mxu0 }
 0x449   :  { %vm3562_vm12 = vcmp.eq.s32.totalorder %v8519_v42, 38  ;;  %vm3566_vm0 = vcmp.eq.s32.totalorder %v8522_v58, 38  ;;  %vm3570_vm11 = vcmp.eq.s32.totalorder %v8525_v23, 38  ;;  %v3554_v9 = vadd.f32 %v3534_v41, %v3478_v27 }
 0x44a   :  { %vm3574_vm10 = vcmp.eq.s32.totalorder %v8528_v30, 38  ;;  %vm3634_vm6 = vcmp.eq.s32.totalorder %v8479_v43, 39  ;;  %v3666_v62 = vrot.slane %v8454_v44, %v5573_v39  ;;  %vm3638_vm3 = vcmp.eq.s32.totalorder %v8519_v42, 39 }
 0x44b   :  { %vm3642_vm9 = vcmp.eq.s32.totalorder %v8522_v58, 39  ;;  %vm3646_vm7 = vcmp.eq.s32.totalorder %v8525_v23, 39  ;;  %vm3650_vm5 = vcmp.eq.s32.totalorder %v8528_v30, 39  ;;  %v3594_v26 = vsel %vm3558_vm2, %v3590_v29, 0.0  ;;  %v656_v23 = vpop.f32.mrf.mxu1 }
 0x44c   :  { %v3598_v13 = vsel %vm3562_vm12, %v3590_v29, 0.0  ;;  %v3602_v37 = vsel %vm3566_vm0, %v3590_v29, 0.0  ;;  %v3606_v16 = vsel %vm3570_vm11, %v3590_v29, 0.0  ;;  %v3610_v59 = vsel %vm3574_vm10, %v3590_v29, 0.0 }
 0x44d   :  { %v8633_v57 = vadd.f32 %v3594_v26, %v3538_v34  ;;  %v8635_v28 = vadd.f32 %v3598_v13, %v3542_v51  ;;  %v8637_v60 = vadd.f32 %v3602_v37, %v3546_v55  ;;  %v8639_v44 = vadd.f32 %v3606_v16, %v3550_v49 }
 0x44e   :  { %v8641_v42 = vadd.f32 %v3610_v59, %v3554_v9  ;;  %v8645_v21 = vsel %vm3634_vm6, %v3666_v62, 0.0  ;;  %v8647_v22 = vsel %vm3638_vm3, %v3666_v62, 0.0  ;;  %v8651_v20 = vsel %vm3642_vm9, %v3666_v62, 0.0 }
 0x44f   :  { %9806 = vst [vmem:[#allocation21_spill] sm:$0xff] %v8633_v57  ;;  %9807 = vst [vmem:[#allocation22_spill] sm:$0xff] %v8635_v28  ;;  %v8655_v8 = vsel %vm3646_vm7, %v3666_v62, 0.0  ;;  %v8659_v27 = vsel %vm3650_vm5, %v3666_v62, 0.0  ;;  %v3730_v12 = vrot.slane %v549_v35, %v5338_v5  ;;  %v3806_v43 = vrot.slane %v549_v35, %v5332_v3 }
 0x450   :  { %9808 = vst [vmem:[#allocation23_spill] sm:$0xff] %v8637_v60  ;;  %9809 = vst [vmem:[#allocation24_spill] sm:$0xff] %v8639_v44  ;;  %v8664_v25 = vrot.slane %v549_v35, %v5341_v6  ;;  %v8667_v52 = vrot.slane %v549_v35, %v5335_v4  ;;  %v8670_v58 = vrot.slane %v549_v35, %v5530_v14  ;;  %vm3707_vm1 = vcmp.eq.s32.totalorder %v8050_v32, 40  ;;  %v9828_v44 = vld [vmem:[#allocation20_spill] sm:$0xff] }
 0x451   :  { %9810 = vst [vmem:[#allocation25_spill] sm:$0xff] %v8641_v42  ;;  %9811 = vst [vmem:[#allocation26_spill] sm:$0xff] %v8645_v21  ;;  %v8673_v31 = vrot.slane %v549_v35, %v5533_v18  ;;  %v8676_v30 = vrot.slane %v549_v35, %v5566_v36  ;;  %v8679_v41 = vrot.slane %v549_v35, %v5573_v39  ;;  %vm3711_vm13 = vcmp.eq.s32.totalorder %v8059_v17, 40 }
 0x452   :  { %9812 = vst [vmem:[#allocation27_spill] sm:$0xff] %v8647_v22  ;;  %9813 = vst [vmem:[#allocation28_spill] sm:$0xff] %v8651_v20  ;;  %v8682_v34 = vrot.slane %v656_v23, %v5338_v5  ;;  %v8685_v51 = vrot.slane %v656_v23, %v5332_v3  ;;  %v8688_v55 = vrot.slane %v656_v23, %v5341_v6  ;;  %vm3715_vm8 = vcmp.eq.s32.totalorder %v8062_v63, 40 }
 0x453   :  { %9814 = vst [vmem:[#allocation29_spill] sm:$0xff] %v8655_v8  ;;  %9815 = vst [vmem:[#allocation30_spill] sm:$0xff] %v8659_v27  ;;  %v8691_v49 = vrot.slane %v656_v23, %v5335_v4  ;;  %v8694_v29 = vrot.slane %v656_v23, %v5530_v14  ;;  %v8697_v9 = vrot.slane %v656_v23, %v5533_v18  ;;  %vm3719_vm14 = vcmp.eq.s32.totalorder %v8065_v15, 40  ;;  %v9827_v8 = vld [vmem:[#allocation16_spill] sm:$0xff] }
 0x454   :  { %v8700_v62 = vrot.slane %v656_v23, %v5566_v36  ;;  %v8703_v26 = vrot.slane %v656_v23, %v5573_v39  ;;  %v3687_v13 = vadd.f32 %v8188_v48, %v8164_v61  ;;  %v3691_v37 = vadd.f32 %v8192_v53, %v8166_v24  ;;  %v9816_v61 = vld [vmem:[#allocation11_spill] sm:$0xff] }
 0x455   :  { %v3695_v16 = vadd.f32 %v8196_v1, %v8177_v45  ;;  %v3699_v59 = vadd.f32 %v8202_v2, %v8179_v11  ;;  %v3703_v35 = vadd.f32 %v8206_v40, %v8181_v56  ;;  %vm3723_vm15 = vcmp.eq.s32.totalorder %v9816_v61, 40  ;;  %v8720_v40 = vld [vmem:[#allocation2] sm:$0xff] }
 0x456   :  { %v3743_v24 = vsel %vm3707_vm1, %v3730_v12, 0.0  ;;  %v3747_v48 = vsel %vm3711_vm13, %v3730_v12, 0.0  ;;  %v3751_v53 = vsel %vm3715_vm8, %v3730_v12, 0.0  ;;  %v3755_v45 = vsel %vm3719_vm14, %v3730_v12, 0.0 }
 0x457   :  { %v3759_v1 = vsel %vm3723_vm15, %v3730_v12, 0.0  ;;  %v3763_v23 = vadd.f32 %v3743_v24, %v3687_v13  ;;  %v3767_v11 = vadd.f32 %v3747_v48, %v3691_v37  ;;  %v3771_v2 = vadd.f32 %v3751_v53, %v3695_v16  ;;  %v8728_v53 = vld [vmem:[#allocation2 + $0x20] sm:$0xff] }
 0x458   :  { %v3775_v27 = vadd.f32 %v3755_v45, %v3699_v59  ;;  %v3779_v56 = vadd.f32 %v3759_v1, %v3703_v35  ;;  %vm3783_vm4 = vcmp.eq.s32.totalorder %v8720_v40, 41  ;;  %vm3787_vm2 = vcmp.eq.s32.totalorder %v8059_v17, 41  ;;  %v8731_v17 = vld [vmem:[#allocation2 + $0x40] sm:$0xff] }
 0x459   :  { %vm3791_vm12 = vcmp.eq.s32.totalorder %v8062_v63, 41  ;;  %vm3795_vm0 = vcmp.eq.s32.totalorder %v8065_v15, 41  ;;  %vm3799_vm11 = vcmp.eq.s32.totalorder %v9816_v61, 41  ;;  %v3819_v32 = vsel %vm3783_vm4, %v3806_v43, 0.0  ;;  %v8734_v63 = vld [vmem:[#allocation2 + $0x60] sm:$0xff] }
 0x45a   :  { %v3823_v42 = vsel %vm3787_vm2, %v3806_v43, 0.0  ;;  %v3827_v12 = vsel %vm3791_vm12, %v3806_v43, 0.0  ;;  %v3831_v13 = vsel %vm3795_vm0, %v3806_v43, 0.0  ;;  %v3835_v37 = vsel %vm3799_vm11, %v3806_v43, 0.0  ;;  %v8737_v15 = vld [vmem:[#allocation2 + $0x80] sm:$0xf] }
 0x45b   :  { %v3839_v16 = vadd.f32 %v3819_v32, %v3763_v23  ;;  %v3843_v59 = vadd.f32 %v3823_v42, %v3767_v11  ;;  %v3847_v35 = vadd.f32 %v3827_v12, %v3771_v2  ;;  %v3851_v24 = vadd.f32 %v3831_v13, %v3775_v27 }
 0x45c   :  { %v3855_v48 = vadd.f32 %v3835_v37, %v3779_v56  ;;  %vm3859_vm10 = vcmp.eq.s32.totalorder %v8720_v40, 42  ;;  %vm3863_vm6 = vcmp.eq.s32.totalorder %v8728_v53, 42  ;;  %vm3867_vm3 = vcmp.eq.s32.totalorder %v8731_v17, 42 }
 0x45d   :  { %vm3871_vm9 = vcmp.eq.s32.totalorder %v8734_v63, 42  ;;  %vm3875_vm7 = vcmp.eq.s32.totalorder %v8737_v15, 42  ;;  %v3895_v42 = vsel %vm3859_vm10, %v8664_v25, 0.0  ;;  %v3899_v27 = vsel %vm3863_vm6, %v8664_v25, 0.0 }
 0x45e   :  { %v3903_v43 = vsel %vm3867_vm3, %v8664_v25, 0.0  ;;  %v3907_v61 = vsel %vm3871_vm9, %v8664_v25, 0.0  ;;  %v3911_v45 = vsel %vm3875_vm7, %v8664_v25, 0.0  ;;  %v3915_v1 = vadd.f32 %v3895_v42, %v3839_v16 }
 0x45f   :  { %v3919_v23 = vadd.f32 %v3899_v27, %v3843_v59  ;;  %v3923_v11 = vadd.f32 %v3903_v43, %v3847_v35  ;;  %v3927_v2 = vadd.f32 %v3907_v61, %v3851_v24  ;;  %v3931_v56 = vadd.f32 %v3911_v45, %v3855_v48 }
 0x460   :  { %vm3935_vm5 = vcmp.eq.s32.totalorder %v8720_v40, 43  ;;  %vm3939_vm1 = vcmp.eq.s32.totalorder %v8728_v53, 43  ;;  %vm3943_vm13 = vcmp.eq.s32.totalorder %v8731_v17, 43  ;;  %vm3947_vm8 = vcmp.eq.s32.totalorder %v8734_v63, 43 }
 0x461   :  { %vm3951_vm14 = vcmp.eq.s32.totalorder %v8737_v15, 43  ;;  %v3971_v32 = vsel %vm3935_vm5, %v8667_v52, 0.0  ;;  %v3975_v12 = vsel %vm3939_vm1, %v8667_v52, 0.0  ;;  %v3979_v25 = vsel %vm3943_vm13, %v8667_v52, 0.0 }
 0x462   :  { %v3983_v13 = vsel %vm3947_vm8, %v8667_v52, 0.0  ;;  %v3987_v37 = vsel %vm3951_vm14, %v8667_v52, 0.0  ;;  %v3991_v16 = vadd.f32 %v3971_v32, %v3915_v1  ;;  %v3995_v59 = vadd.f32 %v3975_v12, %v3919_v23 }
 0x463   :  { %v3999_v35 = vadd.f32 %v3979_v25, %v3923_v11  ;;  %v4003_v24 = vadd.f32 %v3983_v13, %v3927_v2  ;;  %v4007_v48 = vadd.f32 %v3987_v37, %v3931_v56  ;;  %vm4011_vm15 = vcmp.eq.s32.totalorder %v8720_v40, 44 }
 0x464   :  { %vm4015_vm4 = vcmp.eq.s32.totalorder %v8728_v53, 44  ;;  %vm4019_vm2 = vcmp.eq.s32.totalorder %v8731_v17, 44  ;;  %vm4023_vm12 = vcmp.eq.s32.totalorder %v8734_v63, 44  ;;  %vm4027_vm0 = vcmp.eq.s32.totalorder %v8737_v15, 44 }
 0x465   :  { %v4047_v42 = vsel %vm4011_vm15, %v8670_v58, 0.0  ;;  %v4051_v27 = vsel %vm4015_vm4, %v8670_v58, 0.0  ;;  %v4055_v52 = vsel %vm4019_vm2, %v8670_v58, 0.0  ;;  %v4059_v43 = vsel %vm4023_vm12, %v8670_v58, 0.0 }
 0x466   :  { %v4063_v61 = vsel %vm4027_vm0, %v8670_v58, 0.0  ;;  %v4067_v45 = vadd.f32 %v4047_v42, %v3991_v16  ;;  %v4071_v1 = vadd.f32 %v4051_v27, %v3995_v59  ;;  %v4075_v23 = vadd.f32 %v4055_v52, %v3999_v35 }
 0x467   :  { %v4079_v11 = vadd.f32 %v4059_v43, %v4003_v24  ;;  %v4083_v2 = vadd.f32 %v4063_v61, %v4007_v48  ;;  %vm4087_vm11 = vcmp.eq.s32.totalorder %v8720_v40, 45  ;;  %vm4091_vm10 = vcmp.eq.s32.totalorder %v8728_v53, 45 }
 0x468   :  { %vm4095_vm6 = vcmp.eq.s32.totalorder %v8731_v17, 45  ;;  %vm4099_vm3 = vcmp.eq.s32.totalorder %v8734_v63, 45  ;;  %vm4103_vm9 = vcmp.eq.s32.totalorder %v8737_v15, 45  ;;  %v4123_v56 = vsel %vm4087_vm11, %v8673_v31, 0.0 }
 0x469   :  { %v4127_v32 = vsel %vm4091_vm10, %v8673_v31, 0.0  ;;  %v4131_v58 = vsel %vm4095_vm6, %v8673_v31, 0.0  ;;  %v4135_v12 = vsel %vm4099_vm3, %v8673_v31, 0.0  ;;  %v4139_v25 = vsel %vm4103_vm9, %v8673_v31, 0.0 }
 0x46a   :  { %v4143_v13 = vadd.f32 %v4123_v56, %v4067_v45  ;;  %v4147_v37 = vadd.f32 %v4127_v32, %v4071_v1  ;;  %v4151_v16 = vadd.f32 %v4131_v58, %v4075_v23  ;;  %v4155_v59 = vadd.f32 %v4135_v12, %v4079_v11 }
 0x46b   :  { %v4159_v35 = vadd.f32 %v4139_v25, %v4083_v2  ;;  %vm4163_vm7 = vcmp.eq.s32.totalorder %v8720_v40, 46  ;;  %vm4167_vm5 = vcmp.eq.s32.totalorder %v8728_v53, 46  ;;  %vm4171_vm1 = vcmp.eq.s32.totalorder %v8731_v17, 46 }
 0x46c   :  { %vm4175_vm13 = vcmp.eq.s32.totalorder %v8734_v63, 46  ;;  %vm4179_vm8 = vcmp.eq.s32.totalorder %v8737_v15, 46  ;;  %v4199_v24 = vsel %vm4163_vm7, %v8676_v30, 0.0  ;;  %v4203_v48 = vsel %vm4167_vm5, %v8676_v30, 0.0 }
 0x46d   :  { %v4207_v31 = vsel %vm4171_vm1, %v8676_v30, 0.0  ;;  %v4211_v42 = vsel %vm4175_vm13, %v8676_v30, 0.0  ;;  %v4215_v27 = vsel %vm4179_vm8, %v8676_v30, 0.0  ;;  %v4219_v52 = vadd.f32 %v4199_v24, %v4143_v13  ;;  %v551_v30 = vpop.f32.mrf.mxu0 }
 0x46e   :  { %v4223_v43 = vadd.f32 %v4203_v48, %v4147_v37  ;;  %v4227_v61 = vadd.f32 %v4207_v31, %v4151_v16  ;;  %v4231_v45 = vadd.f32 %v4211_v42, %v4155_v59  ;;  %v4235_v1 = vadd.f32 %v4215_v27, %v4159_v35 }
 0x46f   :  { %vm4239_vm14 = vcmp.eq.s32.totalorder %v8720_v40, 47  ;;  %vm4243_vm15 = vcmp.eq.s32.totalorder %v8728_v53, 47  ;;  %vm4247_vm4 = vcmp.eq.s32.totalorder %v8731_v17, 47  ;;  %vm4251_vm2 = vcmp.eq.s32.totalorder %v8734_v63, 47  ;;  %v555_v16 = vpop.f32.mrf.mxu0 }
 0x470   :  { %vm4255_vm12 = vcmp.eq.s32.totalorder %v8737_v15, 47  ;;  %v4275_v23 = vsel %vm4239_vm14, %v8679_v41, 0.0  ;;  %v4279_v11 = vsel %vm4243_vm15, %v8679_v41, 0.0  ;;  %v4283_v2 = vsel %vm4247_vm4, %v8679_v41, 0.0 }
 0x471   :  { %v4287_v56 = vsel %vm4251_vm2, %v8679_v41, 0.0  ;;  %v4291_v32 = vsel %vm4255_vm12, %v8679_v41, 0.0  ;;  %v4295_v58 = vadd.f32 %v4275_v23, %v4219_v52  ;;  %v4299_v12 = vadd.f32 %v4279_v11, %v4223_v43 }
 0x472   :  { %v4303_v25 = vadd.f32 %v4283_v2, %v4227_v61  ;;  %v4307_v13 = vadd.f32 %v4287_v56, %v4231_v45  ;;  %v4311_v37 = vadd.f32 %v4291_v32, %v4235_v1  ;;  %vm4315_vm0 = vcmp.eq.s32.totalorder %v8720_v40, 48 }
 0x473   :  { %vm4319_vm11 = vcmp.eq.s32.totalorder %v8728_v53, 48  ;;  %vm4323_vm10 = vcmp.eq.s32.totalorder %v8731_v17, 48  ;;  %vm4327_vm6 = vcmp.eq.s32.totalorder %v8734_v63, 48  ;;  %vm4331_vm3 = vcmp.eq.s32.totalorder %v8737_v15, 48 }
 0x474   :  { %v4338_v59 = vrot.slane %v555_v16, %v5338_v5  ;;  %vm4391_vm9 = vcmp.eq.s32.totalorder %v8720_v40, 49  ;;  %vm4395_vm7 = vcmp.eq.s32.totalorder %v8728_v53, 49  ;;  %vm4399_vm5 = vcmp.eq.s32.totalorder %v8731_v17, 49 }
 0x475   :  { %vm4403_vm1 = vcmp.eq.s32.totalorder %v8734_v63, 49  ;;  %vm4407_vm13 = vcmp.eq.s32.totalorder %v8737_v15, 49  ;;  %v4414_v41 = vrot.slane %v555_v16, %v5332_v3  ;;  %v8818_v40 = vrot.slane %v551_v30, %v5338_v5 }
 0x476   :  { %v4351_v35 = vsel %vm4315_vm0, %v4338_v59, 0.0  ;;  %v4355_v24 = vsel %vm4319_vm11, %v4338_v59, 0.0  ;;  %v4359_v48 = vsel %vm4323_vm10, %v4338_v59, 0.0  ;;  %v4363_v31 = vsel %vm4327_vm6, %v4338_v59, 0.0 }
 0x477   :  { %v4367_v42 = vsel %vm4331_vm3, %v4338_v59, 0.0  ;;  %v4371_v27 = vadd.f32 %v4351_v35, %v4295_v58  ;;  %v4375_v52 = vadd.f32 %v4355_v24, %v4299_v12  ;;  %v4379_v43 = vadd.f32 %v4359_v48, %v4303_v25 }
 0x478   :  { %v4383_v61 = vadd.f32 %v4363_v31, %v4307_v13  ;;  %v4387_v45 = vadd.f32 %v4367_v42, %v4311_v37  ;;  %v4427_v1 = vsel %vm4391_vm9, %v4414_v41, 0.0  ;;  %v4431_v23 = vsel %vm4395_vm7, %v4414_v41, 0.0  ;;  %v9817_v37 = vld [vmem:[#allocation8_spill] sm:$0xff] }
 0x479   :  { %v4435_v11 = vsel %vm4399_vm5, %v4414_v41, 0.0  ;;  %v4439_v2 = vsel %vm4403_vm1, %v4414_v41, 0.0  ;;  %v4443_v56 = vsel %vm4407_vm13, %v4414_v41, 0.0  ;;  %v4447_v32 = vadd.f32 %v4427_v1, %v4371_v27 }
 0x47a   :  { %v4451_v58 = vadd.f32 %v4431_v23, %v4375_v52  ;;  %v4455_v12 = vadd.f32 %v4435_v11, %v4379_v43  ;;  %v4459_v25 = vadd.f32 %v4439_v2, %v4383_v61  ;;  %v4463_v13 = vadd.f32 %v4443_v56, %v4387_v45  ;;  %v9818_v52 = vld [vmem:[#allocation12_spill] sm:$0xff]  ;;  %v9819_v43 = vld [vmem:[#allocation9_spill] sm:$0xff]  ;;  %v8846_v45 = vpop.f32.mrf.mxu1 }
 0x47b   :  { %v8821_v53 = vrot.slane %v551_v30, %v5332_v3  ;;  %vm4467_vm8 = vcmp.lt.s32.totalorder %v9817_v37, 6  ;;  %v4472_v17 = vsub.f32 0.0, %v4447_v32  ;;  %v8825_v63 = vrot.slane %v551_v30, %v5341_v6  ;;  %v9820_v11 = vld [vmem:[#allocation13_spill] sm:$0xff] }
 0x47c   :  { %v4476_v16 = vsub.f32 0.0, %v4451_v58  ;;  %v4480_v15 = vsub.f32 0.0, %v4455_v12  ;;  %v4484_v59 = vsub.f32 0.0, %v4459_v25  ;;  %v8828_v41 = vrot.slane %v551_v30, %v5335_v4  ;;  %v9821_v2 = vld [vmem:[#allocation17_spill] sm:$0xff] }
 0x47d   :  { %v8831_v35 = vrot.slane %v551_v30, %v5530_v14  ;;  %v8834_v24 = vrot.slane %v551_v30, %v5533_v18  ;;  %v4492_v48 = vsel %vm4467_vm8, %v4447_v32, %v4472_v17  ;;  %v8839_v31 = vrot.slane %v551_v30, %v5566_v36  ;;  %v8852_v58 = vld [vmem:[#allocation2 + $0x10] sm:$0xff] }
 0x47e   :  { %v8842_v42 = vrot.slane %v551_v30, %v5573_v39  ;;  %v4488_v27 = vsub.f32 0.0, %v4463_v13  ;;  %v3689_v61 = vadd.f32 %v9819_v43, %v9818_v52  ;;  %v4976_v1 = vclamps-f32 %v4492_v48, 10.0  ;;  %v8859_v12 = vld [vmem:[#allocation2 + $0x30] sm:$0xff]  ;;  %v9824_v48 = vld [vmem:[#allocation15_spill] sm:$0xff] }
 0x47f   :  { %v8848_v23 = vclamps-f32 %v4476_v16, 10.0  ;;  %v3693_v56 = vadd.f32 %v9821_v2, %v9820_v11  ;;  %vm3709_vm14 = vcmp.eq.s32.totalorder %v8852_v58, 40  ;;  %v8855_v32 = vclamps-f32 %v4480_v15, 10.0  ;;  %v8862_v25 = vld [vmem:[#allocation2 + $0x50] sm:$0xff]  ;;  %v9825_v52 = vld [vmem:[#allocation19_spill] sm:$0xff] }
 0x480   :  { %v8857_v30 = vclamps-f32 %v4484_v59, 10.0  ;;  %vm3713_vm15 = vcmp.eq.s32.totalorder %v8859_v12, 40  ;;  %vm3717_vm4 = vcmp.eq.s32.totalorder %v8862_v25, 40  ;;  %v9822_v13 = vld [vmem:[#allocation14_spill] sm:$0xff]  ;;  %v3701_v43 = vadd.f32 %v9825_v52, %v9824_v48  ;;  %v8872_v15 = vld [vmem:[#allocation2 + $0x90] sm:$0xf] }
 0x481   :  { %v9823_v17 = vld [vmem:[#allocation18_spill] sm:$0xff]  ;;  %vm3725_vm12 = vcmp.eq.s32.totalorder %v8872_v15, 40  ;;  %v8877_v59 = vrot.slane %v8846_v45, %v5338_v5  ;;  %v8879_v2 = vclamps-f32 %v4488_v27, 10.0  ;;  %v4552_v48 = vsub.f32 0.0, %v4976_v1 }
 0x482   :  { %v3697_v16 = vadd.f32 %v9823_v17, %v9822_v13  ;;  %v8869_v11 = vld [vmem:[#allocation2 + $0x70] sm:$0xff]  ;;  %v3705_v13 = vadd.f32 %v9828_v44, %v9827_v8  ;;  %v3745_v17 = vsel %vm3709_vm14, %v8682_v34, 0.0  ;;  %v4556_v52 = vsub.f32 0.0, %v8848_v23 }
 0x483   :  { %vm3721_vm2 = vcmp.eq.s32.totalorder %v8869_v11, 40  ;;  %9826 = vst [vmem:[#allocation11_spill] sm:$0xff] %v8877_v59  ;;  %v3749_v20 = vsel %vm3713_vm15, %v8682_v34, 0.0  ;;  %v3753_v60 = vsel %vm3717_vm4, %v8682_v34, 0.0  ;;  %v4564_v59 = vsub.f32 0.0, %v8857_v30 }
 0x484   :  { %v3757_v27 = vsel %vm3721_vm2, %v8682_v34, 0.0  ;;  %v3761_v28 = vsel %vm3725_vm12, %v8682_v34, 0.0  ;;  %v3765_v44 = vadd.f32 %v3745_v17, %v3689_v61  ;;  %v3769_v8 = vadd.f32 %v3749_v20, %v3693_v56 }
 0x485   :  { %v3773_v21 = vadd.f32 %v3753_v60, %v3697_v16  ;;  %v3777_v57 = vadd.f32 %v3757_v27, %v3701_v43  ;;  %v3781_v39 = vadd.f32 %v3761_v28, %v3705_v13  ;;  %vm3785_vm0 = vcmp.eq.s32.totalorder %v8852_v58, 41 }
 0x486   :  { %vm3789_vm11 = vcmp.eq.s32.totalorder %v8859_v12, 41  ;;  %vm3793_vm10 = vcmp.eq.s32.totalorder %v8862_v25, 41  ;;  %v4568_v1 = vsub.f32 0.0, %v8879_v2  ;;  %v8897_v22 = vmul.f32 1.442695, %v4552_v48 }
 0x487   :  { %vm3797_vm6 = vcmp.eq.s32.totalorder %v8869_v11, 41  ;;  %vm3801_vm3 = vcmp.eq.s32.totalorder %v8872_v15, 41  ;;  %v3821_v34 = vsel %vm3785_vm0, %v8685_v51, 0.0  ;;  %v3825_v60 = vsel %vm3789_vm11, %v8685_v51, 0.0 }
 0x488   :  { %v3829_v28 = vsel %vm3793_vm10, %v8685_v51, 0.0  ;;  %v3833_v20 = vsel %vm3797_vm6, %v8685_v51, 0.0  ;;  %v3837_v61 = vsel %vm3801_vm3, %v8685_v51, 0.0  ;;  %v3841_v56 = vadd.f32 %v3821_v34, %v3765_v44 }
 0x489   :  { %v3845_v16 = vadd.f32 %v3825_v60, %v3769_v8  ;;  %v3849_v43 = vadd.f32 %v3829_v28, %v3773_v21  ;;  %v3853_v13 = vadd.f32 %v3833_v20, %v3777_v57  ;;  %v3857_v17 = vadd.f32 %v3837_v61, %v3781_v39 }
 0x48a   :  { %vm3861_vm9 = vcmp.eq.s32.totalorder %v8852_v58, 42  ;;  %vm3865_vm7 = vcmp.eq.s32.totalorder %v8859_v12, 42  ;;  %vm3869_vm5 = vcmp.eq.s32.totalorder %v8862_v25, 42  ;;  %vm3873_vm1 = vcmp.eq.s32.totalorder %v8869_v11, 42 }
 0x48b   :  { %vm3877_vm13 = vcmp.eq.s32.totalorder %v8872_v15, 42  ;;  %v3897_v48 = vsel %vm3861_vm9, %v8688_v55, 0.0  ;;  %v3901_v27 = vsel %vm3865_vm7, %v8688_v55, 0.0  ;;  %v3905_v51 = vsel %vm3869_vm5, %v8688_v55, 0.0 }
 0x48c   :  { %v3909_v21 = vsel %vm3873_vm1, %v8688_v55, 0.0  ;;  %v3913_v39 = vsel %vm3877_vm13, %v8688_v55, 0.0  ;;  %v3917_v57 = vadd.f32 %v3897_v48, %v3841_v56  ;;  %v3921_v44 = vadd.f32 %v3901_v27, %v3845_v16 }
 0x48d   :  { %v3925_v8 = vadd.f32 %v3905_v51, %v3849_v43  ;;  %v3929_v34 = vadd.f32 %v3909_v21, %v3853_v13  ;;  %v3933_v60 = vadd.f32 %v3913_v39, %v3857_v17  ;;  %vm3937_vm14 = vcmp.eq.s32.totalorder %v8852_v58, 43 }
 0x48e   :  { %vm3941_vm15 = vcmp.eq.s32.totalorder %v8859_v12, 43  ;;  %vm3945_vm4 = vcmp.eq.s32.totalorder %v8862_v25, 43  ;;  %vm3949_vm2 = vcmp.eq.s32.totalorder %v8869_v11, 43  ;;  %vm3953_vm12 = vcmp.eq.s32.totalorder %v8872_v15, 43 }
 0x48f   :  { %v3973_v28 = vsel %vm3937_vm14, %v8691_v49, 0.0  ;;  %v3977_v20 = vsel %vm3941_vm15, %v8691_v49, 0.0  ;;  %v3981_v55 = vsel %vm3945_vm4, %v8691_v49, 0.0  ;;  %v3985_v61 = vsel %vm3949_vm2, %v8691_v49, 0.0 }
 0x490   :  { %v3989_v56 = vsel %vm3953_vm12, %v8691_v49, 0.0  ;;  %v3993_v16 = vadd.f32 %v3973_v28, %v3917_v57  ;;  %v3997_v43 = vadd.f32 %v3977_v20, %v3921_v44  ;;  %v4001_v13 = vadd.f32 %v3981_v55, %v3925_v8 }
 0x491   :  { %v4005_v17 = vadd.f32 %v3985_v61, %v3929_v34  ;;  %v4009_v48 = vadd.f32 %v3989_v56, %v3933_v60  ;;  %vm4013_vm0 = vcmp.eq.s32.totalorder %v8852_v58, 44  ;;  %vm4017_vm11 = vcmp.eq.s32.totalorder %v8859_v12, 44 }
 0x492   :  { %vm4021_vm10 = vcmp.eq.s32.totalorder %v8862_v25, 44  ;;  %vm4025_vm6 = vcmp.eq.s32.totalorder %v8869_v11, 44  ;;  %vm4029_vm3 = vcmp.eq.s32.totalorder %v8872_v15, 44  ;;  %v4049_v27 = vsel %vm4013_vm0, %v8694_v29, 0.0 }
 0x493   :  { %v4053_v51 = vsel %vm4017_vm11, %v8694_v29, 0.0  ;;  %v4057_v49 = vsel %vm4021_vm10, %v8694_v29, 0.0  ;;  %v4061_v21 = vsel %vm4025_vm6, %v8694_v29, 0.0  ;;  %v4065_v39 = vsel %vm4029_vm3, %v8694_v29, 0.0 }
 0x494   :  { %v4069_v57 = vadd.f32 %v4049_v27, %v3993_v16  ;;  %v4073_v44 = vadd.f32 %v4053_v51, %v3997_v43  ;;  %v4077_v8 = vadd.f32 %v4057_v49, %v4001_v13  ;;  %v4081_v34 = vadd.f32 %v4061_v21, %v4005_v17 }
 0x495   :  { %v4085_v60 = vadd.f32 %v4065_v39, %v4009_v48  ;;  %vm4089_vm9 = vcmp.eq.s32.totalorder %v8852_v58, 45  ;;  %vm4093_vm7 = vcmp.eq.s32.totalorder %v8859_v12, 45  ;;  %vm4097_vm5 = vcmp.eq.s32.totalorder %v8862_v25, 45 }
 0x496   :  { %vm4101_vm1 = vcmp.eq.s32.totalorder %v8869_v11, 45  ;;  %vm4105_vm13 = vcmp.eq.s32.totalorder %v8872_v15, 45  ;;  %v8943_v28 = vmul.f32 1.442695, %v4556_v52  ;;  %v4125_v29 = vsel %vm4089_vm9, %v8697_v9, 0.0 }
 0x497   :  { %v4129_v20 = vsel %vm4093_vm7, %v8697_v9, 0.0  ;;  %v4133_v55 = vsel %vm4097_vm5, %v8697_v9, 0.0  ;;  %v4137_v61 = vsel %vm4101_vm1, %v8697_v9, 0.0  ;;  %v4145_v56 = vadd.f32 %v4125_v29, %v4069_v57 }
 0x498   :  { %v4149_v16 = vadd.f32 %v4129_v20, %v4073_v44  ;;  %v4153_v43 = vadd.f32 %v4133_v55, %v4077_v8  ;;  %v4141_v13 = vsel %vm4105_vm13, %v8697_v9, 0.0  ;;  %v4157_v17 = vadd.f32 %v4137_v61, %v4081_v34 }
 0x499   :  { %vm4165_vm14 = vcmp.eq.s32.totalorder %v8852_v58, 46  ;;  %vm4169_vm15 = vcmp.eq.s32.totalorder %v8859_v12, 46  ;;  %v4161_v23 = vadd.f32 %v4141_v13, %v4085_v60  ;;  %vm4173_vm4 = vcmp.eq.s32.totalorder %v8862_v25, 46 }
 0x49a   :  { %vm4177_vm2 = vcmp.eq.s32.totalorder %v8869_v11, 46  ;;  %vm4181_vm12 = vcmp.eq.s32.totalorder %v8872_v15, 46  ;;  %v9829_v52 = vsub.f32 0.0, %v8855_v32  ;;  %v4201_v27 = vsel %vm4165_vm14, %v8700_v62, 0.0 }
 0x49b   :  { %v4205_v9 = vsel %vm4169_vm15, %v8700_v62, 0.0  ;;  %v4209_v51 = vsel %vm4173_vm4, %v8700_v62, 0.0  ;;  %v4213_v49 = vsel %vm4177_vm2, %v8700_v62, 0.0  ;;  %v4221_v21 = vadd.f32 %v4201_v27, %v4145_v56 }
 0x49c   :  { %v8957_v48 = vmul.f32 1.442695, %v9829_v52  ;;  %v4225_v39 = vadd.f32 %v4205_v9, %v4149_v16  ;;  %v4229_v57 = vadd.f32 %v4209_v51, %v4153_v43  ;;  %v4217_v44 = vsel %vm4181_vm12, %v8700_v62, 0.0  ;;  %v662_v16 = vpop.f32.mrf.mxu1 }
 0x49d   :  { %vm4241_vm0 = vcmp.eq.s32.totalorder %v8852_v58, 47  ;;  %vm4245_vm11 = vcmp.eq.s32.totalorder %v8859_v12, 47  ;;  %vm4249_vm10 = vcmp.eq.s32.totalorder %v8862_v25, 47  ;;  %v4233_v32 = vadd.f32 %v4213_v49, %v4157_v17 }
 0x49e   :  { %v4237_v8 = vadd.f32 %v4217_v44, %v4161_v23  ;;  %vm4253_vm6 = vcmp.eq.s32.totalorder %v8869_v11, 47  ;;  %vm4257_vm3 = vcmp.eq.s32.totalorder %v8872_v15, 47  ;;  %v4277_v34 = vsel %vm4241_vm0, %v8703_v26, 0.0 }
 0x49f   :  { %v4281_v60 = vsel %vm4245_vm11, %v8703_v26, 0.0  ;;  %v4285_v29 = vsel %vm4249_vm10, %v8703_v26, 0.0  ;;  %v4289_v62 = vsel %vm4253_vm6, %v8703_v26, 0.0  ;;  %v4293_v20 = vsel %vm4257_vm3, %v8703_v26, 0.0 }
 0x4a0   :  { %v4297_v55 = vadd.f32 %v4277_v34, %v4221_v21  ;;  %v4301_v61 = vadd.f32 %v4281_v60, %v4225_v39  ;;  %v4305_v56 = vadd.f32 %v4285_v29, %v4229_v57  ;;  %vm4317_vm9 = vcmp.eq.s32.totalorder %v8852_v58, 48 }
 0x4a1   :  { %vm4321_vm7 = vcmp.eq.s32.totalorder %v8859_v12, 48  ;;  %vm4325_vm5 = vcmp.eq.s32.totalorder %v8862_v25, 48  ;;  %vm4329_vm1 = vcmp.eq.s32.totalorder %v8869_v11, 48  ;;  %v4309_v43 = vadd.f32 %v4289_v62, %v4233_v32 }
 0x4a2   :  { %v4313_v13 = vadd.f32 %v4293_v20, %v4237_v8  ;;  %vm4333_vm13 = vcmp.eq.s32.totalorder %v8872_v15, 48  ;;  %v4346_v17 = vrot.slane %v662_v16, %v5338_v5  ;;  %vm4393_vm14 = vcmp.eq.s32.totalorder %v8852_v58, 49 }
 0x4a3   :  { %vm4397_vm15 = vcmp.eq.s32.totalorder %v8859_v12, 49  ;;  %vm4401_vm4 = vcmp.eq.s32.totalorder %v8862_v25, 49  ;;  %v4422_v26 = vrot.slane %v662_v16, %v5332_v3  ;;  %v8986_v57 = vrot.slane %v8846_v45, %v5332_v3 }
 0x4a4   :  { %v4353_v23 = vsel %vm4317_vm9, %v4346_v17, 0.0  ;;  %v4357_v52 = vsel %vm4321_vm7, %v4346_v17, 0.0  ;;  %v4361_v27 = vsel %vm4325_vm5, %v4346_v17, 0.0  ;;  %v4365_v9 = vsel %vm4329_vm1, %v4346_v17, 0.0 }
 0x4a5   :  { %v4369_v51 = vsel %vm4333_vm13, %v4346_v17, 0.0  ;;  %v4373_v49 = vadd.f32 %v4353_v23, %v4297_v55  ;;  %v4377_v21 = vadd.f32 %v4357_v52, %v4301_v61  ;;  %v4381_v39 = vadd.f32 %v4361_v27, %v4305_v56  ;;  %v9038_v56 = vld [vmem:[#allocation2 + $0x28] sm:$0xff] }
 0x4a6   :  { %v4596_v58 = vmul.f32 1.442695, %v4564_v59  ;;  %v4604_v44 = vmul.f32 1.442695, %v4568_v1  ;;  %v4429_v32 = vsel %vm4393_vm14, %v4422_v26, 0.0  ;;  %5067 = vpow2.f32 %v8897_v22 }
 0x4a7   :  { %vm4405_vm2 = vcmp.eq.s32.totalorder %v8869_v11, 49  ;;  %vm4409_vm12 = vcmp.eq.s32.totalorder %v8872_v15, 49  ;;  %v4449_v8 = vadd.f32 %v4429_v32, %v4373_v49  ;;  %v4385_v34 = vadd.f32 %v4365_v9, %v4309_v43  ;;  %v9043_v43 = vld [vmem:[#allocation2 + $0x48] sm:$0xff] }
 0x4a8   :  { %v4389_v60 = vadd.f32 %v4369_v51, %v4313_v13  ;;  %v4433_v29 = vsel %vm4397_vm15, %v4422_v26, 0.0  ;;  %v4437_v30 = vsel %vm4401_vm4, %v4422_v26, 0.0  ;;  %5069 = vpow2.f32 %v8943_v28 }
 0x4a9   :  { %v4453_v59 = vadd.f32 %v4433_v29, %v4377_v21  ;;  %v4457_v2 = vadd.f32 %v4437_v30, %v4381_v39  ;;  %v4474_v1 = vsub.f32 0.0, %v4449_v8  ;;  %v9002_v22 = vrot.slane %v8846_v45, %v5341_v6 }
 0x4aa   :  { %v9006_v62 = vrot.slane %v8846_v45, %v5335_v4  ;;  %v9010_v12 = vrot.slane %v8846_v45, %v5530_v14  ;;  %5071 = vpow2.f32 %v8957_v48  ;;  %v9015_v25 = vrot.slane %v8846_v45, %v5533_v18 }
 0x4ab   :  { %5073 = vpow2.f32 %v4596_v58  ;;  %v4441_v28 = vsel %vm4405_vm2, %v4422_v26, 0.0  ;;  %v4445_v6 = vsel %vm4409_vm12, %v4422_v26, 0.0  ;;  %v9023_v4 = vrot.slane %v8846_v45, %v5566_v36  ;;  %v9035_v36 = vld [vmem:[#allocation2 + $0x8] sm:$0xff] }
 0x4ac   :  { %5075 = vpow2.f32 %v4604_v44  ;;  %v4461_v14 = vadd.f32 %v4441_v28, %v4385_v34  ;;  %v4465_v20 = vadd.f32 %v4445_v6, %v4389_v60  ;;  %v4478_v55 = vsub.f32 0.0, %v4453_v59 }
 0x4ad   :  { %v4482_v48 = vsub.f32 0.0, %v4457_v2  ;;  %v9027_v18 = vsel %vm4467_vm8, %v4449_v8, %v4474_v1  ;;  %v3688_v11 = vadd.f32 %v8563_v38, %v8492_v47  ;;  %v3692_v15 = vadd.f32 %v8592_v19, %v8494_v0  ;;  %v9046_v47 = vld [vmem:[#allocation2 + $0x68] sm:$0xff] }
 0x4ae   :  { %v3696_v61 = vadd.f32 %v8597_v10, %v8499_v50  ;;  %vm3708_vm0 = vcmp.eq.s32.totalorder %v9035_v36, 40  ;;  %vm3712_vm11 = vcmp.eq.s32.totalorder %v9038_v56, 40  ;;  %v3700_v16 = vadd.f32 %v8602_v54, %v8552_v33  ;;  %v9049_v50 = vld [vmem:[#allocation2 + $0x88] sm:$0xf] }
 0x4af   :  { %vm3716_vm10 = vcmp.eq.s32.totalorder %v9043_v43, 40  ;;  %vm3720_vm6 = vcmp.eq.s32.totalorder %v9046_v47, 40  ;;  %vm3724_vm3 = vcmp.eq.s32.totalorder %v9049_v50, 40  ;;  %v4486_v0 = vsub.f32 0.0, %v4461_v14 }
 0x4b0   :  { %v4490_v38 = vsub.f32 0.0, %v4465_v20  ;;  %v4978_v19 = vclamps-f32 %v9027_v18, 10.0  ;;  %v3704_v10 = vadd.f32 %v8609_v46, %v8556_v7  ;;  %v9055_v33 = vclamps-f32 %v4478_v55, 10.0 }
 0x4b1   :  { %v9057_v54 = vclamps-f32 %v4482_v48, 10.0  ;;  %v3744_v13 = vsel %vm3708_vm0, %v8818_v40, 0.0  ;;  %v3748_v17 = vsel %vm3712_vm11, %v8818_v40, 0.0  ;;  %v3752_v26 = vsel %vm3716_vm10, %v8818_v40, 0.0 }
 0x4b2   :  { %v3756_v23 = vsel %vm3720_vm6, %v8818_v40, 0.0  ;;  %v3760_v52 = vsel %vm3724_vm3, %v8818_v40, 0.0  ;;  %v3764_v27 = vadd.f32 %v3744_v13, %v3688_v11  ;;  %v3768_v9 = vadd.f32 %v3748_v17, %v3692_v15 }
 0x4b3   :  { %v3772_v51 = vadd.f32 %v3752_v26, %v3696_v61  ;;  %v3776_v7 = vadd.f32 %v3756_v23, %v3700_v16  ;;  %vm3784_vm9 = vcmp.eq.s32.totalorder %v9035_v36, 41  ;;  %v9067_v46 = vpop.eup %5067  ;;  %v3780_v49 = vadd.f32 %v3760_v52, %v3704_v10 }
 0x4b4   :  { %vm3788_vm7 = vcmp.eq.s32.totalorder %v9038_v56, 41  ;;  %vm3792_vm5 = vcmp.eq.s32.totalorder %v9043_v43, 41  ;;  %vm3796_vm1 = vcmp.eq.s32.totalorder %v9046_v47, 41  ;;  %v9072_v21 = vclamps-f32 %v4486_v0, 10.0 }
 0x4b5   :  { %v9074_v39 = vclamps-f32 %v4490_v38, 10.0  ;;  %vm3800_vm13 = vcmp.eq.s32.totalorder %v9049_v50, 41  ;;  %v3820_v40 = vsel %vm3784_vm9, %v8821_v53, 0.0  ;;  %v9078_v58 = vpop.eup %5069  ;;  %v3824_v44 = vsel %vm3788_vm7, %v8821_v53, 0.0 }
 0x4b6   :  { %v3828_v32 = vsel %vm3792_vm5, %v8821_v53, 0.0  ;;  %v3832_v8 = vsel %vm3796_vm1, %v8821_v53, 0.0  ;;  %v3836_v34 = vsel %vm3800_vm13, %v8821_v53, 0.0  ;;  %v3840_v29 = vadd.f32 %v3820_v40, %v3764_v27 }
 0x4b7   :  { %v9084_v60 = vpop.eup %5071  ;;  %v3844_v30 = vadd.f32 %v3824_v44, %v3768_v9  ;;  %v3848_v59 = vadd.f32 %v3828_v32, %v3772_v51  ;;  %v3852_v2 = vadd.f32 %v3832_v8, %v3776_v7  ;;  %v3856_v28 = vadd.f32 %v3836_v34, %v3780_v49 }
 0x4b8   :  { %v9086_v1 = vpop.eup %5073  ;;  %vm3860_vm14 = vcmp.eq.s32.totalorder %v9035_v36, 42  ;;  %vm3864_vm15 = vcmp.eq.s32.totalorder %v9038_v56, 42  ;;  %vm3868_vm4 = vcmp.eq.s32.totalorder %v9043_v43, 42  ;;  %vm3872_vm2 = vcmp.eq.s32.totalorder %v9046_v47, 42 }
 0x4b9   :  { %v9091_v6 = vpop.eup %5075  ;;  %vm3876_vm12 = vcmp.eq.s32.totalorder %v9049_v50, 42  ;;  %v3896_v53 = vsel %vm3860_vm14, %v8825_v63, 0.0  ;;  %v3900_v14 = vsel %vm3864_vm15, %v8825_v63, 0.0  ;;  %v3904_v20 = vsel %vm3868_vm4, %v8825_v63, 0.0 }
 0x4ba   :  { %v3908_v55 = vsel %vm3872_vm2, %v8825_v63, 0.0  ;;  %v3912_v48 = vsel %vm3876_vm12, %v8825_v63, 0.0  ;;  %v3916_v11 = vadd.f32 %v3896_v53, %v3840_v29  ;;  %v3920_v15 = vadd.f32 %v3900_v14, %v3844_v30 }
 0x4bb   :  { %v3924_v61 = vadd.f32 %v3904_v20, %v3848_v59  ;;  %v3928_v16 = vadd.f32 %v3908_v55, %v3852_v2  ;;  %v3932_v0 = vadd.f32 %v3912_v48, %v3856_v28  ;;  %vm3936_vm0 = vcmp.eq.s32.totalorder %v9035_v36, 43 }
 0x4bc   :  { %vm3940_vm11 = vcmp.eq.s32.totalorder %v9038_v56, 43  ;;  %vm3944_vm10 = vcmp.eq.s32.totalorder %v9043_v43, 43  ;;  %vm3948_vm6 = vcmp.eq.s32.totalorder %v9046_v47, 43  ;;  %vm3952_vm3 = vcmp.eq.s32.totalorder %v9049_v50, 43 }
 0x4bd   :  { %v3972_v38 = vsel %vm3936_vm0, %v8828_v41, 0.0  ;;  %v3976_v10 = vsel %vm3940_vm11, %v8828_v41, 0.0  ;;  %v3980_v63 = vsel %vm3944_vm10, %v8828_v41, 0.0  ;;  %v3984_v13 = vsel %vm3948_vm6, %v8828_v41, 0.0 }
 0x4be   :  { %v3988_v17 = vsel %vm3952_vm3, %v8828_v41, 0.0  ;;  %v3992_v26 = vadd.f32 %v3972_v38, %v3916_v11  ;;  %v3996_v23 = vadd.f32 %v3976_v10, %v3920_v15  ;;  %v4000_v52 = vadd.f32 %v3980_v63, %v3924_v61 }
 0x4bf   :  { %v4004_v27 = vadd.f32 %v3984_v13, %v3928_v16  ;;  %v4008_v9 = vadd.f32 %v3988_v17, %v3932_v0  ;;  %vm4012_vm9 = vcmp.eq.s32.totalorder %v9035_v36, 44  ;;  %vm4016_vm7 = vcmp.eq.s32.totalorder %v9038_v56, 44 }
 0x4c0   :  { %vm4020_vm5 = vcmp.eq.s32.totalorder %v9043_v43, 44  ;;  %vm4024_vm1 = vcmp.eq.s32.totalorder %v9046_v47, 44  ;;  %vm4028_vm13 = vcmp.eq.s32.totalorder %v9049_v50, 44  ;;  %v4554_v51 = vsub.f32 0.0, %v4978_v19 }
 0x4c1   :  { %v4048_v41 = vsel %vm4012_vm9, %v8831_v35, 0.0  ;;  %v4052_v7 = vsel %vm4016_vm7, %v8831_v35, 0.0  ;;  %v4056_v49 = vsel %vm4020_vm5, %v8831_v35, 0.0  ;;  %v4060_v40 = vsel %vm4024_vm1, %v8831_v35, 0.0 }
 0x4c2   :  { %v4068_v44 = vadd.f32 %v4048_v41, %v3992_v26  ;;  %v4072_v32 = vadd.f32 %v4052_v7, %v3996_v23  ;;  %v4076_v8 = vadd.f32 %v4056_v49, %v4000_v52  ;;  %v4064_v34 = vsel %vm4028_vm13, %v8831_v35, 0.0 }
 0x4c3   :  { %v4080_v29 = vadd.f32 %v4060_v40, %v4004_v27  ;;  %vm4088_vm14 = vcmp.eq.s32.totalorder %v9035_v36, 45  ;;  %vm4092_vm15 = vcmp.eq.s32.totalorder %v9038_v56, 45  ;;  %v4084_v18 = vadd.f32 %v4064_v34, %v4008_v9 }
 0x4c4   :  { %vm4096_vm4 = vcmp.eq.s32.totalorder %v9043_v43, 45  ;;  %vm4100_vm2 = vcmp.eq.s32.totalorder %v9046_v47, 45  ;;  %vm4104_vm12 = vcmp.eq.s32.totalorder %v9049_v50, 45  ;;  %v4558_v19 = vsub.f32 0.0, %v9055_v33 }
 0x4c5   :  { %v4124_v30 = vsel %vm4088_vm14, %v8834_v24, 0.0  ;;  %v4128_v59 = vsel %vm4092_vm15, %v8834_v24, 0.0  ;;  %v4132_v35 = vsel %vm4096_vm4, %v8834_v24, 0.0  ;;  %v4136_v2 = vsel %vm4100_vm2, %v8834_v24, 0.0 }
 0x4c6   :  { %v4144_v28 = vadd.f32 %v4124_v30, %v4068_v44  ;;  %v4148_v53 = vadd.f32 %v4128_v59, %v4072_v32  ;;  %v4152_v14 = vadd.f32 %v4132_v35, %v4076_v8  ;;  %v4140_v20 = vsel %vm4104_vm12, %v8834_v24, 0.0 }
 0x4c7   :  { %vm4164_vm0 = vcmp.eq.s32.totalorder %v9035_v36, 46  ;;  %vm4168_vm11 = vcmp.eq.s32.totalorder %v9038_v56, 46  ;;  %vm4172_vm10 = vcmp.eq.s32.totalorder %v9043_v43, 46  ;;  %v4156_v33 = vadd.f32 %v4136_v2, %v4080_v29 }
 0x4c8   :  { %v4160_v55 = vadd.f32 %v4140_v20, %v4084_v18  ;;  %vm4176_vm6 = vcmp.eq.s32.totalorder %v9046_v47, 46  ;;  %vm4180_vm3 = vcmp.eq.s32.totalorder %v9049_v50, 46  ;;  %v4200_v48 = vsel %vm4164_vm0, %v8839_v31, 0.0 }
 0x4c9   :  { %v4204_v11 = vsel %vm4168_vm11, %v8839_v31, 0.0  ;;  %v4208_v15 = vsel %vm4172_vm10, %v8839_v31, 0.0  ;;  %v4212_v24 = vsel %vm4176_vm6, %v8839_v31, 0.0  ;;  %v4216_v61 = vsel %vm4180_vm3, %v8839_v31, 0.0  ;;  %v557_v31 = vpop.f32.mrf.mxu0 }
 0x4ca   :  { %v4220_v16 = vadd.f32 %v4200_v48, %v4144_v28  ;;  %v4224_v0 = vadd.f32 %v4204_v11, %v4148_v53  ;;  %v4228_v38 = vadd.f32 %v4208_v15, %v4152_v14  ;;  %vm4240_vm9 = vcmp.eq.s32.totalorder %v9035_v36, 47 }
 0x4cb   :  { %vm4244_vm7 = vcmp.eq.s32.totalorder %v9038_v56, 47  ;;  %vm4248_vm5 = vcmp.eq.s32.totalorder %v9043_v43, 47  ;;  %vm4252_vm1 = vcmp.eq.s32.totalorder %v9046_v47, 47  ;;  %v4562_v10 = vsub.f32 0.0, %v9057_v54 }
 0x4cc   :  { %v4232_v63 = vadd.f32 %v4212_v24, %v4156_v33  ;;  %v4236_v13 = vadd.f32 %v4216_v61, %v4160_v55  ;;  %vm4256_vm13 = vcmp.eq.s32.totalorder %v9049_v50, 47  ;;  %v4566_v17 = vsub.f32 0.0, %v9072_v21 }
 0x4cd   :  { %v4276_v26 = vsel %vm4240_vm9, %v8842_v42, 0.0  ;;  %v4280_v23 = vsel %vm4244_vm7, %v8842_v42, 0.0  ;;  %v4284_v52 = vsel %vm4248_vm5, %v8842_v42, 0.0  ;;  %v4288_v27 = vsel %vm4252_vm1, %v8842_v42, 0.0 }
 0x4ce   :  { %v4292_v9 = vsel %vm4256_vm13, %v8842_v42, 0.0  ;;  %v4296_v41 = vadd.f32 %v4276_v26, %v4220_v16  ;;  %v4300_v7 = vadd.f32 %v4280_v23, %v4224_v0  ;;  %v4304_v54 = vadd.f32 %v4284_v52, %v4228_v38  ;;  %v9186_v23 = vld [vmem:[#allocation2 + $0x18] sm:$0xff] }
 0x4cf   :  { %vm4316_vm14 = vcmp.eq.s32.totalorder %v9035_v36, 48  ;;  %vm4320_vm15 = vcmp.eq.s32.totalorder %v9038_v56, 48  ;;  %vm4324_vm4 = vcmp.eq.s32.totalorder %v9043_v43, 48  ;;  %v4576_v21 = vmul.f32 1.442695, %v4554_v51 }
 0x4d0   :  { %v4308_v49 = vadd.f32 %v4288_v27, %v4232_v63  ;;  %v4312_v40 = vadd.f32 %v4292_v9, %v4236_v13  ;;  %v4342_v44 = vrot.slane %v557_v31, %v5338_v5  ;;  %vm4328_vm2 = vcmp.eq.s32.totalorder %v9046_v47, 48  ;;  %v9831_v13 = vld [vmem:[#allocation21_spill] sm:$0xff]  ;;  %v9835_v27 = vld [vmem:[#allocation23_spill] sm:$0xff]  ;;  %v9836_v9 = vld [vmem:[#allocation28_spill] sm:$0xff] }
 0x4d1   :  { %vm4392_vm12 = vcmp.eq.s32.totalorder %v9035_v36, 49  ;;  %vm4396_vm0 = vcmp.eq.s32.totalorder %v9038_v56, 49  ;;  %v4418_v42 = vrot.slane %v557_v31, %v5332_v3  ;;  %vm4400_vm11 = vcmp.eq.s32.totalorder %v9043_v43, 49  ;;  %v9832_v31 = vld [vmem:[#allocation26_spill] sm:$0xff] }
 0x4d2   :  { %v4352_v32 = vsel %vm4316_vm14, %v4342_v44, 0.0  ;;  %v4356_v8 = vsel %vm4320_vm15, %v4342_v44, 0.0  ;;  %v4360_v34 = vsel %vm4324_vm4, %v4342_v44, 0.0  ;;  %vm4332_vm10 = vcmp.eq.s32.totalorder %v9049_v50, 48 }
 0x4d3   :  { %v4372_v51 = vadd.f32 %v4352_v32, %v4296_v41  ;;  %v4376_v29 = vadd.f32 %v4356_v8, %v4300_v7  ;;  %v4380_v18 = vadd.f32 %v4360_v34, %v4304_v54  ;;  %v4584_v30 = vmul.f32 1.442695, %v4558_v19  ;;  %v9830_v19 = vld [vmem:[#allocation10_spill] sm:$0xff] }
 0x4d4   :  { %v4592_v59 = vmul.f32 1.442695, %v4562_v10  ;;  %vm4404_vm6 = vcmp.eq.s32.totalorder %v9046_v47, 49  ;;  %v4428_v35 = vsel %vm4392_vm12, %v4418_v42, 0.0  ;;  %v4364_v36 = vsel %vm4328_vm2, %v4342_v44, 0.0  ;;  %v9833_v47 = vld [vmem:[#allocation22_spill] sm:$0xff] }
 0x4d5   :  { %v4432_v56 = vsel %vm4396_vm0, %v4418_v42, 0.0  ;;  %v4436_v2 = vsel %vm4400_vm11, %v4418_v42, 0.0  ;;  %v4448_v28 = vadd.f32 %v4428_v35, %v4372_v51  ;;  %v4368_v53 = vsel %vm4332_vm10, %v4342_v44, 0.0  ;;  %v9193_v7 = vld [vmem:[#allocation2 + $0x38] sm:$0xff]  ;;  %v9839_v44 = vld [vmem:[#allocation25_spill] sm:$0xff] }
 0x4d6   :  { %v4384_v14 = vadd.f32 %v4364_v36, %v4308_v49  ;;  %v4452_v20 = vadd.f32 %v4432_v56, %v4376_v29  ;;  %v4456_v43 = vadd.f32 %v4436_v2, %v4380_v18  ;;  %5077 = vpow2.f32 %v4576_v21  ;;  %v9196_v54 = vld [vmem:[#allocation2 + $0x58] sm:$0xff]  ;;  %v9837_v21 = vld [vmem:[#allocation24_spill] sm:$0xff]  ;;  %v9838_v49 = vld [vmem:[#allocation29_spill] sm:$0xff] }
 0x4d7   :  { %v4388_v33 = vadd.f32 %v4368_v53, %v4312_v40  ;;  %vm4408_vm3 = vcmp.eq.s32.totalorder %v9049_v50, 49  ;;  %v4473_v55 = vsub.f32 0.0, %v4448_v28  ;;  %v9171_v48 = vrot.slane %v8846_v45, %v9830_v19  ;;  %v9203_v8 = vld [vmem:[#allocation2 + $0x78] sm:$0xff] }
 0x4d8   :  { %v4570_v11 = vsub.f32 0.0, %v9074_v39  ;;  %5079 = vpow2.f32 %v4584_v30  ;;  %v4477_v15 = vsub.f32 0.0, %v4452_v20  ;;  %v9174_v24 = vmul.f32 1.442695, %v4566_v17  ;;  %v9834_v17 = vld [vmem:[#allocation27_spill] sm:$0xff] }
 0x4d9   :  { %5081 = vpow2.f32 %v4592_v59  ;;  %v4440_v61 = vsel %vm4404_vm6, %v4418_v42, 0.0  ;;  %v4493_v16 = vsel %vm4467_vm8, %v4448_v28, %v4473_v55  ;;  %v4444_v0 = vsel %vm4408_vm3, %v4418_v42, 0.0  ;;  %v9840_v42 = vld [vmem:[#allocation30_spill] sm:$0xff]  ;;  %v9841_v30 = vld [vmem:[#allocation11_spill] sm:$0xff] }
 0x4da   :  { %v9180_v50 = vadd.f32 %v4440_v61, %v4384_v14  ;;  %v4481_v38 = vsub.f32 0.0, %v4456_v43  ;;  %v4977_v10 = vclamps-f32 %v4493_v16, 10.0  ;;  %v9182_v45 = vadd.f32 %v4444_v0, %v4388_v33  ;;  %v9206_v34 = vld [vmem:[#allocation2 + $0x98] sm:$0xf] }
 0x4db   :  { %v4981_v63 = vclamps-f32 %v4477_v15, 10.0  ;;  %v3690_v26 = vadd.f32 %v9832_v31, %v9831_v13  ;;  %vm3710_vm9 = vcmp.eq.s32.totalorder %v9186_v23, 40  ;;  %v3694_v52 = vadd.f32 %v9834_v17, %v9833_v47 }
 0x4dc   :  { %v3698_v41 = vadd.f32 %v9836_v9, %v9835_v27  ;;  %vm3714_vm7 = vcmp.eq.s32.totalorder %v9193_v7, 40  ;;  %vm3718_vm5 = vcmp.eq.s32.totalorder %v9196_v54, 40  ;;  %v3702_v40 = vadd.f32 %v9838_v49, %v9837_v21 }
 0x4dd   :  { %v3706_v32 = vadd.f32 %v9840_v42, %v9839_v44  ;;  %vm3722_vm1 = vcmp.eq.s32.totalorder %v9203_v8, 40  ;;  %vm3726_vm13 = vcmp.eq.s32.totalorder %v9206_v34, 40  ;;  %v4485_v51 = vsub.f32 0.0, %v9180_v50 }
 0x4de   :  { %v9210_v29 = vclamps-f32 %v4481_v38, 10.0  ;;  %v4553_v18 = vsub.f32 0.0, %v4977_v10  ;;  %v3746_v59 = vsel %vm3710_vm9, %v9841_v30, 0.0  ;;  %v4557_v35 = vsub.f32 0.0, %v4981_v63 }
 0x4df   :  { %v3750_v36 = vsel %vm3714_vm7, %v9841_v30, 0.0  ;;  %v3754_v56 = vsel %vm3718_vm5, %v9841_v30, 0.0  ;;  %v3766_v2 = vadd.f32 %v3746_v59, %v3690_v26  ;;  %v3758_v28 = vsel %vm3722_vm1, %v9841_v30, 0.0 }
 0x4e0   :  { %v3762_v53 = vsel %vm3726_vm13, %v9841_v30, 0.0  ;;  %v3770_v14 = vadd.f32 %v3750_v36, %v3694_v52  ;;  %v3774_v20 = vadd.f32 %v3754_v56, %v3698_v41  ;;  %v3778_v43 = vadd.f32 %v3758_v28, %v3702_v40 }
 0x4e1   :  { %v3782_v33 = vadd.f32 %v3762_v53, %v3706_v32  ;;  %vm3786_vm14 = vcmp.eq.s32.totalorder %v9186_v23, 41  ;;  %vm3790_vm15 = vcmp.eq.s32.totalorder %v9193_v7, 41  ;;  %v4561_v55 = vsub.f32 0.0, %v9210_v29 }
 0x4e2   :  { %vm3794_vm4 = vcmp.eq.s32.totalorder %v9196_v54, 41  ;;  %vm3798_vm2 = vcmp.eq.s32.totalorder %v9203_v8, 41  ;;  %vm3802_vm12 = vcmp.eq.s32.totalorder %v9206_v34, 41  ;;  %v4574_v19 = vmul.f32 1.442695, %v4553_v18 }
 0x4e3   :  { %v9225_v15 = vmul.f32 1.442695, %v4557_v35  ;;  %v3822_v61 = vsel %vm3786_vm14, %v8986_v57, 0.0  ;;  %v3826_v16 = vsel %vm3790_vm15, %v8986_v57, 0.0  ;;  %v9229_v0 = vpop.eup %5077  ;;  %v3830_v38 = vsel %vm3794_vm4, %v8986_v57, 0.0 }
 0x4e4   :  { %v3834_v10 = vsel %vm3798_vm2, %v8986_v57, 0.0  ;;  %v3838_v63 = vsel %vm3802_vm12, %v8986_v57, 0.0  ;;  %v3842_v13 = vadd.f32 %v3822_v61, %v3766_v2  ;;  %v3846_v26 = vadd.f32 %v3826_v16, %v3770_v14 }
 0x4e5   :  { %v9234_v31 = vpop.eup %5079  ;;  %v3850_v47 = vadd.f32 %v3830_v38, %v3774_v20  ;;  %v3854_v17 = vadd.f32 %v3834_v10, %v3778_v43  ;;  %v3858_v52 = vadd.f32 %v3838_v63, %v3782_v33  ;;  %vm3862_vm0 = vcmp.eq.s32.totalorder %v9186_v23, 42 }
 0x4e6   :  { %v9236_v27 = vpop.eup %5081  ;;  %vm3866_vm11 = vcmp.eq.s32.totalorder %v9193_v7, 42  ;;  %vm3870_vm10 = vcmp.eq.s32.totalorder %v9196_v54, 42  ;;  %vm3874_vm6 = vcmp.eq.s32.totalorder %v9203_v8, 42  ;;  %vm3878_vm3 = vcmp.eq.s32.totalorder %v9206_v34, 42 }
 0x4e7   :  { %v3898_v57 = vsel %vm3862_vm0, %v9002_v22, 0.0  ;;  %v3902_v9 = vsel %vm3866_vm11, %v9002_v22, 0.0  ;;  %v3906_v41 = vsel %vm3870_vm10, %v9002_v22, 0.0  ;;  %v3910_v21 = vsel %vm3874_vm6, %v9002_v22, 0.0 }
 0x4e8   :  { %v3914_v49 = vsel %vm3878_vm3, %v9002_v22, 0.0  ;;  %v3918_v40 = vadd.f32 %v3898_v57, %v3842_v13  ;;  %v3922_v44 = vadd.f32 %v3902_v9, %v3846_v26  ;;  %v3926_v42 = vadd.f32 %v3906_v41, %v3850_v47 }
 0x4e9   :  { %v3930_v32 = vadd.f32 %v3910_v21, %v3854_v17  ;;  %v3934_v18 = vadd.f32 %v3914_v49, %v3858_v52  ;;  %vm3938_vm9 = vcmp.eq.s32.totalorder %v9186_v23, 43  ;;  %vm3942_vm7 = vcmp.eq.s32.totalorder %v9193_v7, 43 }
 0x4ea   :  { %vm3946_vm5 = vcmp.eq.s32.totalorder %v9196_v54, 43  ;;  %vm3950_vm1 = vcmp.eq.s32.totalorder %v9203_v8, 43  ;;  %vm3954_vm13 = vcmp.eq.s32.totalorder %v9206_v34, 43  ;;  %5083 = vpow2.f32 %v4574_v19 }
 0x4eb   :  { %v3974_v30 = vsel %vm3938_vm9, %v9006_v62, 0.0  ;;  %v3978_v22 = vsel %vm3942_vm7, %v9006_v62, 0.0  ;;  %v3982_v59 = vsel %vm3946_vm5, %v9006_v62, 0.0  ;;  %v3986_v35 = vsel %vm3950_vm1, %v9006_v62, 0.0 }
 0x4ec   :  { %v3994_v36 = vadd.f32 %v3974_v30, %v3918_v40  ;;  %v3998_v56 = vadd.f32 %v3978_v22, %v3922_v44  ;;  %v4002_v2 = vadd.f32 %v3982_v59, %v3926_v42  ;;  %v3990_v28 = vsel %vm3954_vm13, %v9006_v62, 0.0 }
 0x4ed   :  { %v4006_v53 = vadd.f32 %v3986_v35, %v3930_v32  ;;  %vm4014_vm14 = vcmp.eq.s32.totalorder %v9186_v23, 44  ;;  %vm4018_vm15 = vcmp.eq.s32.totalorder %v9193_v7, 44  ;;  %v4010_v14 = vadd.f32 %v3990_v28, %v3934_v18  ;;  %v664_v35 = vpop.f32.mrf.mxu1 }
 0x4ee   :  { %vm4022_vm4 = vcmp.eq.s32.totalorder %v9196_v54, 44  ;;  %vm4026_vm2 = vcmp.eq.s32.totalorder %v9203_v8, 44  ;;  %vm4030_vm12 = vcmp.eq.s32.totalorder %v9206_v34, 44  ;;  %v4050_v20 = vsel %vm4014_vm14, %v9010_v12, 0.0 }
 0x4ef   :  { %v4054_v43 = vsel %vm4018_vm15, %v9010_v12, 0.0  ;;  %v4058_v33 = vsel %vm4022_vm4, %v9010_v12, 0.0  ;;  %v4062_v62 = vsel %vm4026_vm2, %v9010_v12, 0.0  ;;  %v4070_v19 = vadd.f32 %v4050_v20, %v3994_v36 }
 0x4f0   :  { %v4074_v61 = vadd.f32 %v4054_v43, %v3998_v56  ;;  %v4078_v16 = vadd.f32 %v4058_v33, %v4002_v2  ;;  %v4082_v38 = vadd.f32 %v4062_v62, %v4006_v53  ;;  %v4066_v10 = vsel %vm4030_vm12, %v9010_v12, 0.0 }
 0x4f1   :  { %vm4090_vm0 = vcmp.eq.s32.totalorder %v9186_v23, 45  ;;  %vm4094_vm11 = vcmp.eq.s32.totalorder %v9193_v7, 45  ;;  %vm4098_vm10 = vcmp.eq.s32.totalorder %v9196_v54, 45  ;;  %v4086_v63 = vadd.f32 %v4066_v10, %v4010_v14 }
 0x4f2   :  { %vm4102_vm6 = vcmp.eq.s32.totalorder %v9203_v8, 45  ;;  %vm4106_vm3 = vcmp.eq.s32.totalorder %v9206_v34, 45  ;;  %v4126_v13 = vsel %vm4090_vm0, %v9015_v25, 0.0  ;;  %v4130_v26 = vsel %vm4094_vm11, %v9015_v25, 0.0 }
 0x4f3   :  { %v4134_v47 = vsel %vm4098_vm10, %v9015_v25, 0.0  ;;  %v4138_v17 = vsel %vm4102_vm6, %v9015_v25, 0.0  ;;  %v4146_v12 = vadd.f32 %v4126_v13, %v4070_v19  ;;  %v4142_v52 = vsel %vm4106_vm3, %v9015_v25, 0.0 }
 0x4f4   :  { %v4150_v57 = vadd.f32 %v4130_v26, %v4074_v61  ;;  %v4154_v9 = vadd.f32 %v4134_v47, %v4078_v16  ;;  %v4158_v41 = vadd.f32 %v4138_v17, %v4082_v38  ;;  %vm4166_vm9 = vcmp.eq.s32.totalorder %v9186_v23, 46 }
 0x4f5   :  { %vm4170_vm7 = vcmp.eq.s32.totalorder %v9193_v7, 46  ;;  %vm4174_vm5 = vcmp.eq.s32.totalorder %v9196_v54, 46  ;;  %vm4178_vm1 = vcmp.eq.s32.totalorder %v9203_v8, 46  ;;  %v4162_v21 = vadd.f32 %v4142_v52, %v4086_v63 }
 0x4f6   :  { %vm4182_vm13 = vcmp.eq.s32.totalorder %v9206_v34, 46  ;;  %v4202_v49 = vsel %vm4166_vm9, %v9023_v4, 0.0  ;;  %v4206_v40 = vsel %vm4170_vm7, %v9023_v4, 0.0  ;;  %v4210_v25 = vsel %vm4174_vm5, %v9023_v4, 0.0 }
 0x4f7   :  { %v4214_v44 = vsel %vm4178_vm1, %v9023_v4, 0.0  ;;  %v4218_v42 = vsel %vm4182_vm13, %v9023_v4, 0.0  ;;  %v4222_v32 = vadd.f32 %v4202_v49, %v4146_v12  ;;  %v9288_v18 = vpop.eup %5083  ;;  %v4226_v30 = vadd.f32 %v4206_v40, %v4150_v57 }
 0x4f8   :  { %v4230_v22 = vadd.f32 %v4210_v25, %v4154_v9  ;;  %v4234_v59 = vadd.f32 %v4214_v44, %v4158_v41  ;;  %vm4242_vm14 = vcmp.eq.s32.totalorder %v9186_v23, 47  ;;  %vm4246_vm15 = vcmp.eq.s32.totalorder %v9193_v7, 47 }
 0x4f9   :  { %vm4250_vm4 = vcmp.eq.s32.totalorder %v9196_v54, 47  ;;  %vm4254_vm2 = vcmp.eq.s32.totalorder %v9203_v8, 47  ;;  %vm4258_vm12 = vcmp.eq.s32.totalorder %v9206_v34, 47  ;;  %5085 = vpow2.f32 %v9225_v15 }
 0x4fa   :  { %v4238_v4 = vadd.f32 %v4218_v42, %v4162_v21  ;;  %v4278_v36 = vsel %vm4242_vm14, %v9171_v48, 0.0  ;;  %v4282_v56 = vsel %vm4246_vm15, %v9171_v48, 0.0  ;;  %v4286_v2 = vsel %vm4250_vm4, %v9171_v48, 0.0 }
 0x4fb   :  { %v4290_v28 = vsel %vm4254_vm2, %v9171_v48, 0.0  ;;  %v4294_v53 = vsel %vm4258_vm12, %v9171_v48, 0.0  ;;  %v4298_v14 = vadd.f32 %v4278_v36, %v4222_v32  ;;  %v4302_v20 = vadd.f32 %v4282_v56, %v4226_v30 }
 0x4fc   :  { %v4306_v43 = vadd.f32 %v4286_v2, %v4230_v22  ;;  %vm4318_vm0 = vcmp.eq.s32.totalorder %v9186_v23, 48  ;;  %vm4322_vm11 = vcmp.eq.s32.totalorder %v9193_v7, 48  ;;  %v4310_v15 = vadd.f32 %v4290_v28, %v4234_v59 }
 0x4fd   :  { %vm4326_vm10 = vcmp.eq.s32.totalorder %v9196_v54, 48  ;;  %vm4330_vm6 = vcmp.eq.s32.totalorder %v9203_v8, 48  ;;  %v4350_v33 = vrot.slane %v664_v35, %v5338_v5  ;;  %v4314_v62 = vadd.f32 %v4294_v53, %v4238_v4 }
 0x4fe   :  { %vm4334_vm3 = vcmp.eq.s32.totalorder %v9206_v34, 48  ;;  %vm4394_vm9 = vcmp.eq.s32.totalorder %v9186_v23, 49  ;;  %vm4398_vm7 = vcmp.eq.s32.totalorder %v9193_v7, 49  ;;  %vm4402_vm5 = vcmp.eq.s32.totalorder %v9196_v54, 49 }
 0x4ff   :  { %v4354_v48 = vsel %vm4318_vm0, %v4350_v33, 0.0  ;;  %v4358_v19 = vsel %vm4322_vm11, %v4350_v33, 0.0  ;;  %v4362_v61 = vsel %vm4326_vm10, %v4350_v33, 0.0  ;;  %v4366_v16 = vsel %vm4330_vm6, %v4350_v33, 0.0 }
 0x500   :  { %v4374_v38 = vadd.f32 %v4354_v48, %v4298_v14  ;;  %v4378_v10 = vadd.f32 %v4358_v19, %v4302_v20  ;;  %v4382_v63 = vadd.f32 %v4362_v61, %v4306_v43  ;;  %v4370_v13 = vsel %vm4334_vm3, %v4350_v33, 0.0 }
 0x501   :  { %v4386_v26 = vadd.f32 %v4366_v16, %v4310_v15  ;;  %vm4406_vm1 = vcmp.eq.s32.totalorder %v9203_v8, 49  ;;  %v4426_v5 = vrot.slane %v664_v35, %v5332_v3  ;;  %5087 = vpow2.f32 %v9174_v24 }
 0x502   :  { %v4489_v47 = vsub.f32 0.0, %v9182_v45  ;;  %v4390_v17 = vadd.f32 %v4370_v13, %v4314_v62  ;;  %vm4410_vm13 = vcmp.eq.s32.totalorder %v9206_v34, 49  ;;  %v4590_v12 = vmul.f32 1.442695, %v4561_v55 }
 0x503   :  { %v4430_v52 = vsel %vm4394_vm9, %v4426_v5, 0.0  ;;  %v4434_v57 = vsel %vm4398_vm7, %v4426_v5, 0.0  ;;  %v4438_v8 = vsel %vm4402_vm5, %v4426_v5, 0.0  ;;  %v4442_v3 = vsel %vm4406_vm1, %v4426_v5, 0.0 }
 0x504   :  { %v4450_v9 = vadd.f32 %v4430_v52, %v4374_v38  ;;  %v4454_v24 = vadd.f32 %v4434_v57, %v4378_v10  ;;  %v4458_v41 = vadd.f32 %v4438_v8, %v4382_v63  ;;  %v4989_v45 = vclamps-f32 %v4485_v51, 10.0 }
 0x505   :  { %v4446_v34 = vsel %vm4410_vm13, %v4426_v5, 0.0  ;;  %v4462_v21 = vadd.f32 %v4442_v3, %v4386_v26  ;;  %v4612_v29 = vadd.f32 1.0, %v9067_v46  ;;  %v4608_v54 = vmul.f32 1.442695, %v4570_v11 }
 0x506   :  { %v4466_v55 = vadd.f32 %v4446_v34, %v4390_v17  ;;  %v4475_v23 = vsub.f32 0.0, %v4450_v9  ;;  %v4479_v49 = vsub.f32 0.0, %v4454_v24  ;;  %v4483_v40 = vsub.f32 0.0, %v4458_v41  ;;  %v9326_v7 = vpop.eup %5085 }
 0x507   :  { %v4993_v25 = vclamps-f32 %v4489_v47, 10.0  ;;  %5089 = vpow2.f32 %v4590_v12  ;;  %v4487_v44 = vsub.f32 0.0, %v4462_v21  ;;  %v4621_v32 = vadd.f32 1.0, %v9288_v18 }
 0x508   :  { %v4495_v50 = vsel %vm4467_vm8, %v4450_v9, %v4475_v23  ;;  %v4983_v51 = vclamps-f32 %v4479_v49, 10.0  ;;  %v4987_v42 = vclamps-f32 %v4483_v40, 10.0  ;;  %v4565_v30 = vsub.f32 0.0, %v4989_v45 }
 0x509   :  { %v4979_v22 = vclamps-f32 %v4495_v50, 10.0  ;;  %5091 = vlog2.f32 %v4612_v29  ;;  %v4491_v59 = vsub.f32 0.0, %v4466_v55  ;;  %v4630_v36 = vadd.f32 1.0, %v9229_v0 }
 0x50a   :  { %v4559_v35 = vsub.f32 0.0, %v4983_v51  ;;  %v4563_v4 = vsub.f32 0.0, %v4987_v42  ;;  %5093 = vpow2.f32 %v4608_v54  ;;  %v4991_v39 = vclamps-f32 %v4487_v44, 10.0 }
 0x50b   :  { %v4555_v11 = vsub.f32 0.0, %v4979_v22  ;;  %v4569_v56 = vsub.f32 0.0, %v4993_v25  ;;  %5095 = vlog2.f32 %v4621_v32  ;;  %v4598_v53 = vmul.f32 1.442695, %v4565_v30 }
 0x50c   :  { %v4586_v2 = vmul.f32 1.442695, %v4559_v35  ;;  %v4594_v28 = vmul.f32 1.442695, %v4563_v4  ;;  %v4615_v20 = vmul.f32 -0.5, %v9067_v46  ;;  %5097 = vlog2.f32 %v4630_v36 }
 0x50d   :  { %v4578_v14 = vmul.f32 1.442695, %v4555_v11  ;;  %v4995_v43 = vclamps-f32 %v4491_v59, 10.0  ;;  %v4567_v33 = vsub.f32 0.0, %v4991_v39  ;;  %v4648_v62 = vadd.f32 1.0, %v9078_v58 }
 0x50e   :  { %5099 = vpow2.f32 %v4586_v2  ;;  %v9335_v15 = vpop.eup %5087  ;;  %v4624_v48 = vmul.f32 -0.5, %v9288_v18  ;;  %v4657_v19 = vadd.f32 1.0, %v9326_v7  ;;  %v4606_v61 = vmul.f32 1.442695, %v4569_v56 }
 0x50f   :  { %5101 = vpow2.f32 %v4578_v14  ;;  %v4616_v16 = vadd.f32 1.0, %v4615_v20  ;;  %v4618_v38 = vand.u32 2147483647, %v9067_v46  ;;  %v4571_v10 = vsub.f32 0.0, %v4995_v43 }
 0x510   :  { %5103 = vpow2.f32 %v4594_v28  ;;  %v4633_v63 = vmul.f32 -0.5, %v9229_v0  ;;  %v4651_v13 = vmul.f32 -0.5, %v9078_v58  ;;  %v4666_v26 = vadd.f32 1.0, %v9234_v31 }
 0x511   :  { %5105 = vpow2.f32 %v4598_v53  ;;  %v4602_v5 = vmul.f32 1.442695, %v4567_v33  ;;  %v4660_v47 = vmul.f32 -0.5, %v9326_v7  ;;  %v4625_v12 = vadd.f32 1.0, %v4624_v48 }
 0x512   :  { %5107 = vlog2.f32 %v4648_v62  ;;  %v4627_v52 = vand.u32 2147483647, %v9288_v18  ;;  %v9349_v57 = vmul.f32 %v9067_v46, %v4616_v16  ;;  %vm9351_vm8 = vcmp.lt.f32.partialorder %v4618_v38, 0.0004427343 }
 0x513   :  { %5109 = vlog2.f32 %v4657_v19  ;;  %v4684_v3 = vadd.f32 1.0, %v9084_v60  ;;  %v4610_v24 = vmul.f32 1.442695, %v4571_v10  ;;  %v4634_v41 = vadd.f32 1.0, %v4633_v63 }
 0x514   :  { %v9345_v17 = vpop.eup %5089  ;;  %5111 = vpow2.f32 %v4606_v61  ;;  %v4652_v45 = vadd.f32 1.0, %v4651_v13  ;;  %v4636_v34 = vand.u32 2147483647, %v9229_v0  ;;  %v4661_v21 = vadd.f32 1.0, %v4660_v47 }
 0x515   :  { %5113 = vlog2.f32 %v4666_v26  ;;  %v4693_v29 = vadd.f32 1.0, %v9345_v17  ;;  %v9361_v46 = vmul.f32 %v9288_v18, %v4625_v12  ;;  %vm9363_vm14 = vcmp.lt.f32.partialorder %v4627_v52, 0.0004427343 }
 0x516   :  { %v5092_v9 = vpop.eup %5091  ;;  %5115 = vpow2.f32 %v4602_v5  ;;  %v4654_v49 = vand.u32 2147483647, %v9078_v58  ;;  %v4669_v40 = vmul.f32 -0.5, %v9234_v31  ;;  %v4663_v44 = vand.u32 2147483647, %v9326_v7 }
 0x517   :  { %v9358_v55 = vpop.eup %5093  ;;  %v9369_v25 = vmul.f32 0.6931472, %v5092_v9  ;;  %5117 = vlog2.f32 %v4684_v3  ;;  %v4702_v50 = vadd.f32 1.0, %v9236_v27  ;;  %v9374_v18 = vmul.f32 %v9229_v0, %v4634_v41 }
 0x518   :  { %v5096_v54 = vpop.eup %5095  ;;  %5119 = vpow2.f32 %v4610_v24  ;;  %v9377_v42 = vmul.f32 %v9078_v58, %v4652_v45  ;;  %v4687_v32 = vmul.f32 -0.5, %v9084_v60  ;;  %vm9382_vm15 = vcmp.lt.f32.partialorder %v4636_v34, 0.0004427343 }
 0x519   :  { %v5098_v51 = vpop.eup %5097  ;;  %v9387_v59 = vmul.f32 %v9326_v7, %v4661_v21  ;;  %v4672_v35 = vand.u32 2147483647, %v9234_v31  ;;  %5121 = vlog2.f32 %v4693_v29  ;;  %v4696_v0 = vmul.f32 -0.5, %v9345_v17 }
 0x51a   :  { %v9393_v58 = vmul.f32 0.6931472, %v5096_v54  ;;  %v4670_v36 = vadd.f32 1.0, %v4669_v40  ;;  %v4720_v11 = vadd.f32 1.0, %v9086_v1  ;;  %v4620_v7 = vsel %vm9351_vm8, %v9349_v57, %v9369_v25 }
 0x51b   :  { %v9380_v30 = vpop.eup %5099  ;;  %5123 = vlog2.f32 %v4702_v50  ;;  %v4705_v28 = vmul.f32 -0.5, %v9236_v27  ;;  %vm9407_vm4 = vcmp.lt.f32.partialorder %v4654_v49, 0.0004427343  ;;  %v4688_v43 = vadd.f32 1.0, %v4687_v32 }
 0x51c   :  { %v9391_v4 = vpop.eup %5101  ;;  %v4675_v39 = vadd.f32 1.0, %v9380_v30  ;;  %v4678_v20 = vmul.f32 -0.5, %v9380_v30  ;;  %v4690_v33 = vand.u32 2147483647, %v9084_v60  ;;  %vm9414_vm2 = vcmp.lt.f32.partialorder %v4663_v44, 0.0004427343 }
 0x51d   :  { %v9397_v56 = vpop.eup %5103  ;;  %v4639_v2 = vadd.f32 1.0, %v9391_v4  ;;  %v4642_v62 = vmul.f32 -0.5, %v9391_v4  ;;  %v4697_v19 = vadd.f32 1.0, %v4696_v0  ;;  %v9423_v10 = vmul.f32 0.6931472, %v5098_v51 }
 0x51e   :  { %v9405_v53 = vpop.eup %5105  ;;  %5125 = vlog2.f32 %v4675_v39  ;;  %v4711_v61 = vadd.f32 1.0, %v9397_v56  ;;  %v9426_v63 = vmul.f32 %v9234_v31, %v4670_v36  ;;  %vm9428_vm12 = vcmp.lt.f32.partialorder %v4672_v35, 0.0004427343 }
 0x51f   :  { %5127 = vlog2.f32 %v4639_v2  ;;  %v5108_v16 = vpop.eup %5107  ;;  %v4699_v5 = vand.u32 2147483647, %v9345_v17  ;;  %v4706_v47 = vadd.f32 1.0, %v4705_v28  ;;  %v4714_v12 = vmul.f32 -0.5, %v9397_v56 }
 0x520   :  { %5129 = vlog2.f32 %v4720_v11  ;;  %v5110_v13 = vpop.eup %5109  ;;  %v4679_v3 = vadd.f32 1.0, %v4678_v20  ;;  %v9437_v9 = vmul.f32 %v9084_v60, %v4688_v43  ;;  %v4723_v31 = vmul.f32 -0.5, %v9086_v1 }
 0x521   :  { %5131 = vlog2.f32 %v4711_v61  ;;  %v9434_v52 = vpop.eup %5111  ;;  %v4729_v24 = vadd.f32 1.0, %v9405_v53  ;;  %v4643_v45 = vadd.f32 1.0, %v4642_v62  ;;  %v9441_v34 = vmul.f32 0.6931472, %v5108_v16 }
 0x522   :  { %v5114_v41 = vpop.eup %5113  ;;  %v9444_v21 = vmul.f32 %v9345_v17, %v4697_v19  ;;  %v4708_v29 = vand.u32 2147483647, %v9236_v27  ;;  %v9453_v40 = vmul.f32 0.6931472, %v5110_v13  ;;  %v4681_v54 = vand.u32 2147483647, %v9380_v30 }
 0x523   :  { %v9447_v49 = vpop.eup %5115  ;;  %vm9456_vm0 = vcmp.lt.f32.partialorder %v4690_v33, 0.0004427343  ;;  %5133 = vlog2.f32 %v4729_v24  ;;  %v4645_v17 = vand.u32 2147483647, %v9391_v4  ;;  %v9462_v50 = vmul.f32 %v9236_v27, %v4706_v47 }
 0x524   :  { %v4715_v51 = vadd.f32 1.0, %v4714_v12  ;;  %v4732_v32 = vmul.f32 -0.5, %v9405_v53  ;;  %v5118_v35 = vpop.eup %5117  ;;  %v9465_v0 = vmul.f32 0.6931472, %v5114_v41  ;;  %v9468_v36 = vmul.f32 %v9380_v30, %v4679_v3 }
 0x525   :  { %vm9470_vm11 = vcmp.lt.f32.partialorder %v4699_v5, 0.0004427343  ;;  %v4724_v11 = vadd.f32 1.0, %v4723_v31  ;;  %v4738_v2 = vadd.f32 1.0, %v9335_v15  ;;  %v9475_v28 = vpop.eup %5119  ;;  %v9478_v27 = vmul.f32 %v9391_v4, %v4643_v45 }
 0x526   :  { %v4717_v30 = vand.u32 2147483647, %v9397_v56  ;;  %v4747_v43 = vadd.f32 1.0, %v9447_v49  ;;  %v5122_v33 = vpop.eup %5121  ;;  %v4726_v19 = vand.u32 2147483647, %v9086_v1  ;;  %v4741_v4 = vmul.f32 -0.5, %v9335_v15 }
 0x527   :  { %5135 = vlog2.f32 %v4738_v2  ;;  %vm9492_vm10 = vcmp.lt.f32.partialorder %v4681_v54, 0.0004427343  ;;  %v9496_v16 = vmul.f32 0.6931472, %v5118_v35  ;;  %vm9498_vm6 = vcmp.lt.f32.partialorder %v4708_v29, 0.0004427343 }
 0x528   :  { %v9503_v5 = vmul.f32 %v9397_v56, %v4715_v51  ;;  %v4733_v47 = vadd.f32 1.0, %v4732_v32  ;;  %5137 = vlog2.f32 %v4747_v43  ;;  %v5124_v12 = vpop.eup %5123  ;;  %vm9505_vm3 = vcmp.lt.f32.partialorder %v4645_v17, 0.0004427343 }
 0x529   :  { %v9514_v24 = vmul.f32 %v9086_v1, %v4724_v11  ;;  %v4750_v41 = vmul.f32 -0.5, %v9447_v49  ;;  %v4756_v56 = vadd.f32 1.0, %v9091_v6  ;;  %v9518_v29 = vmul.f32 0.6931472, %v5122_v33 }
 0x52a   :  { %vm9520_vm9 = vcmp.lt.f32.partialorder %v4717_v30, 0.0004427343  ;;  %v4735_v17 = vand.u32 2147483647, %v9405_v53  ;;  %v4759_v51 = vmul.f32 -0.5, %v9091_v6  ;;  %v4765_v32 = vadd.f32 1.0, %v9434_v52 }
 0x52b   :  { %v5126_v45 = vpop.eup %5125  ;;  %vm9527_vm7 = vcmp.lt.f32.partialorder %v4726_v19, 0.0004427343  ;;  %v4742_v11 = vadd.f32 1.0, %v4741_v4  ;;  %v4744_v2 = vand.u32 2147483647, %v9335_v15  ;;  %5139 = vlog2.f32 %v4756_v56 }
 0x52c   :  { %v5128_v35 = vpop.eup %5127  ;;  %v4692_v30 = vsel %vm9456_vm0, %v9437_v9, %v9496_v16  ;;  %v4704_v33 = vmul.f32 0.6931472, %v5124_v12  ;;  %v9537_v31 = vmul.f32 %v9405_v53, %v4733_v47  ;;  %5141 = vlog2.f32 %v4765_v32 }
 0x52d   :  { %v5130_v43 = vpop.eup %5129  ;;  %v4677_v19 = vmul.f32 0.6931472, %v5126_v45  ;;  %v4751_v20 = vadd.f32 1.0, %v4750_v41  ;;  %v4762_v60 = vand.u32 2147483647, %v9091_v6  ;;  %v4768_v4 = vmul.f32 -0.5, %v9434_v52 }
 0x52e   :  { %v5132_v62 = vpop.eup %5131  ;;  %v4641_v38 = vmul.f32 0.6931472, %v5128_v35  ;;  %v4701_v56 = vsel %vm9470_vm11, %v9444_v21, %v9518_v29  ;;  %v4722_v44 = vmul.f32 0.6931472, %v5130_v43  ;;  %vm9545_vm5 = vcmp.lt.f32.partialorder %v4735_v17, 0.0004427343 }
 0x52f   :  { %v4760_v53 = vadd.f32 1.0, %v4759_v51  ;;  %v4713_v16 = vmul.f32 0.6931472, %v5132_v62  ;;  %v9550_v47 = vmul.f32 %v9335_v15, %v4742_v11  ;;  %vm9552_vm1 = vcmp.lt.f32.partialorder %v4744_v2, 0.0004427343 }
 0x530   :  { %v4774_v41 = vadd.f32 1.0, %v9358_v55  ;;  %v5134_v45 = vpop.eup %5133  ;;  %v4753_v39 = vand.u32 2147483647, %v9447_v49  ;;  %v4769_v21 = vadd.f32 1.0, %v4768_v4  ;;  %v4771_v29 = vand.u32 2147483647, %v9434_v52 }
 0x531   :  { %v4783_v17 = vadd.f32 1.0, %v9475_v28  ;;  %v4683_v62 = vsel %vm9492_vm10, %v9468_v36, %v4677_v19  ;;  %v4710_v15 = vsel %vm9498_vm6, %v9462_v50, %v4704_v33  ;;  %v9567_v51 = vmul.f32 %v9447_v49, %v4751_v20 }
 0x532   :  { %5143 = vlog2.f32 %v4774_v41  ;;  %v4647_v32 = vsel %vm9505_vm3, %v9478_v27, %v4641_v38  ;;  %v4728_v35 = vsel %vm9527_vm7, %v9514_v24, %v4722_v44  ;;  %v4761_v11 = vmul.f32 %v9091_v6, %v4760_v53 }
 0x533   :  { %vm9576_vm13 = vcmp.lt.f32.partialorder %v4762_v60, 0.0004427343  ;;  %5145 = vlog2.f32 %v4783_v17  ;;  %v4719_v49 = vsel %vm9520_vm9, %v9503_v5, %v4713_v16  ;;  %v4731_v50 = vmul.f32 0.6931472, %v5134_v45 }
 0x534   :  { %v4777_v20 = vmul.f32 -0.5, %v9358_v55  ;;  %v4786_v38 = vmul.f32 -0.5, %v9475_v28  ;;  %v5136_v27 = vpop.eup %5135  ;;  %vm9585_vm0 = vcmp.lt.f32.partialorder %v4753_v39, 0.0004427343  ;;  %v4770_v6 = vmul.f32 %v9434_v52, %v4769_v21 }
 0x535   :  { %vm9590_vm11 = vcmp.lt.f32.partialorder %v4771_v29, 0.0004427343  ;;  %v4780_v13 = vand.u32 2147483647, %v9358_v55  ;;  %v4792_v5 = vsub.f32 0.0, %v4620_v7  ;;  %v5138_v3 = vpop.eup %5137  ;;  %v9878_v54 = vsel %vm9363_vm14, %v9361_v46, %v9393_v58 }
 0x536   :  { %v4740_v24 = vmul.f32 0.6931472, %v5136_v27  ;;  %v4793_v52 = vsub.f32 0.0, %v9878_v54  ;;  %v9879_v1 = vsel %vm9382_vm15, %v9374_v18, %v9423_v10  ;;  %v9880_v57 = vsel %vm9407_vm4, %v9377_v42, %v9441_v34 }
 0x537   :  { %v4794_v2 = vsub.f32 0.0, %v9879_v1  ;;  %v4796_v8 = vsub.f32 0.0, %v9880_v57  ;;  %v4795_v25 = vsub.f32 0.0, %v4647_v32  ;;  %v9881_v23 = vsel %vm9414_vm2, %v9387_v59, %v9453_v40 }
 0x538   :  { %v4797_v46 = vsub.f32 0.0, %v9881_v23  ;;  %v9882_v22 = vsel %vm9428_vm12, %v9426_v63, %v9465_v0  ;;  %v4799_v58 = vsub.f32 0.0, %v4683_v62  ;;  %v4737_v7 = vsel %vm9545_vm5, %v9537_v31, %v4731_v50  ;;  %v5140_v48 = vpop.eup %5139 }
 0x539   :  { %v4798_v18 = vsub.f32 0.0, %v9882_v22  ;;  %v4778_v42 = vadd.f32 1.0, %v4777_v20  ;;  %v4787_v14 = vadd.f32 1.0, %v4786_v38  ;;  %v4789_v10 = vand.u32 2147483647, %v9475_v28  ;;  %v5142_v0 = vpop.eup %5141 }
 0x53a   :  { %v4746_v59 = vsel %vm9552_vm1, %v9550_v47, %v4740_v24  ;;  %v4749_v34 = vmul.f32 0.6931472, %v5138_v3  ;;  %vm9632_vm8 = vcmp.lt.f32.partialorder %v4780_v13, 0.0004427343  ;;  %v4800_v63 = vsub.f32 0.0, %v4692_v30 }
 0x53b   :  { %v4801_v40 = vsub.f32 0.0, %v4701_v56  ;;  %v4758_v43 = vmul.f32 0.6931472, %v5140_v48  ;;  %v4802_v33 = vsub.f32 0.0, %v4710_v15  ;;  %v4803_v31 = vsub.f32 0.0, %v4719_v49 }
 0x53c   :  { %v4812_v19 = vadd.f32 %v4796_v8, %v4792_v5  ;;  %v4767_v4 = vmul.f32 0.6931472, %v5142_v0  ;;  %v4824_v44 = vadd.f32 %v4797_v46, %v4793_v52  ;;  %v4835_v9 = vadd.f32 %v4798_v18, %v4794_v2 }
 0x53d   :  { %v4846_v53 = vadd.f32 %v4799_v58, %v4795_v25  ;;  %v4764_v16 = vsel %vm9576_vm13, %v4761_v11, %v4758_v43  ;;  %v4804_v47 = vsub.f32 0.0, %v4728_v35  ;;  %vm4815_vm14 = vcmask 1043456  }
 0x53e   :  { %v4813_v12 = vadd.f32 %v4812_v19, %v4800_v63  ;;  %v4773_v41 = vsel %vm9590_vm11, %v4770_v6, %v4767_v4  ;;  %v4805_v30 = vsub.f32 0.0, %v4737_v7  ;;  %v4808_v56 = vsub.f32 0.0, %v4764_v16 }
 0x53f   :  { %v4825_v45 = vadd.f32 %v4824_v44, %v4801_v40  ;;  %v4755_v39 = vsel %vm9585_vm0, %v9567_v51, %v4749_v34  ;;  %v4809_v21 = vsub.f32 0.0, %v4773_v41  ;;  %v4836_v17 = vadd.f32 %v4835_v9, %v4802_v33  ;;  %v5144_v62 = vpop.eup %5143 }
 0x540   :  { %v4814_v29 = vadd.f32 %v4813_v12, %v4804_v47  ;;  %v4779_v15 = vmul.f32 %v9358_v55, %v4778_v42  ;;  %v4816_v32 = vsel %vm4815_vm14, %v4808_v56, 0.0  ;;  %v4847_v11 = vadd.f32 %v4846_v53, %v4803_v31  ;;  %v5146_v36 = vpop.eup %5145 }
 0x541   :  { %v4826_v35 = vadd.f32 %v4825_v45, %v4805_v30  ;;  %v4776_v49 = vmul.f32 0.6931472, %v5144_v62  ;;  %v4806_v50 = vsub.f32 0.0, %v4746_v59  ;;  %v4827_v38 = vsel %vm4815_vm14, %v4809_v21, 0.0 }
 0x542   :  { %v4817_v20 = vadd.f32 %v4816_v32, %v4814_v29  ;;  %v4785_v27 = vmul.f32 0.6931472, %v5146_v36  ;;  %v4788_v61 = vmul.f32 %v9475_v28, %v4787_v14  ;;  %v4807_v51 = vsub.f32 0.0, %v4755_v39 }
 0x543   :  { %v4828_v6 = vadd.f32 %v4827_v38, %v4826_v35  ;;  %v4782_v60 = vsel %vm9632_vm8, %v4779_v15, %v4776_v49  ;;  %vm4790_vm15 = vcmp.lt.f32.partialorder %v4789_v10, 0.0004427343  ;;  %v4837_v13 = vadd.f32 %v4836_v17, %v4806_v50 }
 0x544   :  { %v4818_v55 = vrot.slane %v4817_v20, 4  ;;  %v4791_v5 = vsel %vm4790_vm15, %v4788_v61, %v4785_v27  ;;  %v4810_v3 = vsub.f32 0.0, %v4782_v60  ;;  %v4848_v54 = vadd.f32 %v4847_v11, %v4807_v51 }
 0x545   :  { %v4829_v24 = vrot.slane %v4828_v6, 4  ;;  %v4811_v52 = vsub.f32 0.0, %v4791_v5  ;;  %v5296_v59 = vmov 1966171168   ;;  %v9885_v29 = vlaneseq }
 0x546   :  { %v4819_v1 = vadd.f32 %v4818_v55, %v4817_v20  ;;  %v4838_v57 = vsel %vm4815_vm14, %v4810_v3, 0.0  ;;  %v4868_v34 = vunpack.c.l.s4 %v5296_v59 }
 0x547   :  { %v4830_v2 = vadd.f32 %v4829_v24, %v4828_v6  ;;  %v4839_v25 = vadd.f32 %v4838_v57, %v4837_v13  ;;  %v4849_v28 = vsel %vm4815_vm14, %v4811_v52, 0.0  ;;  %vm4892_vm4 = vcmp.lt.s32.totalorder %v9885_v29, 512 }
 0x548   :  { %v4820_v8 = vrot.slane %v4819_v1, 2  ;;  %v4850_v46 = vadd.f32 %v4849_v28, %v4848_v54  ;;  %v4869_v19 = vunpack.c.0.s8 %v4868_v34 }
 0x549   :  { %v4831_v23 = vrot.slane %v4830_v2, 2  ;;  %v4840_v18 = vrot.slane %v4839_v25, 4 }
 0x54a   :  { %v4821_v22 = vadd.f32 %v4820_v8, %v4819_v1  ;;  %v4851_v7 = vrot.slane %v4850_v46, 4  ;;  %v4872_v12 = vsub.s32 %v4869_v19, %v9817_v37 }
 0x54b   :  { %v4832_v58 = vadd.f32 %v4831_v23, %v4830_v2  ;;  %v4841_v14 = vadd.f32 %v4840_v18, %v4839_v25 }
 0x54c   :  { %v4822_v42 = vrot.slane %v4821_v22, 1  ;;  %v4852_v48 = vadd.f32 %v4851_v7, %v4850_v46 }
 0x54d   :  { %v4833_v10 = vrot.slane %v4832_v58, 1  ;;  %v4842_v26 = vrot.slane %v4841_v14, 2 }
 0x54e   :  { %v4823_v63 = vadd.f32 %v4822_v42, %v4821_v22  ;;  %v4853_v0 = vrot.slane %v4852_v48, 2 }
 0x54f   :  { %v4834_v40 = vadd.f32 %v4833_v10, %v4832_v58  ;;  %v4843_v43 = vadd.f32 %v4842_v26, %v4841_v14 }
 0x550   :  { %v4854_v33 = vadd.f32 %v4853_v0, %v4852_v48  ;;  %v4857_v9 = vsub.f32 0.0, %v4823_v63 }
 0x551   :  { %v4858_v31 = vsub.f32 0.0, %v4834_v40  ;;  %v4844_v4 = vrot.slane %v4843_v43, 1 }
 0x552   :  { %v4855_v44 = vrot.slane %v4854_v33, 1 }
 0x553   :  { %v4845_v53 = vadd.f32 %v4844_v4, %v4843_v43  ;;  %v4865_v47 = vcombine.low %v4857_v9, %v4858_v31 }
 0x554   :  { %v4856_v16 = vadd.f32 %v4855_v44, %v4854_v33 }
 0x555   :  { %v4859_v41 = vsub.f32 0.0, %v4845_v53  ;;  %v4873_v45 = vrot.slane %v4865_v47, %v4872_v12 }
 0x556   :  { %v4860_v30 = vsub.f32 0.0, %v4856_v16 }
 0x558   :  { %v4866_v56 = vcombine.low %v4859_v41, %v4860_v30 }
 0x55a   :  { %v4880_v39 = vrot.slane %v4866_v56, %v4872_v12 }
 0x55c   :  { %v4881_v21 = vcombine.low %v4873_v45, %v4880_v39 }
 0x55e   :  { %v4888_v17 = vrot.slane %v4881_v21, %v4872_v12 }
 0x560   :  { %4894 = vst.msk [vmem:[#allocation5] sm:$0xf] %vm4892_vm4, %v4888_v17 }
 0x561   :  { %5278 = shalt.err (!%p5275_p9)
}
 0x562   :  { %4904 = dma.vmem_to_hbm [thread:$0]  %s4902_s17, 64, %s9660_s4, [#allocation4]  }
 0x563   :  { %5289 = dma.done.wait [#allocation4], 64  }
 0x564   :  { %5290 = vsyncadd [#allocation4], 4294967232 }
 0x565   :  { %4908 = vsyncpa [#allocation3], 1 }
 0x566   :  { %4909 = vsyncpa [#allocation4], 1 }

</bundles_post_ra>
